<compile_context>
chip_gen: v5e
topology: v5e:2x2
jax: 0.10.0
libtpu: 0.0.40
codegen_flags: <defaults>
</compile_context>

<pallas_src>
import functools

import jax
import jax.numpy as jnp
from jax.experimental import pallas as pl
from jax.experimental.pallas import tpu as pltpu


# ----------------------------------------------------------------------------
# Fused CNN kernel: 3 x (ReflectionPad2d(1) + Conv3x3 + bias + ReLU + BatchNorm)
# One image per grid step; padding + intermediates stay in VMEM.
# ----------------------------------------------------------------------------
def _fused_cnn_kernel(x_ref,
                      w1_ref, b1_ref, s1_ref, t1_ref,
                      w2_ref, b2_ref, s2_ref, t2_ref,
                      w3_ref, b3_ref, s3_ref, t3_ref,
                      o_ref,
                      pad1_ref, pad2_ref, pad3_ref):
    H = x_ref.shape[1]
    W = x_ref.shape[2]

    def conv_bn_relu(x_hwc, pad_ref, w_ref, b_ref, s_ref, t_ref):
        # x_hwc: (H, W, Cin) value, pad_ref: (H+2, W+2, Cin) VMEM scratch
        cin = x_hwc.shape[-1]
        cout = w_ref.shape[-1]

        # --- ReflectionPad2d(1), built in VMEM (no HBM round trip) ---
        pad_ref[1:H + 1, 1:W + 1, :] = x_hwc
        pad_ref[0:1, 1:W + 1, :] = x_hwc[1:2, :, :]                # top row = row 1
        pad_ref[H + 1:H + 2, 1:W + 1, :] = x_hwc[H - 2:H - 1, :, :]  # bottom = row H-2
        pad_ref[:, 0:1, :] = pad_ref[:, 2:3, :]                    # left col (incl. corners)
        pad_ref[:, W + 1:W + 2, :] = pad_ref[:, W - 1:W, :]        # right col (incl. corners)

        # --- 3x3 conv as 9 shifted (H*W, Cin) x (Cin, Cout) MXU matmuls ---
        acc = jnp.zeros((H * W, cout), jnp.float32)
        for dy in range(3):
            for dx in range(3):
                xs = pad_ref[dy:dy + H, dx:dx + W, :].reshape(H * W, cin)
                acc = acc + jnp.dot(xs, w_ref[dy, dx],
                                    preferred_element_type=jnp.float32)

        y = jnp.maximum(acc + b_ref[...], 0.0)       # conv bias + ReLU
        y = y * s_ref[...] + t_ref[...]              # BatchNorm2d (eval, affine folded)
        # Dropout2d(p=0.2) is identity in eval mode.
        return y                                     # (H*W, Cout)

    y1 = conv_bn_relu(x_ref[0], pad1_ref, w1_ref, b1_ref, s1_ref, t1_ref)
    y2 = conv_bn_relu(y1.reshape(H, W, -1), pad2_ref, w2_ref, b2_ref, s2_ref, t2_ref)
    y3 = conv_bn_relu(y2.reshape(H, W, -1), pad3_ref, w3_ref, b3_ref, s3_ref, t3_ref)
    o_ref[0] = y3.astype(o_ref.dtype)                # (H*W, 12)


def fused_cnn(x_nchw, params):
    B, Cin, H, W = x_nchw.shape
    assert H % 8 == 0 and W % 8 == 0, "spatial dims must be multiples of 8"
    x = jnp.transpose(x_nchw, (0, 2, 3, 1))          # NCHW -> NHWC (tiny, input only)
    c1, c2, c3 = params["conv1"], params["conv2"], params["conv3"]
    cout = c3["w"].shape[-1]

    def conv_specs(p):
        co = p["w"].shape[-1]
        return [
            pl.BlockSpec(p["w"].shape, lambda b: (0, 0, 0, 0)),
            pl.BlockSpec((1, co), lambda b: (0, 0)),
            pl.BlockSpec((1, co), lambda b: (0, 0)),
            pl.BlockSpec((1, co), lambda b: (0, 0)),
        ]

    return pl.pallas_call(
        _fused_cnn_kernel,
        out_shape=jax.ShapeDtypeStruct((B, H * W, cout), x.dtype),
        grid_spec=pltpu.PrefetchScalarGridSpec(
            num_scalar_prefetch=0,
            grid=(B,),
            in_specs=[pl.BlockSpec((1, H, W, Cin), lambda b: (b, 0, 0, 0))]
                     + conv_specs(c1) + conv_specs(c2) + conv_specs(c3),
            out_specs=pl.BlockSpec((1, H * W, cout), lambda b: (b, 0, 0)),
            scratch_shapes=[
                pltpu.VMEM((H + 2, W + 2, c1["w"].shape[2]), jnp.float32),
                pltpu.VMEM((H + 2, W + 2, c2["w"].shape[2]), jnp.float32),
                pltpu.VMEM((H + 2, W + 2, c3["w"].shape[2]), jnp.float32),
            ],
        ),
        compiler_params=pltpu.CompilerParams(
            dimension_semantics=("parallel",),
            vmem_limit_bytes=32 * 1024 * 1024,
        ),
    )(x,
      c1["w"], c1["b"], c1["scale"], c1["shift"],
      c2["w"], c2["b"], c2["scale"], c2["shift"],
      c3["w"], c3["b"], c3["scale"], c3["shift"])


# ----------------------------------------------------------------------------
# Linear (+ optional ReLU): bf16 weights, f32 accumulation directly in o_ref,
# grid = (parallel N tiles, arbitrary K tiles).
# ----------------------------------------------------------------------------
def _linear_kernel(x_ref, w_ref, b_ref, o_ref, *, relu):
    k = pl.program_id(1)

    @pl.when(k == 0)
    def _():
        o_ref[...] = jnp.zeros_like(o_ref)

    o_ref[...] += jnp.dot(x_ref[...].astype(jnp.bfloat16), w_ref[...],
                          preferred_element_type=jnp.float32)

    @pl.when(k == pl.num_programs(1) - 1)
    def _():
        y = o_ref[...] + b_ref[...]
        if relu:
            y = jnp.maximum(y, 0.0)
        o_ref[...] = y


def _pick_k_tile(K, cap=2048):
    """Largest 128-multiple divisor of K (<= cap); fall back to zero-padded K."""
    if K <= cap:
        return K, K
    for tk in range(cap, 127, -128):
        if K % tk == 0:
            return tk, K
    tk = cap
    return tk, pl.cdiv(K, tk) * tk    # rare fallback: pad K with zeros (exact)


def linear(x, w, b, *, relu, tn=256):
    M, K = x.shape
    Kw, N = w.shape
    assert Kw == K and N % 128 == 0
    tn = min(tn, N)
    assert N % tn == 0
    tk, Kp = _pick_k_tile(K)
    if Kp != K:
        x = jnp.pad(x, ((0, 0), (0, Kp - K)))
        w = jnp.pad(w, ((0, Kp - K), (0, 0)))

    return pl.pallas_call(
        functools.partial(_linear_kernel, relu=relu),
        out_shape=jax.ShapeDtypeStruct((M, N), jnp.float32),
        grid_spec=pltpu.PrefetchScalarGridSpec(
            num_scalar_prefetch=0,
            grid=(N // tn, Kp // tk),
            in_specs=[
                pl.BlockSpec((M, tk), lambda n, k: (0, k)),
                pl.BlockSpec((tk, tn), lambda n, k: (k, n)),
                pl.BlockSpec((1, tn), lambda n, k: (0, n)),
            ],
            out_specs=pl.BlockSpec((M, tn), lambda n, k: (0, n)),
        ),
        compiler_params=pltpu.CompilerParams(
            dimension_semantics=("parallel", "arbitrary"),
            vmem_limit_bytes=32 * 1024 * 1024,
        ),
    )(x, w, b)


# ----------------------------------------------------------------------------
# Parameters (deterministic synthetic init)
# ----------------------------------------------------------------------------
def init_params(key, H, W):
    ks = jax.random.split(key, 6)

    def conv_p(k, cin, cout):
        k1, k2 = jax.random.split(k)
        w = jax.random.normal(k1, (3, 3, cin, cout), jnp.float32) * 0.1   # HWIO
        b = jax.random.normal(k2, (1, cout), jnp.float32) * 0.1
        # BatchNorm2d defaults (eval): gamma=1, beta=0, mean=0, var=1, eps=1e-5
        eps = 1e-5
        gamma = jnp.ones((1, cout), jnp.float32)
        beta = jnp.zeros((1, cout), jnp.float32)
        rmean = jnp.zeros((1, cout), jnp.float32)
        rvar = jnp.ones((1, cout), jnp.float32)
        scale = gamma * jax.lax.rsqrt(rvar + eps)
        shift = beta - rmean * scale
        return dict(w=w, b=b, scale=scale, shift=shift)

    def lin_p(k, fin, fout, fin_pad, fout_pad):
        k1, k2 = jax.random.split(k)
        w = jax.random.normal(k1, (fin, fout), jnp.float32) / jnp.sqrt(float(fin))
        b = jax.random.normal(k2, (fout,), jnp.float32) * 0.05
        # zero-pad to lane-dense widths (exact) and store weights in bf16
        w = jnp.pad(w, ((0, fin_pad - fin), (0, fout_pad - fout))).astype(jnp.bfloat16)
        b = jnp.pad(b, (0, fout_pad - fout)).reshape(1, fout_pad).astype(jnp.float32)
        return dict(w=w, b=b)

    fc_in = 12 * H * W
    return dict(
        conv1=conv_p(ks[0], 3, 6),
        conv2=conv_p(ks[1], 6, 12),
        conv3=conv_p(ks[2], 12, 12),
        fc1=lin_p(ks[3], fc_in, 500, fc_in, 512),
        fc2=lin_p(ks[4], 500, 500, 512, 512),
        fc3=lin_p(ks[5], 500, 12, 512, 128),
    )


# ----------------------------------------------------------------------------
# Forward (mirrors SiameseNetwork.forward, both branches batched together)
# ----------------------------------------------------------------------------
def forward_batched(params, x_nchw):
    B = x_nchw.shape[0]
    feat = fused_cnn(x_nchw, params)                       # (B, H*W, 12)
    # flatten in PyTorch NCHW order: view(B, -1)  (cheap transpose of the small output)
    feat = jnp.transpose(feat, (0, 2, 1)).reshape(B, -1)   # (B, 12*H*W)
    h = linear(feat, params["fc1"]["w"], params["fc1"]["b"], relu=True)   # (B, 512)
    h = linear(h, params["fc2"]["w"], params["fc2"]["b"], relu=True)      # (B, 512)
    h = linear(h, params["fc3"]["w"], params["fc3"]["b"], relu=False)     # (B, 128)
    return h[:, :12]


@jax.jit
def siamese_forward(params, input1, input2):
    # Shared weights -> run both Siamese branches as one batched pass so the fc
    # weight stream (HBM-bound) is read once, not twice.
    B = input1.shape[0]
    x = jnp.concatenate([input1, input2], axis=0)
    out = forward_batched(params, x)
    return out[:B], out[B:]


if __name__ == "__main__":
    B, C, H, W = 2, 3, 16, 16   # module implies 200x200; small self-consistent test size
    key = jax.random.PRNGKey(0)
    kp, k1, k2 = jax.random.split(key, 3)
    params = init_params(kp, H, W)
    input1 = jax.random.normal(k1, (B, C, H, W), jnp.float32)
    input2 = jax.random.normal(k2, (B, C, H, W), jnp.float32)

    out1, out2 = siamese_forward(params, input1, input2)
    jax.block_until_ready((out1, out2))
    assert out1.shape == (B, 12) and out2.shape == (B, 12)
    assert out1.dtype == jnp.float32 and out2.dtype == jnp.float32
    print("KERNEL_OK")
</pallas_src>

<mosaic_0001>
module attributes {stable_mosaic.version = 11 : i64} {
  func.func @_fused_cnn_kernel(%arg0: i32, %arg1: memref<1x16x16x3xf32, #tpu.memory_space<vmem>>, %arg2: memref<3x3x3x6xf32, #tpu.memory_space<vmem>>, %arg3: memref<1x6xf32, #tpu.memory_space<vmem>>, %arg4: memref<1x6xf32, #tpu.memory_space<vmem>>, %arg5: memref<1x6xf32, #tpu.memory_space<vmem>>, %arg6: memref<3x3x6x12xf32, #tpu.memory_space<vmem>>, %arg7: memref<1x12xf32, #tpu.memory_space<vmem>>, %arg8: memref<1x12xf32, #tpu.memory_space<vmem>>, %arg9: memref<1x12xf32, #tpu.memory_space<vmem>>, %arg10: memref<3x3x12x12xf32, #tpu.memory_space<vmem>>, %arg11: memref<1x12xf32, #tpu.memory_space<vmem>>, %arg12: memref<1x12xf32, #tpu.memory_space<vmem>>, %arg13: memref<1x12xf32, #tpu.memory_space<vmem>>, %arg14: memref<1x256x12xf32, #tpu.memory_space<vmem>>, %arg15: memref<18x18x3xf32, #tpu.memory_space<vmem>>, %arg16: memref<18x18x6xf32, #tpu.memory_space<vmem>>, %arg17: memref<18x18x12xf32, #tpu.memory_space<vmem>>) attributes {dimension_semantics = [#tpu.dimension_semantics<parallel>], iteration_bounds = array<i64: 4>, scalar_prefetch = 0 : i64, scratch_operands = 3 : i64, tpu.core_type = #tpu.core_type<tc>, window_params = [{transform_indices = @transform_0, window_bounds = array<i64: 1, 16, 16, 3>}, {pipeline_mode = #tpu.pipeline_mode<synchronous>, transform_indices = @transform_1, window_bounds = array<i64: 3, 3, 3, 6>}, {pipeline_mode = #tpu.pipeline_mode<synchronous>, transform_indices = @transform_2, window_bounds = array<i64: 1, 6>}, {pipeline_mode = #tpu.pipeline_mode<synchronous>, transform_indices = @transform_3, window_bounds = array<i64: 1, 6>}, {pipeline_mode = #tpu.pipeline_mode<synchronous>, transform_indices = @transform_4, window_bounds = array<i64: 1, 6>}, {pipeline_mode = #tpu.pipeline_mode<synchronous>, transform_indices = @transform_5, window_bounds = array<i64: 3, 3, 6, 12>}, {pipeline_mode = #tpu.pipeline_mode<synchronous>, transform_indices = @transform_6, window_bounds = array<i64: 1, 12>}, {pipeline_mode = #tpu.pipeline_mode<synchronous>, transform_indices = @transform_7, window_bounds = array<i64: 1, 12>}, {pipeline_mode = #tpu.pipeline_mode<synchronous>, transform_indices = @transform_8, window_bounds = array<i64: 1, 12>}, {pipeline_mode = #tpu.pipeline_mode<synchronous>, transform_indices = @transform_9, window_bounds = array<i64: 3, 3, 12, 12>}, {pipeline_mode = #tpu.pipeline_mode<synchronous>, transform_indices = @transform_10, window_bounds = array<i64: 1, 12>}, {pipeline_mode = #tpu.pipeline_mode<synchronous>, transform_indices = @transform_11, window_bounds = array<i64: 1, 12>}, {pipeline_mode = #tpu.pipeline_mode<synchronous>, transform_indices = @transform_12, window_bounds = array<i64: 1, 12>}, {transform_indices = @transform_13, window_bounds = array<i64: 1, 256, 12>}]} {
    %c0 = arith.constant 0 : index
    %c0_0 = arith.constant 0 : index
    %c0_1 = arith.constant 0 : index
    %c0_2 = arith.constant 0 : index
    %0 = vector.load %arg1[%c0, %c0_0, %c0_1, %c0_2] : memref<1x16x16x3xf32, #tpu.memory_space<vmem>>, vector<1x16x16x3xf32>
    %1 = vector.shape_cast %0 : vector<1x16x16x3xf32> to vector<16x16x3xf32>
    %c1 = arith.constant 1 : index
    %c1_3 = arith.constant 1 : index
    %c0_4 = arith.constant 0 : index
    %2 = vector.load %arg15[%c1, %c1_3, %c0_4] : memref<18x18x3xf32, #tpu.memory_space<vmem>>, vector<16x16x3xf32>
    tpu.vector_store %arg15[%c1, %c1_3, %c0_4], %1 {strides = array<i32>} : memref<18x18x3xf32, #tpu.memory_space<vmem>>, vector<16x16x3xf32>,
    %3 = vector.extract_strided_slice %1 {offsets = [1, 0, 0], sizes = [1, 16, 3], strides = [1, 1, 1]} : vector<16x16x3xf32> to vector<1x16x3xf32>
    %c0_5 = arith.constant 0 : index
    %c1_6 = arith.constant 1 : index
    %c0_7 = arith.constant 0 : index
    %4 = vector.load %arg15[%c0_5, %c1_6, %c0_7] : memref<18x18x3xf32, #tpu.memory_space<vmem>>, vector<1x16x3xf32>
    tpu.vector_store %arg15[%c0_5, %c1_6, %c0_7], %3 {strides = array<i32>} : memref<18x18x3xf32, #tpu.memory_space<vmem>>, vector<1x16x3xf32>,
    %5 = vector.extract_strided_slice %1 {offsets = [14, 0, 0], sizes = [1, 16, 3], strides = [1, 1, 1]} : vector<16x16x3xf32> to vector<1x16x3xf32>
    %c17 = arith.constant 17 : index
    %c1_8 = arith.constant 1 : index
    %c0_9 = arith.constant 0 : index
    %6 = vector.load %arg15[%c17, %c1_8, %c0_9] : memref<18x18x3xf32, #tpu.memory_space<vmem>>, vector<1x16x3xf32>
    tpu.vector_store %arg15[%c17, %c1_8, %c0_9], %5 {strides = array<i32>} : memref<18x18x3xf32, #tpu.memory_space<vmem>>, vector<1x16x3xf32>,
    %c0_10 = arith.constant 0 : index
    %c2 = arith.constant 2 : index
    %c0_11 = arith.constant 0 : index
    %7 = vector.load %arg15[%c0_10, %c2, %c0_11] : memref<18x18x3xf32, #tpu.memory_space<vmem>>, vector<18x1x3xf32>
    %c0_12 = arith.constant 0 : index
    %c0_13 = arith.constant 0 : index
    %c0_14 = arith.constant 0 : index
    %8 = vector.load %arg15[%c0_12, %c0_13, %c0_14] : memref<18x18x3xf32, #tpu.memory_space<vmem>>, vector<18x1x3xf32>
    tpu.vector_store %arg15[%c0_12, %c0_13, %c0_14], %7 {strides = array<i32>} : memref<18x18x3xf32, #tpu.memory_space<vmem>>, vector<18x1x3xf32>,
    %c0_15 = arith.constant 0 : index
    %c15 = arith.constant 15 : index
    %c0_16 = arith.constant 0 : index
    %9 = vector.load %arg15[%c0_15, %c15, %c0_16] : memref<18x18x3xf32, #tpu.memory_space<vmem>>, vector<18x1x3xf32>
    %c0_17 = arith.constant 0 : index
    %c17_18 = arith.constant 17 : index
    %c0_19 = arith.constant 0 : index
    %10 = vector.load %arg15[%c0_17, %c17_18, %c0_19] : memref<18x18x3xf32, #tpu.memory_space<vmem>>, vector<18x1x3xf32>
    tpu.vector_store %arg15[%c0_17, %c17_18, %c0_19], %9 {strides = array<i32>} : memref<18x18x3xf32, #tpu.memory_space<vmem>>, vector<18x1x3xf32>,
    %cst = arith.constant 0.000000e+00 : f32
    %11 = vector.broadcast %cst : f32 to vector<256x6xf32>
    %c0_20 = arith.constant 0 : index
    %c0_21 = arith.constant 0 : index
    %c0_22 = arith.constant 0 : index
    %12 = vector.load %arg15[%c0_20, %c0_21, %c0_22] : memref<18x18x3xf32, #tpu.memory_space<vmem>>, vector<16x16x3xf32>
    %13 = vector.shape_cast %12 : vector<16x16x3xf32> to vector<256x3xf32>
    %c0_23 = arith.constant 0 : index
    %c0_24 = arith.constant 0 : index
    %c0_25 = arith.constant 0 : index
    %c0_26 = arith.constant 0 : index
    %14 = vector.load %arg2[%c0_23, %c0_24, %c0_25, %c0_26] : memref<3x3x3x6xf32, #tpu.memory_space<vmem>>, vector<1x1x3x6xf32>
    %15 = vector.shape_cast %14 : vector<1x1x3x6xf32> to vector<3x6xf32>
    %cst_27 = arith.constant dense<0.000000e+00> : vector<256x6xf32>
    %16 = tpu.matmul %13, %15, %cst_27 {dimension_numbers = #tpu.dot_dimension_numbers<[1], [0], [0], [1], [0, 0, 1, 1], [], []>} : vector<256x3xf32>, vector<3x6xf32>, vector<256x6xf32> -> vector<256x6xf32>
    %17 = arith.addf %11, %16 : vector<256x6xf32>
    %c0_28 = arith.constant 0 : index
    %c1_29 = arith.constant 1 : index
    %c0_30 = arith.constant 0 : index
    %18 = vector.load %arg15[%c0_28, %c1_29, %c0_30] : memref<18x18x3xf32, #tpu.memory_space<vmem>>, vector<16x16x3xf32>
    %19 = vector.shape_cast %18 : vector<16x16x3xf32> to vector<256x3xf32>
    %c0_31 = arith.constant 0 : index
    %c1_32 = arith.constant 1 : index
    %c0_33 = arith.constant 0 : index
    %c0_34 = arith.constant 0 : index
    %20 = vector.load %arg2[%c0_31, %c1_32, %c0_33, %c0_34] : memref<3x3x3x6xf32, #tpu.memory_space<vmem>>, vector<1x1x3x6xf32>
    %21 = vector.shape_cast %20 : vector<1x1x3x6xf32> to vector<3x6xf32>
    %cst_35 = arith.constant dense<0.000000e+00> : vector<256x6xf32>
    %22 = tpu.matmul %19, %21, %cst_35 {dimension_numbers = #tpu.dot_dimension_numbers<[1], [0], [0], [1], [0, 0, 1, 1], [], []>} : vector<256x3xf32>, vector<3x6xf32>, vector<256x6xf32> -> vector<256x6xf32>
    %23 = arith.addf %17, %22 : vector<256x6xf32>
    %c0_36 = arith.constant 0 : index
    %c2_37 = arith.constant 2 : index
    %c0_38 = arith.constant 0 : index
    %24 = vector.load %arg15[%c0_36, %c2_37, %c0_38] : memref<18x18x3xf32, #tpu.memory_space<vmem>>, vector<16x16x3xf32>
    %25 = vector.shape_cast %24 : vector<16x16x3xf32> to vector<256x3xf32>
    %c0_39 = arith.constant 0 : index
    %c2_40 = arith.constant 2 : index
    %c0_41 = arith.constant 0 : index
    %c0_42 = arith.constant 0 : index
    %26 = vector.load %arg2[%c0_39, %c2_40, %c0_41, %c0_42] : memref<3x3x3x6xf32, #tpu.memory_space<vmem>>, vector<1x1x3x6xf32>
    %27 = vector.shape_cast %26 : vector<1x1x3x6xf32> to vector<3x6xf32>
    %cst_43 = arith.constant dense<0.000000e+00> : vector<256x6xf32>
    %28 = tpu.matmul %25, %27, %cst_43 {dimension_numbers = #tpu.dot_dimension_numbers<[1], [0], [0], [1], [0, 0, 1, 1], [], []>} : vector<256x3xf32>, vector<3x6xf32>, vector<256x6xf32> -> vector<256x6xf32>
    %29 = arith.addf %23, %28 : vector<256x6xf32>
    %c1_44 = arith.constant 1 : index
    %c0_45 = arith.constant 0 : index
    %c0_46 = arith.constant 0 : index
    %30 = vector.load %arg15[%c1_44, %c0_45, %c0_46] : memref<18x18x3xf32, #tpu.memory_space<vmem>>, vector<16x16x3xf32>
    %31 = vector.shape_cast %30 : vector<16x16x3xf32> to vector<256x3xf32>
    %c1_47 = arith.constant 1 : index
    %c0_48 = arith.constant 0 : index
    %c0_49 = arith.constant 0 : index
    %c0_50 = arith.constant 0 : index
    %32 = vector.load %arg2[%c1_47, %c0_48, %c0_49, %c0_50] : memref<3x3x3x6xf32, #tpu.memory_space<vmem>>, vector<1x1x3x6xf32>
    %33 = vector.shape_cast %32 : vector<1x1x3x6xf32> to vector<3x6xf32>
    %cst_51 = arith.constant dense<0.000000e+00> : vector<256x6xf32>
    %34 = tpu.matmul %31, %33, %cst_51 {dimension_numbers = #tpu.dot_dimension_numbers<[1], [0], [0], [1], [0, 0, 1, 1], [], []>} : vector<256x3xf32>, vector<3x6xf32>, vector<256x6xf32> -> vector<256x6xf32>
    %35 = arith.addf %29, %34 : vector<256x6xf32>
    %c1_52 = arith.constant 1 : index
    %c1_53 = arith.constant 1 : index
    %c0_54 = arith.constant 0 : index
    %36 = vector.load %arg15[%c1_52, %c1_53, %c0_54] : memref<18x18x3xf32, #tpu.memory_space<vmem>>, vector<16x16x3xf32>
    %37 = vector.shape_cast %36 : vector<16x16x3xf32> to vector<256x3xf32>
    %c1_55 = arith.constant 1 : index
    %c1_56 = arith.constant 1 : index
    %c0_57 = arith.constant 0 : index
    %c0_58 = arith.constant 0 : index
    %38 = vector.load %arg2[%c1_55, %c1_56, %c0_57, %c0_58] : memref<3x3x3x6xf32, #tpu.memory_space<vmem>>, vector<1x1x3x6xf32>
    %39 = vector.shape_cast %38 : vector<1x1x3x6xf32> to vector<3x6xf32>
    %cst_59 = arith.constant dense<0.000000e+00> : vector<256x6xf32>
    %40 = tpu.matmul %37, %39, %cst_59 {dimension_numbers = #tpu.dot_dimension_numbers<[1], [0], [0], [1], [0, 0, 1, 1], [], []>} : vector<256x3xf32>, vector<3x6xf32>, vector<256x6xf32> -> vector<256x6xf32>
    %41 = arith.addf %35, %40 : vector<256x6xf32>
    %c1_60 = arith.constant 1 : index
    %c2_61 = arith.constant 2 : index
    %c0_62 = arith.constant 0 : index
    %42 = vector.load %arg15[%c1_60, %c2_61, %c0_62] : memref<18x18x3xf32, #tpu.memory_space<vmem>>, vector<16x16x3xf32>
    %43 = vector.shape_cast %42 : vector<16x16x3xf32> to vector<256x3xf32>
    %c1_63 = arith.constant 1 : index
    %c2_64 = arith.constant 2 : index
    %c0_65 = arith.constant 0 : index
    %c0_66 = arith.constant 0 : index
    %44 = vector.load %arg2[%c1_63, %c2_64, %c0_65, %c0_66] : memref<3x3x3x6xf32, #tpu.memory_space<vmem>>, vector<1x1x3x6xf32>
    %45 = vector.shape_cast %44 : vector<1x1x3x6xf32> to vector<3x6xf32>
    %cst_67 = arith.constant dense<0.000000e+00> : vector<256x6xf32>
    %46 = tpu.matmul %43, %45, %cst_67 {dimension_numbers = #tpu.dot_dimension_numbers<[1], [0], [0], [1], [0, 0, 1, 1], [], []>} : vector<256x3xf32>, vector<3x6xf32>, vector<256x6xf32> -> vector<256x6xf32>
    %47 = arith.addf %41, %46 : vector<256x6xf32>
    %c2_68 = arith.constant 2 : index
    %c0_69 = arith.constant 0 : index
    %c0_70 = arith.constant 0 : index
    %48 = vector.load %arg15[%c2_68, %c0_69, %c0_70] : memref<18x18x3xf32, #tpu.memory_space<vmem>>, vector<16x16x3xf32>
    %49 = vector.shape_cast %48 : vector<16x16x3xf32> to vector<256x3xf32>
    %c2_71 = arith.constant 2 : index
    %c0_72 = arith.constant 0 : index
    %c0_73 = arith.constant 0 : index
    %c0_74 = arith.constant 0 : index
    %50 = vector.load %arg2[%c2_71, %c0_72, %c0_73, %c0_74] : memref<3x3x3x6xf32, #tpu.memory_space<vmem>>, vector<1x1x3x6xf32>
    %51 = vector.shape_cast %50 : vector<1x1x3x6xf32> to vector<3x6xf32>
    %cst_75 = arith.constant dense<0.000000e+00> : vector<256x6xf32>
    %52 = tpu.matmul %49, %51, %cst_75 {dimension_numbers = #tpu.dot_dimension_numbers<[1], [0], [0], [1], [0, 0, 1, 1], [], []>} : vector<256x3xf32>, vector<3x6xf32>, vector<256x6xf32> -> vector<256x6xf32>
    %53 = arith.addf %47, %52 : vector<256x6xf32>
    %c2_76 = arith.constant 2 : index
    %c1_77 = arith.constant 1 : index
    %c0_78 = arith.constant 0 : index
    %54 = vector.load %arg15[%c2_76, %c1_77, %c0_78] : memref<18x18x3xf32, #tpu.memory_space<vmem>>, vector<16x16x3xf32>
    %55 = vector.shape_cast %54 : vector<16x16x3xf32> to vector<256x3xf32>
    %c2_79 = arith.constant 2 : index
    %c1_80 = arith.constant 1 : index
    %c0_81 = arith.constant 0 : index
    %c0_82 = arith.constant 0 : index
    %56 = vector.load %arg2[%c2_79, %c1_80, %c0_81, %c0_82] : memref<3x3x3x6xf32, #tpu.memory_space<vmem>>, vector<1x1x3x6xf32>
    %57 = vector.shape_cast %56 : vector<1x1x3x6xf32> to vector<3x6xf32>
    %cst_83 = arith.constant dense<0.000000e+00> : vector<256x6xf32>
    %58 = tpu.matmul %55, %57, %cst_83 {dimension_numbers = #tpu.dot_dimension_numbers<[1], [0], [0], [1], [0, 0, 1, 1], [], []>} : vector<256x3xf32>, vector<3x6xf32>, vector<256x6xf32> -> vector<256x6xf32>
    %59 = arith.addf %53, %58 : vector<256x6xf32>
    %c2_84 = arith.constant 2 : index
    %c2_85 = arith.constant 2 : index
    %c0_86 = arith.constant 0 : index
    %60 = vector.load %arg15[%c2_84, %c2_85, %c0_86] : memref<18x18x3xf32, #tpu.memory_space<vmem>>, vector<16x16x3xf32>
    %61 = vector.shape_cast %60 : vector<16x16x3xf32> to vector<256x3xf32>
    %c2_87 = arith.constant 2 : index
    %c2_88 = arith.constant 2 : index
    %c0_89 = arith.constant 0 : index
    %c0_90 = arith.constant 0 : index
    %62 = vector.load %arg2[%c2_87, %c2_88, %c0_89, %c0_90] : memref<3x3x3x6xf32, #tpu.memory_space<vmem>>, vector<1x1x3x6xf32>
    %63 = vector.shape_cast %62 : vector<1x1x3x6xf32> to vector<3x6xf32>
    %cst_91 = arith.constant dense<0.000000e+00> : vector<256x6xf32>
    %64 = tpu.matmul %61, %63, %cst_91 {dimension_numbers = #tpu.dot_dimension_numbers<[1], [0], [0], [1], [0, 0, 1, 1], [], []>} : vector<256x3xf32>, vector<3x6xf32>, vector<256x6xf32> -> vector<256x6xf32>
    %65 = arith.addf %59, %64 : vector<256x6xf32>
    %c0_92 = arith.constant 0 : index
    %c0_93 = arith.constant 0 : index
    %66 = vector.load %arg3[%c0_92, %c0_93] : memref<1x6xf32, #tpu.memory_space<vmem>>, vector<1x6xf32>
    %67 = vector.broadcast %66 : vector<1x6xf32> to vector<256x6xf32>
    %68 = arith.addf %65, %67 : vector<256x6xf32>
    %cst_94 = arith.constant 0.000000e+00 : f32
    %69 = vector.broadcast %cst_94 : f32 to vector<256x6xf32>
    %70 = arith.maximumf %68, %69 : vector<256x6xf32>
    %c0_95 = arith.constant 0 : index
    %c0_96 = arith.constant 0 : index
    %71 = vector.load %arg4[%c0_95, %c0_96] : memref<1x6xf32, #tpu.memory_space<vmem>>, vector<1x6xf32>
    %72 = vector.broadcast %71 : vector<1x6xf32> to vector<256x6xf32>
    %73 = arith.mulf %70, %72 : vector<256x6xf32>
    %c0_97 = arith.constant 0 : index
    %c0_98 = arith.constant 0 : index
    %74 = vector.load %arg5[%c0_97, %c0_98] : memref<1x6xf32, #tpu.memory_space<vmem>>, vector<1x6xf32>
    %75 = vector.broadcast %74 : vector<1x6xf32> to vector<256x6xf32>
    %76 = arith.addf %73, %75 : vector<256x6xf32>
    %77 = vector.shape_cast %76 : vector<256x6xf32> to vector<16x16x6xf32>
    %c1_99 = arith.constant 1 : index
    %c1_100 = arith.constant 1 : index
    %c0_101 = arith.constant 0 : index
    %78 = vector.load %arg16[%c1_99, %c1_100, %c0_101] : memref<18x18x6xf32, #tpu.memory_space<vmem>>, vector<16x16x6xf32>
    tpu.vector_store %arg16[%c1_99, %c1_100, %c0_101], %77 {strides = array<i32>} : memref<18x18x6xf32, #tpu.memory_space<vmem>>, vector<16x16x6xf32>,
    %79 = vector.extract_strided_slice %77 {offsets = [1, 0, 0], sizes = [1, 16, 6], strides = [1, 1, 1]} : vector<16x16x6xf32> to vector<1x16x6xf32>
    %c0_102 = arith.constant 0 : index
    %c1_103 = arith.constant 1 : index
    %c0_104 = arith.constant 0 : index
    %80 = vector.load %arg16[%c0_102, %c1_103, %c0_104] : memref<18x18x6xf32, #tpu.memory_space<vmem>>, vector<1x16x6xf32>
    tpu.vector_store %arg16[%c0_102, %c1_103, %c0_104], %79 {strides = array<i32>} : memref<18x18x6xf32, #tpu.memory_space<vmem>>, vector<1x16x6xf32>,
    %81 = vector.extract_strided_slice %77 {offsets = [14, 0, 0], sizes = [1, 16, 6], strides = [1, 1, 1]} : vector<16x16x6xf32> to vector<1x16x6xf32>
    %c17_105 = arith.constant 17 : index
    %c1_106 = arith.constant 1 : index
    %c0_107 = arith.constant 0 : index
    %82 = vector.load %arg16[%c17_105, %c1_106, %c0_107] : memref<18x18x6xf32, #tpu.memory_space<vmem>>, vector<1x16x6xf32>
    tpu.vector_store %arg16[%c17_105, %c1_106, %c0_107], %81 {strides = array<i32>} : memref<18x18x6xf32, #tpu.memory_space<vmem>>, vector<1x16x6xf32>,
    %c0_108 = arith.constant 0 : index
    %c2_109 = arith.constant 2 : index
    %c0_110 = arith.constant 0 : index
    %83 = vector.load %arg16[%c0_108, %c2_109, %c0_110] : memref<18x18x6xf32, #tpu.memory_space<vmem>>, vector<18x1x6xf32>
    %c0_111 = arith.constant 0 : index
    %c0_112 = arith.constant 0 : index
    %c0_113 = arith.constant 0 : index
    %84 = vector.load %arg16[%c0_111, %c0_112, %c0_113] : memref<18x18x6xf32, #tpu.memory_space<vmem>>, vector<18x1x6xf32>
    tpu.vector_store %arg16[%c0_111, %c0_112, %c0_113], %83 {strides = array<i32>} : memref<18x18x6xf32, #tpu.memory_space<vmem>>, vector<18x1x6xf32>,
    %c0_114 = arith.constant 0 : index
    %c15_115 = arith.constant 15 : index
    %c0_116 = arith.constant 0 : index
    %85 = vector.load %arg16[%c0_114, %c15_115, %c0_116] : memref<18x18x6xf32, #tpu.memory_space<vmem>>, vector<18x1x6xf32>
    %c0_117 = arith.constant 0 : index
    %c17_118 = arith.constant 17 : index
    %c0_119 = arith.constant 0 : index
    %86 = vector.load %arg16[%c0_117, %c17_118, %c0_119] : memref<18x18x6xf32, #tpu.memory_space<vmem>>, vector<18x1x6xf32>
    tpu.vector_store %arg16[%c0_117, %c17_118, %c0_119], %85 {strides = array<i32>} : memref<18x18x6xf32, #tpu.memory_space<vmem>>, vector<18x1x6xf32>,
    %cst_120 = arith.constant 0.000000e+00 : f32
    %87 = vector.broadcast %cst_120 : f32 to vector<256x12xf32>
    %c0_121 = arith.constant 0 : index
    %c0_122 = arith.constant 0 : index
    %c0_123 = arith.constant 0 : index
    %88 = vector.load %arg16[%c0_121, %c0_122, %c0_123] : memref<18x18x6xf32, #tpu.memory_space<vmem>>, vector<16x16x6xf32>
    %89 = vector.shape_cast %88 : vector<16x16x6xf32> to vector<256x6xf32>
    %c0_124 = arith.constant 0 : index
    %c0_125 = arith.constant 0 : index
    %c0_126 = arith.constant 0 : index
    %c0_127 = arith.constant 0 : index
    %90 = vector.load %arg6[%c0_124, %c0_125, %c0_126, %c0_127] : memref<3x3x6x12xf32, #tpu.memory_space<vmem>>, vector<1x1x6x12xf32>
    %91 = vector.shape_cast %90 : vector<1x1x6x12xf32> to vector<6x12xf32>
    %cst_128 = arith.constant dense<0.000000e+00> : vector<256x12xf32>
    %92 = tpu.matmul %89, %91, %cst_128 {dimension_numbers = #tpu.dot_dimension_numbers<[1], [0], [0], [1], [0, 0, 1, 1], [], []>} : vector<256x6xf32>, vector<6x12xf32>, vector<256x12xf32> -> vector<256x12xf32>
    %93 = arith.addf %87, %92 : vector<256x12xf32>
    %c0_129 = arith.constant 0 : index
    %c1_130 = arith.constant 1 : index
    %c0_131 = arith.constant 0 : index
    %94 = vector.load %arg16[%c0_129, %c1_130, %c0_131] : memref<18x18x6xf32, #tpu.memory_space<vmem>>, vector<16x16x6xf32>
    %95 = vector.shape_cast %94 : vector<16x16x6xf32> to vector<256x6xf32>
    %c0_132 = arith.constant 0 : index
    %c1_133 = arith.constant 1 : index
    %c0_134 = arith.constant 0 : index
    %c0_135 = arith.constant 0 : index
    %96 = vector.load %arg6[%c0_132, %c1_133, %c0_134, %c0_135] : memref<3x3x6x12xf32, #tpu.memory_space<vmem>>, vector<1x1x6x12xf32>
    %97 = vector.shape_cast %96 : vector<1x1x6x12xf32> to vector<6x12xf32>
    %cst_136 = arith.constant dense<0.000000e+00> : vector<256x12xf32>
    %98 = tpu.matmul %95, %97, %cst_136 {dimension_numbers = #tpu.dot_dimension_numbers<[1], [0], [0], [1], [0, 0, 1, 1], [], []>} : vector<256x6xf32>, vector<6x12xf32>, vector<256x12xf32> -> vector<256x12xf32>
    %99 = arith.addf %93, %98 : vector<256x12xf32>
    %c0_137 = arith.constant 0 : index
    %c2_138 = arith.constant 2 : index
    %c0_139 = arith.constant 0 : index
    %100 = vector.load %arg16[%c0_137, %c2_138, %c0_139] : memref<18x18x6xf32, #tpu.memory_space<vmem>>, vector<16x16x6xf32>
    %101 = vector.shape_cast %100 : vector<16x16x6xf32> to vector<256x6xf32>
    %c0_140 = arith.constant 0 : index
    %c2_141 = arith.constant 2 : index
    %c0_142 = arith.constant 0 : index
    %c0_143 = arith.constant 0 : index
    %102 = vector.load %arg6[%c0_140, %c2_141, %c0_142, %c0_143] : memref<3x3x6x12xf32, #tpu.memory_space<vmem>>, vector<1x1x6x12xf32>
    %103 = vector.shape_cast %102 : vector<1x1x6x12xf32> to vector<6x12xf32>
    %cst_144 = arith.constant dense<0.000000e+00> : vector<256x12xf32>
    %104 = tpu.matmul %101, %103, %cst_144 {dimension_numbers = #tpu.dot_dimension_numbers<[1], [0], [0], [1], [0, 0, 1, 1], [], []>} : vector<256x6xf32>, vector<6x12xf32>, vector<256x12xf32> -> vector<256x12xf32>
    %105 = arith.addf %99, %104 : vector<256x12xf32>
    %c1_145 = arith.constant 1 : index
    %c0_146 = arith.constant 0 : index
    %c0_147 = arith.constant 0 : index
    %106 = vector.load %arg16[%c1_145, %c0_146, %c0_147] : memref<18x18x6xf32, #tpu.memory_space<vmem>>, vector<16x16x6xf32>
    %107 = vector.shape_cast %106 : vector<16x16x6xf32> to vector<256x6xf32>
    %c1_148 = arith.constant 1 : index
    %c0_149 = arith.constant 0 : index
    %c0_150 = arith.constant 0 : index
    %c0_151 = arith.constant 0 : index
    %108 = vector.load %arg6[%c1_148, %c0_149, %c0_150, %c0_151] : memref<3x3x6x12xf32, #tpu.memory_space<vmem>>, vector<1x1x6x12xf32>
    %109 = vector.shape_cast %108 : vector<1x1x6x12xf32> to vector<6x12xf32>
    %cst_152 = arith.constant dense<0.000000e+00> : vector<256x12xf32>
    %110 = tpu.matmul %107, %109, %cst_152 {dimension_numbers = #tpu.dot_dimension_numbers<[1], [0], [0], [1], [0, 0, 1, 1], [], []>} : vector<256x6xf32>, vector<6x12xf32>, vector<256x12xf32> -> vector<256x12xf32>
    %111 = arith.addf %105, %110 : vector<256x12xf32>
    %c1_153 = arith.constant 1 : index
    %c1_154 = arith.constant 1 : index
    %c0_155 = arith.constant 0 : index
    %112 = vector.load %arg16[%c1_153, %c1_154, %c0_155] : memref<18x18x6xf32, #tpu.memory_space<vmem>>, vector<16x16x6xf32>
    %113 = vector.shape_cast %112 : vector<16x16x6xf32> to vector<256x6xf32>
    %c1_156 = arith.constant 1 : index
    %c1_157 = arith.constant 1 : index
    %c0_158 = arith.constant 0 : index
    %c0_159 = arith.constant 0 : index
    %114 = vector.load %arg6[%c1_156, %c1_157, %c0_158, %c0_159] : memref<3x3x6x12xf32, #tpu.memory_space<vmem>>, vector<1x1x6x12xf32>
    %115 = vector.shape_cast %114 : vector<1x1x6x12xf32> to vector<6x12xf32>
    %cst_160 = arith.constant dense<0.000000e+00> : vector<256x12xf32>
    %116 = tpu.matmul %113, %115, %cst_160 {dimension_numbers = #tpu.dot_dimension_numbers<[1], [0], [0], [1], [0, 0, 1, 1], [], []>} : vector<256x6xf32>, vector<6x12xf32>, vector<256x12xf32> -> vector<256x12xf32>
    %117 = arith.addf %111, %116 : vector<256x12xf32>
    %c1_161 = arith.constant 1 : index
    %c2_162 = arith.constant 2 : index
    %c0_163 = arith.constant 0 : index
    %118 = vector.load %arg16[%c1_161, %c2_162, %c0_163] : memref<18x18x6xf32, #tpu.memory_space<vmem>>, vector<16x16x6xf32>
    %119 = vector.shape_cast %118 : vector<16x16x6xf32> to vector<256x6xf32>
    %c1_164 = arith.constant 1 : index
    %c2_165 = arith.constant 2 : index
    %c0_166 = arith.constant 0 : index
    %c0_167 = arith.constant 0 : index
    %120 = vector.load %arg6[%c1_164, %c2_165, %c0_166, %c0_167] : memref<3x3x6x12xf32, #tpu.memory_space<vmem>>, vector<1x1x6x12xf32>
    %121 = vector.shape_cast %120 : vector<1x1x6x12xf32> to vector<6x12xf32>
    %cst_168 = arith.constant dense<0.000000e+00> : vector<256x12xf32>
    %122 = tpu.matmul %119, %121, %cst_168 {dimension_numbers = #tpu.dot_dimension_numbers<[1], [0], [0], [1], [0, 0, 1, 1], [], []>} : vector<256x6xf32>, vector<6x12xf32>, vector<256x12xf32> -> vector<256x12xf32>
    %123 = arith.addf %117, %122 : vector<256x12xf32>
    %c2_169 = arith.constant 2 : index
    %c0_170 = arith.constant 0 : index
    %c0_171 = arith.constant 0 : index
    %124 = vector.load %arg16[%c2_169, %c0_170, %c0_171] : memref<18x18x6xf32, #tpu.memory_space<vmem>>, vector<16x16x6xf32>
    %125 = vector.shape_cast %124 : vector<16x16x6xf32> to vector<256x6xf32>
    %c2_172 = arith.constant 2 : index
    %c0_173 = arith.constant 0 : index
    %c0_174 = arith.constant 0 : index
    %c0_175 = arith.constant 0 : index
    %126 = vector.load %arg6[%c2_172, %c0_173, %c0_174, %c0_175] : memref<3x3x6x12xf32, #tpu.memory_space<vmem>>, vector<1x1x6x12xf32>
    %127 = vector.shape_cast %126 : vector<1x1x6x12xf32> to vector<6x12xf32>
    %cst_176 = arith.constant dense<0.000000e+00> : vector<256x12xf32>
    %128 = tpu.matmul %125, %127, %cst_176 {dimension_numbers = #tpu.dot_dimension_numbers<[1], [0], [0], [1], [0, 0, 1, 1], [], []>} : vector<256x6xf32>, vector<6x12xf32>, vector<256x12xf32> -> vector<256x12xf32>
    %129 = arith.addf %123, %128 : vector<256x12xf32>
    %c2_177 = arith.constant 2 : index
    %c1_178 = arith.constant 1 : index
    %c0_179 = arith.constant 0 : index
    %130 = vector.load %arg16[%c2_177, %c1_178, %c0_179] : memref<18x18x6xf32, #tpu.memory_space<vmem>>, vector<16x16x6xf32>
    %131 = vector.shape_cast %130 : vector<16x16x6xf32> to vector<256x6xf32>
    %c2_180 = arith.constant 2 : index
    %c1_181 = arith.constant 1 : index
    %c0_182 = arith.constant 0 : index
    %c0_183 = arith.constant 0 : index
    %132 = vector.load %arg6[%c2_180, %c1_181, %c0_182, %c0_183] : memref<3x3x6x12xf32, #tpu.memory_space<vmem>>, vector<1x1x6x12xf32>
    %133 = vector.shape_cast %132 : vector<1x1x6x12xf32> to vector<6x12xf32>
    %cst_184 = arith.constant dense<0.000000e+00> : vector<256x12xf32>
    %134 = tpu.matmul %131, %133, %cst_184 {dimension_numbers = #tpu.dot_dimension_numbers<[1], [0], [0], [1], [0, 0, 1, 1], [], []>} : vector<256x6xf32>, vector<6x12xf32>, vector<256x12xf32> -> vector<256x12xf32>
    %135 = arith.addf %129, %134 : vector<256x12xf32>
    %c2_185 = arith.constant 2 : index
    %c2_186 = arith.constant 2 : index
    %c0_187 = arith.constant 0 : index
    %136 = vector.load %arg16[%c2_185, %c2_186, %c0_187] : memref<18x18x6xf32, #tpu.memory_space<vmem>>, vector<16x16x6xf32>
    %137 = vector.shape_cast %136 : vector<16x16x6xf32> to vector<256x6xf32>
    %c2_188 = arith.constant 2 : index
    %c2_189 = arith.constant 2 : index
    %c0_190 = arith.constant 0 : index
    %c0_191 = arith.constant 0 : index
    %138 = vector.load %arg6[%c2_188, %c2_189, %c0_190, %c0_191] : memref<3x3x6x12xf32, #tpu.memory_space<vmem>>, vector<1x1x6x12xf32>
    %139 = vector.shape_cast %138 : vector<1x1x6x12xf32> to vector<6x12xf32>
    %cst_192 = arith.constant dense<0.000000e+00> : vector<256x12xf32>
    %140 = tpu.matmul %137, %139, %cst_192 {dimension_numbers = #tpu.dot_dimension_numbers<[1], [0], [0], [1], [0, 0, 1, 1], [], []>} : vector<256x6xf32>, vector<6x12xf32>, vector<256x12xf32> -> vector<256x12xf32>
    %141 = arith.addf %135, %140 : vector<256x12xf32>
    %c0_193 = arith.constant 0 : index
    %c0_194 = arith.constant 0 : index
    %142 = vector.load %arg7[%c0_193, %c0_194] : memref<1x12xf32, #tpu.memory_space<vmem>>, vector<1x12xf32>
    %143 = vector.broadcast %142 : vector<1x12xf32> to vector<256x12xf32>
    %144 = arith.addf %141, %143 : vector<256x12xf32>
    %cst_195 = arith.constant 0.000000e+00 : f32
    %145 = vector.broadcast %cst_195 : f32 to vector<256x12xf32>
    %146 = arith.maximumf %144, %145 : vector<256x12xf32>
    %c0_196 = arith.constant 0 : index
    %c0_197 = arith.constant 0 : index
    %147 = vector.load %arg8[%c0_196, %c0_197] : memref<1x12xf32, #tpu.memory_space<vmem>>, vector<1x12xf32>
    %148 = vector.broadcast %147 : vector<1x12xf32> to vector<256x12xf32>
    %149 = arith.mulf %146, %148 : vector<256x12xf32>
    %c0_198 = arith.constant 0 : index
    %c0_199 = arith.constant 0 : index
    %150 = vector.load %arg9[%c0_198, %c0_199] : memref<1x12xf32, #tpu.memory_space<vmem>>, vector<1x12xf32>
    %151 = vector.broadcast %150 : vector<1x12xf32> to vector<256x12xf32>
    %152 = arith.addf %149, %151 : vector<256x12xf32>
    %153 = vector.shape_cast %152 : vector<256x12xf32> to vector<16x16x12xf32>
    %c1_200 = arith.constant 1 : index
    %c1_201 = arith.constant 1 : index
    %c0_202 = arith.constant 0 : index
    %154 = vector.load %arg17[%c1_200, %c1_201, %c0_202] : memref<18x18x12xf32, #tpu.memory_space<vmem>>, vector<16x16x12xf32>
    tpu.vector_store %arg17[%c1_200, %c1_201, %c0_202], %153 {strides = array<i32>} : memref<18x18x12xf32, #tpu.memory_space<vmem>>, vector<16x16x12xf32>,
    %155 = vector.extract_strided_slice %153 {offsets = [1, 0, 0], sizes = [1, 16, 12], strides = [1, 1, 1]} : vector<16x16x12xf32> to vector<1x16x12xf32>
    %c0_203 = arith.constant 0 : index
    %c1_204 = arith.constant 1 : index
    %c0_205 = arith.constant 0 : index
    %156 = vector.load %arg17[%c0_203, %c1_204, %c0_205] : memref<18x18x12xf32, #tpu.memory_space<vmem>>, vector<1x16x12xf32>
    tpu.vector_store %arg17[%c0_203, %c1_204, %c0_205], %155 {strides = array<i32>} : memref<18x18x12xf32, #tpu.memory_space<vmem>>, vector<1x16x12xf32>,
    %157 = vector.extract_strided_slice %153 {offsets = [14, 0, 0], sizes = [1, 16, 12], strides = [1, 1, 1]} : vector<16x16x12xf32> to vector<1x16x12xf32>
    %c17_206 = arith.constant 17 : index
    %c1_207 = arith.constant 1 : index
    %c0_208 = arith.constant 0 : index
    %158 = vector.load %arg17[%c17_206, %c1_207, %c0_208] : memref<18x18x12xf32, #tpu.memory_space<vmem>>, vector<1x16x12xf32>
    tpu.vector_store %arg17[%c17_206, %c1_207, %c0_208], %157 {strides = array<i32>} : memref<18x18x12xf32, #tpu.memory_space<vmem>>, vector<1x16x12xf32>,
    %c0_209 = arith.constant 0 : index
    %c2_210 = arith.constant 2 : index
    %c0_211 = arith.constant 0 : index
    %159 = vector.load %arg17[%c0_209, %c2_210, %c0_211] : memref<18x18x12xf32, #tpu.memory_space<vmem>>, vector<18x1x12xf32>
    %c0_212 = arith.constant 0 : index
    %c0_213 = arith.constant 0 : index
    %c0_214 = arith.constant 0 : index
    %160 = vector.load %arg17[%c0_212, %c0_213, %c0_214] : memref<18x18x12xf32, #tpu.memory_space<vmem>>, vector<18x1x12xf32>
    tpu.vector_store %arg17[%c0_212, %c0_213, %c0_214], %159 {strides = array<i32>} : memref<18x18x12xf32, #tpu.memory_space<vmem>>, vector<18x1x12xf32>,
    %c0_215 = arith.constant 0 : index
    %c15_216 = arith.constant 15 : index
    %c0_217 = arith.constant 0 : index
    %161 = vector.load %arg17[%c0_215, %c15_216, %c0_217] : memref<18x18x12xf32, #tpu.memory_space<vmem>>, vector<18x1x12xf32>
    %c0_218 = arith.constant 0 : index
    %c17_219 = arith.constant 17 : index
    %c0_220 = arith.constant 0 : index
    %162 = vector.load %arg17[%c0_218, %c17_219, %c0_220] : memref<18x18x12xf32, #tpu.memory_space<vmem>>, vector<18x1x12xf32>
    tpu.vector_store %arg17[%c0_218, %c17_219, %c0_220], %161 {strides = array<i32>} : memref<18x18x12xf32, #tpu.memory_space<vmem>>, vector<18x1x12xf32>,
    %cst_221 = arith.constant 0.000000e+00 : f32
    %163 = vector.broadcast %cst_221 : f32 to vector<256x12xf32>
    %c0_222 = arith.constant 0 : index
    %c0_223 = arith.constant 0 : index
    %c0_224 = arith.constant 0 : index
    %164 = vector.load %arg17[%c0_222, %c0_223, %c0_224] : memref<18x18x12xf32, #tpu.memory_space<vmem>>, vector<16x16x12xf32>
    %165 = vector.shape_cast %164 : vector<16x16x12xf32> to vector<256x12xf32>
    %c0_225 = arith.constant 0 : index
    %c0_226 = arith.constant 0 : index
    %c0_227 = arith.constant 0 : index
    %c0_228 = arith.constant 0 : index
    %166 = vector.load %arg10[%c0_225, %c0_226, %c0_227, %c0_228] : memref<3x3x12x12xf32, #tpu.memory_space<vmem>>, vector<1x1x12x12xf32>
    %167 = vector.shape_cast %166 : vector<1x1x12x12xf32> to vector<12x12xf32>
    %cst_229 = arith.constant dense<0.000000e+00> : vector<256x12xf32>
    %168 = tpu.matmul %165, %167, %cst_229 {dimension_numbers = #tpu.dot_dimension_numbers<[1], [0], [0], [1], [0, 0, 1, 1], [], []>} : vector<256x12xf32>, vector<12x12xf32>, vector<256x12xf32> -> vector<256x12xf32>
    %169 = arith.addf %163, %168 : vector<256x12xf32>
    %c0_230 = arith.constant 0 : index
    %c1_231 = arith.constant 1 : index
    %c0_232 = arith.constant 0 : index
    %170 = vector.load %arg17[%c0_230, %c1_231, %c0_232] : memref<18x18x12xf32, #tpu.memory_space<vmem>>, vector<16x16x12xf32>
    %171 = vector.shape_cast %170 : vector<16x16x12xf32> to vector<256x12xf32>
    %c0_233 = arith.constant 0 : index
    %c1_234 = arith.constant 1 : index
    %c0_235 = arith.constant 0 : index
    %c0_236 = arith.constant 0 : index
    %172 = vector.load %arg10[%c0_233, %c1_234, %c0_235, %c0_236] : memref<3x3x12x12xf32, #tpu.memory_space<vmem>>, vector<1x1x12x12xf32>
    %173 = vector.shape_cast %172 : vector<1x1x12x12xf32> to vector<12x12xf32>
    %cst_237 = arith.constant dense<0.000000e+00> : vector<256x12xf32>
    %174 = tpu.matmul %171, %173, %cst_237 {dimension_numbers = #tpu.dot_dimension_numbers<[1], [0], [0], [1], [0, 0, 1, 1], [], []>} : vector<256x12xf32>, vector<12x12xf32>, vector<256x12xf32> -> vector<256x12xf32>
    %175 = arith.addf %169, %174 : vector<256x12xf32>
    %c0_238 = arith.constant 0 : index
    %c2_239 = arith.constant 2 : index
    %c0_240 = arith.constant 0 : index
    %176 = vector.load %arg17[%c0_238, %c2_239, %c0_240] : memref<18x18x12xf32, #tpu.memory_space<vmem>>, vector<16x16x12xf32>
    %177 = vector.shape_cast %176 : vector<16x16x12xf32> to vector<256x12xf32>
    %c0_241 = arith.constant 0 : index
    %c2_242 = arith.constant 2 : index
    %c0_243 = arith.constant 0 : index
    %c0_244 = arith.constant 0 : index
    %178 = vector.load %arg10[%c0_241, %c2_242, %c0_243, %c0_244] : memref<3x3x12x12xf32, #tpu.memory_space<vmem>>, vector<1x1x12x12xf32>
    %179 = vector.shape_cast %178 : vector<1x1x12x12xf32> to vector<12x12xf32>
    %cst_245 = arith.constant dense<0.000000e+00> : vector<256x12xf32>
    %180 = tpu.matmul %177, %179, %cst_245 {dimension_numbers = #tpu.dot_dimension_numbers<[1], [0], [0], [1], [0, 0, 1, 1], [], []>} : vector<256x12xf32>, vector<12x12xf32>, vector<256x12xf32> -> vector<256x12xf32>
    %181 = arith.addf %175, %180 : vector<256x12xf32>
    %c1_246 = arith.constant 1 : index
    %c0_247 = arith.constant 0 : index
    %c0_248 = arith.constant 0 : index
    %182 = vector.load %arg17[%c1_246, %c0_247, %c0_248] : memref<18x18x12xf32, #tpu.memory_space<vmem>>, vector<16x16x12xf32>
    %183 = vector.shape_cast %182 : vector<16x16x12xf32> to vector<256x12xf32>
    %c1_249 = arith.constant 1 : index
    %c0_250 = arith.constant 0 : index
    %c0_251 = arith.constant 0 : index
    %c0_252 = arith.constant 0 : index
    %184 = vector.load %arg10[%c1_249, %c0_250, %c0_251, %c0_252] : memref<3x3x12x12xf32, #tpu.memory_space<vmem>>, vector<1x1x12x12xf32>
    %185 = vector.shape_cast %184 : vector<1x1x12x12xf32> to vector<12x12xf32>
    %cst_253 = arith.constant dense<0.000000e+00> : vector<256x12xf32>
    %186 = tpu.matmul %183, %185, %cst_253 {dimension_numbers = #tpu.dot_dimension_numbers<[1], [0], [0], [1], [0, 0, 1, 1], [], []>} : vector<256x12xf32>, vector<12x12xf32>, vector<256x12xf32> -> vector<256x12xf32>
    %187 = arith.addf %181, %186 : vector<256x12xf32>
    %c1_254 = arith.constant 1 : index
    %c1_255 = arith.constant 1 : index
    %c0_256 = arith.constant 0 : index
    %188 = vector.load %arg17[%c1_254, %c1_255, %c0_256] : memref<18x18x12xf32, #tpu.memory_space<vmem>>, vector<16x16x12xf32>
    %189 = vector.shape_cast %188 : vector<16x16x12xf32> to vector<256x12xf32>
    %c1_257 = arith.constant 1 : index
    %c1_258 = arith.constant 1 : index
    %c0_259 = arith.constant 0 : index
    %c0_260 = arith.constant 0 : index
    %190 = vector.load %arg10[%c1_257, %c1_258, %c0_259, %c0_260] : memref<3x3x12x12xf32, #tpu.memory_space<vmem>>, vector<1x1x12x12xf32>
    %191 = vector.shape_cast %190 : vector<1x1x12x12xf32> to vector<12x12xf32>
    %cst_261 = arith.constant dense<0.000000e+00> : vector<256x12xf32>
    %192 = tpu.matmul %189, %191, %cst_261 {dimension_numbers = #tpu.dot_dimension_numbers<[1], [0], [0], [1], [0, 0, 1, 1], [], []>} : vector<256x12xf32>, vector<12x12xf32>, vector<256x12xf32> -> vector<256x12xf32>
    %193 = arith.addf %187, %192 : vector<256x12xf32>
    %c1_262 = arith.constant 1 : index
    %c2_263 = arith.constant 2 : index
    %c0_264 = arith.constant 0 : index
    %194 = vector.load %arg17[%c1_262, %c2_263, %c0_264] : memref<18x18x12xf32, #tpu.memory_space<vmem>>, vector<16x16x12xf32>
    %195 = vector.shape_cast %194 : vector<16x16x12xf32> to vector<256x12xf32>
    %c1_265 = arith.constant 1 : index
    %c2_266 = arith.constant 2 : index
    %c0_267 = arith.constant 0 : index
    %c0_268 = arith.constant 0 : index
    %196 = vector.load %arg10[%c1_265, %c2_266, %c0_267, %c0_268] : memref<3x3x12x12xf32, #tpu.memory_space<vmem>>, vector<1x1x12x12xf32>
    %197 = vector.shape_cast %196 : vector<1x1x12x12xf32> to vector<12x12xf32>
    %cst_269 = arith.constant dense<0.000000e+00> : vector<256x12xf32>
    %198 = tpu.matmul %195, %197, %cst_269 {dimension_numbers = #tpu.dot_dimension_numbers<[1], [0], [0], [1], [0, 0, 1, 1], [], []>} : vector<256x12xf32>, vector<12x12xf32>, vector<256x12xf32> -> vector<256x12xf32>
    %199 = arith.addf %193, %198 : vector<256x12xf32>
    %c2_270 = arith.constant 2 : index
    %c0_271 = arith.constant 0 : index
    %c0_272 = arith.constant 0 : index
    %200 = vector.load %arg17[%c2_270, %c0_271, %c0_272] : memref<18x18x12xf32, #tpu.memory_space<vmem>>, vector<16x16x12xf32>
    %201 = vector.shape_cast %200 : vector<16x16x12xf32> to vector<256x12xf32>
    %c2_273 = arith.constant 2 : index
    %c0_274 = arith.constant 0 : index
    %c0_275 = arith.constant 0 : index
    %c0_276 = arith.constant 0 : index
    %202 = vector.load %arg10[%c2_273, %c0_274, %c0_275, %c0_276] : memref<3x3x12x12xf32, #tpu.memory_space<vmem>>, vector<1x1x12x12xf32>
    %203 = vector.shape_cast %202 : vector<1x1x12x12xf32> to vector<12x12xf32>
    %cst_277 = arith.constant dense<0.000000e+00> : vector<256x12xf32>
    %204 = tpu.matmul %201, %203, %cst_277 {dimension_numbers = #tpu.dot_dimension_numbers<[1], [0], [0], [1], [0, 0, 1, 1], [], []>} : vector<256x12xf32>, vector<12x12xf32>, vector<256x12xf32> -> vector<256x12xf32>
    %205 = arith.addf %199, %204 : vector<256x12xf32>
    %c2_278 = arith.constant 2 : index
    %c1_279 = arith.constant 1 : index
    %c0_280 = arith.constant 0 : index
    %206 = vector.load %arg17[%c2_278, %c1_279, %c0_280] : memref<18x18x12xf32, #tpu.memory_space<vmem>>, vector<16x16x12xf32>
    %207 = vector.shape_cast %206 : vector<16x16x12xf32> to vector<256x12xf32>
    %c2_281 = arith.constant 2 : index
    %c1_282 = arith.constant 1 : index
    %c0_283 = arith.constant 0 : index
    %c0_284 = arith.constant 0 : index
    %208 = vector.load %arg10[%c2_281, %c1_282, %c0_283, %c0_284] : memref<3x3x12x12xf32, #tpu.memory_space<vmem>>, vector<1x1x12x12xf32>
    %209 = vector.shape_cast %208 : vector<1x1x12x12xf32> to vector<12x12xf32>
    %cst_285 = arith.constant dense<0.000000e+00> : vector<256x12xf32>
    %210 = tpu.matmul %207, %209, %cst_285 {dimension_numbers = #tpu.dot_dimension_numbers<[1], [0], [0], [1], [0, 0, 1, 1], [], []>} : vector<256x12xf32>, vector<12x12xf32>, vector<256x12xf32> -> vector<256x12xf32>
    %211 = arith.addf %205, %210 : vector<256x12xf32>
    %c2_286 = arith.constant 2 : index
    %c2_287 = arith.constant 2 : index
    %c0_288 = arith.constant 0 : index
    %212 = vector.load %arg17[%c2_286, %c2_287, %c0_288] : memref<18x18x12xf32, #tpu.memory_space<vmem>>, vector<16x16x12xf32>
    %213 = vector.shape_cast %212 : vector<16x16x12xf32> to vector<256x12xf32>
    %c2_289 = arith.constant 2 : index
    %c2_290 = arith.constant 2 : index
    %c0_291 = arith.constant 0 : index
    %c0_292 = arith.constant 0 : index
    %214 = vector.load %arg10[%c2_289, %c2_290, %c0_291, %c0_292] : memref<3x3x12x12xf32, #tpu.memory_space<vmem>>, vector<1x1x12x12xf32>
    %215 = vector.shape_cast %214 : vector<1x1x12x12xf32> to vector<12x12xf32>
    %cst_293 = arith.constant dense<0.000000e+00> : vector<256x12xf32>
    %216 = tpu.matmul %213, %215, %cst_293 {dimension_numbers = #tpu.dot_dimension_numbers<[1], [0], [0], [1], [0, 0, 1, 1], [], []>} : vector<256x12xf32>, vector<12x12xf32>, vector<256x12xf32> -> vector<256x12xf32>
    %217 = arith.addf %211, %216 : vector<256x12xf32>
    %c0_294 = arith.constant 0 : index
    %c0_295 = arith.constant 0 : index
    %218 = vector.load %arg11[%c0_294, %c0_295] : memref<1x12xf32, #tpu.memory_space<vmem>>, vector<1x12xf32>
    %219 = vector.broadcast %218 : vector<1x12xf32> to vector<256x12xf32>
    %220 = arith.addf %217, %219 : vector<256x12xf32>
    %cst_296 = arith.constant 0.000000e+00 : f32
    %221 = vector.broadcast %cst_296 : f32 to vector<256x12xf32>
    %222 = arith.maximumf %220, %221 : vector<256x12xf32>
    %c0_297 = arith.constant 0 : index
    %c0_298 = arith.constant 0 : index
    %223 = vector.load %arg12[%c0_297, %c0_298] : memref<1x12xf32, #tpu.memory_space<vmem>>, vector<1x12xf32>
    %224 = vector.broadcast %223 : vector<1x12xf32> to vector<256x12xf32>
    %225 = arith.mulf %222, %224 : vector<256x12xf32>
    %c0_299 = arith.constant 0 : index
    %c0_300 = arith.constant 0 : index
    %226 = vector.load %arg13[%c0_299, %c0_300] : memref<1x12xf32, #tpu.memory_space<vmem>>, vector<1x12xf32>
    %227 = vector.broadcast %226 : vector<1x12xf32> to vector<256x12xf32>
    %228 = arith.addf %225, %227 : vector<256x12xf32>
    %c0_301 = arith.constant 0 : index
    %c0_302 = arith.constant 0 : index
    %c0_303 = arith.constant 0 : index
    %229 = vector.load %arg14[%c0_301, %c0_302, %c0_303] : memref<1x256x12xf32, #tpu.memory_space<vmem>>, vector<1x256x12xf32>
    %230 = vector.shape_cast %229 : vector<1x256x12xf32> to vector<256x12xf32>
    %231 = vector.shape_cast %228 : vector<256x12xf32> to vector<1x256x12xf32>
    tpu.vector_store %arg14[%c0_301, %c0_302, %c0_303], %231 {strides = array<i32>} : memref<1x256x12xf32, #tpu.memory_space<vmem>>, vector<1x256x12xf32>,
    return
  }
  func.func @transform_0(%arg0: i32) -> (i32, i32, i32, i32) {
    %c0_i32 = arith.constant 0 : i32
    %c0_i32_0 = arith.constant 0 : i32
    %c0_i32_1 = arith.constant 0 : i32
    %c0_i32_2 = arith.constant 0 : i32
    return %arg0, %c0_i32, %c0_i32_0, %c0_i32_1 : i32, i32, i32, i32
  }
  func.func @transform_1(%arg0: i32) -> (i32, i32, i32, i32) {
    %c0_i32 = arith.constant 0 : i32
    %c0_i32_0 = arith.constant 0 : i32
    %c0_i32_1 = arith.constant 0 : i32
    %c0_i32_2 = arith.constant 0 : i32
    %c0_i32_3 = arith.constant 0 : i32
    return %c0_i32, %c0_i32_0, %c0_i32_1, %c0_i32_2 : i32, i32, i32, i32
  }
  func.func @transform_2(%arg0: i32) -> (i32, i32) {
    %c0_i32 = arith.constant 0 : i32
    %c0_i32_0 = arith.constant 0 : i32
    %c0_i32_1 = arith.constant 0 : i32
    return %c0_i32, %c0_i32_0 : i32, i32
  }
  func.func @transform_3(%arg0: i32) -> (i32, i32) {
    %c0_i32 = arith.constant 0 : i32
    %c0_i32_0 = arith.constant 0 : i32
    %c0_i32_1 = arith.constant 0 : i32
    return %c0_i32, %c0_i32_0 : i32, i32
  }
  func.func @transform_4(%arg0: i32) -> (i32, i32) {
    %c0_i32 = arith.constant 0 : i32
    %c0_i32_0 = arith.constant 0 : i32
    %c0_i32_1 = arith.constant 0 : i32
    return %c0_i32, %c0_i32_0 : i32, i32
  }
  func.func @transform_5(%arg0: i32) -> (i32, i32, i32, i32) {
    %c0_i32 = arith.constant 0 : i32
    %c0_i32_0 = arith.constant 0 : i32
    %c0_i32_1 = arith.constant 0 : i32
    %c0_i32_2 = arith.constant 0 : i32
    %c0_i32_3 = arith.constant 0 : i32
    return %c0_i32, %c0_i32_0, %c0_i32_1, %c0_i32_2 : i32, i32, i32, i32
  }
  func.func @transform_6(%arg0: i32) -> (i32, i32) {
    %c0_i32 = arith.constant 0 : i32
    %c0_i32_0 = arith.constant 0 : i32
    %c0_i32_1 = arith.constant 0 : i32
    return %c0_i32, %c0_i32_0 : i32, i32
  }
  func.func @transform_7(%arg0: i32) -> (i32, i32) {
    %c0_i32 = arith.constant 0 : i32
    %c0_i32_0 = arith.constant 0 : i32
    %c0_i32_1 = arith.constant 0 : i32
    return %c0_i32, %c0_i32_0 : i32, i32
  }
  func.func @transform_8(%arg0: i32) -> (i32, i32) {
    %c0_i32 = arith.constant 0 : i32
    %c0_i32_0 = arith.constant 0 : i32
    %c0_i32_1 = arith.constant 0 : i32
    return %c0_i32, %c0_i32_0 : i32, i32
  }
  func.func @transform_9(%arg0: i32) -> (i32, i32, i32, i32) {
    %c0_i32 = arith.constant 0 : i32
    %c0_i32_0 = arith.constant 0 : i32
    %c0_i32_1 = arith.constant 0 : i32
    %c0_i32_2 = arith.constant 0 : i32
    %c0_i32_3 = arith.constant 0 : i32
    return %c0_i32, %c0_i32_0, %c0_i32_1, %c0_i32_2 : i32, i32, i32, i32
  }
  func.func @transform_10(%arg0: i32) -> (i32, i32) {
    %c0_i32 = arith.constant 0 : i32
    %c0_i32_0 = arith.constant 0 : i32
    %c0_i32_1 = arith.constant 0 : i32
    return %c0_i32, %c0_i32_0 : i32, i32
  }
  func.func @transform_11(%arg0: i32) -> (i32, i32) {
    %c0_i32 = arith.constant 0 : i32
    %c0_i32_0 = arith.constant 0 : i32
    %c0_i32_1 = arith.constant 0 : i32
    return %c0_i32, %c0_i32_0 : i32, i32
  }
  func.func @transform_12(%arg0: i32) -> (i32, i32) {
    %c0_i32 = arith.constant 0 : i32
    %c0_i32_0 = arith.constant 0 : i32
    %c0_i32_1 = arith.constant 0 : i32
    return %c0_i32, %c0_i32_0 : i32, i32
  }
  func.func @transform_13(%arg0: i32) -> (i32, i32, i32) {
    %c0_i32 = arith.constant 0 : i32
    %c0_i32_0 = arith.constant 0 : i32
    %c0_i32_1 = arith.constant 0 : i32
    return %arg0, %c0_i32, %c0_i32_0 : i32, i32, i32
  }
}

module attributes {stable_mosaic.version = 11 : i64} {
  func.func @_linear_kernel(%arg0: i32, %arg1: i32, %arg2: memref<4x1536xf32, #tpu.memory_space<vmem>>, %arg3: memref<1536x256xbf16, #tpu.memory_space<vmem>>, %arg4: memref<1x256xf32, #tpu.memory_space<vmem>>, %arg5: memref<4x256xf32, #tpu.memory_space<vmem>>) attributes {dimension_semantics = [#tpu.dimension_semantics<parallel>, #tpu.dimension_semantics<arbitrary>], iteration_bounds = array<i64: 2, 2>, scalar_prefetch = 0 : i64, scratch_operands = 0 : i64, tpu.core_type = #tpu.core_type<tc>, window_params = [{transform_indices = @transform_0, window_bounds = array<i64: 4, 1536>}, {transform_indices = @transform_1, window_bounds = array<i64: 1536, 256>}, {transform_indices = @transform_2, window_bounds = array<i64: 1, 256>}, {transform_indices = @transform_3, window_bounds = array<i64: 4, 256>}]} {
    %c0_i32 = arith.constant 0 : i32
    %0 = arith.cmpi eq, %arg1, %c0_i32 : i32
    %1 = arith.extui %0 : i1 to i32
    %c0_i32_0 = arith.constant 0 : i32
    %2 = arith.cmpi ne, %1, %c0_i32_0 : i32
    scf.if %2 {
      %cst_9 = arith.constant 0.000000e+00 : f32
      %13 = vector.broadcast %cst_9 : f32 to vector<4x256xf32>
      %c0_10 = arith.constant 0 : index
      %c0_11 = arith.constant 0 : index
      %14 = vector.load %arg5[%c0_10, %c0_11] : memref<4x256xf32, #tpu.memory_space<vmem>>, vector<4x256xf32>
      tpu.vector_store %arg5[%c0_10, %c0_11], %13 {strides = array<i32>} : memref<4x256xf32, #tpu.memory_space<vmem>>, vector<4x256xf32>,
    } else {
    }
    %c0 = arith.constant 0 : index
    %c0_1 = arith.constant 0 : index
    %3 = vector.load %arg5[%c0, %c0_1] : memref<4x256xf32, #tpu.memory_space<vmem>>, vector<4x256xf32>
    %c0_2 = arith.constant 0 : index
    %c0_3 = arith.constant 0 : index
    %4 = vector.load %arg2[%c0_2, %c0_3] : memref<4x1536xf32, #tpu.memory_space<vmem>>, vector<4x1536xf32>
    %5 = arith.truncf %4 : vector<4x1536xf32> to vector<4x1536xbf16>
    %c0_4 = arith.constant 0 : index
    %c0_5 = arith.constant 0 : index
    %6 = vector.load %arg3[%c0_4, %c0_5] : memref<1536x256xbf16, #tpu.memory_space<vmem>>, vector<1536x256xbf16>
    %cst = arith.constant dense<0.000000e+00> : vector<4x256xf32>
    %7 = tpu.matmul %5, %6, %cst {dimension_numbers = #tpu.dot_dimension_numbers<[1], [0], [0], [1], [0, 0, 1, 1], [], []>} : vector<4x1536xbf16>, vector<1536x256xbf16>, vector<4x256xf32> -> vector<4x256xf32>
    %8 = arith.addf %3, %7 : vector<4x256xf32>
    %c0_6 = arith.constant 0 : index
    %c0_7 = arith.constant 0 : index
    %9 = vector.load %arg5[%c0_6, %c0_7] : memref<4x256xf32, #tpu.memory_space<vmem>>, vector<4x256xf32>
    tpu.vector_store %arg5[%c0_6, %c0_7], %8 {strides = array<i32>} : memref<4x256xf32, #tpu.memory_space<vmem>>, vector<4x256xf32>,
    %c1_i32 = arith.constant 1 : i32
    %10 = arith.cmpi eq, %arg1, %c1_i32 : i32
    %11 = arith.extui %10 : i1 to i32
    %c0_i32_8 = arith.constant 0 : i32
    %12 = arith.cmpi ne, %11, %c0_i32_8 : i32
    scf.if %12 {
      %c0_9 = arith.constant 0 : index
      %c0_10 = arith.constant 0 : index
      %13 = vector.load %arg5[%c0_9, %c0_10] : memref<4x256xf32, #tpu.memory_space<vmem>>, vector<4x256xf32>
      %c0_11 = arith.constant 0 : index
      %c0_12 = arith.constant 0 : index
      %14 = vector.load %arg4[%c0_11, %c0_12] : memref<1x256xf32, #tpu.memory_space<vmem>>, vector<1x256xf32>
      %15 = vector.broadcast %14 : vector<1x256xf32> to vector<4x256xf32>
      %16 = arith.addf %13, %15 : vector<4x256xf32>
      %cst_13 = arith.constant 0.000000e+00 : f32
      %17 = vector.broadcast %cst_13 : f32 to vector<4x256xf32>
      %18 = arith.maximumf %16, %17 : vector<4x256xf32>
      %c0_14 = arith.constant 0 : index
      %c0_15 = arith.constant 0 : index
      %19 = vector.load %arg5[%c0_14, %c0_15] : memref<4x256xf32, #tpu.memory_space<vmem>>, vector<4x256xf32>
      tpu.vector_store %arg5[%c0_14, %c0_15], %18 {strides = array<i32>} : memref<4x256xf32, #tpu.memory_space<vmem>>, vector<4x256xf32>,
    } else {
    }
    return
  }
  func.func @transform_0(%arg0: i32, %arg1: i32) -> (i32, i32) {
    %c0_i32 = arith.constant 0 : i32
    %c0_i32_0 = arith.constant 0 : i32
    return %c0_i32, %arg1 : i32, i32
  }
  func.func @transform_1(%arg0: i32, %arg1: i32) -> (i32, i32) {
    %c0_i32 = arith.constant 0 : i32
    return %arg1, %arg0 : i32, i32
  }
  func.func @transform_2(%arg0: i32, %arg1: i32) -> (i32, i32) {
    %c0_i32 = arith.constant 0 : i32
    %c0_i32_0 = arith.constant 0 : i32
    return %c0_i32, %arg0 : i32, i32
  }
  func.func @transform_3(%arg0: i32, %arg1: i32) -> (i32, i32) {
    %c0_i32 = arith.constant 0 : i32
    %c0_i32_0 = arith.constant 0 : i32
    return %c0_i32, %arg0 : i32, i32
  }
}

module attributes {stable_mosaic.version = 11 : i64} {
  func.func @_linear_kernel(%arg0: i32, %arg1: i32, %arg2: memref<4x512xf32, #tpu.memory_space<vmem>>, %arg3: memref<512x256xbf16, #tpu.memory_space<vmem>>, %arg4: memref<1x256xf32, #tpu.memory_space<vmem>>, %arg5: memref<4x256xf32, #tpu.memory_space<vmem>>) attributes {dimension_semantics = [#tpu.dimension_semantics<parallel>, #tpu.dimension_semantics<arbitrary>], iteration_bounds = array<i64: 2, 1>, scalar_prefetch = 0 : i64, scratch_operands = 0 : i64, tpu.core_type = #tpu.core_type<tc>, window_params = [{transform_indices = @transform_0, window_bounds = array<i64: 4, 512>}, {transform_indices = @transform_1, window_bounds = array<i64: 512, 256>}, {transform_indices = @transform_2, window_bounds = array<i64: 1, 256>}, {transform_indices = @transform_3, window_bounds = array<i64: 4, 256>}]} {
    %c0_i32 = arith.constant 0 : i32
    %0 = arith.cmpi eq, %arg1, %c0_i32 : i32
    %1 = arith.extui %0 : i1 to i32
    %c0_i32_0 = arith.constant 0 : i32
    %2 = arith.cmpi ne, %1, %c0_i32_0 : i32
    scf.if %2 {
      %cst_10 = arith.constant 0.000000e+00 : f32
      %13 = vector.broadcast %cst_10 : f32 to vector<4x256xf32>
      %c0_11 = arith.constant 0 : index
      %c0_12 = arith.constant 0 : index
      %14 = vector.load %arg5[%c0_11, %c0_12] : memref<4x256xf32, #tpu.memory_space<vmem>>, vector<4x256xf32>
      tpu.vector_store %arg5[%c0_11, %c0_12], %13 {strides = array<i32>} : memref<4x256xf32, #tpu.memory_space<vmem>>, vector<4x256xf32>,
    } else {
    }
    %c0 = arith.constant 0 : index
    %c0_1 = arith.constant 0 : index
    %3 = vector.load %arg5[%c0, %c0_1] : memref<4x256xf32, #tpu.memory_space<vmem>>, vector<4x256xf32>
    %c0_2 = arith.constant 0 : index
    %c0_3 = arith.constant 0 : index
    %4 = vector.load %arg2[%c0_2, %c0_3] : memref<4x512xf32, #tpu.memory_space<vmem>>, vector<4x512xf32>
    %5 = arith.truncf %4 : vector<4x512xf32> to vector<4x512xbf16>
    %c0_4 = arith.constant 0 : index
    %c0_5 = arith.constant 0 : index
    %6 = vector.load %arg3[%c0_4, %c0_5] : memref<512x256xbf16, #tpu.memory_space<vmem>>, vector<512x256xbf16>
    %cst = arith.constant dense<0.000000e+00> : vector<4x256xf32>
    %7 = tpu.matmul %5, %6, %cst {dimension_numbers = #tpu.dot_dimension_numbers<[1], [0], [0], [1], [0, 0, 1, 1], [], []>} : vector<4x512xbf16>, vector<512x256xbf16>, vector<4x256xf32> -> vector<4x256xf32>
    %8 = arith.addf %3, %7 : vector<4x256xf32>
    %c0_6 = arith.constant 0 : index
    %c0_7 = arith.constant 0 : index
    %9 = vector.load %arg5[%c0_6, %c0_7] : memref<4x256xf32, #tpu.memory_space<vmem>>, vector<4x256xf32>
    tpu.vector_store %arg5[%c0_6, %c0_7], %8 {strides = array<i32>} : memref<4x256xf32, #tpu.memory_space<vmem>>, vector<4x256xf32>,
    %c0_i32_8 = arith.constant 0 : i32
    %10 = arith.cmpi eq, %arg1, %c0_i32_8 : i32
    %11 = arith.extui %10 : i1 to i32
    %c0_i32_9 = arith.constant 0 : i32
    %12 = arith.cmpi ne, %11, %c0_i32_9 : i32
    scf.if %12 {
      %c0_10 = arith.constant 0 : index
      %c0_11 = arith.constant 0 : index
      %13 = vector.load %arg5[%c0_10, %c0_11] : memref<4x256xf32, #tpu.memory_space<vmem>>, vector<4x256xf32>
      %c0_12 = arith.constant 0 : index
      %c0_13 = arith.constant 0 : index
      %14 = vector.load %arg4[%c0_12, %c0_13] : memref<1x256xf32, #tpu.memory_space<vmem>>, vector<1x256xf32>
      %15 = vector.broadcast %14 : vector<1x256xf32> to vector<4x256xf32>
      %16 = arith.addf %13, %15 : vector<4x256xf32>
      %cst_14 = arith.constant 0.000000e+00 : f32
      %17 = vector.broadcast %cst_14 : f32 to vector<4x256xf32>
      %18 = arith.maximumf %16, %17 : vector<4x256xf32>
      %c0_15 = arith.constant 0 : index
      %c0_16 = arith.constant 0 : index
      %19 = vector.load %arg5[%c0_15, %c0_16] : memref<4x256xf32, #tpu.memory_space<vmem>>, vector<4x256xf32>
      tpu.vector_store %arg5[%c0_15, %c0_16], %18 {strides = array<i32>} : memref<4x256xf32, #tpu.memory_space<vmem>>, vector<4x256xf32>,
    } else {
    }
    return
  }
  func.func @transform_0(%arg0: i32, %arg1: i32) -> (i32, i32) {
    %c0_i32 = arith.constant 0 : i32
    %c0_i32_0 = arith.constant 0 : i32
    return %c0_i32, %arg1 : i32, i32
  }
  func.func @transform_1(%arg0: i32, %arg1: i32) -> (i32, i32) {
    %c0_i32 = arith.constant 0 : i32
    return %arg1, %arg0 : i32, i32
  }
  func.func @transform_2(%arg0: i32, %arg1: i32) -> (i32, i32) {
    %c0_i32 = arith.constant 0 : i32
    %c0_i32_0 = arith.constant 0 : i32
    return %c0_i32, %arg0 : i32, i32
  }
  func.func @transform_3(%arg0: i32, %arg1: i32) -> (i32, i32) {
    %c0_i32 = arith.constant 0 : i32
    %c0_i32_0 = arith.constant 0 : i32
    return %c0_i32, %arg0 : i32, i32
  }
}

module attributes {stable_mosaic.version = 11 : i64} {
  func.func @_linear_kernel(%arg0: i32, %arg1: i32, %arg2: memref<4x512xf32, #tpu.memory_space<vmem>>, %arg3: memref<512x128xbf16, #tpu.memory_space<vmem>>, %arg4: memref<1x128xf32, #tpu.memory_space<vmem>>, %arg5: memref<4x128xf32, #tpu.memory_space<vmem>>) attributes {dimension_semantics = [#tpu.dimension_semantics<parallel>, #tpu.dimension_semantics<arbitrary>], iteration_bounds = array<i64: 1, 1>, scalar_prefetch = 0 : i64, scratch_operands = 0 : i64, tpu.core_type = #tpu.core_type<tc>, window_params = [{transform_indices = @transform_0, window_bounds = array<i64: 4, 512>}, {transform_indices = @transform_1, window_bounds = array<i64: 512, 128>}, {transform_indices = @transform_2, window_bounds = array<i64: 1, 128>}, {transform_indices = @transform_3, window_bounds = array<i64: 4, 128>}]} {
    %c0_i32 = arith.constant 0 : i32
    %0 = arith.cmpi eq, %arg1, %c0_i32 : i32
    %1 = arith.extui %0 : i1 to i32
    %c0_i32_0 = arith.constant 0 : i32
    %2 = arith.cmpi ne, %1, %c0_i32_0 : i32
    scf.if %2 {
      %cst_10 = arith.constant 0.000000e+00 : f32
      %13 = vector.broadcast %cst_10 : f32 to vector<4x128xf32>
      %c0_11 = arith.constant 0 : index
      %c0_12 = arith.constant 0 : index
      %14 = vector.load %arg5[%c0_11, %c0_12] : memref<4x128xf32, #tpu.memory_space<vmem>>, vector<4x128xf32>
      tpu.vector_store %arg5[%c0_11, %c0_12], %13 {strides = array<i32>} : memref<4x128xf32, #tpu.memory_space<vmem>>, vector<4x128xf32>,
    } else {
    }
    %c0 = arith.constant 0 : index
    %c0_1 = arith.constant 0 : index
    %3 = vector.load %arg5[%c0, %c0_1] : memref<4x128xf32, #tpu.memory_space<vmem>>, vector<4x128xf32>
    %c0_2 = arith.constant 0 : index
    %c0_3 = arith.constant 0 : index
    %4 = vector.load %arg2[%c0_2, %c0_3] : memref<4x512xf32, #tpu.memory_space<vmem>>, vector<4x512xf32>
    %5 = arith.truncf %4 : vector<4x512xf32> to vector<4x512xbf16>
    %c0_4 = arith.constant 0 : index
    %c0_5 = arith.constant 0 : index
    %6 = vector.load %arg3[%c0_4, %c0_5] : memref<512x128xbf16, #tpu.memory_space<vmem>>, vector<512x128xbf16>
    %cst = arith.constant dense<0.000000e+00> : vector<4x128xf32>
    %7 = tpu.matmul %5, %6, %cst {dimension_numbers = #tpu.dot_dimension_numbers<[1], [0], [0], [1], [0, 0, 1, 1], [], []>} : vector<4x512xbf16>, vector<512x128xbf16>, vector<4x128xf32> -> vector<4x128xf32>
    %8 = arith.addf %3, %7 : vector<4x128xf32>
    %c0_6 = arith.constant 0 : index
    %c0_7 = arith.constant 0 : index
    %9 = vector.load %arg5[%c0_6, %c0_7] : memref<4x128xf32, #tpu.memory_space<vmem>>, vector<4x128xf32>
    tpu.vector_store %arg5[%c0_6, %c0_7], %8 {strides = array<i32>} : memref<4x128xf32, #tpu.memory_space<vmem>>, vector<4x128xf32>,
    %c0_i32_8 = arith.constant 0 : i32
    %10 = arith.cmpi eq, %arg1, %c0_i32_8 : i32
    %11 = arith.extui %10 : i1 to i32
    %c0_i32_9 = arith.constant 0 : i32
    %12 = arith.cmpi ne, %11, %c0_i32_9 : i32
    scf.if %12 {
      %c0_10 = arith.constant 0 : index
      %c0_11 = arith.constant 0 : index
      %13 = vector.load %arg5[%c0_10, %c0_11] : memref<4x128xf32, #tpu.memory_space<vmem>>, vector<4x128xf32>
      %c0_12 = arith.constant 0 : index
      %c0_13 = arith.constant 0 : index
      %14 = vector.load %arg4[%c0_12, %c0_13] : memref<1x128xf32, #tpu.memory_space<vmem>>, vector<1x128xf32>
      %15 = vector.broadcast %14 : vector<1x128xf32> to vector<4x128xf32>
      %16 = arith.addf %13, %15 : vector<4x128xf32>
      %c0_14 = arith.constant 0 : index
      %c0_15 = arith.constant 0 : index
      %17 = vector.load %arg5[%c0_14, %c0_15] : memref<4x128xf32, #tpu.memory_space<vmem>>, vector<4x128xf32>
      tpu.vector_store %arg5[%c0_14, %c0_15], %16 {strides = array<i32>} : memref<4x128xf32, #tpu.memory_space<vmem>>, vector<4x128xf32>,
    } else {
    }
    return
  }
  func.func @transform_0(%arg0: i32, %arg1: i32) -> (i32, i32) {
    %c0_i32 = arith.constant 0 : i32
    %c0_i32_0 = arith.constant 0 : i32
    return %c0_i32, %arg1 : i32, i32
  }
  func.func @transform_1(%arg0: i32, %arg1: i32) -> (i32, i32) {
    %c0_i32 = arith.constant 0 : i32
    return %arg1, %arg0 : i32, i32
  }
  func.func @transform_2(%arg0: i32, %arg1: i32) -> (i32, i32) {
    %c0_i32 = arith.constant 0 : i32
    %c0_i32_0 = arith.constant 0 : i32
    return %c0_i32, %arg0 : i32, i32
  }
  func.func @transform_3(%arg0: i32, %arg1: i32) -> (i32, i32) {
    %c0_i32 = arith.constant 0 : i32
    %c0_i32_0 = arith.constant 0 : i32
    return %c0_i32, %arg0 : i32, i32
  }
}

</mosaic_0001>

<bundles_post_ra>
// kernel: siamese_forward.6
= control target key start
LH: loop header
LB: loop body
LE: loop exit
PB: predicated region body
PF: predicated region fallthrough
CT: control target
= control target key end

     0   :  { %8 = vsyncpa [#allocation3], 0  ;;  %s1732_s0 = inlined_call_operand.vmem [shape: f32[4,512], index: 0, kind: input, shape index: {}]   ;;  %s1733_s1 = inlined_call_operand.hbm [shape: bf16[512,512], index: 1, kind: input, shape index: {}]   ;;  %s1734_s2 = inlined_call_operand.hbm [shape: f32[1,512], index: 2, kind: input, shape index: {}]   ;;  %s1735_s3 = inlined_call_operand.vmem [shape: f32[4,512], index: 3, kind: output, shape index: {}]  }
   0x1   :  { %10 = vsyncpa [#allocation3 + $0x1], 0 }
   0x2   :  { %11 = vsyncpa [#allocation5], 0 }
   0x3   :  { %13 = vsyncpa [#allocation5 + $0x1], 0  ;;  %s1468_s12 = smov 0   ;;  %s1470_s13 = smov 0  }
   0x4   :  { %s1472_s14 = smov 0   ;;  %s1474_s15 = smov 0  }
   0x5   :  { %s1476_s16 = smov 0   ;;  %s1478_s17 = smov 0  }
   0x6 LB: > { %s927_s18 = sadd.s32 4294967295, %s1443_s17   ;;  %s31_s19 = sadd.s32 1, %s1439_s16  ;;  %s1443_s17 = sphi %s1478_s17, %s19_s17   ;;  %s1439_s16 = sphi %s1476_s16, %s1743_s16   ;;  %s1435_s15 = sphi %s1474_s15, %s1742_s15   ;;  %s1431_s14 = sphi %s1472_s14, %s1741_s14   ;;  %s1427_s13 = sphi %s1470_s13, %s1740_s13   ;;  %s1423_s12 = sphi %s1468_s12, %s1739_s12  }
   0x7   : > { %p33_p0 = scmp.ge.s32.totalorder %s31_s19, 2  ;;  %s66_s20 = sadd.s32 1, %s1431_s14 }
   0x8   : > { %p73_p1 = scmp.ne.s32.totalorder %s1431_s14, %s1427_s13  ;;  %p74_p2 = scmp.eq.s32.totalorder %s1443_s17, 0 }
   0x9   : > { %s1745_s19 = smov (%p33_p0, %s31_s19), 0  ;;  %p79_p4 = scmp.ne.s32.totalorder %s1427_s13, %s1423_s12 }
   0xa   : > { %p1504_p3 = por %p74_p2, %p73_p1  ;;  %s62_s22 = ssub.s32 %s1439_s16, %s1745_s19 }
   0xb   : > { %p80_p5 = scmp.eq.s32.totalorder %s927_s18, 0  ;;  %p64_p6 = scmp.eq.s32.totalorder %s62_s22, 0 }
   0xc   : > { %p1276_p8 = scmp.lt.s32.totalorder %s1443_s17, 2  ;;  %s1520_s25 = sand.u32 1, %s1431_s14  }
   0xd   : > { %p1511_p7 = por %p80_p5, %p79_p4  ;;  %s1200_s26 = sshll.u32 %s1439_s16, 3 }
   0xe   : > { %s1517_s24 = scalar_select %p64_p6, %s1431_s14, %s66_s20  }
   0xf   : > { %s932_s27 = sshll.u32 %s1520_s25, 9  ;;  %s176_s30 = scalar_lea.hbm %s1733_s1, %s1200_s26 }
  0x10   : > { %s177_s4 = sshll.u32 %s176_s30, 4  ;;  %s168_s5 = scalar_lea.vmem [#allocation2], %s932_s27  ;;  %s178_s4 = int_to_ptr.hbm [resolvable:$true] %s177_s4 }
  0x11   : > { %s179_s6 = sshll.u32 %s168_s5, 4  ;;  %p1529_p9 = pnand %p1276_p8, %p1504_p3  ;;  %s180_s6 = int_to_ptr.vmem [resolvable:$true] %s179_s6 }
  0x12   : > { %p937_p10 = scmp.ge.s32.totalorder %s1443_s17, 1  ;;  %s165_s8 = scalar_lea.sflag [#allocation3], %s1520_s25 }
  0x13   : > { %s1445_s9 = smov 256   ;;  %s1446_s10 = smov 128  }
  0x14   : > { %s1447_s11 = smov 8   ;;  %p206_p11 = scmp.lt.s32.totalorder %s1443_s17, 3 }
  0x15   : > { %1272 = dma.hbm_to_vmem [thread:$0]  (!%p1529_p9), %s178_s4, 8192, %s180_s6, %s165_s8, %s1445_s9, %s1446_s10, %s1447_s11  }
  0x16   : > { %s935_s12 = sshll.u32 %s1520_s25, 1  ;;  %s936_s18 = sshll.u32 %s1439_s16, 1 }
  0x17   : > { %p207_p12 = pnand %p937_p10, %p206_p11  ;;  %s197_s22 = scalar_lea.hbm %s1734_s2, %s936_s18 }
  0x18   : > { %s193_s26 = scalar_lea.vmem [#allocation4], %s935_s12  ;;  %s199_s28 = sshll.u32 %s197_s22, 4  ;;  %s200_s28 = int_to_ptr.hbm [resolvable:$true] %s199_s28 }
  0x19   : > { %s201_s27 = sshll.u32 %s193_s26, 4  ;;  %s190_s29 = scalar_lea.sflag [#allocation5], %s1520_s25  ;;  %s202_s27 = int_to_ptr.vmem [resolvable:$true] %s201_s27 }
  0x1a   : > { %1275 = dma.hbm_to_vmem [thread:$0]  (!%p1529_p9), %s200_s28, 32, %s202_s27, %s190_s29  }
  0x1b   : > { %210 = sbr.rel (%p207_p12) target bundleno = 248 (0xf8), region = 32  ;;  %s212_s30 = sand.u32 (!%p207_p12), 1, %s1427_s13  }
  0x1c   : > { %s938_s4 = sshll.u32 (!%p207_p12), %s212_s30, 9  ;;  %s213_s5 = scalar_lea.sflag (!%p207_p12), [#allocation3], %s212_s30 }
  0x1d   : > { %s1547_s6 = scalar_lea.vmem (!%p207_p12), [#allocation2], %s938_s4 }
  0x20   : > { %1414 = dma.done.wait (%p1511_p7), %s213_s5, 8192  }
  0x21   : > { %1416 = vsyncadd (%p1511_p7), %s213_s5, 4294959104  ;;  %s939_s8 = sshll.u32 %s212_s30, 1  ;;  %s223_s9 = scalar_lea.sflag [#allocation5], %s212_s30 }
  0x22   : > { %s1553_s10 = scalar_lea.vmem [#allocation4], %s939_s8 }
  0x23   : > { %1418 = dma.done.wait (%p1511_p7), %s223_s9, 32  }
  0x24   : > { %1420 = vsyncadd (%p1511_p7), %s223_s9, 4294967264  ;;  %v1000_v0 = vld [vmem:[%s1547_s6 + $0x70] sm:$0xf]  ;;  %v1216_v1 = vld [vmem:[%s1547_s6 + $0x74] sm:$0xf0]  ;;  %s940_s12 = sshll.u32 %s1435_s15, 1 }
  0x25   : > { %v1064_v2 = vld [vmem:[%s1547_s6 + $0xf0] sm:$0xf]  ;;  %v1001_v3 = vor.u32 %v1216_v1, %v1000_v0  ;;  %v1232_v4 = vld [vmem:[%s1547_s6 + $0xf4] sm:$0xf0]  ;;  %v992_v11 = vld [vmem:[%s1547_s6 + $0x60] sm:$0xf] }
  0x26   : > { %v1128_v5 = vld [vmem:[%s1547_s6 + $0x170] sm:$0xf]  ;;  %v1248_v6 = vld [vmem:[%s1547_s6 + $0x174] sm:$0xf0]  ;;  %v1065_v7 = vor.u32 %v1232_v4, %v1064_v2  ;;  %v1214_v13 = vld [vmem:[%s1547_s6 + $0x64] sm:$0xf0] }
  0x27   : > { %v1129_v8 = vor.u32 %v1248_v6, %v1128_v5  ;;  %v1192_v9 = vld [vmem:[%s1547_s6 + $0x1f0] sm:$0xf]  ;;  %v1264_v10 = vld [vmem:[%s1547_s6 + $0x1f4] sm:$0xf0]  ;;  %684 = vmatpush.bf16.msra.mxu0 %v1001_v3  ;;  %v1056_v14 = vld [vmem:[%s1547_s6 + $0xe0] sm:$0xf]  ;;  %v993_v16 = vor.u32 %v1214_v13, %v992_v11 }
  0x28   : > { %v1193_v12 = vor.u32 %v1264_v10, %v1192_v9  ;;  %v1230_v15 = vld [vmem:[%s1547_s6 + $0xe4] sm:$0xf0]  ;;  %697 = vmatpush.bf16.msra.mxu1 %v1065_v7  ;;  %v1120_v18 = vld [vmem:[%s1547_s6 + $0x160] sm:$0xf]  ;;  %v984_v23 = vld [vmem:[%s1547_s6 + $0x50] sm:$0xf] }
  0x29   : > { %710 = vmatpush.bf16.msra.mxu2 %v1129_v8  ;;  %v1057_v17 = vor.u32 %v1230_v15, %v1056_v14  ;;  %v1246_v19 = vld [vmem:[%s1547_s6 + $0x164] sm:$0xf0]  ;;  %v1184_v20 = vld [vmem:[%s1547_s6 + $0x1e0] sm:$0xf]  ;;  %v1212_v24 = vld [vmem:[%s1547_s6 + $0x54] sm:$0xf0] }
  0x2a   : > { %723 = vmatpush.bf16.msra.mxu3 %v1193_v12  ;;  %v1121_v21 = vor.u32 %v1246_v19, %v1120_v18  ;;  %v1262_v22 = vld [vmem:[%s1547_s6 + $0x1e4] sm:$0xf0]  ;;  %v1048_v26 = vld [vmem:[%s1547_s6 + $0xd0] sm:$0xf]  ;;  %v1228_v27 = vld [vmem:[%s1547_s6 + $0xd4] sm:$0xf0]  ;;  %v985_v29 = vor.u32 %v1212_v24, %v984_v23 }
  0x2b   : > { %v1185_v25 = vor.u32 %v1262_v22, %v1184_v20  ;;  %v1112_v28 = vld [vmem:[%s1547_s6 + $0x150] sm:$0xf]  ;;  %685 = vmatpush.bf16.msra.mxu0 %v993_v16  ;;  %v1244_v30 = vld [vmem:[%s1547_s6 + $0x154] sm:$0xf0]  ;;  %v1049_v33 = vor.u32 %v1228_v27, %v1048_v26  ;;  %v976_v35 = vld [vmem:[%s1547_s6 + $0x40] sm:$0xf] }
  0x2c   : > { %v1176_v31 = vld [vmem:[%s1547_s6 + $0x1d0] sm:$0xf]  ;;  %v1260_v32 = vld [vmem:[%s1547_s6 + $0x1d4] sm:$0xf0]  ;;  %698 = vmatpush.bf16.msra.mxu1 %v1057_v17  ;;  %v1113_v34 = vor.u32 %v1244_v30, %v1112_v28  ;;  %v1210_v36 = vld [vmem:[%s1547_s6 + $0x44] sm:$0xf0] }
  0x2d   : > { %711 = vmatpush.bf16.msra.mxu2 %v1121_v21  ;;  %v1040_v37 = vld [vmem:[%s1547_s6 + $0xc0] sm:$0xf]  ;;  %v1177_v38 = vor.u32 %v1260_v32, %v1176_v31  ;;  %v1226_v39 = vld [vmem:[%s1547_s6 + $0xc4] sm:$0xf0]  ;;  %v977_v44 = vor.u32 %v1210_v36, %v976_v35  ;;  %v968_v47 = vld [vmem:[%s1547_s6 + $0x30] sm:$0xf] }
  0x2e   : > { %724 = vmatpush.bf16.msra.mxu3 %v1185_v25  ;;  %v1104_v40 = vld [vmem:[%s1547_s6 + $0x140] sm:$0xf]  ;;  %v1242_v41 = vld [vmem:[%s1547_s6 + $0x144] sm:$0xf0]  ;;  %v1041_v45 = vor.u32 %v1226_v39, %v1040_v37  ;;  %v1208_v48 = vld [vmem:[%s1547_s6 + $0x34] sm:$0xf0] }
  0x2f   : > { %v1168_v42 = vld [vmem:[%s1547_s6 + $0x1c0] sm:$0xf]  ;;  %v1258_v43 = vld [vmem:[%s1547_s6 + $0x1c4] sm:$0xf0]  ;;  %686 = vmatpush.bf16.msra.mxu0 %v985_v29  ;;  %v1105_v46 = vor.u32 %v1242_v41, %v1104_v40  ;;  %v1032_v49 = vld [vmem:[%s1547_s6 + $0xb0] sm:$0xf]  ;;  %v969_v56 = vor.u32 %v1208_v48, %v968_v47 }
  0x30   : > { %699 = vmatpush.bf16.msra.mxu1 %v1049_v33  ;;  %v1169_v50 = vor.u32 %v1258_v43, %v1168_v42  ;;  %v1224_v51 = vld [vmem:[%s1547_s6 + $0xb4] sm:$0xf0]  ;;  %v1096_v52 = vld [vmem:[%s1547_s6 + $0x130] sm:$0xf]  ;;  %v960_v59 = vld [vmem:[%s1547_s6 + $0x20] sm:$0xf] }
  0x31   : > { %712 = vmatpush.bf16.msra.mxu2 %v1113_v34  ;;  %v1240_v53 = vld [vmem:[%s1547_s6 + $0x134] sm:$0xf0]  ;;  %v1160_v54 = vld [vmem:[%s1547_s6 + $0x1b0] sm:$0xf]  ;;  %v1033_v57 = vor.u32 %v1224_v51, %v1032_v49  ;;  %v1206_v60 = vld [vmem:[%s1547_s6 + $0x24] sm:$0xf0] }
  0x32   : > { %725 = vmatpush.bf16.msra.mxu3 %v1177_v38  ;;  %v1256_v55 = vld [vmem:[%s1547_s6 + $0x1b4] sm:$0xf0]  ;;  %v1097_v58 = vor.u32 %v1240_v53, %v1096_v52  ;;  %v1024_v61 = vld [vmem:[%s1547_s6 + $0xa0] sm:$0xf]  ;;  %v1222_v63 = vld [vmem:[%s1547_s6 + $0xa4] sm:$0xf0]  ;;  %v961_v4 = vor.u32 %v1206_v60, %v960_v59 }
  0x33   : > { %687 = vmatpush.bf16.msra.mxu0 %v977_v44  ;;  %v1161_v62 = vor.u32 %v1256_v55, %v1160_v54  ;;  %v1088_v0 = vld [vmem:[%s1547_s6 + $0x120] sm:$0xf]  ;;  %v1238_v1 = vld [vmem:[%s1547_s6 + $0x124] sm:$0xf0]  ;;  %v1025_v5 = vor.u32 %v1222_v63, %v1024_v61  ;;  %v952_v7 = vld [vmem:[%s1547_s6 + $0x10] sm:$0xf] }
  0x34   : > { %700 = vmatpush.bf16.msra.mxu1 %v1041_v45  ;;  %v1152_v2 = vld [vmem:[%s1547_s6 + $0x1a0] sm:$0xf]  ;;  %v1254_v3 = vld [vmem:[%s1547_s6 + $0x1a4] sm:$0xf0]  ;;  %v1089_v6 = vor.u32 %v1238_v1, %v1088_v0  ;;  %v1204_v8 = vld [vmem:[%s1547_s6 + $0x14] sm:$0xf0] }
  0x35   : > { %713 = vmatpush.bf16.msra.mxu2 %v1105_v46  ;;  %v1016_v9 = vld [vmem:[%s1547_s6 + $0x90] sm:$0xf]  ;;  %v1153_v10 = vor.u32 %v1254_v3, %v1152_v2  ;;  %v1220_v11 = vld [vmem:[%s1547_s6 + $0x94] sm:$0xf0]  ;;  %v944_v16 = vld [vmem:[%s1547_s6] sm:$0xf]  ;;  %v953_v17 = vor.u32 %v1204_v8, %v952_v7 }
  0x36   : > { %726 = vmatpush.bf16.msra.mxu3 %v1169_v50  ;;  %v1080_v12 = vld [vmem:[%s1547_s6 + $0x110] sm:$0xf]  ;;  %v1236_v13 = vld [vmem:[%s1547_s6 + $0x114] sm:$0xf0]  ;;  %v1202_v18 = vld [vmem:[%s1547_s6 + $0x4] sm:$0xf0]  ;;  %v1017_v21 = vor.u32 %v1220_v11, %v1016_v9 }
  0x37   : > { %688 = vmatpush.bf16.msra.mxu0 %v969_v56  ;;  %v1144_v14 = vld [vmem:[%s1547_s6 + $0x190] sm:$0xf]  ;;  %v1252_v15 = vld [vmem:[%s1547_s6 + $0x194] sm:$0xf0]  ;;  %v1008_v19 = vld [vmem:[%s1547_s6 + $0x80] sm:$0xf]  ;;  %v1081_v22 = vor.u32 %v1236_v13, %v1080_v12  ;;  %v945_v33 = vor.u32 %v1202_v18, %v944_v16 }
  0x38   : > { %701 = vmatpush.bf16.msra.mxu1 %v1033_v57  ;;  %v1218_v20 = vld [vmem:[%s1547_s6 + $0x84] sm:$0xf0]  ;;  %v1072_v23 = vld [vmem:[%s1547_s6 + $0x100] sm:$0xf]  ;;  %v1145_v26 = vor.u32 %v1252_v15, %v1144_v14  ;;  %v1215_v28 = vld [vmem:[%s1547_s6 + $0x74] sm:$0xf] }
  0x39   : > { %714 = vmatpush.bf16.msra.mxu2 %v1097_v58  ;;  %v1234_v24 = vld [vmem:[%s1547_s6 + $0x104] sm:$0xf0]  ;;  %v1136_v25 = vld [vmem:[%s1547_s6 + $0x180] sm:$0xf]  ;;  %v1002_v29 = vld [vmem:[%s1547_s6 + $0x78] sm:$0xf0]  ;;  %v1009_v36 = vor.u32 %v1218_v20, %v1008_v19 }
  0x3a   : > { %727 = vmatpush.bf16.msra.mxu3 %v1161_v62  ;;  %v1250_v27 = vld [vmem:[%s1547_s6 + $0x184] sm:$0xf0]  ;;  %v1231_v30 = vld [vmem:[%s1547_s6 + $0xf4] sm:$0xf]  ;;  %v1066_v31 = vld [vmem:[%s1547_s6 + $0xf8] sm:$0xf0]  ;;  %v1073_v37 = vor.u32 %v1234_v24, %v1072_v23  ;;  %v1005_v41 = vor.u32 %v1215_v28, %v1002_v29 }
  0x3b   : > { %689 = vmatpush.bf16.msra.mxu0 %v961_v4  ;;  %v282_v32 = vld [vmem:[%s1732_s0 + $0x8] sm:$0xff]  ;;  %v1247_v34 = vld [vmem:[%s1547_s6 + $0x174] sm:$0xf]  ;;  %v1130_v35 = vld [vmem:[%s1547_s6 + $0x178] sm:$0xf0]  ;;  %v1137_v40 = vor.u32 %v1250_v27, %v1136_v25  ;;  %v1069_v44 = vor.u32 %v1231_v30, %v1066_v31  ;;  %p270_p13 = scmp.lt.s32.totalorder %s940_s12, 3 }
  0x3c   : > { %702 = vmatpush.bf16.msra.mxu1 %v1025_v5  ;;  %287 = vst [vmem:[#allocation1 + $0x10] ss:$2 sm:$0xff] %v282_v32  ;;  %v1263_v38 = vld [vmem:[%s1547_s6 + $0x1f4] sm:$0xf]  ;;  %v1194_v39 = vld [vmem:[%s1547_s6 + $0x1f8] sm:$0xf0]  ;;  %v1133_v45 = vor.u32 %v1247_v34, %v1130_v35 }
  0x3d   : > { %715 = vmatpush.bf16.msra.mxu2 %v1089_v6  ;;  %v1213_v42 = vld [vmem:[%s1547_s6 + $0x64] sm:$0xf]  ;;  %v994_v43 = vld [vmem:[%s1547_s6 + $0x68] sm:$0xf0]  ;;  %v281_v48 = vld [vmem:[%s1732_s0] sm:$0xff]  ;;  %v1197_v49 = vor.u32 %v1263_v38, %v1194_v39  ;;  %s1747_s12 = smov (!%p270_p13, %s940_s12), 3 }
  0x3e   : > { %728 = vmatpush.bf16.msra.mxu3 %v1153_v10  ;;  %v1229_v46 = vld [vmem:[%s1547_s6 + $0xe4] sm:$0xf]  ;;  %v1058_v47 = vld [vmem:[%s1547_s6 + $0xe8] sm:$0xf0]  ;;  %285 = vst [vmem:[#allocation1] ss:$2 sm:$0xff] %v281_v48  ;;  %v997_v54 = vor.u32 %v1213_v42, %v994_v43 }
  0x3f   : > { %690 = vmatpush.bf16.msra.mxu0 %v953_v17  ;;  %v1245_v50 = vld [vmem:[%s1547_s6 + $0x164] sm:$0xf]  ;;  %v1122_v51 = vld [vmem:[%s1547_s6 + $0x168] sm:$0xf0]  ;;  %v1211_v55 = vld [vmem:[%s1547_s6 + $0x54] sm:$0xf]  ;;  %v1061_v58 = vor.u32 %v1229_v46, %v1058_v47 }
  0x40   : > { %703 = vmatpush.bf16.msra.mxu1 %v1017_v21  ;;  %v1261_v52 = vld [vmem:[%s1547_s6 + $0x1e4] sm:$0xf]  ;;  %v1186_v53 = vld [vmem:[%s1547_s6 + $0x1e8] sm:$0xf0]  ;;  %v986_v56 = vld [vmem:[%s1547_s6 + $0x58] sm:$0xf0]  ;;  %v1125_v59 = vor.u32 %v1245_v50, %v1122_v51 }
  0x41   : > { %716 = vmatpush.bf16.msra.mxu2 %v1081_v22  ;;  %v1227_v57 = vld [vmem:[%s1547_s6 + $0xd4] sm:$0xf]  ;;  %v1189_v62 = vor.u32 %v1261_v52, %v1186_v53  ;;  %v1050_v0 = vld [vmem:[%s1547_s6 + $0xd8] sm:$0xf0]  ;;  %v989_v6 = vor.u32 %v1211_v55, %v986_v56  ;;  %v1209_v7 = vld [vmem:[%s1547_s6 + $0x44] sm:$0xf] }
  0x42   : > { %729 = vmatpush.bf16.msra.mxu3 %v1145_v26  ;;  %v1243_v1 = vld [vmem:[%s1547_s6 + $0x154] sm:$0xf]  ;;  %v1114_v2 = vld [vmem:[%s1547_s6 + $0x158] sm:$0xf0]  ;;  %v978_v8 = vld [vmem:[%s1547_s6 + $0x48] sm:$0xf0]  ;;  %v1053_v10 = vor.u32 %v1227_v57, %v1050_v0 }
  0x43   : > { %691 = vmatpush.bf16.msra.mxu0 %v945_v33  ;;  %v290_v60 = vld.sshfl [vmem:[#allocation1 + $0x10] sm:$0xff pattern:$0x75316420]  ;;  %v291_v61 = vld.sshfl [vmem:[#allocation1 + $0x18] sm:$0xff pattern:$0x75316420]  ;;  %v1117_v11 = vor.u32 %v1243_v1, %v1114_v2  ;;  %v981_v22 = vor.u32 %v1209_v7, %v978_v8 }
  0x44   : > { %704 = vmatpush.bf16.msra.mxu1 %v1009_v36  ;;  %v1648_v63 = vpack.c.bf16 %v290_v60, %v290_v60  ;;  %v1259_v3 = vld [vmem:[%s1547_s6 + $0x1d4] sm:$0xf]  ;;  %v1178_v4 = vld [vmem:[%s1547_s6 + $0x1d8] sm:$0xf0]  ;;  %v1655_v5 = vpack.c.bf16 %v291_v61, %v291_v61  ;;  %v1225_v9 = vld [vmem:[%s1547_s6 + $0xc4] sm:$0xf] }
  0x45   : > { %717 = vmatpush.bf16.msra.mxu2 %v1073_v37  ;;  %v288_v12 = vld.sshfl [vmem:[#allocation1] sm:$0xff pattern:$0x75316420]  ;;  %v289_v13 = vld.sshfl [vmem:[#allocation1 + $0x8] sm:$0xff pattern:$0x75316420]  ;;  %v1181_v14 = vor.u32 %v1259_v3, %v1178_v4 }
  0x46   : > { %730 = vmatpush.bf16.msra.mxu3 %v1137_v40  ;;  %v1661_v15 = vpack.c.bf16 %v288_v12, %v288_v12  ;;  %v1663_v16 = vpack.c.bf16 %v289_v13, %v289_v13  ;;  %v1042_v17 = vld [vmem:[%s1547_s6 + $0xc8] sm:$0xf0]  ;;  %v1241_v18 = vld [vmem:[%s1547_s6 + $0x144] sm:$0xf]  ;;  %v1207_v25 = vld [vmem:[%s1547_s6 + $0x34] sm:$0xf] }
  0x47   : > { %736 = vmatpush.bf16.msrb.mxu0 %v1005_v41  ;;  %v1106_v19 = vld [vmem:[%s1547_s6 + $0x148] sm:$0xf0]  ;;  %v1257_v20 = vld [vmem:[%s1547_s6 + $0x1c4] sm:$0xf]  ;;  %v1045_v23 = vor.u32 %v1225_v9, %v1042_v17  ;;  %v970_v26 = vld [vmem:[%s1547_s6 + $0x38] sm:$0xf0] }
  0x48   : > { %749 = vmatpush.bf16.msrb.mxu1 %v1069_v44  ;;  %718 = vmatmul.bf16.vlgmr.msra.gmra.mxu2 %v1648_v63  ;;  %v1170_v21 = vld [vmem:[%s1547_s6 + $0x1c8] sm:$0xf0]  ;;  %v1109_v24 = vor.u32 %v1241_v18, %v1106_v19  ;;  %v1223_v27 = vld [vmem:[%s1547_s6 + $0xb4] sm:$0xf]  ;;  %v1034_v29 = vld [vmem:[%s1547_s6 + $0xb8] sm:$0xf0]  ;;  %v973_v34 = vor.u32 %v1207_v25, %v970_v26 }
  0x49   : > { %762 = vmatpush.bf16.msrb.mxu2 %v1133_v45  ;;  %731 = vmatmul.bf16.vlgmr.msra.gmra.mxu3 %v1655_v5  ;;  %v1173_v28 = vor.u32 %v1257_v20, %v1170_v21  ;;  %v1239_v30 = vld [vmem:[%s1547_s6 + $0x134] sm:$0xf]  ;;  %v1098_v31 = vld [vmem:[%s1547_s6 + $0x138] sm:$0xf0]  ;;  %v1037_v35 = vor.u32 %v1223_v27, %v1034_v29  ;;  %v1205_v37 = vld [vmem:[%s1547_s6 + $0x24] sm:$0xf] }
  0x4a   : > { %775 = vmatpush.bf16.msrb.mxu3 %v1197_v49  ;;  %705 = vmatmul.bf16.vlgmr.msra.gmra.mxu1 %v1663_v16  ;;  %v1255_v32 = vld [vmem:[%s1547_s6 + $0x1b4] sm:$0xf]  ;;  %v1162_v33 = vld [vmem:[%s1547_s6 + $0x1b8] sm:$0xf0]  ;;  %v1101_v36 = vor.u32 %v1239_v30, %v1098_v31  ;;  %v962_v38 = vld [vmem:[%s1547_s6 + $0x28] sm:$0xf0] }
  0x4b   : > { %737 = vmatpush.bf16.msrb.mxu0 %v997_v54  ;;  %v1221_v39 = vld [vmem:[%s1547_s6 + $0xa4] sm:$0xf]  ;;  %v1165_v40 = vor.u32 %v1255_v32, %v1162_v33  ;;  %v1026_v41 = vld [vmem:[%s1547_s6 + $0xa8] sm:$0xf0]  ;;  %v965_v46 = vor.u32 %v1205_v37, %v962_v38  ;;  %v1203_v49 = vld [vmem:[%s1547_s6 + $0x14] sm:$0xf] }
  0x4c   : > { %750 = vmatpush.bf16.msrb.mxu1 %v1061_v58  ;;  %692 = vmatmul.bf16.vlgmr.msra.gmra.mxu0 %v1661_v15  ;;  %v1237_v42 = vld [vmem:[%s1547_s6 + $0x124] sm:$0xf]  ;;  %v1090_v43 = vld [vmem:[%s1547_s6 + $0x128] sm:$0xf0]  ;;  %v1029_v47 = vor.u32 %v1221_v39, %v1026_v41  ;;  %v954_v50 = vld [vmem:[%s1547_s6 + $0x18] sm:$0xf0] }
  0x4d   : > { %763 = vmatpush.bf16.msrb.mxu2 %v1125_v59  ;;  %v1253_v44 = vld [vmem:[%s1547_s6 + $0x1a4] sm:$0xf]  ;;  %v1154_v45 = vld [vmem:[%s1547_s6 + $0x1a8] sm:$0xf0]  ;;  %v1093_v48 = vor.u32 %v1237_v42, %v1090_v43  ;;  %v1219_v51 = vld [vmem:[%s1547_s6 + $0x94] sm:$0xf]  ;;  %v957_v58 = vor.u32 %v1203_v49, %v954_v50 }
  0x4e   : > { %776 = vmatpush.bf16.msrb.mxu3 %v1189_v62  ;;  %v1157_v52 = vor.u32 %v1253_v44, %v1154_v45  ;;  %v1018_v53 = vld [vmem:[%s1547_s6 + $0x98] sm:$0xf0]  ;;  %v1235_v54 = vld [vmem:[%s1547_s6 + $0x114] sm:$0xf]  ;;  %v1201_v61 = vld [vmem:[%s1547_s6 + $0x4] sm:$0xf] }
  0x4f   : > { %738 = vmatpush.bf16.msrb.mxu0 %v989_v6  ;;  %v1082_v55 = vld [vmem:[%s1547_s6 + $0x118] sm:$0xf0]  ;;  %v1251_v56 = vld [vmem:[%s1547_s6 + $0x194] sm:$0xf]  ;;  %v1021_v59 = vor.u32 %v1219_v51, %v1018_v53  ;;  %v946_v62 = vld [vmem:[%s1547_s6 + $0x8] sm:$0xf0] }
  0x50   : > { %751 = vmatpush.bf16.msrb.mxu1 %v1053_v10  ;;  %v1146_v57 = vld [vmem:[%s1547_s6 + $0x198] sm:$0xf0]  ;;  %v1085_v60 = vor.u32 %v1235_v54, %v1082_v55  ;;  %v1217_v0 = vld [vmem:[%s1547_s6 + $0x84] sm:$0xf]  ;;  %v1010_v2 = vld [vmem:[%s1547_s6 + $0x88] sm:$0xf0]  ;;  %v949_v8 = vor.u32 %v1201_v61, %v946_v62 }
  0x51   : > { %764 = vmatpush.bf16.msrb.mxu2 %v1117_v11  ;;  %v1149_v1 = vor.u32 %v1251_v56, %v1146_v57  ;;  %v1233_v3 = vld [vmem:[%s1547_s6 + $0x104] sm:$0xf]  ;;  %v1074_v4 = vld [vmem:[%s1547_s6 + $0x108] sm:$0xf0]  ;;  %v1013_v9 = vor.u32 %v1217_v0, %v1010_v2  ;;  %vm791_vm0 = vcmask 1043456   ;;  %s941_s18 = sshll.u32 %s1747_s12, 2 }
  0x52   : > { %777 = vmatpush.bf16.msrb.mxu3 %v1181_v14  ;;  %v1249_v6 = vld [vmem:[%s1547_s6 + $0x184] sm:$0xf]  ;;  %v1138_v7 = vld [vmem:[%s1547_s6 + $0x188] sm:$0xf0]  ;;  %v1077_v10 = vor.u32 %v1233_v3, %v1074_v4  ;;  %s273_s21 = scalar_lea.vmem %s1735_s3, %s941_s18 }
  0x53   : > { %739 = vmatpush.bf16.msrb.mxu0 %v981_v22  ;;  %v1141_v11 = vor.u32 %v1249_v6, %v1138_v7 }
  0x54   : > { %752 = vmatpush.bf16.msrb.mxu1 %v1045_v23 }
  0x55   : > { %765 = vmatpush.bf16.msrb.mxu2 %v1109_v24  ;;  %v800_v24 = vld [vmem:[%s1553_s10] sm:$0x3] }
  0x56   : > { %778 = vmatpush.bf16.msrb.mxu3 %v1173_v28  ;;  %v802_v31 = vperm.slane %v800_v24, 0 }
  0x57   : > { %740 = vmatpush.bf16.msrb.mxu0 %v973_v34 }
  0x58   : > { %753 = vmatpush.bf16.msrb.mxu1 %v1037_v35 }
  0x59   : > { %766 = vmatpush.bf16.msrb.mxu2 %v1101_v36 }
  0x5a   : > { %779 = vmatpush.bf16.msrb.mxu3 %v1165_v40 }
  0x5b   : > { %741 = vmatpush.bf16.msrb.mxu0 %v965_v46 }
  0x5c   : > { %754 = vmatpush.bf16.msrb.mxu1 %v1029_v47 }
  0x5d   : > { %767 = vmatpush.bf16.msrb.mxu2 %v1093_v48 }
  0x5e   : > { %780 = vmatpush.bf16.msrb.mxu3 %v1157_v52 }
  0x5f   : > { %742 = vmatpush.bf16.msrb.mxu0 %v957_v58 }
  0x60   : > { %755 = vmatpush.bf16.msrb.mxu1 %v1021_v59 }
  0x61   : > { %768 = vmatpush.bf16.msrb.mxu2 %v1085_v60 }
  0x62   : > { %781 = vmatpush.bf16.msrb.mxu3 %v1149_v1 }
  0x63   : > { %743 = vmatpush.bf16.msrb.mxu0 %v949_v8 }
  0x64   : > { %756 = vmatpush.bf16.msrb.mxu1 %v1013_v9 }
  0x65   : > { %769 = vmatpush.bf16.msrb.mxu2 %v1077_v10 }
  0x66   : > { %782 = vmatpush.bf16.msrb.mxu3 %v1141_v11  ;;  %744 = vmatmul.bf16.vlgmr.msrb.gmra.mxu0 %v1661_v15 }
  0x67   : > { %757 = vmatmul.bf16.vlgmr.msrb.gmra.mxu1 %v1663_v16  ;;  %v803_v16 = vperm.slane %v800_v24, 1 }
  0x68   : > { %770 = vmatmul.bf16.vlgmr.msrb.gmra.mxu2 %v1648_v63 }
  0x69   : > { %783 = vmatmul.bf16.vlgmr.msrb.gmra.mxu3 %v1655_v5  ;;  %v804_v32 = vrot.slane %v803_v16, 4 }
  0x6b   : > { %v805_v36 = vsel %vm791_vm0, %v802_v31, %v804_v32 }
  0xc7   : > { %v706_v12 = vpop.f32.mrf.mxu1 }
  0xc9   : > { %v693_v13 = vpop.f32.mrf.mxu0 }
  0xca   : > { %v707_v25 = vadd.f32 %v706_v12, %v693_v13 }
  0xcb   : > { %v719_v14 = vpop.f32.mrf.mxu2 }
  0xcc   : > { %v732_v17 = vpop.f32.mrf.mxu3  ;;  %v720_v63 = vadd.f32 %v719_v14, %v707_v25 }
  0xce   : > { %v733_v33 = vadd.f32 %v732_v17, %v720_v63 }
  0xcf   : > { %v708_v18 = vpop.f32.mrf.mxu1 }
  0xd1   : > { %v695_v19 = vpop.f32.mrf.mxu0 }
  0xd3   : > { %v721_v20 = vpop.f32.mrf.mxu2 }
  0xd4   : > { %v734_v21 = vpop.f32.mrf.mxu3 }
  0xe3   : > { %v745_v22 = vpop.f32.mrf.mxu0 }
  0xe4   : > { %v758_v23 = vpop.f32.mrf.mxu1 }
  0xe5   : > { %v759_v15 = vadd.f32 %v758_v23, %v745_v22 }
  0xeb   : > { %v771_v26 = vpop.f32.mrf.mxu2  ;;  %v747_v28 = vpop.f32.mrf.mxu0 }
  0xec   : > { %v772_v27 = vadd.f32 %v771_v26, %v759_v15  ;;  %v784_v5 = vpop.f32.mrf.mxu3  ;;  %v760_v29 = vpop.f32.mrf.mxu1 }
  0xee   : > { %v785_v30 = vadd.f32 %v784_v5, %v772_v27 }
  0xf0   : > { %v790_v34 = vrot.slane %v785_v30, 4 }
  0xf2   : > { %v792_v35 = vsel %vm791_vm0, %v733_v33, %v790_v34 }
  0xf3   : > { %v773_v37 = vpop.f32.mrf.mxu2  ;;  %v807_v39 = vadd.f32 %v805_v36, %v792_v35 }
  0xf4   : > { %v786_v38 = vpop.f32.mrf.mxu3 }
  0xf5   : > { %v808_v40 = vmax.f32 %v807_v39, 0.0 }
  0xf7   : > { %809 = vst [vmem:[%s273_s21] sm:$0xff] %v808_v40 }
  0xf8 PF: > { %s19_s17 = sadd.s32 1, %s1443_s17   ;;  %s1739_s12 = smov %s1427_s13 }
  0xf9   : > { %p16_p0 = scmp.ge.s32.totalorder %s19_s17, 4   ;;  %s1740_s13 = smov %s1431_s14 }
  0xfa   : > { %s1741_s14 = smov %s1517_s24  ;;  %s1742_s15 = smov %s1439_s16 }
  0xfb   : > { %s1743_s16 = smov %s1745_s19  ;;  %18 = sbr.rel (!%p16_p0) target bundleno = 6 (0x6), region = 97 }
 0x100   :  { %832 = vsyncpa [#allocation3], 1 }
 0x101   :  { %834 = vsyncpa [#allocation3 + $0x1], 1 }
 0x102   :  { %835 = vsyncpa [#allocation5], 1 }
 0x103   :  { %837 = vsyncpa [#allocation5 + $0x1], 1 }

// kernel: siamese_forward.7
= control target key start
LH: loop header
LB: loop body
LE: loop exit
PB: predicated region body
PF: predicated region fallthrough
CT: control target
= control target key end

     0   :  { %8 = vsyncpa [#allocation3], 0  ;;  %s665_s0 = inlined_call_operand.vmem [shape: f32[4,512], index: 0, kind: input, shape index: {}]   ;;  %s666_s1 = inlined_call_operand.hbm [shape: bf16[512,128], index: 1, kind: input, shape index: {}]   ;;  %s667_s2 = inlined_call_operand.hbm [shape: f32[1,128], index: 2, kind: input, shape index: {}]   ;;  %s668_s3 = inlined_call_operand.vmem [shape: f32[4,128], index: 3, kind: output, shape index: {}]  }
   0x1   :  { %s16_s14 = sshll.u32 %s666_s1, 4  ;;  %s17_s14 = int_to_ptr.hbm [resolvable:$true] %s16_s14 }
   0x2   :  { %9 = vsyncpa [#allocation5], 0  ;;  %s613_s15 = smov [#allocation2]   ;;  %s30_s19 = sshll.u32 %s667_s2, 4  ;;  %s31_s19 = int_to_ptr.hbm [resolvable:$true] %s30_s19 }
   0x3   :  { %s18_s16 = sshll.u32 %s613_s15, 4  ;;  %s614_s20 = smov 64   ;;  %s19_s16 = int_to_ptr.vmem [resolvable:$true] %s18_s16 }
   0x4   :  { %s615_s21 = smov 4   ;;  %s616_s22 = smov [#allocation4]  }
   0x5   :  { %24 = dma.hbm_to_vmem [thread:$0]  %s17_s14, 4096, %s19_s16, [#allocation3], %s614_s20, %s614_s20, %s615_s21  }
   0x6   :  { %s32_s23 = sshll.u32 %s616_s22, 4  ;;  %s33_s23 = int_to_ptr.vmem [resolvable:$true] %s32_s23 }
   0x7   :  { %35 = dma.hbm_to_vmem [thread:$0]  %s31_s19, 16, %s33_s23, [#allocation5]  }
   0x8   :  { %609 = dma.done.wait [#allocation3], 4096  }
   0x9   :  { %610 = vsyncadd [#allocation3], 4294963200 }
   0xa   :  { %611 = dma.done.wait [#allocation5], 16  }
   0xb   :  { %612 = vsyncadd [#allocation5], 4294967280  ;;  %v530_v0 = vld [vmem:[#allocation2 + $0x38] sm:$0xff]  ;;  %v529_v4 = vld [vmem:[#allocation2 + $0x30] sm:$0xff]  ;;  %v617_v42 = vmov 0.0  }
   0xc   :  { %v538_v1 = vld [vmem:[#allocation2 + $0x78] sm:$0xff]  ;;  %325 = vmatpush.bf16.msra.mxu0 %v530_v0  ;;  %v537_v5 = vld [vmem:[#allocation2 + $0x70] sm:$0xff]  ;;  %v528_v8 = vld [vmem:[#allocation2 + $0x28] sm:$0xff]  ;;  %48 = vst [vmem:[%s668_s3] sm:$0xf] %v617_v42 }
   0xd   :  { %v546_v2 = vld [vmem:[#allocation2 + $0xb8] sm:$0xff]  ;;  %338 = vmatpush.bf16.msra.mxu1 %v538_v1  ;;  %v545_v6 = vld [vmem:[#allocation2 + $0xb0] sm:$0xff]  ;;  %v536_v9 = vld [vmem:[#allocation2 + $0x68] sm:$0xff] }
   0xe   :  { %v554_v3 = vld [vmem:[#allocation2 + $0xf8] sm:$0xff]  ;;  %351 = vmatpush.bf16.msra.mxu2 %v546_v2  ;;  %v553_v7 = vld [vmem:[#allocation2 + $0xf0] sm:$0xff]  ;;  %v544_v10 = vld [vmem:[#allocation2 + $0xa8] sm:$0xff] }
   0xf   :  { %364 = vmatpush.bf16.msra.mxu3 %v554_v3  ;;  %v552_v11 = vld [vmem:[#allocation2 + $0xe8] sm:$0xff]  ;;  %v527_v12 = vld [vmem:[#allocation2 + $0x20] sm:$0xff]  ;;  %v50_v15 = vld [vmem:[%s665_s0] sm:$0xff] }
  0x10   :  { %326 = vmatpush.bf16.msra.mxu0 %v529_v4  ;;  %v535_v13 = vld [vmem:[#allocation2 + $0x60] sm:$0xff]  ;;  %54 = vst [vmem:[#allocation1] ss:$2 sm:$0xff] %v50_v15  ;;  %v526_v18 = vld [vmem:[#allocation2 + $0x18] sm:$0xff]  ;;  %v525_v22 = vld [vmem:[#allocation2 + $0x10] sm:$0xff] }
  0x11   :  { %339 = vmatpush.bf16.msra.mxu1 %v537_v5  ;;  %v543_v14 = vld [vmem:[#allocation2 + $0xa0] sm:$0xff]  ;;  %v534_v19 = vld [vmem:[#allocation2 + $0x58] sm:$0xff]  ;;  %v533_v23 = vld [vmem:[#allocation2 + $0x50] sm:$0xff] }
  0x12   :  { %352 = vmatpush.bf16.msra.mxu2 %v545_v6  ;;  %v551_v16 = vld [vmem:[#allocation2 + $0xe0] sm:$0xff]  ;;  %v542_v20 = vld [vmem:[#allocation2 + $0x98] sm:$0xff]  ;;  %v541_v24 = vld [vmem:[#allocation2 + $0x90] sm:$0xff] }
  0x13   :  { %365 = vmatpush.bf16.msra.mxu3 %v553_v7  ;;  %v51_v17 = vld [vmem:[%s665_s0 + $0x8] sm:$0xff]  ;;  %v550_v21 = vld [vmem:[#allocation2 + $0xd8] sm:$0xff]  ;;  %v549_v25 = vld [vmem:[#allocation2 + $0xd0] sm:$0xff] }
  0x14   :  { %327 = vmatpush.bf16.msra.mxu0 %v528_v8  ;;  %56 = vst [vmem:[#allocation1 + $0x10] ss:$2 sm:$0xff] %v51_v17  ;;  %v524_v26 = vld [vmem:[#allocation2 + $0x8] sm:$0xff]  ;;  %v523_v30 = vld [vmem:[#allocation2] sm:$0xff]  ;;  %v49_v51 = vld [vmem:[%s668_s3] sm:$0xf] }
  0x15   :  { %340 = vmatpush.bf16.msra.mxu1 %v536_v9  ;;  %v532_v27 = vld [vmem:[#allocation2 + $0x48] sm:$0xff]  ;;  %v531_v31 = vld [vmem:[#allocation2 + $0x40] sm:$0xff] }
  0x16   :  { %353 = vmatpush.bf16.msra.mxu2 %v544_v10  ;;  %v540_v28 = vld [vmem:[#allocation2 + $0x88] sm:$0xff]  ;;  %v539_v32 = vld [vmem:[#allocation2 + $0x80] sm:$0xff] }
  0x17   :  { %366 = vmatpush.bf16.msra.mxu3 %v552_v11  ;;  %v548_v29 = vld [vmem:[#allocation2 + $0xc8] sm:$0xff]  ;;  %v547_v33 = vld [vmem:[#allocation2 + $0xc0] sm:$0xff]  ;;  %v57_v34 = vld.sshfl [vmem:[#allocation1] sm:$0xff pattern:$0x75316420] }
  0x18   :  { %328 = vmatpush.bf16.msra.mxu0 %v527_v12  ;;  %v58_v35 = vld.sshfl [vmem:[#allocation1 + $0x8] sm:$0xff pattern:$0x75316420]  ;;  %v65_v38 = vpack.c.bf16 %v57_v34, %v57_v34 }
  0x19   :  { %341 = vmatpush.bf16.msra.mxu1 %v535_v13  ;;  %v66_v39 = vpack.c.bf16 %v58_v35, %v58_v35  ;;  %v560_v56 = vld [vmem:[#allocation4] ss:$0 sm:$0xff] }
  0x1a   :  { %354 = vmatpush.bf16.msra.mxu2 %v543_v14 }
  0x1b   :  { %367 = vmatpush.bf16.msra.mxu3 %v551_v16  ;;  %v59_v36 = vld.sshfl [vmem:[#allocation1 + $0x10] sm:$0xff pattern:$0x75316420]  ;;  %v60_v37 = vld.sshfl [vmem:[#allocation1 + $0x18] sm:$0xff pattern:$0x75316420] }
  0x1c   :  { %329 = vmatpush.bf16.msra.mxu0 %v526_v18  ;;  %v67_v40 = vpack.c.bf16 %v59_v36, %v59_v36  ;;  %v68_v41 = vpack.c.bf16 %v60_v37, %v60_v37 }
  0x1d   :  { %342 = vmatpush.bf16.msra.mxu1 %v534_v19 }
  0x1e   :  { %355 = vmatpush.bf16.msra.mxu2 %v542_v20 }
  0x1f   :  { %368 = vmatpush.bf16.msra.mxu3 %v550_v21 }
  0x20   :  { %330 = vmatpush.bf16.msra.mxu0 %v525_v22 }
  0x21   :  { %343 = vmatpush.bf16.msra.mxu1 %v533_v23 }
  0x22   :  { %356 = vmatpush.bf16.msra.mxu2 %v541_v24 }
  0x23   :  { %369 = vmatpush.bf16.msra.mxu3 %v549_v25 }
  0x24   :  { %331 = vmatpush.bf16.msra.mxu0 %v524_v26 }
  0x25   :  { %344 = vmatpush.bf16.msra.mxu1 %v532_v27 }
  0x26   :  { %357 = vmatpush.bf16.msra.mxu2 %v540_v28 }
  0x27   :  { %370 = vmatpush.bf16.msra.mxu3 %v548_v29 }
  0x28   :  { %332 = vmatpush.bf16.msra.mxu0 %v523_v30 }
  0x29   :  { %345 = vmatpush.bf16.msra.mxu1 %v531_v31 }
  0x2a   :  { %358 = vmatpush.bf16.msra.mxu2 %v539_v32 }
  0x2b   :  { %371 = vmatpush.bf16.msra.mxu3 %v547_v33  ;;  %333 = vmatmul.bf16.vlgmr.msra.gmra.mxu0 %v65_v38 }
  0x2c   :  { %346 = vmatmul.bf16.vlgmr.msra.gmra.mxu1 %v66_v39 }
  0x2d   :  { %359 = vmatmul.bf16.vlgmr.msra.gmra.mxu2 %v67_v40 }
  0x2e   :  { %372 = vmatmul.bf16.vlgmr.msra.gmra.mxu3 %v68_v41 }
  0xa8   :  { %v334_v43 = vpop.f32.mrf.mxu0 }
  0xa9   :  { %v347_v44 = vpop.f32.mrf.mxu1 }
  0xaa   :  { %v348_v45 = vadd.f32 %v347_v44, %v334_v43 }
  0xb0   :  { %v360_v46 = vpop.f32.mrf.mxu2  ;;  %v336_v49 = vpop.f32.mrf.mxu0 }
  0xb1   :  { %v373_v47 = vpop.f32.mrf.mxu3  ;;  %v361_v48 = vadd.f32 %v360_v46, %v348_v45  ;;  %v349_v50 = vpop.f32.mrf.mxu1 }
  0xb3   :  { %v374_v52 = vadd.f32 %v373_v47, %v361_v48 }
  0xb5   :  { %v377_v53 = vadd.f32 %v374_v52, %v49_v51 }
  0xb7   :  { %378 = vst [vmem:[%s668_s3] sm:$0xf] %v377_v53 }
  0xb8   :  { %v362_v54 = vpop.f32.mrf.mxu2 }
  0xb9   :  { %v375_v55 = vpop.f32.mrf.mxu3 }
  0xbe   :  { %v382_v57 = vld [vmem:[%s668_s3] sm:$0xf] }
  0xbf   :  { %v387_v58 = vadd.f32 %v560_v56, %v382_v57 }
  0xc1   :  { %388 = vst [vmem:[%s668_s3] sm:$0xf] %v387_v58 }
  0xc2   :  { %393 = vsyncpa [#allocation3], 1 }
  0xc3   :  { %394 = vsyncpa [#allocation5], 1 }

// kernel: siamese_forward.5
= control target key start
LH: loop header
LB: loop body
LE: loop exit
PB: predicated region body
PF: predicated region fallthrough
CT: control target
= control target key end

     0   :  { %s3843_s0 = inlined_call_operand.vmem [shape: f32[4,3072], index: 0, kind: input, shape index: {}]   ;;  %s3844_s1 = inlined_call_operand.hbm [shape: bf16[3072,512], index: 1, kind: input, shape index: {}]   ;;  %s3845_s2 = inlined_call_operand.hbm [shape: f32[1,512], index: 2, kind: input, shape index: {}]   ;;  %s3846_s3 = inlined_call_operand.vmem [shape: f32[4,512], index: 3, kind: output, shape index: {}]  }
   0x1   :  { %3849 = sst [smem:[#allocation10_spill]] %s3844_s1 }
   0x2   :  { %8 = vsyncpa [#allocation3], 0 }
   0x3   :  { %10 = vsyncpa [#allocation3 + $0x1], 0 }
   0x4   :  { %11 = vsyncpa [#allocation5], 0 }
   0x5   :  { %13 = vsyncpa [#allocation5 + $0x1], 0  ;;  %s3207_s12 = smov 0   ;;  %s3209_s13 = smov 0  }
   0x6   :  { %s3211_s14 = smov 0   ;;  %s3213_s15 = smov 0  }
   0x7   :  { %s3215_s16 = smov 0   ;;  %s3217_s17 = smov 0  }
   0x8   :  { %s3219_s18 = smov 0   ;;  %s3221_s19 = smov 0  }
   0x9   :  { %s3223_s20 = smov 0   ;;  %s3225_s21 = smov 0  }
   0xa   :  { %s3227_s22 = smov 0  }
   0xb LB: > { %s28_s23 = sadd.s32 1, %s3173_s20  ;;  %s31_s24 = sadd.s32 1, %s3177_s21  ;;  %s3181_s22 = sphi %s3227_s22, %s19_s22   ;;  %s3177_s21 = sphi %s3225_s21, %s3868_s21   ;;  %s3173_s20 = sphi %s3223_s20, %s3867_s20   ;;  %s3169_s19 = sphi %s3221_s19, %s3866_s19   ;;  %s3165_s18 = sphi %s3219_s18, %s3865_s18   ;;  %s3161_s17 = sphi %s3217_s17, %s3864_s17   ;;  %s3157_s16 = sphi %s3215_s16, %s3863_s16   ;;  %s3153_s15 = sphi %s3213_s15, %s3862_s15   ;;  %s3149_s14 = sphi %s3211_s14, %s3861_s14   ;;  %s3145_s13 = sphi %s3209_s13, %s3860_s13   ;;  %s3141_s12 = sphi %s3207_s12, %s3859_s12  }
   0xc   : > { %p29_p0 = scmp.ge.s32.totalorder %s28_s23, 2  ;;  %p73_p1 = scmp.ne.s32.totalorder %s3161_s17, %s3157_s16 }
   0xd   : > { %p74_p2 = scmp.eq.s32.totalorder %s3181_s22, 0  ;;  %p2934_p4 = scmp.lt.s32.totalorder %s3181_s22, 4 }
   0xe   : > { %s3870_s23 = smov (%p29_p0, %s28_s23), 0  ;;  %s3872_s24 = smov (!%p29_p0, %s31_s24), %s3177_s21 }
   0xf   : > { %3850 = sst [smem:[#allocation8_spill]] %s3870_s23  ;;  %p75_p3 = por %p74_p2, %p73_p1 }
  0x10   : > { %s164_s26 = sand.u32 1, %s3161_s17   ;;  %s1946_s27 = sshll.u32 %s3177_s21, 1 }
  0x11   : > { %s2921_s28 = smul.u32 1536, %s164_s26  ;;  %p2928_p5 = pnand %p2934_p4, %p75_p3 }
  0x12   : > { %s2728_s29 = smul.u32 768, %s3173_s20  ;;  %s3851_s1 = sld [smem:[#allocation10_spill]] }
  0x13   : > { %s168_s4 = scalar_lea.vmem [#allocation2], %s2921_s28  ;;  %s165_s11 = scalar_lea.sflag [#allocation3], %s164_s26 }
  0x14   : > { %s174_s30 = sadd.s32 %s2728_s29, %s1946_s27  ;;  %s179_s5 = sshll.u32 %s168_s4, 4  ;;  %s180_s5 = int_to_ptr.vmem [resolvable:$true] %s179_s5 }
  0x15   : > { %s1948_s6 = sshll.u32 %s174_s30, 2  ;;  %s3183_s25 = smov 256  }
  0x16   : > { %s3184_s28 = smov 128   ;;  %s3185_s29 = smov 8  }
  0x17   : > { %p1951_p6 = scmp.ge.s32.totalorder %s3181_s22, 1  ;;  %p206_p7 = scmp.lt.s32.totalorder %s3181_s22, 5 }
  0x18   : > { %s176_s9 = scalar_lea.hbm %s3851_s1, %s1948_s6  ;;  %s61_s30 = ssub.s32 %s3173_s20, %s3870_s23 }
  0x19   : > { %s177_s10 = sshll.u32 %s176_s9, 4  ;;  %p3290_p8 = pnand %p1951_p6, %p206_p7  ;;  %s178_s10 = int_to_ptr.hbm [resolvable:$true] %s177_s10 }
  0x1a   : > { %2930 = dma.hbm_to_vmem [thread:$0]  (!%p2928_p5), %s178_s10, 24576, %s180_s5, %s165_s11, %s3183_s25, %s3184_s28, %s3185_s29  }
  0x1b   : > { %s1942_s26 = sadd.s32 4294967295, %s3181_s22   ;;  %p33_p9 = scmp.ge.s32.totalorder %s3872_s24, 2 }
  0x1c   : > { %p79_p10 = scmp.ne.s32.totalorder %s3157_s16, %s3153_s15  ;;  %p80_p11 = scmp.eq.s32.totalorder %s1942_s26, 0 }
  0x1d   : > { %s3874_s24 = smov (%p33_p9, %s3872_s24), 0  ;;  %s92_s5 = sadd.s32 1, %s3149_s14 }
  0x1e   : > { %3853 = sst [smem:[#allocation9_spill]] %s3874_s24  ;;  %p3301_p12 = por %p80_p11, %p79_p10 }
  0x1f   : > { %s62_s6 = ssub.s32 %s3177_s21, %s3874_s24  ;;  %p105_p13 = scmp.ne.s32.totalorder %s3145_s13, %s3141_s12 }
  0x20   : > { %s63_s7 = sor.u32 %s62_s6, %s61_s30  ;;  %p90_p0 = scmp.eq.s32.totalorder %s62_s6, 0 }
  0x21   : > { %p64_p1 = scmp.eq.s32.totalorder %s63_s7, 0  ;;  %p99_p3 = scmp.ne.s32.totalorder %s3149_s14, %s3145_s13 }
  0x22   : > { %s3313_s8 = scalar_select %p90_p0, %s3149_s14, %s92_s5  }
  0x23   : > { %s3855_s15 = sadd.s32 1, %s3161_s17  ;;  %p3320_p5 = por %p105_p13, %p80_p11 }
  0x24   : > { %s3318_s9 = scalar_select %p64_p1, %s3161_s17, %s3855_s15  }
  0x25   : > { %s189_s11 = sand.u32 1, %s3149_s14   ;;  %p101_p6 = por %p99_p3, %p74_p2 }
  0x26   : > { %s1949_s28 = sshll.u32 %s189_s11, 1  ;;  %s197_s30 = scalar_lea.hbm %s3845_s2, %s1946_s27 }
  0x27   : > { %s199_s26 = sshll.u32 %s197_s30, 4  ;;  %s193_s6 = scalar_lea.vmem [#allocation4], %s1949_s28  ;;  %s200_s26 = int_to_ptr.hbm [resolvable:$true] %s199_s26 }
  0x28   : > { %s201_s5 = sshll.u32 %s193_s6, 4  ;;  %p2931_p7 = pnand %p2934_p4, %p101_p6  ;;  %s202_s5 = int_to_ptr.vmem [resolvable:$true] %s201_s5 }
  0x29   : > { %s190_s7 = scalar_lea.sflag [#allocation5], %s189_s11  ;;  %210 = sbr.rel (%p3290_p8) target bundleno = 412 (0x19c), region = 32 }
  0x2a   : > { %2933 = dma.hbm_to_vmem [thread:$0]  (!%p2931_p7), %s200_s26, 32, %s202_s5, %s190_s7  }
  0x2b   : > { %s212_s15 = sand.u32 (!%p3290_p8), 1, %s3157_s16  }
  0x2c   : > { %s2922_s1 = smul.u32 (!%p3290_p8), 1536, %s212_s15  ;;  %s213_s24 = scalar_lea.sflag (!%p3290_p8), [#allocation3], %s212_s15 }
  0x2e   : > { %s3337_s23 = scalar_lea.vmem [#allocation2], %s2922_s1 }
  0x2f   : > { %3132 = dma.done.wait (%p3301_p12), %s213_s24, 24576  }
  0x30   : > { %3134 = vsyncadd (%p3301_p12), %s213_s24, 4294942720  ;;  %s222_s27 = sand.u32 1, %s3145_s13  }
  0x31   : > { %s3344_s11 = sshll.u32 %s222_s27, 1  ;;  %s223_s4 = scalar_lea.sflag [#allocation5], %s222_s27 }
  0x32   : > { %s226_s28 = scalar_lea.vmem [#allocation4], %s3344_s11 }
  0x33   : > { %3136 = dma.done.wait (%p3320_p5), %s223_s4, 32  }
  0x34   : > { %3138 = vsyncadd (%p3320_p5), %s223_s4, 4294967264  ;;  %s260_s1 = smul.u32 12, %s3165_s18  ;;  %s1954_s12 = sshll.u32 %s3169_s19, 1 }
  0x35   : > { %p270_p2 = scmp.lt.s32.totalorder %s1954_s12, 3  ;;  %p1956_p8 = scmp.ne.s32.totalorder %s3165_s18, 0 }
  0x36   : > { %p261_p4 = scmp.lt.s32.totalorder %s260_s1, 23 }
  0x37   : > { %s3876_s12 = smov (!%p270_p2, %s1954_s12), 3  ;;  %278 = sbr.rel (%p1956_p8) target bundleno = 62 (0x3e), region = 44 }
  0x38   : > { %s3878_s1 = smov (!%p261_p4, %s260_s1), 23  ;;  %s1955_s24 = sshll.u32 %s3876_s12, 2 }
  0x39   : > { %s1953_s25 = sshll.u32 %s3878_s1, 2  ;;  %s3356_s26 = scalar_lea.vmem %s3846_s3, %s1955_s24 }
  0x3a   : > { %s3361_s10 = scalar_lea.vmem %s3843_s0, %s1953_s25 }
  0x3c   : > { %v3186_v0 = vmov 0.0  }
  0x3d   : > { %279 = vst [vmem:[%s3356_s26] sm:$0xff] %v3186_v0 }
  0x3e PF: > { %v2015_v1 = vld [vmem:[%s3337_s23 + $0x70] sm:$0xf]  ;;  %v2744_v2 = vld [vmem:[%s3337_s23 + $0x74] sm:$0xf0]  ;;  %v2007_v12 = vld [vmem:[%s3337_s23 + $0x60] sm:$0xf] }
  0x3f   : > { %v2079_v3 = vld [vmem:[%s3337_s23 + $0xf0] sm:$0xf]  ;;  %v2016_v4 = vor.u32 %v2744_v2, %v2015_v1  ;;  %v2760_v5 = vld [vmem:[%s3337_s23 + $0xf4] sm:$0xf0]  ;;  %v2742_v14 = vld [vmem:[%s3337_s23 + $0x64] sm:$0xf0] }
  0x40   : > { %v2143_v6 = vld [vmem:[%s3337_s23 + $0x170] sm:$0xf]  ;;  %v2776_v7 = vld [vmem:[%s3337_s23 + $0x174] sm:$0xf0]  ;;  %v2080_v8 = vor.u32 %v2760_v5, %v2079_v3  ;;  %v2071_v15 = vld [vmem:[%s3337_s23 + $0xe0] sm:$0xf]  ;;  %v2008_v17 = vor.u32 %v2742_v14, %v2007_v12 }
  0x41   : > { %v2144_v9 = vor.u32 %v2776_v7, %v2143_v6  ;;  %v2207_v10 = vld [vmem:[%s3337_s23 + $0x1f0] sm:$0xf]  ;;  %v2792_v11 = vld [vmem:[%s3337_s23 + $0x1f4] sm:$0xf0]  ;;  %1490 = vmatpush.bf16.msra.mxu0 %v2016_v4  ;;  %v2758_v16 = vld [vmem:[%s3337_s23 + $0xe4] sm:$0xf0] }
  0x42   : > { %v2208_v13 = vor.u32 %v2792_v11, %v2207_v10  ;;  %1503 = vmatpush.bf16.msra.mxu1 %v2080_v8  ;;  %v2072_v18 = vor.u32 %v2758_v16, %v2071_v15  ;;  %v2135_v19 = vld [vmem:[%s3337_s23 + $0x160] sm:$0xf]  ;;  %v2774_v20 = vld [vmem:[%s3337_s23 + $0x164] sm:$0xf0]  ;;  %v1999_v24 = vld [vmem:[%s3337_s23 + $0x50] sm:$0xf] }
  0x43   : > { %1516 = vmatpush.bf16.msra.mxu2 %v2144_v9  ;;  %v2199_v21 = vld [vmem:[%s3337_s23 + $0x1e0] sm:$0xf]  ;;  %v2136_v22 = vor.u32 %v2774_v20, %v2135_v19  ;;  %v2790_v23 = vld [vmem:[%s3337_s23 + $0x1e4] sm:$0xf0]  ;;  %v2740_v25 = vld [vmem:[%s3337_s23 + $0x54] sm:$0xf0] }
  0x44   : > { %1529 = vmatpush.bf16.msra.mxu3 %v2208_v13  ;;  %v2200_v26 = vor.u32 %v2790_v23, %v2199_v21  ;;  %v2063_v27 = vld [vmem:[%s3337_s23 + $0xd0] sm:$0xf]  ;;  %v2756_v28 = vld [vmem:[%s3337_s23 + $0xd4] sm:$0xf0]  ;;  %v2000_v30 = vor.u32 %v2740_v25, %v1999_v24  ;;  %v1991_v36 = vld [vmem:[%s3337_s23 + $0x40] sm:$0xf] }
  0x45   : > { %v2127_v29 = vld [vmem:[%s3337_s23 + $0x150] sm:$0xf]  ;;  %1491 = vmatpush.bf16.msra.mxu0 %v2008_v17  ;;  %v2772_v31 = vld [vmem:[%s3337_s23 + $0x154] sm:$0xf0]  ;;  %v2064_v34 = vor.u32 %v2756_v28, %v2063_v27  ;;  %v2738_v37 = vld [vmem:[%s3337_s23 + $0x44] sm:$0xf0] }
  0x46   : > { %v2191_v32 = vld [vmem:[%s3337_s23 + $0x1d0] sm:$0xf]  ;;  %v2788_v33 = vld [vmem:[%s3337_s23 + $0x1d4] sm:$0xf0]  ;;  %1504 = vmatpush.bf16.msra.mxu1 %v2072_v18  ;;  %v2128_v35 = vor.u32 %v2772_v31, %v2127_v29  ;;  %v2055_v38 = vld [vmem:[%s3337_s23 + $0xc0] sm:$0xf]  ;;  %v1992_v45 = vor.u32 %v2738_v37, %v1991_v36 }
  0x47   : > { %1517 = vmatpush.bf16.msra.mxu2 %v2136_v22  ;;  %v2192_v39 = vor.u32 %v2788_v33, %v2191_v32  ;;  %v2754_v40 = vld [vmem:[%s3337_s23 + $0xc4] sm:$0xf0]  ;;  %v2119_v41 = vld [vmem:[%s3337_s23 + $0x140] sm:$0xf]  ;;  %v1983_v48 = vld [vmem:[%s3337_s23 + $0x30] sm:$0xf] }
  0x48   : > { %1530 = vmatpush.bf16.msra.mxu3 %v2200_v26  ;;  %v2770_v42 = vld [vmem:[%s3337_s23 + $0x144] sm:$0xf0]  ;;  %v2183_v43 = vld [vmem:[%s3337_s23 + $0x1c0] sm:$0xf]  ;;  %v2056_v46 = vor.u32 %v2754_v40, %v2055_v38  ;;  %v2736_v49 = vld [vmem:[%s3337_s23 + $0x34] sm:$0xf0] }
  0x49   : > { %v2786_v44 = vld [vmem:[%s3337_s23 + $0x1c4] sm:$0xf0]  ;;  %1492 = vmatpush.bf16.msra.mxu0 %v2000_v30  ;;  %v2120_v47 = vor.u32 %v2770_v42, %v2119_v41  ;;  %v2047_v50 = vld [vmem:[%s3337_s23 + $0xb0] sm:$0xf]  ;;  %v2752_v52 = vld [vmem:[%s3337_s23 + $0xb4] sm:$0xf0]  ;;  %v1984_v57 = vor.u32 %v2736_v49, %v1983_v48 }
  0x4a   : > { %1505 = vmatpush.bf16.msra.mxu1 %v2064_v34  ;;  %v2184_v51 = vor.u32 %v2786_v44, %v2183_v43  ;;  %v2111_v53 = vld [vmem:[%s3337_s23 + $0x130] sm:$0xf]  ;;  %v2768_v54 = vld [vmem:[%s3337_s23 + $0x134] sm:$0xf0]  ;;  %v2048_v58 = vor.u32 %v2752_v52, %v2047_v50  ;;  %v1975_v60 = vld [vmem:[%s3337_s23 + $0x20] sm:$0xf] }
  0x4b   : > { %1518 = vmatpush.bf16.msra.mxu2 %v2128_v35  ;;  %v2175_v55 = vld [vmem:[%s3337_s23 + $0x1b0] sm:$0xf]  ;;  %v2784_v56 = vld [vmem:[%s3337_s23 + $0x1b4] sm:$0xf0]  ;;  %v2112_v59 = vor.u32 %v2768_v54, %v2111_v53  ;;  %v2734_v61 = vld [vmem:[%s3337_s23 + $0x24] sm:$0xf0] }
  0x4c   : > { %1531 = vmatpush.bf16.msra.mxu3 %v2192_v39  ;;  %v2039_v62 = vld [vmem:[%s3337_s23 + $0xa0] sm:$0xf]  ;;  %v2176_v63 = vor.u32 %v2784_v56, %v2175_v55  ;;  %v2750_v0 = vld [vmem:[%s3337_s23 + $0xa4] sm:$0xf0]  ;;  %v1976_v5 = vor.u32 %v2734_v61, %v1975_v60  ;;  %v1967_v8 = vld [vmem:[%s3337_s23 + $0x10] sm:$0xf] }
  0x4d   : > { %1493 = vmatpush.bf16.msra.mxu0 %v1992_v45  ;;  %v2103_v1 = vld [vmem:[%s3337_s23 + $0x120] sm:$0xf]  ;;  %v2766_v2 = vld [vmem:[%s3337_s23 + $0x124] sm:$0xf0]  ;;  %v2040_v6 = vor.u32 %v2750_v0, %v2039_v62  ;;  %v2732_v9 = vld [vmem:[%s3337_s23 + $0x14] sm:$0xf0] }
  0x4e   : > { %1506 = vmatpush.bf16.msra.mxu1 %v2056_v46  ;;  %v2167_v3 = vld [vmem:[%s3337_s23 + $0x1a0] sm:$0xf]  ;;  %v2782_v4 = vld [vmem:[%s3337_s23 + $0x1a4] sm:$0xf0]  ;;  %v2104_v7 = vor.u32 %v2766_v2, %v2103_v1  ;;  %v2031_v10 = vld [vmem:[%s3337_s23 + $0x90] sm:$0xf]  ;;  %v1968_v17 = vor.u32 %v2732_v9, %v1967_v8 }
  0x4f   : > { %1519 = vmatpush.bf16.msra.mxu2 %v2120_v47  ;;  %v2168_v11 = vor.u32 %v2782_v4, %v2167_v3  ;;  %v2748_v12 = vld [vmem:[%s3337_s23 + $0x94] sm:$0xf0]  ;;  %v2095_v13 = vld [vmem:[%s3337_s23 + $0x110] sm:$0xf]  ;;  %v1959_v18 = vld [vmem:[%s3337_s23] sm:$0xf] }
  0x50   : > { %1532 = vmatpush.bf16.msra.mxu3 %v2184_v51  ;;  %v2764_v14 = vld [vmem:[%s3337_s23 + $0x114] sm:$0xf0]  ;;  %v2159_v15 = vld [vmem:[%s3337_s23 + $0x190] sm:$0xf]  ;;  %v2730_v19 = vld [vmem:[%s3337_s23 + $0x4] sm:$0xf0]  ;;  %v2032_v20 = vor.u32 %v2748_v12, %v2031_v10 }
  0x51   : > { %1494 = vmatpush.bf16.msra.mxu0 %v1984_v57  ;;  %v2780_v16 = vld [vmem:[%s3337_s23 + $0x194] sm:$0xf0]  ;;  %v2096_v21 = vor.u32 %v2764_v14, %v2095_v13  ;;  %v2023_v22 = vld [vmem:[%s3337_s23 + $0x80] sm:$0xf]  ;;  %v2746_v23 = vld [vmem:[%s3337_s23 + $0x84] sm:$0xf0]  ;;  %v1960_v32 = vor.u32 %v2730_v19, %v1959_v18 }
  0x52   : > { %1507 = vmatpush.bf16.msra.mxu1 %v2048_v58  ;;  %v2087_v24 = vld [vmem:[%s3337_s23 + $0x100] sm:$0xf]  ;;  %v2160_v25 = vor.u32 %v2780_v16, %v2159_v15  ;;  %v2762_v26 = vld [vmem:[%s3337_s23 + $0x104] sm:$0xf0]  ;;  %v2271_v29 = vld [vmem:[%s3337_s23 + $0x270] sm:$0xf]  ;;  %v2024_v36 = vor.u32 %v2746_v23, %v2023_v22 }
  0x53   : > { %1520 = vmatpush.bf16.msra.mxu2 %v2112_v59  ;;  %v2151_v27 = vld [vmem:[%s3337_s23 + $0x180] sm:$0xf]  ;;  %v2778_v28 = vld [vmem:[%s3337_s23 + $0x184] sm:$0xf0]  ;;  %v2808_v30 = vld [vmem:[%s3337_s23 + $0x274] sm:$0xf0]  ;;  %v2088_v37 = vor.u32 %v2762_v26, %v2087_v24 }
  0x54   : > { %1533 = vmatpush.bf16.msra.mxu3 %v2176_v63  ;;  %v2335_v31 = vld [vmem:[%s3337_s23 + $0x2f0] sm:$0xf]  ;;  %v2824_v33 = vld [vmem:[%s3337_s23 + $0x2f4] sm:$0xf0]  ;;  %v2152_v40 = vor.u32 %v2778_v28, %v2151_v27  ;;  %v2272_v41 = vor.u32 %v2808_v30, %v2271_v29  ;;  %v2263_v44 = vld [vmem:[%s3337_s23 + $0x260] sm:$0xf] }
  0x55   : > { %1495 = vmatpush.bf16.msra.mxu0 %v1976_v5  ;;  %v2399_v34 = vld [vmem:[%s3337_s23 + $0x370] sm:$0xf]  ;;  %v2840_v35 = vld [vmem:[%s3337_s23 + $0x374] sm:$0xf0]  ;;  %v2336_v42 = vor.u32 %v2824_v33, %v2335_v31  ;;  %v2806_v45 = vld [vmem:[%s3337_s23 + $0x264] sm:$0xf0] }
  0x56   : > { %1508 = vmatpush.bf16.msra.mxu1 %v2040_v6  ;;  %v2463_v38 = vld [vmem:[%s3337_s23 + $0x3f0] sm:$0xf]  ;;  %v2856_v39 = vld [vmem:[%s3337_s23 + $0x3f4] sm:$0xf0]  ;;  %v2400_v43 = vor.u32 %v2840_v35, %v2399_v34  ;;  %v2327_v46 = vld [vmem:[%s3337_s23 + $0x2e0] sm:$0xf]  ;;  %v2264_v53 = vor.u32 %v2806_v45, %v2263_v44 }
  0x57   : > { %1521 = vmatpush.bf16.msra.mxu2 %v2104_v7  ;;  %v2464_v47 = vor.u32 %v2856_v39, %v2463_v38  ;;  %v2822_v48 = vld [vmem:[%s3337_s23 + $0x2e4] sm:$0xf0]  ;;  %v2391_v49 = vld [vmem:[%s3337_s23 + $0x360] sm:$0xf]  ;;  %v2255_v54 = vld [vmem:[%s3337_s23 + $0x250] sm:$0xf] }
  0x58   : > { %1534 = vmatpush.bf16.msra.mxu3 %v2168_v11  ;;  %v2838_v50 = vld [vmem:[%s3337_s23 + $0x364] sm:$0xf0]  ;;  %v2455_v51 = vld [vmem:[%s3337_s23 + $0x3e0] sm:$0xf]  ;;  %v2804_v55 = vld [vmem:[%s3337_s23 + $0x254] sm:$0xf0]  ;;  %v2328_v56 = vor.u32 %v2822_v48, %v2327_v46 }
  0x59   : > { %1496 = vmatpush.bf16.msra.mxu0 %v1968_v17  ;;  %v2854_v52 = vld [vmem:[%s3337_s23 + $0x3e4] sm:$0xf0]  ;;  %v2392_v57 = vor.u32 %v2838_v50, %v2391_v49  ;;  %v2319_v58 = vld [vmem:[%s3337_s23 + $0x2d0] sm:$0xf]  ;;  %v2820_v59 = vld [vmem:[%s3337_s23 + $0x2d4] sm:$0xf0]  ;;  %v2256_v3 = vor.u32 %v2804_v55, %v2255_v54 }
  0x5a   : > { %1509 = vmatpush.bf16.msra.mxu1 %v2032_v20  ;;  %v282_v60 = vld [vmem:[%s3361_s10 + $0x8] sm:$0xff]  ;;  %v2456_v61 = vor.u32 %v2854_v52, %v2455_v51  ;;  %v2383_v62 = vld [vmem:[%s3337_s23 + $0x350] sm:$0xf]  ;;  %v2836_v63 = vld [vmem:[%s3337_s23 + $0x354] sm:$0xf0]  ;;  %v2320_v7 = vor.u32 %v2820_v59, %v2319_v58  ;;  %vm1805_vm0 = vcmask 1043456  }
  0x5b   : > { %1522 = vmatpush.bf16.msra.mxu2 %v2096_v21  ;;  %295 = vst [vmem:[#allocation1 + $0x10] ss:$2 sm:$0xff] %v282_v60  ;;  %v2447_v0 = vld [vmem:[%s3337_s23 + $0x3d0] sm:$0xf]  ;;  %v2852_v1 = vld [vmem:[%s3337_s23 + $0x3d4] sm:$0xf0]  ;;  %v2384_v8 = vor.u32 %v2836_v63, %v2383_v62 }
  0x5c   : > { %1535 = vmatpush.bf16.msra.mxu3 %v2160_v25  ;;  %v2247_v2 = vld [vmem:[%s3337_s23 + $0x240] sm:$0xf]  ;;  %v2802_v4 = vld [vmem:[%s3337_s23 + $0x244] sm:$0xf0]  ;;  %v281_v11 = vld [vmem:[%s3361_s10] sm:$0xff]  ;;  %v2448_v12 = vor.u32 %v2852_v1, %v2447_v0  ;;  %p2725_p9 = scmp.ne.s32.totalorder %s3165_s18, 1 }
  0x5d   : > { %1497 = vmatpush.bf16.msra.mxu0 %v1960_v32  ;;  %v2311_v5 = vld [vmem:[%s3337_s23 + $0x2c0] sm:$0xf]  ;;  %v2818_v6 = vld [vmem:[%s3337_s23 + $0x2c4] sm:$0xf0]  ;;  %293 = vst [vmem:[#allocation1] ss:$2 sm:$0xff] %v281_v11  ;;  %v2248_v18 = vor.u32 %v2802_v4, %v2247_v2 }
  0x5e   : > { %1510 = vmatpush.bf16.msra.mxu1 %v2024_v36  ;;  %v2375_v9 = vld [vmem:[%s3337_s23 + $0x340] sm:$0xf]  ;;  %v2834_v10 = vld [vmem:[%s3337_s23 + $0x344] sm:$0xf0]  ;;  %v2239_v15 = vld [vmem:[%s3337_s23 + $0x230] sm:$0xf]  ;;  %v2312_v22 = vor.u32 %v2818_v6, %v2311_v5 }
  0x5f   : > { %1523 = vmatpush.bf16.msra.mxu2 %v2088_v37  ;;  %v2439_v13 = vld [vmem:[%s3337_s23 + $0x3c0] sm:$0xf]  ;;  %v2850_v14 = vld [vmem:[%s3337_s23 + $0x3c4] sm:$0xf0]  ;;  %v2800_v16 = vld [vmem:[%s3337_s23 + $0x234] sm:$0xf0]  ;;  %v2376_v23 = vor.u32 %v2834_v10, %v2375_v9 }
  0x60   : > { %1536 = vmatpush.bf16.msra.mxu3 %v2152_v40  ;;  %v286_v17 = vld [vmem:[%s3361_s10 + $0x28] sm:$0xff]  ;;  %v2303_v19 = vld [vmem:[%s3337_s23 + $0x2b0] sm:$0xf]  ;;  %v2816_v20 = vld [vmem:[%s3337_s23 + $0x2b4] sm:$0xf0]  ;;  %v2440_v26 = vor.u32 %v2850_v14, %v2439_v13  ;;  %v2240_v34 = vor.u32 %v2800_v16, %v2239_v15 }
  0x61   : > { %1542 = vmatpush.bf16.msrb.mxu0 %v2272_v41  ;;  %v2367_v21 = vld [vmem:[%s3337_s23 + $0x330] sm:$0xf]  ;;  %v2832_v27 = vld [vmem:[%s3337_s23 + $0x334] sm:$0xf0]  ;;  %v2231_v31 = vld [vmem:[%s3337_s23 + $0x220] sm:$0xf]  ;;  %v2304_v38 = vor.u32 %v2816_v20, %v2303_v19 }
  0x62   : > { %1555 = vmatpush.bf16.msrb.mxu1 %v2336_v42  ;;  %v302_v24 = vld.sshfl [vmem:[#allocation1 + $0x10] sm:$0xff pattern:$0x75316420]  ;;  %v303_v25 = vld.sshfl [vmem:[#allocation1 + $0x18] sm:$0xff pattern:$0x75316420]  ;;  %v2368_v39 = vor.u32 %v2832_v27, %v2367_v21 }
  0x63   : > { %1568 = vmatpush.bf16.msrb.mxu2 %v2400_v43  ;;  %v2431_v28 = vld [vmem:[%s3337_s23 + $0x3b0] sm:$0xf]  ;;  %v3471_v29 = vpack.c.bf16 %v302_v24, %v302_v24  ;;  %309 = vst [vmem:[#allocation1 + $0x10] ss:$2 sm:$0xff] %v286_v17  ;;  %v2848_v30 = vld [vmem:[%s3337_s23 + $0x3b4] sm:$0xf0]  ;;  %v3475_v32 = vpack.c.bf16 %v303_v25, %v303_v25 }
  0x64   : > { %1581 = vmatpush.bf16.msrb.mxu3 %v2464_v47  ;;  %v285_v33 = vld [vmem:[%s3361_s10 + $0x20] sm:$0xff]  ;;  %v2798_v35 = vld [vmem:[%s3337_s23 + $0x224] sm:$0xf0]  ;;  %v2295_v36 = vld [vmem:[%s3337_s23 + $0x2a0] sm:$0xf]  ;;  %v2432_v42 = vor.u32 %v2848_v30, %v2431_v28 }
  0x65   : > { %1543 = vmatpush.bf16.msrb.mxu0 %v2264_v53  ;;  %1524 = vmatmul.bf16.vlgmr.msra.gmra.mxu2 %v3471_v29  ;;  %v2814_v37 = vld [vmem:[%s3337_s23 + $0x2a4] sm:$0xf0]  ;;  %v300_v40 = vld.sshfl [vmem:[#allocation1] sm:$0xff pattern:$0x75316420]  ;;  %v2232_v49 = vor.u32 %v2798_v35, %v2231_v31  ;;  %v284_v63 = vld [vmem:[%s3361_s10 + $0x18] sm:$0xff] }
  0x66   : > { %1556 = vmatpush.bf16.msrb.mxu1 %v2328_v56  ;;  %v301_v41 = vld.sshfl [vmem:[#allocation1 + $0x8] sm:$0xff pattern:$0x75316420]  ;;  %v2830_v44 = vld [vmem:[%s3337_s23 + $0x324] sm:$0xf0]  ;;  %v3484_v45 = vpack.c.bf16 %v300_v40, %v300_v40  ;;  %1537 = vmatmul.bf16.vlgmr.msra.gmra.mxu3 %v3475_v32  ;;  %v2296_v52 = vor.u32 %v2814_v37, %v2295_v36 }
  0x67   : > { %1569 = vmatpush.bf16.msrb.mxu2 %v2392_v57  ;;  %v2359_v43 = vld [vmem:[%s3337_s23 + $0x320] sm:$0xf]  ;;  %308 = vst [vmem:[#allocation1] ss:$2 sm:$0xff] %v285_v33  ;;  %v3486_v46 = vpack.c.bf16 %v301_v41, %v301_v41  ;;  %v2846_v48 = vld [vmem:[%s3337_s23 + $0x3a4] sm:$0xf0] }
  0x68   : > { %1582 = vmatpush.bf16.msrb.mxu3 %v2456_v61  ;;  %v2423_v47 = vld [vmem:[%s3337_s23 + $0x3a0] sm:$0xf]  ;;  %v2223_v50 = vld [vmem:[%s3337_s23 + $0x210] sm:$0xf]  ;;  %v2796_v51 = vld [vmem:[%s3337_s23 + $0x214] sm:$0xf0]  ;;  %v2360_v53 = vor.u32 %v2830_v44, %v2359_v43  ;;  %1498 = vmatmul.bf16.vlgmr.msra.gmra.mxu0 %v3484_v45 }
  0x69   : > { %1544 = vmatpush.bf16.msrb.mxu0 %v2256_v3  ;;  %1511 = vmatmul.bf16.vlgmr.msra.gmra.mxu1 %v3486_v46  ;;  %v2287_v54 = vld [vmem:[%s3337_s23 + $0x290] sm:$0xf]  ;;  %v2812_v55 = vld [vmem:[%s3337_s23 + $0x294] sm:$0xf0]  ;;  %v2424_v57 = vor.u32 %v2846_v48, %v2423_v47  ;;  %v2215_v61 = vld [vmem:[%s3337_s23 + $0x200] sm:$0xf]  ;;  %v2224_v0 = vor.u32 %v2796_v51, %v2223_v50 }
  0x6a   : > { %1557 = vmatpush.bf16.msrb.mxu1 %v2320_v7  ;;  %v2351_v56 = vld [vmem:[%s3337_s23 + $0x310] sm:$0xf]  ;;  %v2828_v58 = vld [vmem:[%s3337_s23 + $0x314] sm:$0xf0]  ;;  %v2794_v62 = vld [vmem:[%s3337_s23 + $0x204] sm:$0xf0]  ;;  %v2288_v4 = vor.u32 %v2812_v55, %v2287_v54 }
  0x6b   : > { %1570 = vmatpush.bf16.msrb.mxu2 %v2384_v8  ;;  %v2415_v59 = vld [vmem:[%s3337_s23 + $0x390] sm:$0xf]  ;;  %v2844_v60 = vld [vmem:[%s3337_s23 + $0x394] sm:$0xf0]  ;;  %v2279_v1 = vld [vmem:[%s3337_s23 + $0x280] sm:$0xf]  ;;  %v2352_v5 = vor.u32 %v2828_v58, %v2351_v56  ;;  %v2216_v15 = vor.u32 %v2794_v62, %v2215_v61 }
  0x6c   : > { %1583 = vmatpush.bf16.msrb.mxu3 %v2448_v12  ;;  %v2810_v2 = vld [vmem:[%s3337_s23 + $0x284] sm:$0xf0]  ;;  %299 = vst [vmem:[#allocation1 + $0x30] ss:$2 sm:$0xff] %v284_v63  ;;  %v2343_v6 = vld [vmem:[%s3337_s23 + $0x300] sm:$0xf]  ;;  %v2416_v8 = vor.u32 %v2844_v60, %v2415_v59 }
  0x6d   : > { %1545 = vmatpush.bf16.msrb.mxu0 %v2248_v18  ;;  %v283_v3 = vld [vmem:[%s3361_s10 + $0x10] sm:$0xff]  ;;  %v2407_v9 = vld [vmem:[%s3337_s23 + $0x380] sm:$0xf]  ;;  %v2527_v11 = vld [vmem:[%s3337_s23 + $0x470] sm:$0xf]  ;;  %v2280_v19 = vor.u32 %v2810_v2, %v2279_v1 }
  0x6e   : > { %1558 = vmatpush.bf16.msrb.mxu1 %v2312_v22  ;;  %v2826_v7 = vld [vmem:[%s3337_s23 + $0x304] sm:$0xf0]  ;;  %297 = vst [vmem:[#allocation1 + $0x20] ss:$2 sm:$0xff] %v283_v3  ;;  %v2872_v12 = vld [vmem:[%s3337_s23 + $0x474] sm:$0xf0] }
  0x6f   : > { %1571 = vmatpush.bf16.msrb.mxu2 %v2376_v23  ;;  %v2842_v10 = vld [vmem:[%s3337_s23 + $0x384] sm:$0xf0]  ;;  %v2591_v13 = vld [vmem:[%s3337_s23 + $0x4f0] sm:$0xf]  ;;  %v2888_v14 = vld [vmem:[%s3337_s23 + $0x4f4] sm:$0xf0]  ;;  %v2344_v20 = vor.u32 %v2826_v7, %v2343_v6  ;;  %v2528_v25 = vor.u32 %v2872_v12, %v2527_v11 }
  0x70   : > { %1584 = vmatpush.bf16.msrb.mxu3 %v2440_v26  ;;  %v2655_v16 = vld [vmem:[%s3337_s23 + $0x570] sm:$0xf]  ;;  %v2904_v17 = vld [vmem:[%s3337_s23 + $0x574] sm:$0xf0]  ;;  %v2519_v22 = vld [vmem:[%s3337_s23 + $0x460] sm:$0xf]  ;;  %v2408_v24 = vor.u32 %v2842_v10, %v2407_v9  ;;  %v2592_v31 = vor.u32 %v2888_v14, %v2591_v13 }
  0x71   : > { %1546 = vmatpush.bf16.msrb.mxu0 %v2240_v34  ;;  %v2719_v18 = vld [vmem:[%s3337_s23 + $0x5f0] sm:$0xf]  ;;  %v2920_v21 = vld [vmem:[%s3337_s23 + $0x5f4] sm:$0xf0]  ;;  %v2870_v23 = vld [vmem:[%s3337_s23 + $0x464] sm:$0xf0]  ;;  %v2656_v33 = vor.u32 %v2904_v17, %v2655_v16 }
  0x72   : > { %1559 = vmatpush.bf16.msrb.mxu1 %v2304_v38  ;;  %v2583_v26 = vld [vmem:[%s3337_s23 + $0x4e0] sm:$0xf]  ;;  %v2886_v27 = vld [vmem:[%s3337_s23 + $0x4e4] sm:$0xf0]  ;;  %v2720_v36 = vor.u32 %v2920_v21, %v2719_v18  ;;  %v2520_v44 = vor.u32 %v2870_v23, %v2519_v22  ;;  %v2868_v50 = vld [vmem:[%s3337_s23 + $0x454] sm:$0xf0] }
  0x73   : > { %1572 = vmatpush.bf16.msrb.mxu2 %v2368_v39  ;;  %v2647_v28 = vld [vmem:[%s3337_s23 + $0x560] sm:$0xf]  ;;  %v2902_v30 = vld [vmem:[%s3337_s23 + $0x564] sm:$0xf0]  ;;  %v2584_v47 = vor.u32 %v2886_v27, %v2583_v26  ;;  %v2575_v51 = vld [vmem:[%s3337_s23 + $0x4d0] sm:$0xf] }
  0x74   : > { %1585 = vmatpush.bf16.msrb.mxu3 %v2432_v42  ;;  %v306_v34 = vld.sshfl [vmem:[#allocation1 + $0x30] sm:$0xff pattern:$0x75316420]  ;;  %v307_v35 = vld.sshfl [vmem:[#allocation1 + $0x38] sm:$0xff pattern:$0x75316420]  ;;  %v2648_v48 = vor.u32 %v2902_v30, %v2647_v28 }
  0x75   : > { %1547 = vmatpush.bf16.msrb.mxu0 %v2232_v49  ;;  %v2711_v37 = vld [vmem:[%s3337_s23 + $0x5e0] sm:$0xf]  ;;  %v3526_v38 = vpack.c.bf16 %v306_v34, %v306_v34  ;;  %v2918_v40 = vld [vmem:[%s3337_s23 + $0x5e4] sm:$0xf0]  ;;  %v3529_v42 = vpack.c.bf16 %v307_v35, %v307_v35  ;;  %v2511_v49 = vld [vmem:[%s3337_s23 + $0x450] sm:$0xf] }
  0x76   : > { %1560 = vmatpush.bf16.msrb.mxu1 %v2296_v52  ;;  %v305_v39 = vld.sshfl [vmem:[#allocation1 + $0x28] sm:$0xff pattern:$0x75316420]  ;;  %v304_v41 = vld.sshfl [vmem:[#allocation1 + $0x20] sm:$0xff pattern:$0x75316420]  ;;  %v2712_v52 = vor.u32 %v2918_v40, %v2711_v37  ;;  %v2512_v59 = vor.u32 %v2868_v50, %v2511_v49 }
  0x77   : > { %1573 = vmatpush.bf16.msrb.mxu2 %v2360_v53  ;;  %v3531_v43 = vpack.c.bf16 %v305_v39, %v305_v39  ;;  %v3537_v53 = vpack.c.bf16 %v304_v41, %v304_v41  ;;  %v2884_v54 = vld [vmem:[%s3337_s23 + $0x4d4] sm:$0xf0]  ;;  %v2639_v55 = vld [vmem:[%s3337_s23 + $0x550] sm:$0xf]  ;;  %v2503_v62 = vld [vmem:[%s3337_s23 + $0x440] sm:$0xf] }
  0x78   : > { %1586 = vmatpush.bf16.msrb.mxu3 %v2424_v57  ;;  %v2900_v56 = vld [vmem:[%s3337_s23 + $0x554] sm:$0xf0]  ;;  %v2703_v57 = vld [vmem:[%s3337_s23 + $0x5d0] sm:$0xf]  ;;  %v2576_v60 = vor.u32 %v2884_v54, %v2575_v51  ;;  %v2866_v63 = vld [vmem:[%s3337_s23 + $0x444] sm:$0xf0] }
  0x79   : > { %1548 = vmatpush.bf16.msrb.mxu0 %v2224_v0  ;;  %v2916_v58 = vld [vmem:[%s3337_s23 + $0x5d4] sm:$0xf0]  ;;  %v2640_v61 = vor.u32 %v2900_v56, %v2639_v55  ;;  %v2567_v0 = vld [vmem:[%s3337_s23 + $0x4c0] sm:$0xf]  ;;  %v2882_v2 = vld [vmem:[%s3337_s23 + $0x4c4] sm:$0xf0]  ;;  %v2504_v7 = vor.u32 %v2866_v63, %v2503_v62 }
  0x7a   : > { %1561 = vmatpush.bf16.msrb.mxu1 %v2288_v4  ;;  %v2704_v1 = vor.u32 %v2916_v58, %v2703_v57  ;;  %v2631_v3 = vld [vmem:[%s3337_s23 + $0x540] sm:$0xf]  ;;  %v2898_v4 = vld [vmem:[%s3337_s23 + $0x544] sm:$0xf0]  ;;  %v2495_v10 = vld [vmem:[%s3337_s23 + $0x430] sm:$0xf] }
  0x7b   : > { %1574 = vmatpush.bf16.msrb.mxu2 %v2352_v5  ;;  %v2695_v5 = vld [vmem:[%s3337_s23 + $0x5c0] sm:$0xf]  ;;  %v2914_v6 = vld [vmem:[%s3337_s23 + $0x5c4] sm:$0xf0]  ;;  %v2632_v9 = vor.u32 %v2898_v4, %v2631_v3  ;;  %v2864_v11 = vld [vmem:[%s3337_s23 + $0x434] sm:$0xf0] }
  0x7c   : > { %1587 = vmatpush.bf16.msrb.mxu3 %v2416_v8  ;;  %v2568_v8 = vor.u32 %v2882_v2, %v2567_v0  ;;  %v2559_v12 = vld [vmem:[%s3337_s23 + $0x4b0] sm:$0xf]  ;;  %v2696_v13 = vor.u32 %v2914_v6, %v2695_v5  ;;  %v2880_v14 = vld [vmem:[%s3337_s23 + $0x4b4] sm:$0xf0]  ;;  %v2487_v22 = vld [vmem:[%s3337_s23 + $0x420] sm:$0xf] }
  0x7d   : > { %1549 = vmatpush.bf16.msrb.mxu0 %v2216_v15  ;;  %v2623_v15 = vld [vmem:[%s3337_s23 + $0x530] sm:$0xf]  ;;  %v2896_v16 = vld [vmem:[%s3337_s23 + $0x534] sm:$0xf0]  ;;  %v2862_v23 = vld [vmem:[%s3337_s23 + $0x424] sm:$0xf0] }
  0x7e   : > { %1562 = vmatpush.bf16.msrb.mxu1 %v2280_v19  ;;  %v2687_v17 = vld [vmem:[%s3337_s23 + $0x5b0] sm:$0xf]  ;;  %v2912_v18 = vld [vmem:[%s3337_s23 + $0x5b4] sm:$0xf0]  ;;  %v2496_v19 = vor.u32 %v2864_v11, %v2495_v10  ;;  %v2624_v21 = vor.u32 %v2896_v16, %v2623_v15  ;;  %v2878_v26 = vld [vmem:[%s3337_s23 + $0x4a4] sm:$0xf0] }
  0x7f   : > { %1575 = vmatpush.bf16.msrb.mxu2 %v2344_v20  ;;  %v2560_v20 = vor.u32 %v2880_v14, %v2559_v12  ;;  %v2615_v27 = vld [vmem:[%s3337_s23 + $0x520] sm:$0xf]  ;;  %v2894_v28 = vld [vmem:[%s3337_s23 + $0x524] sm:$0xf0]  ;;  %v2860_v37 = vld [vmem:[%s3337_s23 + $0x414] sm:$0xf0] }
  0x80   : > { %1588 = vmatpush.bf16.msrb.mxu3 %v2408_v24  ;;  %1550 = vmatmul.bf16.vlgmr.msrb.gmra.mxu0 %v3537_v53  ;;  %v2551_v24 = vld [vmem:[%s3337_s23 + $0x4a0] sm:$0xf]  ;;  %v2616_v35 = vor.u32 %v2894_v28, %v2615_v27  ;;  %v2543_v39 = vld [vmem:[%s3337_s23 + $0x490] sm:$0xf]  ;;  %v2876_v41 = vld [vmem:[%s3337_s23 + $0x494] sm:$0xf0] }
  0x81   : > { %1594 = vmatpush.bf16.msra.mxu0 %v2528_v25  ;;  %1563 = vmatmul.bf16.vlgmr.msrb.gmra.mxu1 %v3531_v43  ;;  %v2688_v25 = vor.u32 %v2912_v18, %v2687_v17  ;;  %v2679_v30 = vld [vmem:[%s3337_s23 + $0x5a0] sm:$0xf]  ;;  %v2552_v34 = vor.u32 %v2878_v26, %v2551_v24  ;;  %v2908_v49 = vld [vmem:[%s3337_s23 + $0x594] sm:$0xf0]  ;;  %v2874_v55 = vld [vmem:[%s3337_s23 + $0x484] sm:$0xf0]  ;;  %v2544_v56 = vor.u32 %v2876_v41, %v2543_v39 }
  0x82   : > { %1607 = vmatpush.bf16.msra.mxu1 %v2592_v31  ;;  %1576 = vmatmul.bf16.vlgmr.msrb.gmra.mxu2 %v3526_v38  ;;  %v2910_v31 = vld [vmem:[%s3337_s23 + $0x5a4] sm:$0xf0]  ;;  %v2471_v50 = vld [vmem:[%s3337_s23 + $0x400] sm:$0xf]  ;;  %v2743_v63 = vld [vmem:[%s3337_s23 + $0x74] sm:$0xf] }
  0x83   : > { %1620 = vmatpush.bf16.msra.mxu2 %v2656_v33  ;;  %1589 = vmatmul.bf16.vlgmr.msrb.gmra.mxu3 %v3529_v42  ;;  %v2488_v33 = vor.u32 %v2862_v23, %v2487_v22  ;;  %v2680_v40 = vor.u32 %v2910_v31, %v2679_v30  ;;  %v2535_v54 = vld [vmem:[%s3337_s23 + $0x480] sm:$0xf]  ;;  %v2906_v62 = vld [vmem:[%s3337_s23 + $0x584] sm:$0xf0]  ;;  %v2017_v0 = vld [vmem:[%s3337_s23 + $0x78] sm:$0xf0] }
  0x84   : > { %1633 = vmatpush.bf16.msra.mxu3 %v2720_v36  ;;  %v2479_v36 = vld [vmem:[%s3337_s23 + $0x410] sm:$0xf]  ;;  %v2599_v58 = vld [vmem:[%s3337_s23 + $0x500] sm:$0xf]  ;;  %v2081_v2 = vld [vmem:[%s3337_s23 + $0xf8] sm:$0xf0] }
  0x85   : > { %1595 = vmatpush.bf16.msra.mxu0 %v2520_v44  ;;  %v2607_v44 = vld [vmem:[%s3337_s23 + $0x510] sm:$0xf]  ;;  %v2480_v51 = vor.u32 %v2860_v37, %v2479_v36  ;;  %v2775_v3 = vld [vmem:[%s3337_s23 + $0x174] sm:$0xf]  ;;  %v2145_v5 = vld [vmem:[%s3337_s23 + $0x178] sm:$0xf0] }
  0x86   : > { %1608 = vmatpush.bf16.msra.mxu1 %v2584_v47  ;;  %v2892_v47 = vld [vmem:[%s3337_s23 + $0x514] sm:$0xf0]  ;;  %v2791_v6 = vld [vmem:[%s3337_s23 + $0x1f4] sm:$0xf]  ;;  %v2148_v17 = vor.u32 %v2775_v3, %v2145_v5  ;;  %v2741_v18 = vld [vmem:[%s3337_s23 + $0x64] sm:$0xf] }
  0x87   : > { %1621 = vmatpush.bf16.msra.mxu2 %v2648_v48  ;;  %v2671_v48 = vld [vmem:[%s3337_s23 + $0x590] sm:$0xf]  ;;  %v2608_v57 = vor.u32 %v2892_v47, %v2607_v44  ;;  %v310_v10 = vld.sshfl [vmem:[#allocation1] sm:$0xff pattern:$0x75316420] }
  0x88   : > { %1634 = vmatpush.bf16.msra.mxu3 %v2712_v52  ;;  %v2858_v52 = vld [vmem:[%s3337_s23 + $0x404] sm:$0xf0]  ;;  %v311_v14 = vld.sshfl [vmem:[#allocation1 + $0x8] sm:$0xff pattern:$0x75316420]  ;;  %v3598_v22 = vpack.c.bf16 %v310_v10, %v310_v10 }
  0x89   : > { %1596 = vmatpush.bf16.msra.mxu0 %v2512_v59  ;;  %v2890_v59 = vld [vmem:[%s3337_s23 + $0x504] sm:$0xf0]  ;;  %v2472_v4 = vor.u32 %v2858_v52, %v2471_v50  ;;  %v313_v15 = vld.sshfl [vmem:[#allocation1 + $0x18] sm:$0xff pattern:$0x75316420]  ;;  %v3605_v27 = vpack.c.bf16 %v311_v14, %v311_v14 }
  0x8a   : > { %1609 = vmatpush.bf16.msra.mxu1 %v2576_v60  ;;  %v2663_v60 = vld [vmem:[%s3337_s23 + $0x580] sm:$0xf]  ;;  %v312_v11 = vld.sshfl [vmem:[#allocation1 + $0x10] sm:$0xff pattern:$0x75316420]  ;;  %v3609_v31 = vpack.c.bf16 %v313_v15, %v313_v15 }
  0x8b   : > { %1622 = vmatpush.bf16.msra.mxu2 %v2640_v61  ;;  %v2672_v61 = vor.u32 %v2908_v49, %v2671_v48  ;;  %v2664_v12 = vor.u32 %v2906_v62, %v2663_v60  ;;  %v2073_v23 = vld [vmem:[%s3337_s23 + $0xe8] sm:$0xf0]  ;;  %v2773_v24 = vld [vmem:[%s3337_s23 + $0x164] sm:$0xf]  ;;  %v3603_v26 = vpack.c.bf16 %v312_v11, %v312_v11  ;;  %v2739_v36 = vld [vmem:[%s3337_s23 + $0x54] sm:$0xf] }
  0x8c   : > { %1635 = vmatpush.bf16.msra.mxu3 %v2704_v1  ;;  %v2759_v1 = vld [vmem:[%s3337_s23 + $0xf4] sm:$0xf]  ;;  %v2789_v28 = vld [vmem:[%s3337_s23 + $0x1e4] sm:$0xf]  ;;  %v2201_v30 = vld [vmem:[%s3337_s23 + $0x1e8] sm:$0xf0] }
  0x8d   : > { %1597 = vmatpush.bf16.msra.mxu0 %v2504_v7  ;;  %v2209_v7 = vld [vmem:[%s3337_s23 + $0x1f8] sm:$0xf0]  ;;  %v2084_v16 = vor.u32 %v2759_v1, %v2081_v2  ;;  %v2755_v39 = vld [vmem:[%s3337_s23 + $0xd4] sm:$0xf]  ;;  %v2121_v60 = vld [vmem:[%s3337_s23 + $0x148] sm:$0xf0] }
  0x8e   : > { %1610 = vmatpush.bf16.msra.mxu1 %v2568_v8  ;;  %v2536_v8 = vor.u32 %v2874_v55, %v2535_v54  ;;  %v2001_v37 = vld [vmem:[%s3337_s23 + $0x58] sm:$0xf0]  ;;  %v2771_v44 = vld [vmem:[%s3337_s23 + $0x154] sm:$0xf]  ;;  %v2737_v54 = vld [vmem:[%s3337_s23 + $0x44] sm:$0xf] }
  0x8f   : > { %1623 = vmatpush.bf16.msra.mxu2 %v2632_v9  ;;  %v2600_v9 = vor.u32 %v2890_v59, %v2599_v58  ;;  %v2065_v41 = vld [vmem:[%s3337_s23 + $0xd8] sm:$0xf0]  ;;  %v2787_v48 = vld [vmem:[%s3337_s23 + $0x1d4] sm:$0xf]  ;;  %v2004_v50 = vor.u32 %v2739_v36, %v2001_v37  ;;  %v1993_v55 = vld [vmem:[%s3337_s23 + $0x48] sm:$0xf0] }
  0x90   : > { %1636 = vmatpush.bf16.msra.mxu3 %v2696_v13  ;;  %v2020_v13 = vor.u32 %v2743_v63, %v2017_v0  ;;  %v2129_v47 = vld [vmem:[%s3337_s23 + $0x158] sm:$0xf0]  ;;  %v2057_v58 = vld [vmem:[%s3337_s23 + $0xc8] sm:$0xf0]  ;;  %v2769_v59 = vld [vmem:[%s3337_s23 + $0x144] sm:$0xf]  ;;  %v1996_v63 = vor.u32 %v2737_v54, %v1993_v55 }
  0x91   : > { %1598 = vmatpush.bf16.msra.mxu0 %v2496_v19  ;;  %v2009_v19 = vld [vmem:[%s3337_s23 + $0x68] sm:$0xf0]  ;;  %v2193_v49 = vld [vmem:[%s3337_s23 + $0x1d8] sm:$0xf0]  ;;  %v2132_v52 = vor.u32 %v2771_v44, %v2129_v47  ;;  %v2124_v1 = vor.u32 %v2769_v59, %v2121_v60  ;;  %v2735_v2 = vld [vmem:[%s3337_s23 + $0x34] sm:$0xf] }
  0x92   : > { %1611 = vmatpush.bf16.msra.mxu1 %v2560_v20  ;;  %v2757_v20 = vld [vmem:[%s3337_s23 + $0xe4] sm:$0xf]  ;;  %v2185_v62 = vld [vmem:[%s3337_s23 + $0x1c8] sm:$0xf0]  ;;  %v1985_v3 = vld [vmem:[%s3337_s23 + $0x38] sm:$0xf0] }
  0x93   : > { %1624 = vmatpush.bf16.msra.mxu2 %v2624_v21  ;;  %v2212_v21 = vor.u32 %v2791_v6, %v2209_v7  ;;  %v2049_v6 = vld [vmem:[%s3337_s23 + $0xb8] sm:$0xf0]  ;;  %v2767_v7 = vld [vmem:[%s3337_s23 + $0x134] sm:$0xf]  ;;  %v1988_v11 = vor.u32 %v2735_v2, %v1985_v3  ;;  %v2733_v14 = vld [vmem:[%s3337_s23 + $0x24] sm:$0xf] }
  0x94   : > { %1637 = vmatpush.bf16.msra.mxu3 %v2688_v25  ;;  %v2137_v25 = vld [vmem:[%s3337_s23 + $0x168] sm:$0xf0]  ;;  %v2177_v10 = vld [vmem:[%s3337_s23 + $0x1b8] sm:$0xf0]  ;;  %v2763_v37 = vld [vmem:[%s3337_s23 + $0x114] sm:$0xf] }
  0x95   : > { %1599 = vmatpush.bf16.msra.mxu0 %v2488_v33  ;;  %v2012_v33 = vor.u32 %v2741_v18, %v2009_v19  ;;  %v1977_v15 = vld [vmem:[%s3337_s23 + $0x28] sm:$0xf0]  ;;  %v2765_v19 = vld [vmem:[%s3337_s23 + $0x124] sm:$0xf]  ;;  %v2033_v36 = vld [vmem:[%s3337_s23 + $0x98] sm:$0xf0] }
  0x96   : > { %1612 = vmatpush.bf16.msra.mxu1 %v2552_v34  ;;  %v2076_v34 = vor.u32 %v2757_v20, %v2073_v23  ;;  %v2041_v18 = vld [vmem:[%s3337_s23 + $0xa8] sm:$0xf0]  ;;  %v2729_v47 = vld [vmem:[%s3337_s23 + $0x4] sm:$0xf]  ;;  %v2807_v59 = vld [vmem:[%s3337_s23 + $0x274] sm:$0xf] }
  0x97   : > { %1625 = vmatpush.bf16.msra.mxu2 %v2616_v35  ;;  %v2140_v35 = vor.u32 %v2773_v24, %v2137_v25  ;;  %v2105_v20 = vld [vmem:[%s3337_s23 + $0x128] sm:$0xf0]  ;;  %v1980_v24 = vor.u32 %v2733_v14, %v1977_v15  ;;  %v2761_v54 = vld [vmem:[%s3337_s23 + $0x104] sm:$0xf]  ;;  %v2273_v60 = vld [vmem:[%s3337_s23 + $0x278] sm:$0xf0] }
  0x98   : > { %1638 = vmatpush.bf16.msra.mxu3 %v2680_v40  ;;  %v2204_v40 = vor.u32 %v2789_v28, %v2201_v30  ;;  %v2169_v23 = vld [vmem:[%s3337_s23 + $0x1a8] sm:$0xf0]  ;;  %v2108_v28 = vor.u32 %v2765_v19, %v2105_v20  ;;  %v2731_v30 = vld [vmem:[%s3337_s23 + $0x14] sm:$0xf]  ;;  %v2837_v15 = vld [vmem:[%s3337_s23 + $0x364] sm:$0xf] }
  0x99   : > { %1600 = vmatpush.bf16.msra.mxu0 %v2480_v51  ;;  %v2068_v51 = vor.u32 %v2755_v39, %v2065_v41  ;;  %v2097_v39 = vld [vmem:[%s3337_s23 + $0x118] sm:$0xf0]  ;;  %v2329_v14 = vld [vmem:[%s3337_s23 + $0x2e8] sm:$0xf0] }
  0x9a   : > { %1613 = vmatpush.bf16.msra.mxu1 %v2544_v56  ;;  %v2753_v56 = vld [vmem:[%s3337_s23 + $0xc4] sm:$0xf]  ;;  %v2161_v41 = vld [vmem:[%s3337_s23 + $0x198] sm:$0xf0] }
  0x9b   : > { %1626 = vmatpush.bf16.msra.mxu2 %v2608_v57  ;;  %v2196_v57 = vor.u32 %v2787_v48, %v2193_v49  ;;  %v2060_v0 = vor.u32 %v2753_v56, %v2057_v58  ;;  %v1961_v48 = vld [vmem:[%s3337_s23 + $0x8] sm:$0xf0] }
  0x9c   : > { %1639 = vmatpush.bf16.msra.mxu3 %v2672_v61  ;;  %v2785_v61 = vld [vmem:[%s3337_s23 + $0x1c4] sm:$0xf]  ;;  %v2089_v56 = vld [vmem:[%s3337_s23 + $0x108] sm:$0xf0] }
  0x9d   : > { %1601 = vmatpush.bf16.msra.mxu0 %v2472_v4  ;;  %v2751_v4 = vld [vmem:[%s3337_s23 + $0xb4] sm:$0xf]  ;;  %v2188_v5 = vor.u32 %v2785_v61, %v2185_v62  ;;  %v2153_v58 = vld [vmem:[%s3337_s23 + $0x188] sm:$0xf0]  ;;  %v1964_v62 = vor.u32 %v2729_v47, %v1961_v48  ;;  %v2092_v3 = vor.u32 %v2761_v54, %v2089_v56 }
  0x9e   : > { %1614 = vmatpush.bf16.msra.mxu1 %v2536_v8  ;;  %v2113_v8 = vld [vmem:[%s3337_s23 + $0x138] sm:$0xf0]  ;;  %v2823_v61 = vld [vmem:[%s3337_s23 + $0x2f4] sm:$0xf]  ;;  %v2313_v47 = vld [vmem:[%s3337_s23 + $0x2c8] sm:$0xf0] }
  0x9f   : > { %1627 = vmatpush.bf16.msra.mxu2 %v2600_v9  ;;  %v2783_v9 = vld [vmem:[%s3337_s23 + $0x1b4] sm:$0xf]  ;;  %v2377_v48 = vld [vmem:[%s3337_s23 + $0x348] sm:$0xf0] }
  0xa0   : > { %1640 = vmatpush.bf16.msra.mxu3 %v2664_v12  ;;  %1602 = vmatmul.bf16.vlgmr.msra.gmra.mxu0 %v3598_v22  ;;  %v2052_v12 = vor.u32 %v2751_v4, %v2049_v6  ;;  %v2855_v4 = vld [vmem:[%s3337_s23 + $0x3f4] sm:$0xf] }
  0xa1   : > { %1646 = vmatpush.bf16.msrb.mxu0 %v2020_v13  ;;  %1615 = vmatmul.bf16.vlgmr.msra.gmra.mxu1 %v3605_v27  ;;  %v2116_v13 = vor.u32 %v2767_v7, %v2113_v8  ;;  %v2276_v7 = vor.u32 %v2807_v59, %v2273_v60  ;;  %v2799_v54 = vld [vmem:[%s3337_s23 + $0x234] sm:$0xf]  ;;  %v2369_v60 = vld [vmem:[%s3337_s23 + $0x338] sm:$0xf0] }
  0xa2   : > { %1659 = vmatpush.bf16.msrb.mxu1 %v2084_v16  ;;  %1628 = vmatmul.bf16.vlgmr.msra.gmra.mxu2 %v3603_v26  ;;  %v2749_v16 = vld [vmem:[%s3337_s23 + $0xa4] sm:$0xf]  ;;  %v2815_v56 = vld [vmem:[%s3337_s23 + $0x2b4] sm:$0xf] }
  0xa3   : > { %1672 = vmatpush.bf16.msrb.mxu2 %v2148_v17  ;;  %1641 = vmatmul.bf16.vlgmr.msra.gmra.mxu3 %v3609_v31  ;;  %v2180_v17 = vor.u32 %v2783_v9, %v2177_v10  ;;  %v2044_v25 = vor.u32 %v2749_v16, %v2041_v18  ;;  %v2805_v10 = vld [vmem:[%s3337_s23 + $0x264] sm:$0xf]  ;;  %v2393_v16 = vld [vmem:[%s3337_s23 + $0x368] sm:$0xf0]  ;;  %v2831_v59 = vld [vmem:[%s3337_s23 + $0x334] sm:$0xf] }
  0xa4   : > { %1685 = vmatpush.bf16.msrb.mxu3 %v2212_v21  ;;  %v2781_v21 = vld [vmem:[%s3337_s23 + $0x1a4] sm:$0xf]  ;;  %v2457_v18 = vld [vmem:[%s3337_s23 + $0x3e8] sm:$0xf0] }
  0xa5   : > { %1647 = vmatpush.bf16.msrb.mxu0 %v2012_v33  ;;  %v1969_v33 = vld [vmem:[%s3337_s23 + $0x18] sm:$0xf0] }
  0xa6   : > { %1660 = vmatpush.bf16.msrb.mxu1 %v2076_v34  ;;  %v2747_v34 = vld [vmem:[%s3337_s23 + $0x94] sm:$0xf]  ;;  %v1972_v44 = vor.u32 %v2731_v30, %v1969_v33  ;;  %v2321_v30 = vld [vmem:[%s3337_s23 + $0x2d8] sm:$0xf0] }
  0xa7   : > { %1673 = vmatpush.bf16.msrb.mxu2 %v2140_v35  ;;  %v2172_v35 = vor.u32 %v2781_v21, %v2169_v23  ;;  %v2036_v49 = vor.u32 %v2747_v34, %v2033_v36  ;;  %v2396_v21 = vor.u32 %v2837_v15, %v2393_v16  ;;  %v2803_v23 = vld [vmem:[%s3337_s23 + $0x254] sm:$0xf]  ;;  %v2385_v34 = vld [vmem:[%s3337_s23 + $0x358] sm:$0xf0] }
  0xa8   : > { %1686 = vmatpush.bf16.msrb.mxu3 %v2204_v40  ;;  %v2779_v40 = vld [vmem:[%s3337_s23 + $0x194] sm:$0xf]  ;;  %v2449_v36 = vld [vmem:[%s3337_s23 + $0x3d8] sm:$0xf0] }
  0xa9   : > { %1648 = vmatpush.bf16.msrb.mxu0 %v2004_v50  ;;  %v2100_v50 = vor.u32 %v2763_v37, %v2097_v39  ;;  %v2164_v55 = vor.u32 %v2779_v40, %v2161_v41  ;;  %v2835_v33 = vld [vmem:[%s3337_s23 + $0x354] sm:$0xf]  ;;  %v2249_v41 = vld [vmem:[%s3337_s23 + $0x248] sm:$0xf0]  ;;  %v2225_v15 = vld [vmem:[%s3337_s23 + $0x218] sm:$0xf0] }
  0xaa   : > { %1661 = vmatpush.bf16.msrb.mxu1 %v2068_v51  ;;  %v2745_v51 = vld [vmem:[%s3337_s23 + $0x84] sm:$0xf]  ;;  %v2388_v40 = vor.u32 %v2835_v33, %v2385_v34  ;;  %v2811_v16 = vld [vmem:[%s3337_s23 + $0x294] sm:$0xf] }
  0xab   : > { %1674 = vmatpush.bf16.msrb.mxu2 %v2132_v52  ;;  %v2025_v52 = vld [vmem:[%s3337_s23 + $0x88] sm:$0xf0]  ;;  %v2809_v34 = vld [vmem:[%s3337_s23 + $0x284] sm:$0xf] }
  0xac   : > { %1687 = vmatpush.bf16.msrb.mxu3 %v2196_v57  ;;  %v2777_v57 = vld [vmem:[%s3337_s23 + $0x184] sm:$0xf]  ;;  %v2028_v2 = vor.u32 %v2745_v51, %v2025_v52 }
  0xad   : > { %1649 = vmatpush.bf16.msrb.mxu0 %v1996_v63  ;;  %v2337_v63 = vld [vmem:[%s3337_s23 + $0x2f8] sm:$0xf0]  ;;  %v2156_v6 = vor.u32 %v2777_v57, %v2153_v58 }
  0xae   : > { %1662 = vmatpush.bf16.msrb.mxu1 %v2060_v0  ;;  %v2839_v0 = vld [vmem:[%s3337_s23 + $0x374] sm:$0xf]  ;;  %v2340_v8 = vor.u32 %v2823_v61, %v2337_v63  ;;  %v2305_v58 = vld [vmem:[%s3337_s23 + $0x2b8] sm:$0xf0] }
  0xaf   : > { %1675 = vmatpush.bf16.msrb.mxu2 %v2124_v1  ;;  %v2401_v1 = vld [vmem:[%s3337_s23 + $0x378] sm:$0xf0]  ;;  %v2847_v61 = vld [vmem:[%s3337_s23 + $0x3b4] sm:$0xf] }
  0xb0   : > { %1688 = vmatpush.bf16.msrb.mxu3 %v2188_v5  ;;  %v2465_v5 = vld [vmem:[%s3337_s23 + $0x3f8] sm:$0xf0]  ;;  %v2404_v9 = vor.u32 %v2839_v0, %v2401_v1  ;;  %v2308_v0 = vor.u32 %v2815_v56, %v2305_v58  ;;  %v2372_v1 = vor.u32 %v2831_v59, %v2369_v60  ;;  %v2869_v58 = vld [vmem:[%s3337_s23 + $0x464] sm:$0xf]  ;;  %v2521_v59 = vld [vmem:[%s3337_s23 + $0x468] sm:$0xf0] }
  0xb1   : > { %1650 = vmatpush.bf16.msrb.mxu0 %v1988_v11  ;;  %v2265_v11 = vld [vmem:[%s3337_s23 + $0x268] sm:$0xf0]  ;;  %v2885_v60 = vld [vmem:[%s3337_s23 + $0x4e4] sm:$0xf] }
  0xb2   : > { %1663 = vmatpush.bf16.msrb.mxu1 %v2052_v12  ;;  %v2821_v12 = vld [vmem:[%s3337_s23 + $0x2e4] sm:$0xf]  ;;  %v2268_v19 = vor.u32 %v2805_v10, %v2265_v11  ;;  %v2425_v10 = vld [vmem:[%s3337_s23 + $0x3a8] sm:$0xf0] }
  0xb3   : > { %1676 = vmatpush.bf16.msrb.mxu2 %v2116_v13  ;;  %v2468_v13 = vor.u32 %v2855_v4, %v2465_v5  ;;  %v2332_v20 = vor.u32 %v2821_v12, %v2329_v14  ;;  %v2813_v4 = vld [vmem:[%s3337_s23 + $0x2a4] sm:$0xf]  ;;  %v2795_v14 = vld [vmem:[%s3337_s23 + $0x214] sm:$0xf] }
  0xb4   : > { %1689 = vmatpush.bf16.msrb.mxu3 %v2180_v17  ;;  %v2853_v17 = vld [vmem:[%s3337_s23 + $0x3e4] sm:$0xf] }
  0xb5   : > { %1651 = vmatpush.bf16.msrb.mxu0 %v1980_v24  ;;  %v2257_v24 = vld [vmem:[%s3337_s23 + $0x258] sm:$0xf0] }
  0xb6   : > { %1664 = vmatpush.bf16.msrb.mxu1 %v2044_v25  ;;  %v2819_v25 = vld [vmem:[%s3337_s23 + $0x2d4] sm:$0xf]  ;;  %v2260_v37 = vor.u32 %v2803_v23, %v2257_v24  ;;  %v2417_v23 = vld [vmem:[%s3337_s23 + $0x398] sm:$0xf0]  ;;  %v2228_v24 = vor.u32 %v2795_v14, %v2225_v15 }
  0xb7   : > { %1677 = vmatpush.bf16.msrb.mxu2 %v2108_v28  ;;  %v2460_v28 = vor.u32 %v2853_v17, %v2457_v18  ;;  %v2324_v39 = vor.u32 %v2819_v25, %v2321_v30  ;;  %v2289_v18 = vld [vmem:[%s3337_s23 + $0x298] sm:$0xf0]  ;;  %v2793_v25 = vld [vmem:[%s3337_s23 + $0x204] sm:$0xf] }
  0xb8   : > { %1690 = vmatpush.bf16.msrb.mxu3 %v2172_v35  ;;  %v2851_v35 = vld [vmem:[%s3337_s23 + $0x3d4] sm:$0xf]  ;;  %v2292_v30 = vor.u32 %v2811_v16, %v2289_v18  ;;  %v2705_v14 = vld [vmem:[%s3337_s23 + $0x5d8] sm:$0xf0]  ;;  %v2881_v18 = vld [vmem:[%s3337_s23 + $0x4c4] sm:$0xf] }
  0xb9   : > { %1652 = vmatpush.bf16.msrb.mxu0 %v1972_v44  ;;  %v2817_v44 = vld [vmem:[%s3337_s23 + $0x2c4] sm:$0xf] }
  0xba   : > { %1665 = vmatpush.bf16.msrb.mxu1 %v2036_v49  ;;  %v2849_v49 = vld [vmem:[%s3337_s23 + $0x3c4] sm:$0xf]  ;;  %v2316_v51 = vor.u32 %v2817_v44, %v2313_v47  ;;  %v2529_v44 = vld [vmem:[%s3337_s23 + $0x478] sm:$0xf0] }
  0xbb   : > { %1678 = vmatpush.bf16.msrb.mxu2 %v2100_v50 }
  0xbc   : > { %1691 = vmatpush.bf16.msrb.mxu3 %v2164_v55  ;;  %v2241_v55 = vld [vmem:[%s3337_s23 + $0x238] sm:$0xf0] }
  0xbd   : > { %1653 = vmatpush.bf16.msrb.mxu0 %v1964_v62  ;;  %v2433_v62 = vld [vmem:[%s3337_s23 + $0x3b8] sm:$0xf0]  ;;  %v2244_v63 = vor.u32 %v2799_v54, %v2241_v55 }
  0xbe   : > { %1666 = vmatpush.bf16.msrb.mxu1 %v2028_v2  ;;  %v2797_v2 = vld [vmem:[%s3337_s23 + $0x224] sm:$0xf]  ;;  %v2436_v5 = vor.u32 %v2847_v61, %v2433_v62  ;;  %v2585_v62 = vld [vmem:[%s3337_s23 + $0x4e8] sm:$0xf0] }
  0xbf   : > { %1679 = vmatpush.bf16.msrb.mxu2 %v2092_v3  ;;  %v2233_v3 = vld [vmem:[%s3337_s23 + $0x228] sm:$0xf0] }
  0xc0   : > { %1692 = vmatpush.bf16.msrb.mxu3 %v2156_v6  ;;  %1654 = vmatmul.bf16.vlgmr.msrb.gmra.mxu0 %v3484_v45  ;;  %v2452_v45 = vor.u32 %v2851_v35, %v2449_v36  ;;  %v2297_v6 = vld [vmem:[%s3337_s23 + $0x2a8] sm:$0xf0]  ;;  %v2236_v11 = vor.u32 %v2797_v2, %v2233_v3  ;;  %v2825_v36 = vld [vmem:[%s3337_s23 + $0x304] sm:$0xf]  ;;  %v2524_v3 = vor.u32 %v2869_v58, %v2521_v59  ;;  %v2859_v58 = vld [vmem:[%s3337_s23 + $0x414] sm:$0xf] }
  0xc1   : > { %1698 = vmatpush.bf16.msra.mxu0 %v2276_v7  ;;  %1667 = vmatmul.bf16.vlgmr.msrb.gmra.mxu1 %v3486_v46  ;;  %v2441_v46 = vld [vmem:[%s3337_s23 + $0x3c8] sm:$0xf0]  ;;  %v2829_v7 = vld [vmem:[%s3337_s23 + $0x324] sm:$0xf]  ;;  %v2300_v12 = vor.u32 %v2813_v4, %v2297_v6  ;;  %v2588_v4 = vor.u32 %v2885_v60, %v2585_v62  ;;  %v2867_v6 = vld [vmem:[%s3337_s23 + $0x454] sm:$0xf] }
  0xc2   : > { %1711 = vmatpush.bf16.msra.mxu1 %v2340_v8  ;;  %1680 = vmatmul.bf16.vlgmr.msrb.gmra.mxu2 %v3471_v29  ;;  %v2801_v29 = vld [vmem:[%s3337_s23 + $0x244] sm:$0xf]  ;;  %v2444_v57 = vor.u32 %v2849_v49, %v2441_v46  ;;  %v2361_v8 = vld [vmem:[%s3337_s23 + $0x328] sm:$0xf0]  ;;  %v2657_v49 = vld [vmem:[%s3337_s23 + $0x578] sm:$0xf0] }
  0xc3   : > { %1724 = vmatpush.bf16.msra.mxu2 %v2404_v9  ;;  %1693 = vmatmul.bf16.vlgmr.msrb.gmra.mxu3 %v3475_v32  ;;  %v2833_v32 = vld [vmem:[%s3337_s23 + $0x344] sm:$0xf]  ;;  %v2252_v50 = vor.u32 %v2801_v29, %v2249_v41  ;;  %v2281_v35 = vld [vmem:[%s3337_s23 + $0x288] sm:$0xf0]  ;;  %v2871_v41 = vld [vmem:[%s3337_s23 + $0x474] sm:$0xf] }
  0xc4   : > { %1737 = vmatpush.bf16.msra.mxu3 %v2468_v13  ;;  %v2380_v52 = vor.u32 %v2833_v32, %v2377_v48  ;;  %v2845_v9 = vld [vmem:[%s3337_s23 + $0x3a4] sm:$0xf]  ;;  %v2364_v13 = vor.u32 %v2829_v7, %v2361_v8  ;;  %v2409_v29 = vld [vmem:[%s3337_s23 + $0x388] sm:$0xf0]  ;;  %v2593_v32 = vld [vmem:[%s3337_s23 + $0x4f8] sm:$0xf0]  ;;  %v2284_v46 = vor.u32 %v2809_v34, %v2281_v35  ;;  %v2532_v55 = vor.u32 %v2871_v41, %v2529_v44 }
  0xc5   : > { %1699 = vmatpush.bf16.msra.mxu0 %v2268_v19  ;;  %v2428_v17 = vor.u32 %v2845_v9, %v2425_v10  ;;  %v2827_v19 = vld [vmem:[%s3337_s23 + $0x314] sm:$0xf]  ;;  %v2713_v2 = vld [vmem:[%s3337_s23 + $0x5e8] sm:$0xf0]  ;;  %v2513_v7 = vld [vmem:[%s3337_s23 + $0x458] sm:$0xf0] }
  0xc6   : > { %1712 = vmatpush.bf16.msra.mxu1 %v2332_v20  ;;  %v2353_v20 = vld [vmem:[%s3337_s23 + $0x318] sm:$0xf0]  ;;  %v2903_v48 = vld [vmem:[%s3337_s23 + $0x574] sm:$0xf]  ;;  %v2516_v15 = vor.u32 %v2867_v6, %v2513_v7  ;;  %v2857_v6 = vld [vmem:[%s3337_s23 + $0x404] sm:$0xf] }
  0xc7   : > { %1725 = vmatpush.bf16.msra.mxu2 %v2396_v21  ;;  %v2843_v21 = vld [vmem:[%s3337_s23 + $0x394] sm:$0xf]  ;;  %v2356_v33 = vor.u32 %v2827_v19, %v2353_v20  ;;  %v2577_v10 = vld [vmem:[%s3337_s23 + $0x4d8] sm:$0xf0]  ;;  %v2569_v19 = vld [vmem:[%s3337_s23 + $0x4c8] sm:$0xf0] }
  0xc8   : > { %1738 = vmatpush.bf16.msra.mxu3 %v2460_v28  ;;  %v2217_v28 = vld [vmem:[%s3337_s23 + $0x208] sm:$0xf0]  ;;  %v2883_v8 = vld [vmem:[%s3337_s23 + $0x4d4] sm:$0xf]  ;;  %v2897_v20 = vld [vmem:[%s3337_s23 + $0x544] sm:$0xf] }
  0xc9   : > { %1700 = vmatpush.bf16.msra.mxu0 %v2260_v37  ;;  %v2420_v37 = vor.u32 %v2843_v21, %v2417_v23  ;;  %v2220_v47 = vor.u32 %v2793_v25, %v2217_v28  ;;  %v2633_v21 = vld [vmem:[%s3337_s23 + $0x548] sm:$0xf0]  ;;  %v2913_v23 = vld [vmem:[%s3337_s23 + $0x5c4] sm:$0xf]  ;;  %v2572_v25 = vor.u32 %v2881_v18, %v2569_v19  ;;  %v2879_v34 = vld [vmem:[%s3337_s23 + $0x4b4] sm:$0xf] }
  0xca   : > { %1713 = vmatpush.bf16.msra.mxu1 %v2324_v39  ;;  %v2345_v39 = vld [vmem:[%s3337_s23 + $0x308] sm:$0xf0]  ;;  %v2636_v28 = vor.u32 %v2897_v20, %v2633_v21  ;;  %v2481_v59 = vld [vmem:[%s3337_s23 + $0x418] sm:$0xf0]  ;;  %v2875_v60 = vld [vmem:[%s3337_s23 + $0x494] sm:$0xf] }
  0xcb   : > { %1726 = vmatpush.bf16.msra.mxu2 %v2388_v40  ;;  %v2841_v40 = vld [vmem:[%s3337_s23 + $0x384] sm:$0xf]  ;;  %v2545_v62 = vld [vmem:[%s3337_s23 + $0x498] sm:$0xf0]  ;;  %v2473_v7 = vld [vmem:[%s3337_s23 + $0x408] sm:$0xf0] }
  0xcc   : > { %1739 = vmatpush.bf16.msra.mxu3 %v2452_v45  ;;  %v2887_v45 = vld [vmem:[%s3337_s23 + $0x4f4] sm:$0xf]  ;;  %v2412_v54 = vor.u32 %v2841_v40, %v2409_v29  ;;  %v2689_v29 = vld [vmem:[%s3337_s23 + $0x5b8] sm:$0xf0] }
  0xcd   : > { %1701 = vmatpush.bf16.msra.mxu0 %v2252_v50  ;;  %v2348_v50 = vor.u32 %v2825_v36, %v2345_v39  ;;  %v2596_v56 = vor.u32 %v2887_v45, %v2593_v32  ;;  %v2561_v36 = vld [vmem:[%s3337_s23 + $0x4b8] sm:$0xf0]  ;;  %v2911_v40 = vld [vmem:[%s3337_s23 + $0x5b4] sm:$0xf]  ;;  %v2489_v32 = vld [vmem:[%s3337_s23 + $0x428] sm:$0xf0] }
  0xce   : > { %1714 = vmatpush.bf16.msra.mxu1 %v2316_v51  ;;  %v2919_v51 = vld [vmem:[%s3337_s23 + $0x5f4] sm:$0xf]  ;;  %v2625_v39 = vld [vmem:[%s3337_s23 + $0x538] sm:$0xf0]  ;;  %v2564_v44 = vor.u32 %v2879_v34, %v2561_v36 }
  0xcf   : > { %1727 = vmatpush.bf16.msra.mxu2 %v2380_v52  ;;  %v2721_v52 = vld [vmem:[%s3337_s23 + $0x5f8] sm:$0xf0] }
  0xd0   : > { %1740 = vmatpush.bf16.msra.mxu3 %v2444_v57  ;;  %v2660_v57 = vor.u32 %v2903_v48, %v2657_v49  ;;  %v2724_v61 = vor.u32 %v2919_v51, %v2721_v52  ;;  %v2877_v48 = vld [vmem:[%s3337_s23 + $0x4a4] sm:$0xf]  ;;  %v2692_v49 = vor.u32 %v2911_v40, %v2689_v29  ;;  %v2617_v51 = vld [vmem:[%s3337_s23 + $0x528] sm:$0xf0] }
  0xd1   : > { %1702 = vmatpush.bf16.msra.mxu0 %v2244_v63  ;;  %v2901_v63 = vld [vmem:[%s3337_s23 + $0x564] sm:$0xf] }
  0xd2   : > { %1715 = vmatpush.bf16.msra.mxu1 %v2308_v0  ;;  %v2649_v0 = vld [vmem:[%s3337_s23 + $0x568] sm:$0xf0]  ;;  %v2909_v52 = vld [vmem:[%s3337_s23 + $0x5a4] sm:$0xf] }
  0xd3   : > { %1728 = vmatpush.bf16.msra.mxu2 %v2372_v1  ;;  %v2917_v1 = vld [vmem:[%s3337_s23 + $0x5e4] sm:$0xf] }
  0xd4   : > { %1741 = vmatpush.bf16.msra.mxu3 %v2436_v5  ;;  %v2652_v5 = vor.u32 %v2901_v63, %v2649_v0  ;;  %v2716_v9 = vor.u32 %v2917_v1, %v2713_v2  ;;  %v2891_v63 = vld [vmem:[%s3337_s23 + $0x514] sm:$0xf]  ;;  %v2609_v0 = vld [vmem:[%s3337_s23 + $0x518] sm:$0xf0] }
  0xd5   : > { %1703 = vmatpush.bf16.msra.mxu0 %v2236_v11  ;;  %v2899_v11 = vld [vmem:[%s3337_s23 + $0x554] sm:$0xf]  ;;  %v2673_v2 = vld [vmem:[%s3337_s23 + $0x598] sm:$0xf0] }
  0xd6   : > { %1716 = vmatpush.bf16.msra.mxu1 %v2300_v12  ;;  %v2641_v12 = vld [vmem:[%s3337_s23 + $0x558] sm:$0xf0]  ;;  %v2907_v1 = vld [vmem:[%s3337_s23 + $0x594] sm:$0xf] }
  0xd7   : > { %1729 = vmatpush.bf16.msra.mxu2 %v2364_v13  ;;  %v2915_v13 = vld [vmem:[%s3337_s23 + $0x5d4] sm:$0xf]  ;;  %v2644_v16 = vor.u32 %v2899_v11, %v2641_v12  ;;  %v2537_v11 = vld [vmem:[%s3337_s23 + $0x488] sm:$0xf0]  ;;  %v2889_v12 = vld [vmem:[%s3337_s23 + $0x504] sm:$0xf] }
  0xd8   : > { %1742 = vmatpush.bf16.msra.mxu3 %v2428_v17  ;;  %v2865_v17 = vld [vmem:[%s3337_s23 + $0x444] sm:$0xf] }
  0xd9   : > { %1704 = vmatpush.bf16.msra.mxu0 %v2228_v24 }
  0xda   : > { %1717 = vmatpush.bf16.msra.mxu1 %v2292_v30  ;;  %v2863_v30 = vld [vmem:[%s3337_s23 + $0x434] sm:$0xf] }
  0xdb   : > { %1730 = vmatpush.bf16.msra.mxu2 %v2356_v33  ;;  %v2497_v33 = vld [vmem:[%s3337_s23 + $0x438] sm:$0xf0] }
  0xdc   : > { %1743 = vmatpush.bf16.msra.mxu3 %v2420_v37  ;;  %v2895_v37 = vld [vmem:[%s3337_s23 + $0x534] sm:$0xf]  ;;  %v2500_v41 = vor.u32 %v2863_v30, %v2497_v33 }
  0xdd   : > { %1705 = vmatpush.bf16.msra.mxu0 %v2220_v47  ;;  %v2628_v45 = vor.u32 %v2895_v37, %v2625_v39  ;;  %v2861_v47 = vld [vmem:[%s3337_s23 + $0x424] sm:$0xf] }
  0xde   : > { %1718 = vmatpush.bf16.msra.mxu1 %v2284_v46  ;;  %v2553_v46 = vld [vmem:[%s3337_s23 + $0x4a8] sm:$0xf0] }
  0xdf   : > { %1731 = vmatpush.bf16.msra.mxu2 %v2348_v50  ;;  %v2893_v50 = vld [vmem:[%s3337_s23 + $0x524] sm:$0xf] }
  0xe0   : > { %1744 = vmatpush.bf16.msra.mxu3 %v2412_v54  ;;  %1706 = vmatmul.bf16.vlgmr.msra.gmra.mxu0 %v3537_v53  ;;  %v2505_v53 = vld [vmem:[%s3337_s23 + $0x448] sm:$0xf0] }
  0xe1   : > { %1750 = vmatpush.bf16.msrb.mxu0 %v2532_v55  ;;  %1719 = vmatmul.bf16.vlgmr.msra.gmra.mxu1 %v3531_v43  ;;  %v2697_v43 = vld [vmem:[%s3337_s23 + $0x5c8] sm:$0xf0]  ;;  %v2508_v24 = vor.u32 %v2865_v17, %v2505_v53  ;;  %v2492_v55 = vor.u32 %v2861_v47, %v2489_v32  ;;  %v2476_v17 = vor.u32 %v2857_v6, %v2473_v7 }
  0xe2   : > { %1763 = vmatpush.bf16.msrb.mxu1 %v2596_v56  ;;  %1732 = vmatmul.bf16.vlgmr.msra.gmra.mxu2 %v3526_v38  ;;  %v2580_v38 = vor.u32 %v2883_v8, %v2577_v10  ;;  %v2700_v35 = vor.u32 %v2913_v23, %v2697_v43  ;;  %v2681_v54 = vld [vmem:[%s3337_s23 + $0x5a8] sm:$0xf0]  ;;  %v2556_v56 = vor.u32 %v2877_v48, %v2553_v46  ;;  %v2873_v8 = vld [vmem:[%s3337_s23 + $0x484] sm:$0xf] }
  0xe3   : > { %1776 = vmatpush.bf16.msrb.mxu2 %v2660_v57  ;;  %1745 = vmatmul.bf16.vlgmr.msra.gmra.mxu3 %v3529_v42  ;;  %v2708_v42 = vor.u32 %v2915_v13, %v2705_v14  ;;  %v2620_v57 = vor.u32 %v2893_v50, %v2617_v51  ;;  %v2676_v10 = vor.u32 %v2907_v1, %v2673_v2  ;;  %v2601_v13 = vld [vmem:[%s3337_s23 + $0x508] sm:$0xf0]  ;;  %v2905_v14 = vld [vmem:[%s3337_s23 + $0x584] sm:$0xf] }
  0xe4   : > { %1789 = vmatpush.bf16.msrb.mxu3 %v2724_v61  ;;  %v2684_v61 = vor.u32 %v2909_v52, %v2681_v54  ;;  %v2540_v18 = vor.u32 %v2873_v8, %v2537_v11 }
  0xe5   : > { %1751 = vmatpush.bf16.msrb.mxu0 %v2524_v3  ;;  %v2484_v3 = vor.u32 %v2859_v58, %v2481_v59 }
  0xe6   : > { %1764 = vmatpush.bf16.msrb.mxu1 %v2588_v4  ;;  %v2548_v4 = vor.u32 %v2875_v60, %v2545_v62 }
  0xe7   : > { %1777 = vmatpush.bf16.msrb.mxu2 %v2652_v5  ;;  %v2612_v5 = vor.u32 %v2891_v63, %v2609_v0 }
  0xe8   : > { %1790 = vmatpush.bf16.msrb.mxu3 %v2716_v9  ;;  %v1512_v9 = vpop.f32.mrf.mxu1 }
  0xe9   : > { %1752 = vmatpush.bf16.msrb.mxu0 %v2516_v15  ;;  %v2665_v15 = vld [vmem:[%s3337_s23 + $0x588] sm:$0xf0]  ;;  %v1538_v21 = vpop.f32.mrf.mxu3 }
  0xea   : > { %1765 = vmatpush.bf16.msrb.mxu1 %v2580_v38  ;;  %v1499_v38 = vpop.f32.mrf.mxu0  ;;  %v2668_v19 = vor.u32 %v2905_v14, %v2665_v15 }
  0xeb   : > { %1778 = vmatpush.bf16.msrb.mxu2 %v2644_v16  ;;  %v1525_v16 = vpop.f32.mrf.mxu2  ;;  %v1513_v53 = vadd.f32 %v1512_v9, %v1499_v38 }
  0xec   : > { %1791 = vmatpush.bf16.msrb.mxu3 %v2708_v42  ;;  %v2604_v42 = vor.u32 %v2889_v12, %v2601_v13 }
  0xed   : > { %1753 = vmatpush.bf16.msrb.mxu0 %v2508_v24  ;;  %v1526_v20 = vadd.f32 %v1525_v16, %v1513_v53 }
  0xee   : > { %1766 = vmatpush.bf16.msrb.mxu1 %v2572_v25 }
  0xef   : > { %1779 = vmatpush.bf16.msrb.mxu2 %v2636_v28  ;;  %v1539_v23 = vadd.f32 %v1538_v21, %v1526_v20  ;;  %v280_v20 = vld [vmem:[%s3356_s26] sm:$0xff] }
  0xf0   : > { %1792 = vmatpush.bf16.msrb.mxu3 %v2700_v35  ;;  %v1514_v43 = vpop.f32.mrf.mxu1 }
  0xf1   : > { %1754 = vmatpush.bf16.msrb.mxu0 %v2500_v41  ;;  %v1540_v28 = vpop.f32.mrf.mxu3 }
  0xf2   : > { %1767 = vmatpush.bf16.msrb.mxu1 %v2564_v44  ;;  %v1501_v24 = vpop.f32.mrf.mxu0 }
  0xf3   : > { %1780 = vmatpush.bf16.msrb.mxu2 %v2628_v45  ;;  %v1527_v25 = vpop.f32.mrf.mxu2 }
  0xf4   : > { %1793 = vmatpush.bf16.msrb.mxu3 %v2692_v49 }
  0xf5   : > { %1755 = vmatpush.bf16.msrb.mxu0 %v2492_v55 }
  0xf6   : > { %1768 = vmatpush.bf16.msrb.mxu1 %v2556_v56 }
  0xf7   : > { %1781 = vmatpush.bf16.msrb.mxu2 %v2620_v57 }
  0xf8   : > { %1794 = vmatpush.bf16.msrb.mxu3 %v2684_v61 }
  0xf9   : > { %1756 = vmatpush.bf16.msrb.mxu0 %v2484_v3 }
  0xfa   : > { %1769 = vmatpush.bf16.msrb.mxu1 %v2548_v4 }
  0xfb   : > { %1782 = vmatpush.bf16.msrb.mxu2 %v2612_v5 }
  0xfc   : > { %1795 = vmatpush.bf16.msrb.mxu3 %v2676_v10 }
  0xfd   : > { %1757 = vmatpush.bf16.msrb.mxu0 %v2476_v17  ;;  %v1551_v33 = vpop.f32.mrf.mxu0 }
  0xfe   : > { %1770 = vmatpush.bf16.msrb.mxu1 %v2540_v18  ;;  %v1564_v30 = vpop.f32.mrf.mxu1  ;;  %v1552_v34 = vadd.f32 %v1551_v33, %v1539_v23 }
  0xff   : > { %1783 = vmatpush.bf16.msrb.mxu2 %v2604_v42 }
 0x100   : > { %1796 = vmatpush.bf16.msrb.mxu3 %v2668_v19  ;;  %1758 = vmatmul.bf16.vlgmr.msrb.gmra.mxu0 %v3598_v22  ;;  %v1565_v36 = vadd.f32 %v1564_v30, %v1552_v34 }
 0x101   : > { %1771 = vmatmul.bf16.vlgmr.msrb.gmra.mxu1 %v3605_v27 }
 0x102   : > { %1784 = vmatmul.bf16.vlgmr.msrb.gmra.mxu2 %v3603_v26 }
 0x103   : > { %1797 = vmatmul.bf16.vlgmr.msrb.gmra.mxu3 %v3609_v31 }
 0x105   : > { %v1577_v35 = vpop.f32.mrf.mxu2  ;;  %v1553_v41 = vpop.f32.mrf.mxu0 }
 0x106   : > { %v1590_v37 = vpop.f32.mrf.mxu3  ;;  %v1578_v39 = vadd.f32 %v1577_v35, %v1565_v36  ;;  %v1566_v40 = vpop.f32.mrf.mxu1 }
 0x108   : > { %v1591_v29 = vadd.f32 %v1590_v37, %v1578_v39 }
 0x10d   : > { %v1579_v22 = vpop.f32.mrf.mxu2 }
 0x10e   : > { %v1592_v44 = vpop.f32.mrf.mxu3 }
 0x11d   : > { %v1603_v45 = vpop.f32.mrf.mxu0 }
 0x11e   : > { %v1604_v47 = vadd.f32 %v1603_v45, %v1591_v29  ;;  %v1616_v27 = vpop.f32.mrf.mxu1 }
 0x120   : > { %v1617_v32 = vadd.f32 %v1616_v27, %v1604_v47 }
 0x125   : > { %v1629_v26 = vpop.f32.mrf.mxu2  ;;  %v1605_v49 = vpop.f32.mrf.mxu0 }
 0x126   : > { %v1630_v48 = vadd.f32 %v1629_v26, %v1617_v32  ;;  %v1642_v31 = vpop.f32.mrf.mxu3  ;;  %v1618_v46 = vpop.f32.mrf.mxu1 }
 0x128   : > { %v1643_v50 = vadd.f32 %v1642_v31, %v1630_v48 }
 0x12d   : > { %v1631_v51 = vpop.f32.mrf.mxu2 }
 0x12e   : > { %v1644_v52 = vpop.f32.mrf.mxu3 }
 0x13d   : > { %v1655_v54 = vpop.f32.mrf.mxu0 }
 0x13e   : > { %v1668_v55 = vpop.f32.mrf.mxu1 }
 0x13f   : > { %v1669_v0 = vadd.f32 %v1668_v55, %v1655_v54 }
 0x145   : > { %v1681_v56 = vpop.f32.mrf.mxu2  ;;  %v1657_v58 = vpop.f32.mrf.mxu0 }
 0x146   : > { %v1694_v57 = vpop.f32.mrf.mxu3  ;;  %v1670_v59 = vpop.f32.mrf.mxu1  ;;  %v1682_v3 = vadd.f32 %v1681_v56, %v1669_v0 }
 0x148   : > { %v1695_v6 = vadd.f32 %v1694_v57, %v1682_v3 }
 0x14d   : > { %v1683_v60 = vpop.f32.mrf.mxu2 }
 0x14e   : > { %v1696_v61 = vpop.f32.mrf.mxu3 }
 0x15d   : > { %v1707_v62 = vpop.f32.mrf.mxu0 }
 0x15e   : > { %v1720_v63 = vpop.f32.mrf.mxu1  ;;  %v1708_v9 = vadd.f32 %v1707_v62, %v1695_v6 }
 0x160   : > { %v1721_v10 = vadd.f32 %v1720_v63, %v1708_v9 }
 0x165   : > { %v1733_v1 = vpop.f32.mrf.mxu2  ;;  %v1709_v4 = vpop.f32.mrf.mxu0 }
 0x166   : > { %v1746_v2 = vpop.f32.mrf.mxu3  ;;  %v1722_v5 = vpop.f32.mrf.mxu1  ;;  %v1734_v11 = vadd.f32 %v1733_v1, %v1721_v10 }
 0x168   : > { %v1747_v12 = vadd.f32 %v1746_v2, %v1734_v11 }
 0x16d   : > { %v1735_v7 = vpop.f32.mrf.mxu2 }
 0x16e   : > { %v1748_v8 = vpop.f32.mrf.mxu3 }
 0x17d   : > { %v1759_v13 = vpop.f32.mrf.mxu0 }
 0x17e   : > { %v1772_v14 = vpop.f32.mrf.mxu1  ;;  %v1760_v15 = vadd.f32 %v1759_v13, %v1747_v12 }
 0x180   : > { %v1773_v38 = vadd.f32 %v1772_v14, %v1760_v15 }
 0x185   : > { %v1785_v16 = vpop.f32.mrf.mxu2  ;;  %v1761_v18 = vpop.f32.mrf.mxu0 }
 0x186   : > { %v1786_v17 = vadd.f32 %v1785_v16, %v1773_v38  ;;  %v1798_v53 = vpop.f32.mrf.mxu3  ;;  %v1774_v42 = vpop.f32.mrf.mxu1 }
 0x188   : > { %v1799_v19 = vadd.f32 %v1798_v53, %v1786_v17 }
 0x18a   : > { %v1804_v21 = vrot.slane %v1799_v19, 4 }
 0x18b   : > { %1813 = sbr.rel (%p2725_p9) target bundleno = 412 (0x19c), region = 48 }
 0x18c   : > { %v1806_v23 = vsel %vm1805_vm0, %v1643_v50, %v1804_v21 }
 0x18d   : > { %v1808_v43 = vadd.f32 %v1806_v23, %v280_v20  ;;  %v1787_v24 = vpop.f32.mrf.mxu2 }
 0x18e   : > { %v1800_v25 = vpop.f32.mrf.mxu3 }
 0x18f   : > { %1809 = vst [vmem:[%s3356_s26] sm:$0xff] %v1808_v43 }
 0x190   : > { %v1815_v28 = vld [vmem:[%s226_s28] sm:$0x3] }
 0x191   : > { %v1817_v30 = vperm.slane %v1815_v28, 0  ;;  %v1818_v33 = vperm.slane %v1815_v28, 1 }
 0x193   : > { %v1819_v35 = vrot.slane %v1818_v33, 4 }
 0x195   : > { %v1820_v36 = vsel %vm1805_vm0, %v1817_v30, %v1819_v35 }
 0x196   : > { %v1814_v34 = vld [vmem:[%s3356_s26] sm:$0xff] }
 0x197   : > { %v1822_v37 = vadd.f32 %v1820_v36, %v1814_v34 }
 0x199   : > { %v1823_v39 = vmax.f32 %v1822_v37, 0.0 }
 0x19b   : > { %1824 = vst [vmem:[%s3356_s26] sm:$0xff] %v1823_v39 }
 0x19c PF: > { %s19_s22 = sadd.s32 1, %s3181_s22   ;;  %s3857_s23 = sld [smem:[#allocation8_spill]] }
 0x19d   : > { %p16_p10 = scmp.ge.s32.totalorder %s19_s22, 6   ;;  %s3858_s7 = sld [smem:[#allocation9_spill]] }
 0x19e   : > { %s3859_s12 = smov %s3145_s13  ;;  %s3860_s13 = smov %s3149_s14 }
 0x19f   : > { %s3861_s14 = smov %s3313_s8  ;;  %s3862_s15 = smov %s3157_s16 }
 0x1a0   : > { %s3863_s16 = smov %s3161_s17  ;;  %s3864_s17 = smov %s3318_s9 }
 0x1a1   : > { %s3865_s18 = smov %s3173_s20  ;;  %s3866_s19 = smov %s3177_s21 }
 0x1a2   : > { %s3867_s20 = smov %s3857_s23  ;;  %18 = sbr.rel (!%p16_p10) target bundleno = 11 (0xb), region = 99 }
 0x1a3   : > { %s3868_s21 = smov %s3858_s7 }
 0x1a7   :  { %1847 = vsyncpa [#allocation3], 1 }
 0x1a8   :  { %1849 = vsyncpa [#allocation3 + $0x1], 1 }
 0x1a9   :  { %1850 = vsyncpa [#allocation5], 1 }
 0x1aa   :  { %1852 = vsyncpa [#allocation5 + $0x1], 1 }

// kernel: siamese_forward.4
= control target key start
LH: loop header
LB: loop body
LE: loop exit
PB: predicated region body
PF: predicated region fallthrough
CT: control target
= control target key end

     0   :  { %s14569_s0 = inlined_call_operand.vmem [shape: f32[4,16,16,3], index: 0, kind: input, shape index: {}]   ;;  %s14570_s1 = inlined_call_operand.hbm [shape: f32[3,3,3,6], index: 1, kind: input, shape index: {}]   ;;  %s14571_s2 = inlined_call_operand.hbm [shape: f32[1,6], index: 2, kind: input, shape index: {}]   ;;  %s14572_s3 = inlined_call_operand.hbm [shape: f32[1,6], index: 3, kind: input, shape index: {}]   ;;  %s14573_s4 = inlined_call_operand.hbm [shape: f32[1,6], index: 4, kind: input, shape index: {}]   ;;  %s14574_s5 = inlined_call_operand.hbm [shape: f32[3,3,6,12], index: 5, kind: input, shape index: {}]   ;;  %s14575_s6 = inlined_call_operand.hbm [shape: f32[1,12], index: 6, kind: input, shape index: {}]   ;;  %s14576_s7 = inlined_call_operand.hbm [shape: f32[1,12], index: 7, kind: input, shape index: {}]   ;;  %s14577_s8 = inlined_call_operand.hbm [shape: f32[1,12], index: 8, kind: input, shape index: {}]   ;;  %s14578_s9 = inlined_call_operand.hbm [shape: f32[3,3,12,12], index: 9, kind: input, shape index: {}]   ;;  %s14579_s10 = inlined_call_operand.hbm [shape: f32[1,12], index: 10, kind: input, shape index: {}]   ;;  %s14580_s11 = inlined_call_operand.hbm [shape: f32[1,12], index: 11, kind: input, shape index: {}]   ;;  %s14581_s12 = inlined_call_operand.hbm [shape: f32[1,12], index: 12, kind: input, shape index: {}]   ;;  %s14582_s13 = inlined_call_operand.vmem [shape: f32[4,256,12], index: 13, kind: output, shape index: {}]  }
   0x1   :  { %14649 = sst [smem:[#allocation84_spill]] %s14571_s2 }
   0x2   :  { %14650 = sst [smem:[#allocation85_spill]] %s14573_s4 }
   0x3   :  { %18 = vsyncpa [#allocation6], 0 }
   0x4   :  { %19 = vsyncpa [#allocation8], 0 }
   0x5   :  { %20 = vsyncpa [#allocation11], 0 }
   0x6   :  { %21 = vsyncpa [#allocation14], 0 }
   0x7   :  { %22 = vsyncpa [#allocation17], 0 }
   0x8   :  { %23 = vsyncpa [#allocation20], 0 }
   0x9   :  { %24 = vsyncpa [#allocation23], 0  ;;  %s10501_s25 = smov 0  }
   0xa LB: > { %s14651_s2 = sld [smem:[#allocation84_spill]]  ;;  %s10510_s29 = sadd.s32 4294967295, %s10413_s25   ;;  %s10413_s25 = sphi %s10501_s25, %s30_s25  }
   0xb   : > { %p8942_p0 = scmp.ge.s32.totalorder %s10413_s25, 1  ;;  %p339_p1 = scmp.lt.s32.totalorder %s10413_s25, 5 }
   0xc   : > { %p9956_p2 = scmp.eq.s32.totalorder %s10510_s29, 0  ;;  %s10415_s14 = smov [#allocation7]  }
   0xd   : > { %p10515_p3 = pnand %p8942_p0, %p339_p1  ;;  %s367_s15 = sshll.u32 %s10415_s14, 4  ;;  %s368_s15 = int_to_ptr.vmem [resolvable:$true] %s367_s15 }
   0xe   : > { %s14653_s4 = sld [smem:[#allocation85_spill]]  ;;  %s415_s21 = sshll.u32 %s14575_s6, 4  ;;  %s416_s21 = int_to_ptr.hbm [resolvable:$true] %s415_s21 }
   0xf   : > { %p9919_p4 = pneg %p10515_p3  ;;  %s10416_s23 = smov [#allocation10]  }
  0x10   : > { %s365_s28 = sshll.u32 %s14651_s2, 4  ;;  %s391_s24 = sshll.u32 %s10416_s23, 4  ;;  %s366_s28 = int_to_ptr.hbm [resolvable:$true] %s365_s28  ;;  %s392_s24 = int_to_ptr.vmem [resolvable:$true] %s391_s24 }
  0x11   : > { %p10529_p5 = pnand %p9956_p2, %p9919_p4  ;;  %s10417_s26 = smov [#allocation13]  }
  0x12   : > { %s417_s27 = sshll.u32 %s10417_s26, 4  ;;  %s439_s17 = sshll.u32 %s14577_s8, 4  ;;  %s418_s27 = int_to_ptr.vmem [resolvable:$true] %s417_s27  ;;  %s440_s17 = int_to_ptr.hbm [resolvable:$true] %s439_s17 }
  0x13   : > { %9925 = dma.hbm_to_vmem [thread:$0]  (!%p10529_p5), %s366_s28, 16, %s368_s15, [#allocation8]  }
  0x14   : > { %s389_s18 = sshll.u32 %s14653_s4, 4  ;;  %s465_s23 = sshll.u32 %s14579_s10, 4  ;;  %s390_s18 = int_to_ptr.hbm [resolvable:$true] %s389_s18  ;;  %s466_s23 = int_to_ptr.hbm [resolvable:$true] %s465_s23 }
  0x15   : > { %9931 = dma.hbm_to_vmem [thread:$0]  (!%p10529_p5), %s390_s18, 16, %s392_s24, [#allocation11]  }
  0x16   : > { %9937 = dma.hbm_to_vmem [thread:$0]  (!%p10529_p5), %s416_s21, 16, %s418_s27, [#allocation14]  }
  0x17   : > { %s10418_s2 = smov [#allocation16]   ;;  %s10419_s28 = smov [#allocation19]  }
  0x18   : > { %s441_s4 = sshll.u32 %s10418_s2, 4  ;;  %s467_s15 = sshll.u32 %s10419_s28, 4  ;;  %s442_s4 = int_to_ptr.vmem [resolvable:$true] %s441_s4  ;;  %s468_s15 = int_to_ptr.vmem [resolvable:$true] %s467_s15 }
  0x19   : > { %9943 = dma.hbm_to_vmem [thread:$0]  (!%p10529_p5), %s440_s17, 16, %s442_s4, [#allocation17]  }
  0x1a   : > { %s350_s26 = sshll.u32 %s14570_s1, 4  ;;  %s10420_s21 = smov [#allocation5]   ;;  %s351_s26 = int_to_ptr.hbm [resolvable:$true] %s350_s26 }
  0x1b   : > { %9949 = dma.hbm_to_vmem [thread:$0]  (!%p10529_p5), %s466_s23, 16, %s468_s15, [#allocation20]  }
  0x1c   : > { %s352_s27 = sshll.u32 %s10420_s21, 4  ;;  %s377_s16 = sshll.u32 %s14572_s3, 4  ;;  %s353_s27 = int_to_ptr.vmem [resolvable:$true] %s352_s27  ;;  %s378_s16 = int_to_ptr.hbm [resolvable:$true] %s377_s16 }
  0x1d   : > { %s10421_s19 = smov 64   ;;  %s10422_s4 = smov 4  }
  0x1e   : > { %9922 = dma.hbm_to_vmem [thread:$0]  (!%p10529_p5), %s351_s26, 576, %s353_s27, [#allocation6], %s10421_s19, %s10421_s19, %s10422_s4  }
  0x1f   : > { %s10423_s17 = smov [#allocation9]   ;;  %s400_s24 = sshll.u32 %s14574_s5, 4  ;;  %s401_s24 = int_to_ptr.hbm [resolvable:$true] %s400_s24 }
  0x20   : > { %s379_s20 = sshll.u32 %s10423_s17, 4  ;;  %s10424_s23 = smov [#allocation12]   ;;  %s380_s20 = int_to_ptr.vmem [resolvable:$true] %s379_s20 }
  0x21   : > { %9928 = dma.hbm_to_vmem [thread:$0]  (!%p10529_p5), %s378_s16, 16, %s380_s20, [#allocation8]  }
  0x22   : > { %s402_s15 = sshll.u32 %s10424_s23, 4  ;;  %s427_s14 = sshll.u32 %s14576_s7, 4  ;;  %s403_s15 = int_to_ptr.vmem [resolvable:$true] %s402_s15  ;;  %s428_s14 = int_to_ptr.hbm [resolvable:$true] %s427_s14 }
  0x23   : > { %s10425_s26 = smov 128   ;;  %s10426_s27 = smov 8  }
  0x24   : > { %9934 = dma.hbm_to_vmem [thread:$0]  (!%p10529_p5), %s401_s24, 1152, %s403_s15, [#allocation11], %s10425_s26, %s10425_s26, %s10426_s27  }
  0x25   : > { %s10427_s19 = smov [#allocation15]   ;;  %s450_s16 = sshll.u32 %s14578_s9, 4  ;;  %s451_s16 = int_to_ptr.hbm [resolvable:$true] %s450_s16 }
  0x26   : > { %s429_s4 = sshll.u32 %s10427_s19, 4  ;;  %s477_s23 = sshll.u32 %s14580_s11, 4  ;;  %s430_s4 = int_to_ptr.vmem [resolvable:$true] %s429_s4  ;;  %s478_s23 = int_to_ptr.hbm [resolvable:$true] %s477_s23 }
  0x27   : > { %9940 = dma.hbm_to_vmem [thread:$0]  (!%p10529_p5), %s428_s14, 16, %s430_s4, [#allocation14]  }
  0x28   : > { %s10428_s21 = smov [#allocation18]   ;;  %s10429_s24 = smov [#allocation21]  }
  0x29   : > { %s452_s2 = sshll.u32 %s10428_s21, 4  ;;  %s479_s15 = sshll.u32 %s10429_s24, 4  ;;  %s453_s2 = int_to_ptr.vmem [resolvable:$true] %s452_s2  ;;  %s480_s15 = int_to_ptr.vmem [resolvable:$true] %s479_s15 }
  0x2a   : > { %9946 = dma.hbm_to_vmem [thread:$0]  (!%p10529_p5), %s451_s16, 2304, %s453_s2, [#allocation17], %s10425_s26, %s10425_s26, %s10426_s27  }
  0x2b   : > { %s489_s28 = sshll.u32 %s14581_s12, 4  ;;  %s10430_s14 = smov [#allocation22]   ;;  %s490_s28 = int_to_ptr.hbm [resolvable:$true] %s489_s28 }
  0x2c   : > { %9952 = dma.hbm_to_vmem [thread:$0]  (!%p10529_p5), %s478_s23, 16, %s480_s15, [#allocation20]  }
  0x2d   : > { %s491_s4 = sshll.u32 %s10430_s14, 4  ;;  %512 = sbr.rel (%p10515_p3) target bundleno = 2272 (0x8e0), region = 72  ;;  %s492_s4 = int_to_ptr.vmem [resolvable:$true] %s491_s4 }
  0x2e   : > { %9955 = dma.hbm_to_vmem [thread:$0]  (!%p10529_p5), %s490_s28, 16, %s492_s4, [#allocation23]  }
  0x32   : > { %10384 = dma.done.wait (%p9956_p2), [#allocation6], 576  }
  0x33   : > { %10386 = vsyncadd (%p9956_p2), [#allocation6], 4294966720 }
  0x34   : > { %10388 = dma.done.wait (%p9956_p2), [#allocation8], 32  }
  0x35   : > { %10390 = vsyncadd (%p9956_p2), [#allocation8], 4294967264 }
  0x36   : > { %10392 = dma.done.wait (%p9956_p2), [#allocation11], 1168  }
  0x37   : > { %10394 = vsyncadd (%p9956_p2), [#allocation11], 4294966128 }
  0x38   : > { %10396 = dma.done.wait (%p9956_p2), [#allocation14], 32  }
  0x39   : > { %10398 = vsyncadd (%p9956_p2), [#allocation14], 4294967264 }
  0x3a   : > { %10400 = dma.done.wait (%p9956_p2), [#allocation17], 2320  }
  0x3b   : > { %10402 = vsyncadd (%p9956_p2), [#allocation17], 4294964976 }
  0x3c   : > { %10404 = dma.done.wait (%p9956_p2), [#allocation20], 32  }
  0x3d   : > { %10406 = vsyncadd (%p9956_p2), [#allocation20], 4294967264 }
  0x3e   : > { %10408 = dma.done.wait (%p9956_p2), [#allocation23], 16  }
  0x3f   : > { %10410 = vsyncadd (%p9956_p2), [#allocation23], 4294967280  ;;  %p612_p6 = scmp.lt.s32.totalorder %s10510_s29, 3  ;;  %vm929_vm0 = vcmask 1042432   ;;  %vm655_vm1 = vcmask 23552   ;;  %vm711_vm2 = vcmask 16384  }
  0x40   : > { %v832_v0 = vld [vmem:[#allocation5 + $0x4] sm:$0x7]  ;;  %v798_v3 = vld [vmem:[#allocation5] sm:$0x7]  ;;  %v1291_v4 = vld [vmem:[#allocation5 + $0x8] sm:$0x7] }
  0x41   : > { %s14960_s29 = smov (!%p612_p6, %s10510_s29), 3  ;;  %8973 = vmatpush.msk.msra.mxu0 %vm929_vm0, %v832_v0  ;;  %9868 = vmatpush.msk.msra.mxu3 %vm929_vm0, %v832_v0  ;;  %v1847_v6 = vld [vmem:[#allocation5 + $0x10] sm:$0x7]  ;;  %vm3620_vm3 = vcmask 1045504   ;;  %vm3346_vm4 = vcmask 48128   ;;  %vm3402_vm5 = vcmask 40960  }
  0x42   : > { %s9866_s30 = sshll.u32 %s14960_s29, 8  ;;  %9039 = vmatpush.msk.msra.mxu2 %vm929_vm0, %v1291_v4  ;;  %9006 = vmatpush.msk.msra.mxu1 %vm929_vm0, %v798_v3  ;;  %vm6313_vm6 = vcmask 1043456   ;;  %vm6037_vm7 = vcmask 97280   ;;  %vm6093_vm8 = vcmask 90112  }
  0x43   : > { %s10624_s27 = scalar_lea.vmem %s14569_s0, %s9866_s30  ;;  %9869 = vmatpush.msk.msrb.mxu3 %vm929_vm0, %v798_v3  ;;  %9105 = vmatpush.msk.msrb.mxu0 %vm929_vm0, %v1847_v6  ;;  %s14293_s18 = scalar_lea.vmem %s14582_s13, %s9866_s30 }
  0x44   : > { %v624_v1 = vld [vmem:[%s10624_s27 + $0x10] sm:$0xff]  ;;  %v625_v5 = vld [vmem:[%s10624_s27 + $0x18] sm:$0xff]  ;;  %v622_v8 = vld [vmem:[%s10624_s27] sm:$0xff] }
  0x45   : > { %v644_v2 = vld [vmem:[%s10624_s27 + $0xb0] sm:$0xff]  ;;  %688 = vst.msk [vmem:[#allocation2 + $0x1] sm:$0xff] %vm655_vm1, %v624_v1  ;;  %v645_v7 = vld [vmem:[%s10624_s27 + $0xb8] sm:$0xff]  ;;  %v646_v9 = vld [vmem:[%s10624_s27 + $0xc0] sm:$0xff] }
  0x46   : > { %658 = vst.msk [vmem:[#allocation2 + $0x31] sm:$0xff] %vm655_vm1, %v624_v1  ;;  %v623_v10 = vld [vmem:[%s10624_s27 + $0x8] sm:$0xff]  ;;  %v648_v15 = vld [vmem:[%s10624_s27 + $0xd0] sm:$0xff]  ;;  %v649_v18 = vld [vmem:[%s10624_s27 + $0xd8] sm:$0xff] }
  0x47   : > { %678 = vst.msk [vmem:[#allocation2 + $0x121] sm:$0xff] %vm655_vm1, %v644_v2  ;;  %v647_v11 = vld [vmem:[%s10624_s27 + $0xc8] sm:$0xff]  ;;  %v626_v26 = vld [vmem:[%s10624_s27 + $0x20] sm:$0xff]  ;;  %v628_v41 = vld [vmem:[%s10624_s27 + $0x30] sm:$0xff] }
  0x48   : > { %689 = vst.msk [vmem:[#allocation2 + $0x9] sm:$0xff] %vm655_vm1, %v625_v5  ;;  %v650_v28 = vld [vmem:[%s10624_s27 + $0xe0] sm:$0xff]  ;;  %v627_v31 = vld [vmem:[%s10624_s27 + $0x28] sm:$0xff]  ;;  %v629_v45 = vld [vmem:[%s10624_s27 + $0x38] sm:$0xff] }
  0x49   : > { %659 = vst.msk [vmem:[#allocation2 + $0x39] sm:$0xff] %vm655_vm1, %v625_v5  ;;  %v651_v34 = vld [vmem:[%s10624_s27 + $0xe8] sm:$0xff]  ;;  %v630_v54 = vld [vmem:[%s10624_s27 + $0x40] sm:$0xff]  ;;  %v632_v3 = vld [vmem:[%s10624_s27 + $0x50] sm:$0xff] }
  0x4a   : > { %679 = vst.msk [vmem:[#allocation2 + $0x129] sm:$0xff] %vm655_vm1, %v645_v7  ;;  %v631_v58 = vld [vmem:[%s10624_s27 + $0x48] sm:$0xff]  ;;  %v633_v7 = vld [vmem:[%s10624_s27 + $0x58] sm:$0xff] }
  0x4b   : > { %656 = vst.msk [vmem:[#allocation2 + $0x19] sm:$0xff] %vm655_vm1, %v622_v8 }
  0x4c   : > { %v799_v12 = vld [vmem:[#allocation2 + $0x1] sm:$0xff]  ;;  %680 = vst.msk [vmem:[#allocation2 + $0x139] sm:$0xff] %vm655_vm1, %v646_v9 }
  0x4d   : > { %v693_v13 = vld [vmem:[#allocation2 + $0x2] sm:$0x1]  ;;  %8974 = vmatmul.msk.f32.vlgmr.msra.gmra.mxu0 %vm655_vm1, %v799_v12  ;;  %657 = vst.msk [vmem:[#allocation2 + $0x21] sm:$0xff] %vm655_vm1, %v623_v10  ;;  %v695_v19 = vld [vmem:[#allocation2 + $0x32] sm:$0x1] }
  0x4e   : > { %712 = vst.msk [vmem:[#allocation2] sm:$0x1] %vm711_vm2, %v693_v13  ;;  %v823_v14 = vld [vmem:[#allocation2 + $0x121] sm:$0xff]  ;;  %v10706_v43 = vld [vmem:[#allocation2 + $0x31] sm:$0xff] }
  0x4f   : > { %8998 = vmatmul.msk.f32.vlgmr.msra.gmra.mxu3 %vm655_vm1, %v823_v14  ;;  %v1258_v16 = vld [vmem:[#allocation2 + $0x2] sm:$0xff]  ;;  %v730_v17 = vld [vmem:[#allocation2 + $0xf] sm:$0x1]  ;;  %681 = vst.msk [vmem:[#allocation2 + $0x141] sm:$0xff] %vm655_vm1, %v647_v11 }
  0x50   : > { %9040 = vmatmul.msk.f32.vlgmr.msra.gmra.mxu2 %vm655_vm1, %v1258_v16  ;;  %748 = vst.msk [vmem:[#allocation2 + $0x11] sm:$0x1] %vm711_vm2, %v730_v17  ;;  %9870 = vmatpush.msk.msra.mxu3 %vm929_vm0, %v1291_v4  ;;  %v800_v20 = vld [vmem:[#allocation2 + $0x9] sm:$0xff]  ;;  %v732_v22 = vld [vmem:[#allocation2 + $0x3f] sm:$0x1]  ;;  %v10716_v47 = vld [vmem:[#allocation2 + $0x32] sm:$0xff] }
  0x51   : > { %682 = vst.msk [vmem:[#allocation2 + $0x151] sm:$0xff] %vm655_vm1, %v648_v15  ;;  %v824_v23 = vld [vmem:[#allocation2 + $0x129] sm:$0xff]  ;;  %v705_v42 = vld [vmem:[#allocation2 + $0x122] sm:$0x1]  ;;  %v10722_v49 = vld [vmem:[#allocation2 + $0x39] sm:$0xff] }
  0x52   : > { %v694_v21 = vld [vmem:[#allocation2 + $0x1a] sm:$0x1]  ;;  %683 = vst.msk [vmem:[#allocation2 + $0x159] sm:$0xff] %vm655_vm1, %v649_v18  ;;  %v767_v30 = vld [vmem:[#allocation2 + $0x8] sm:$0xff]  ;;  %v634_v16 = vld [vmem:[%s10624_s27 + $0x60] sm:$0xff] }
  0x53   : > { %713 = vst.msk [vmem:[#allocation2 + $0x18] sm:$0x1] %vm711_vm2, %v694_v21  ;;  %v10673_v29 = vld [vmem:[#allocation2 + $0x19] sm:$0xff]  ;;  %v791_v14 = vld [vmem:[#allocation2 + $0x128] sm:$0xff] }
  0x54   : > { %714 = vst.msk [vmem:[#allocation2 + $0x30] sm:$0x1] %vm711_vm2, %v695_v19  ;;  %v731_v25 = vld [vmem:[#allocation2 + $0x27] sm:$0x1]  ;;  %v825_v32 = vld [vmem:[#allocation2 + $0x139] sm:$0xff] }
  0x55   : > { %v766_v24 = vld [vmem:[#allocation2] sm:$0xff]  ;;  %8975 = vmatmul.msk.f32.gmra.mxu0 %vm655_vm1, %v800_v20  ;;  %750 = vst.msk [vmem:[#allocation2 + $0x41] sm:$0x1] %vm711_vm2, %v732_v22  ;;  %v706_v55 = vld [vmem:[#allocation2 + $0x13a] sm:$0x1]  ;;  %v635_v20 = vld [vmem:[%s10624_s27 + $0x68] sm:$0xff] }
  0x56   : > { %9007 = vmatmul.msk.f32.vlgmr.msra.gmra.mxu1 %vm655_vm1, %v766_v24  ;;  %749 = vst.msk [vmem:[#allocation2 + $0x29] sm:$0x1] %vm711_vm2, %v731_v25  ;;  %v10680_v33 = vld [vmem:[#allocation2 + $0x1a] sm:$0xff] }
  0x57   : > { %8999 = vmatmul.msk.f32.gmra.mxu3 %vm655_vm1, %v824_v23  ;;  %v1259_v27 = vld [vmem:[#allocation2 + $0xa] sm:$0xff]  ;;  %660 = vst.msk [vmem:[#allocation2 + $0x49] sm:$0xff] %vm655_vm1, %v626_v26  ;;  %v10689_v36 = vld [vmem:[#allocation2 + $0x21] sm:$0xff]  ;;  %v10741_v57 = vld [vmem:[#allocation2 + $0x38] sm:$0xff] }
  0x58   : > { %9041 = vmatmul.msk.f32.gmra.mxu2 %vm655_vm1, %v1259_v27  ;;  %684 = vst.msk [vmem:[#allocation2 + $0x169] sm:$0xff] %vm655_vm1, %v650_v28  ;;  %v826_v39 = vld [vmem:[#allocation2 + $0x141] sm:$0xff]  ;;  %v827_v46 = vld [vmem:[#allocation2 + $0x151] sm:$0xff] }
  0x59   : > { %691 = vst.msk [vmem:[#allocation2 + $0x199] sm:$0xff] %vm655_vm1, %v650_v28  ;;  %v10708_v44 = vld [vmem:[#allocation2 + $0x20] sm:$0xff]  ;;  %v707_v4 = vld [vmem:[#allocation2 + $0x152] sm:$0x1] }
  0x5a   : > { %661 = vst.msk [vmem:[#allocation2 + $0x51] sm:$0xff] %vm655_vm1, %v627_v31  ;;  %v10691_v37 = vld [vmem:[#allocation2 + $0x18] sm:$0xff]  ;;  %v793_v27 = vld [vmem:[#allocation2 + $0x140] sm:$0xff] }
  0x5b   : > { %685 = vst.msk [vmem:[#allocation2 + $0x171] sm:$0xff] %vm655_vm1, %v651_v34  ;;  %v10724_v50 = vld [vmem:[#allocation2 + $0x30] sm:$0xff]  ;;  %v828_v52 = vld [vmem:[#allocation2 + $0x159] sm:$0xff] }
  0x5c   : > { %692 = vst.msk [vmem:[#allocation2 + $0x1a1] sm:$0xff] %vm655_vm1, %v651_v34  ;;  %v10731_v53 = vld [vmem:[#allocation2 + $0x3a] sm:$0xff] }
  0x5d   : > { %8976 = vmatmul.msk.f32.gmra.mxu0 %vm655_vm1, %v10673_v29  ;;  %v10698_v40 = vld [vmem:[#allocation2 + $0x22] sm:$0xff]  ;;  %662 = vst.msk [vmem:[#allocation2 + $0x61] sm:$0xff] %vm655_vm1, %v628_v41  ;;  %v637_v34 = vld [vmem:[%s10624_s27 + $0x78] sm:$0xff]  ;;  %v742_v41 = vld [vmem:[#allocation2 + $0x12f] sm:$0x1] }
  0x5e   : > { %9008 = vmatmul.msk.f32.gmra.mxu1 %vm655_vm1, %v767_v30  ;;  %v696_v35 = vld [vmem:[#allocation2 + $0x4a] sm:$0x1]  ;;  %724 = vst.msk [vmem:[#allocation2 + $0x120] sm:$0x1] %vm711_vm2, %v705_v42  ;;  %v636_v30 = vld [vmem:[%s10624_s27 + $0x70] sm:$0xff] }
  0x5f   : > { %9000 = vmatmul.msk.f32.gmra.mxu3 %vm655_vm1, %v825_v32  ;;  %715 = vst.msk [vmem:[#allocation2 + $0x48] sm:$0x1] %vm711_vm2, %v696_v35  ;;  %v10739_v56 = vld [vmem:[#allocation2 + $0x49] sm:$0xff]  ;;  %v1569_v42 = vld [vmem:[#allocation5 + $0xc] sm:$0x7] }
  0x60   : > { %9042 = vmatmul.msk.f32.gmra.mxu2 %vm655_vm1, %v10680_v33  ;;  %663 = vst.msk [vmem:[#allocation2 + $0x69] sm:$0xff] %vm655_vm1, %v629_v45  ;;  %v829_v59 = vld [vmem:[#allocation2 + $0x169] sm:$0xff] }
  0x61   : > { %v733_v38 = vld [vmem:[#allocation2 + $0x57] sm:$0x1]  ;;  %664 = vst.msk [vmem:[#allocation2 + $0x79] sm:$0xff] %vm655_vm1, %v630_v54  ;;  %v10749_v60 = vld [vmem:[#allocation2 + $0x4a] sm:$0xff]  ;;  %v638_v54 = vld [vmem:[%s10624_s27 + $0x80] sm:$0xff] }
  0x62   : > { %751 = vst.msk [vmem:[#allocation2 + $0x59] sm:$0x1] %vm711_vm2, %v733_v38  ;;  %v10755_v62 = vld [vmem:[#allocation2 + $0x51] sm:$0xff]  ;;  %v708_v17 = vld [vmem:[#allocation2 + $0x16a] sm:$0x1] }
  0x63   : > { %725 = vst.msk [vmem:[#allocation2 + $0x138] sm:$0x1] %vm711_vm2, %v706_v55  ;;  %v830_v1 = vld [vmem:[#allocation2 + $0x171] sm:$0xff] }
  0x64   : > { %v697_v48 = vld [vmem:[#allocation2 + $0x62] sm:$0x1]  ;;  %665 = vst.msk [vmem:[#allocation2 + $0x81] sm:$0xff] %vm655_vm1, %v631_v58  ;;  %v10774_v6 = vld [vmem:[#allocation2 + $0x50] sm:$0xff] }
  0x65   : > { %8977 = vmatmul.msk.f32.gmra.mxu0 %vm655_vm1, %v10689_v36  ;;  %716 = vst.msk [vmem:[#allocation2 + $0x60] sm:$0x1] %vm711_vm2, %v697_v48  ;;  %v10772_v5 = vld [vmem:[#allocation2 + $0x61] sm:$0xff] }
  0x66   : > { %9009 = vmatmul.msk.f32.gmra.mxu1 %vm655_vm1, %v10691_v37  ;;  %v10757_v63 = vld [vmem:[#allocation2 + $0x48] sm:$0xff]  ;;  %666 = vst.msk [vmem:[#allocation2 + $0x91] sm:$0xff] %vm655_vm1, %v632_v3  ;;  %v790_v8 = vld [vmem:[#allocation2 + $0x120] sm:$0xff] }
  0x67   : > { %9001 = vmatmul.msk.f32.gmra.mxu3 %vm655_vm1, %v826_v39  ;;  %v734_v51 = vld [vmem:[#allocation2 + $0x6f] sm:$0x1]  ;;  %726 = vst.msk [vmem:[#allocation2 + $0x150] sm:$0x1] %vm711_vm2, %v707_v4  ;;  %v10782_v9 = vld [vmem:[#allocation2 + $0x62] sm:$0xff] }
  0x68   : > { %9043 = vmatmul.msk.f32.gmra.mxu2 %vm655_vm1, %v10698_v40  ;;  %752 = vst.msk [vmem:[#allocation2 + $0x71] sm:$0x1] %vm711_vm2, %v734_v51  ;;  %v698_v61 = vld [vmem:[#allocation2 + $0x7a] sm:$0x1]  ;;  %v10788_v11 = vld [vmem:[#allocation2 + $0x69] sm:$0xff] }
  0x69   : > { %717 = vst.msk [vmem:[#allocation2 + $0x78] sm:$0x1] %vm711_vm2, %v698_v61  ;;  %v10764_v2 = vld [vmem:[#allocation2 + $0x52] sm:$0xff]  ;;  %v10807_v19 = vld [vmem:[#allocation2 + $0x68] sm:$0xff]  ;;  %v743_v3 = vld [vmem:[#allocation2 + $0x147] sm:$0x1] }
  0x6a   : > { %667 = vst.msk [vmem:[#allocation2 + $0x99] sm:$0xff] %vm655_vm1, %v633_v7  ;;  %v10805_v18 = vld [vmem:[#allocation2 + $0x79] sm:$0xff] }
  0x6b   : > { %v735_v0 = vld [vmem:[#allocation2 + $0x87] sm:$0x1]  ;;  %668 = vst.msk [vmem:[#allocation2 + $0xa9] sm:$0xff] %vm655_vm1, %v634_v16  ;;  %v792_v21 = vld [vmem:[#allocation2 + $0x138] sm:$0xff] }
  0x6c   : > { %753 = vst.msk [vmem:[#allocation2 + $0x89] sm:$0x1] %vm711_vm2, %v735_v0  ;;  %v10790_v12 = vld [vmem:[#allocation2 + $0x60] sm:$0xff]  ;;  %v795_v51 = vld [vmem:[#allocation2 + $0x158] sm:$0xff] }
  0x6d   : > { %8978 = vmatmul.msk.f32.gmra.mxu0 %vm655_vm1, %v10706_v43  ;;  %v699_v10 = vld [vmem:[#allocation2 + $0x92] sm:$0x1]  ;;  %727 = vst.msk [vmem:[#allocation2 + $0x168] sm:$0x1] %vm711_vm2, %v708_v17  ;;  %v10815_v22 = vld [vmem:[#allocation2 + $0x7a] sm:$0xff] }
  0x6e   : > { %9010 = vmatmul.msk.f32.gmra.mxu1 %vm655_vm1, %v10708_v44  ;;  %718 = vst.msk [vmem:[#allocation2 + $0x90] sm:$0x1] %vm711_vm2, %v699_v10  ;;  %v10821_v24 = vld [vmem:[#allocation2 + $0x81] sm:$0xff]  ;;  %v10837_v31 = vld [vmem:[#allocation2 + $0x91] sm:$0xff] }
  0x6f   : > { %9002 = vmatmul.msk.f32.gmra.mxu3 %vm655_vm1, %v827_v46  ;;  %v10797_v15 = vld [vmem:[#allocation2 + $0x6a] sm:$0xff]  ;;  %669 = vst.msk [vmem:[#allocation2 + $0xb1] sm:$0xff] %vm655_vm1, %v635_v20  ;;  %v10839_v32 = vld [vmem:[#allocation2 + $0x80] sm:$0xff] }
  0x70   : > { %9044 = vmatmul.msk.f32.gmra.mxu2 %vm655_vm1, %v10716_v47  ;;  %v10823_v25 = vld [vmem:[#allocation2 + $0x78] sm:$0xff]  ;;  %670 = vst.msk [vmem:[#allocation2 + $0xc1] sm:$0xff] %vm655_vm1, %v636_v30  ;;  %v794_v35 = vld [vmem:[#allocation2 + $0x150] sm:$0xff] }
  0x71   : > { %v736_v13 = vld [vmem:[#allocation2 + $0x9f] sm:$0x1]  ;;  %671 = vst.msk [vmem:[#allocation2 + $0xc9] sm:$0xff] %vm655_vm1, %v637_v34  ;;  %v10847_v38 = vld [vmem:[#allocation2 + $0x92] sm:$0xff] }
  0x72   : > { %754 = vst.msk [vmem:[#allocation2 + $0xa1] sm:$0x1] %vm711_vm2, %v736_v13  ;;  %v700_v23 = vld [vmem:[#allocation2 + $0xaa] sm:$0x1]  ;;  %v10855_v45 = vld [vmem:[#allocation2 + $0x99] sm:$0xff]  ;;  %v797_v10 = vld [vmem:[#allocation2 + $0x170] sm:$0xff] }
  0x73   : > { %719 = vst.msk [vmem:[#allocation2 + $0xa8] sm:$0x1] %vm711_vm2, %v700_v23  ;;  %v10830_v28 = vld [vmem:[#allocation2 + $0x82] sm:$0xff]  ;;  %v10873_v58 = vld [vmem:[#allocation2 + $0x98] sm:$0xff] }
  0x74   : > { %760 = vst.msk [vmem:[#allocation2 + $0x131] sm:$0x1] %vm711_vm2, %v742_v41  ;;  %v10871_v55 = vld [vmem:[#allocation2 + $0xa9] sm:$0xff]  ;;  %v744_v30 = vld [vmem:[#allocation2 + $0x15f] sm:$0x1] }
  0x75   : > { %8979 = vmatmul.msk.f32.gmra.mxu0 %vm655_vm1, %v10722_v49  ;;  %v10857_v46 = vld [vmem:[#allocation2 + $0x90] sm:$0xff]  ;;  %672 = vst.msk [vmem:[#allocation2 + $0xd9] sm:$0xff] %vm655_vm1, %v638_v54  ;;  %v796_v61 = vld [vmem:[#allocation2 + $0x168] sm:$0xff] }
  0x76   : > { %9011 = vmatmul.msk.f32.gmra.mxu1 %vm655_vm1, %v10724_v50  ;;  %v737_v26 = vld [vmem:[#allocation2 + $0xb7] sm:$0x1]  ;;  %v10881_v0 = vld [vmem:[#allocation2 + $0xaa] sm:$0xff]  ;;  %761 = vst.msk [vmem:[#allocation2 + $0x149] sm:$0x1] %vm711_vm2, %v743_v3  ;;  %v1282_v23 = vld [vmem:[#allocation2 + $0x122] sm:$0xff] }
  0x77   : > { %9003 = vmatmul.msk.f32.gmra.mxu3 %vm655_vm1, %v828_v52  ;;  %755 = vst.msk [vmem:[#allocation2 + $0xb9] sm:$0x1] %vm711_vm2, %v737_v26  ;;  %v701_v39 = vld [vmem:[#allocation2 + $0xc2] sm:$0x1]  ;;  %v10888_v4 = vld [vmem:[#allocation2 + $0xb1] sm:$0xff] }
  0x78   : > { %9045 = vmatmul.msk.f32.gmra.mxu2 %vm655_vm1, %v10731_v53  ;;  %720 = vst.msk [vmem:[#allocation2 + $0xc0] sm:$0x1] %vm711_vm2, %v701_v39  ;;  %v738_v48 = vld [vmem:[#allocation2 + $0xcf] sm:$0x1]  ;;  %v10904_v17 = vld [vmem:[#allocation2 + $0xc1] sm:$0xff]  ;;  %v10906_v20 = vld [vmem:[#allocation2 + $0xb0] sm:$0xff] }
  0x79   : > { %756 = vst.msk [vmem:[#allocation2 + $0xd1] sm:$0x1] %vm711_vm2, %v738_v48  ;;  %v10864_v52 = vld [vmem:[#allocation2 + $0x9a] sm:$0xff]  ;;  %v10914_v26 = vld [vmem:[#allocation2 + $0xc2] sm:$0xff] }
  0x7a   : > { %v10890_v7 = vld [vmem:[#allocation2 + $0xa8] sm:$0xff]  ;;  %14656 = vst [vmem:[#allocation32_spill] sm:$0xff] %v10914_v26  ;;  %v642_v3 = vld [vmem:[%s10624_s27 + $0xa0] sm:$0xff] }
  0x7b   : > { %762 = vst.msk [vmem:[#allocation2 + $0x161] sm:$0x1] %vm711_vm2, %v744_v30  ;;  %v10923_v39 = vld [vmem:[#allocation2 + $0xc9] sm:$0xff] }
  0x7c   : > { %14657 = vst [vmem:[#allocation33_spill] sm:$0xff] %v10923_v39 }
  0x7d   : > { %8980 = vmatmul.msk.f32.gmra.mxu0 %vm655_vm1, %v10739_v56  ;;  %676 = vst.msk [vmem:[#allocation2 + $0x109] sm:$0xff] %vm655_vm1, %v642_v3 }
  0x7e   : > { %9012 = vmatmul.msk.f32.gmra.mxu1 %vm655_vm1, %v10741_v57  ;;  %v10897_v13 = vld [vmem:[#allocation2 + $0xb2] sm:$0xff] }
  0x7f   : > { %9004 = vmatmul.msk.f32.gmra.mxu3 %vm655_vm1, %v829_v59  ;;  %v639_v59 = vld [vmem:[%s10624_s27 + $0x88] sm:$0xff]  ;;  %14655 = vst [vmem:[#allocation31_spill] sm:$0xff] %v10897_v13  ;;  %v10925_v41 = vld [vmem:[#allocation2 + $0xc0] sm:$0xff] }
  0x80   : > { %9046 = vmatmul.msk.f32.gmra.mxu2 %vm655_vm1, %v10749_v60  ;;  %673 = vst.msk [vmem:[#allocation2 + $0xe1] sm:$0xff] %vm655_vm1, %v639_v59  ;;  %v10928_v59 = vld [vmem:[#allocation2 + $0x12a] sm:$0xff] }
  0x81   : > { %14658 = vst [vmem:[#allocation34_spill] sm:$0xff] %v10928_v59 }
  0x84   : > { %v704_v3 = vld [vmem:[#allocation2 + $0x10a] sm:$0x1] }
  0x85   : > { %8981 = vmatmul.msk.f32.gmra.mxu0 %vm655_vm1, %v10755_v62  ;;  %723 = vst.msk [vmem:[#allocation2 + $0x108] sm:$0x1] %vm711_vm2, %v704_v3 }
  0x86   : > { %9013 = vmatmul.msk.f32.gmra.mxu1 %vm655_vm1, %v10757_v63 }
  0x87   : > { %9005 = vmatmul.msk.f32.gmra.mxu3 %vm655_vm1, %v830_v1  ;;  %v702_v1 = vld [vmem:[#allocation2 + $0xda] sm:$0x1] }
  0x88   : > { %9047 = vmatmul.msk.f32.gmra.mxu2 %vm655_vm1, %v10764_v2  ;;  %721 = vst.msk [vmem:[#allocation2 + $0xd8] sm:$0x1] %vm711_vm2, %v702_v1 }
  0x8d   : > { %8982 = vmatmul.msk.f32.gmra.mxu0 %vm655_vm1, %v10772_v5 }
  0x8e   : > { %9014 = vmatmul.msk.f32.gmra.mxu1 %vm655_vm1, %v10774_v6 }
  0x8f   : > { %9031 = vmatmul.msk.f32.vlgmr.msrb.gmra.mxu3 %vm655_vm1, %v790_v8  ;;  %v739_v8 = vld [vmem:[#allocation2 + $0xe7] sm:$0x1] }
  0x90   : > { %9048 = vmatmul.msk.f32.gmra.mxu2 %vm655_vm1, %v10782_v9  ;;  %9072 = vmatpush.msk.msrb.mxu3 %vm929_vm0, %v1569_v42  ;;  %757 = vst.msk [vmem:[#allocation2 + $0xe9] sm:$0x1] %vm711_vm2, %v739_v8  ;;  %v2125_v8 = vld [vmem:[#allocation5 + $0x14] sm:$0x7] }
  0x91   : > { %9138 = vmatpush.msk.msrb.mxu1 %vm929_vm0, %v2125_v8  ;;  %v745_v8 = vld [vmem:[#allocation2 + $0x177] sm:$0x1] }
  0x92   : > { %763 = vst.msk [vmem:[#allocation2 + $0x179] sm:$0x1] %vm711_vm2, %v745_v8 }
  0x95   : > { %8983 = vmatmul.msk.f32.gmra.mxu0 %vm655_vm1, %v10788_v11 }
  0x96   : > { %9015 = vmatmul.msk.f32.gmra.mxu1 %vm655_vm1, %v10790_v12 }
  0x97   : > { %9032 = vmatmul.msk.f32.gmra.mxu3 %vm655_vm1, %v791_v14  ;;  %v640_v14 = vld [vmem:[%s10624_s27 + $0x90] sm:$0xff]  ;;  %v10982_v3 = vld [vmem:[#allocation2 + $0xe2] sm:$0xff] }
  0x98   : > { %9049 = vmatmul.msk.f32.gmra.mxu2 %vm655_vm1, %v10797_v15  ;;  %674 = vst.msk [vmem:[#allocation2 + $0xf1] sm:$0xff] %vm655_vm1, %v640_v14 }
  0x99   : > { %14668 = vst [vmem:[#allocation44_spill] sm:$0xff] %v10982_v3 }
  0x9d   : > { %8984 = vmatmul.msk.f32.gmra.mxu0 %vm655_vm1, %v10805_v18 }
  0x9e   : > { %9016 = vmatmul.msk.f32.gmra.mxu1 %vm655_vm1, %v10807_v19 }
  0x9f   : > { %9033 = vmatmul.msk.f32.gmra.mxu3 %vm655_vm1, %v792_v21  ;;  %v641_v21 = vld [vmem:[%s10624_s27 + $0x98] sm:$0xff] }
  0xa0   : > { %9050 = vmatmul.msk.f32.gmra.mxu2 %vm655_vm1, %v10815_v22  ;;  %675 = vst.msk [vmem:[#allocation2 + $0xf9] sm:$0xff] %vm655_vm1, %v641_v21  ;;  %v10949_v21 = vld [vmem:[#allocation2 + $0xc8] sm:$0xff] }
  0xa5   : > { %8985 = vmatmul.msk.f32.gmra.mxu0 %vm655_vm1, %v10821_v24 }
  0xa6   : > { %9017 = vmatmul.msk.f32.gmra.mxu1 %vm655_vm1, %v10823_v25 }
  0xa7   : > { %9034 = vmatmul.msk.f32.gmra.mxu3 %vm655_vm1, %v793_v27  ;;  %v703_v27 = vld [vmem:[#allocation2 + $0xf2] sm:$0x1]  ;;  %v740_v42 = vld [vmem:[#allocation2 + $0xff] sm:$0x1] }
  0xa8   : > { %9051 = vmatmul.msk.f32.gmra.mxu2 %vm655_vm1, %v10830_v28  ;;  %722 = vst.msk [vmem:[#allocation2 + $0xf0] sm:$0x1] %vm711_vm2, %v703_v27 }
  0xa9   : > { %758 = vst.msk [vmem:[#allocation2 + $0x101] sm:$0x1] %vm711_vm2, %v740_v42 }
  0xad   : > { %8986 = vmatmul.msk.f32.gmra.mxu0 %vm655_vm1, %v10837_v31 }
  0xae   : > { %9018 = vmatmul.msk.f32.gmra.mxu1 %vm655_vm1, %v10839_v32 }
  0xaf   : > { %9035 = vmatmul.msk.f32.gmra.mxu3 %vm655_vm1, %v794_v35 }
  0xb0   : > { %9052 = vmatmul.msk.f32.gmra.mxu2 %vm655_vm1, %v10847_v38 }
  0xb5   : > { %8987 = vmatmul.msk.f32.gmra.mxu0 %vm655_vm1, %v10855_v45 }
  0xb6   : > { %9019 = vmatmul.msk.f32.gmra.mxu1 %vm655_vm1, %v10857_v46 }
  0xb7   : > { %9036 = vmatmul.msk.f32.gmra.mxu3 %vm655_vm1, %v795_v51 }
  0xb8   : > { %9053 = vmatmul.msk.f32.gmra.mxu2 %vm655_vm1, %v10864_v52 }
  0xbd   : > { %8988 = vmatmul.msk.f32.gmra.mxu0 %vm655_vm1, %v10871_v55 }
  0xbe   : > { %9020 = vmatmul.msk.f32.gmra.mxu1 %vm655_vm1, %v10873_v58 }
  0xbf   : > { %9037 = vmatmul.msk.f32.gmra.mxu3 %vm655_vm1, %v796_v61  ;;  %v10934_v61 = vld [vmem:[#allocation2 + $0xca] sm:$0xff] }
  0xc0   : > { %9054 = vmatmul.msk.f32.gmra.mxu2 %vm655_vm1, %v10881_v0  ;;  %14659 = vst [vmem:[#allocation35_spill] sm:$0xff] %v10934_v61 }
  0xc5   : > { %8989 = vmatmul.msk.f32.gmra.mxu0 %vm655_vm1, %v10888_v4 }
  0xc6   : > { %9021 = vmatmul.msk.f32.gmra.mxu1 %vm655_vm1, %v10890_v7 }
  0xc7   : > { %9038 = vmatmul.msk.f32.gmra.mxu3 %vm655_vm1, %v797_v10 }
  0xc8   : > { %9055 = vmatmul.msk.f32.gmra.mxu2 %vm655_vm1, %v10897_v13  ;;  %v11059_v13 = vld [vmem:[#allocation2 + $0x172] sm:$0xff] }
  0xc9   : > { %14686 = vst [vmem:[#allocation62_spill] sm:$0xff] %v11059_v13 }
  0xca   : > { %v950_v16 = vpop.f32.mrf.mxu0 }
  0xcd   : > { %8990 = vmatmul.msk.f32.gmra.mxu0 %vm655_vm1, %v10904_v17 }
  0xce   : > { %9022 = vmatmul.msk.f32.gmra.mxu1 %vm655_vm1, %v10906_v20 }
  0xcf   : > { %9064 = vmatmul.msk.f32.vlgmr.msra.gmra.mxu3 %vm655_vm1, %v1282_v23  ;;  %v643_v23 = vld [vmem:[%s10624_s27 + $0xa8] sm:$0xff] }
  0xd0   : > { %9056 = vmatmul.msk.f32.gmra.mxu2 %vm655_vm1, %v10914_v26  ;;  %677 = vst.msk [vmem:[#allocation2 + $0x111] sm:$0xff] %vm655_vm1, %v643_v23  ;;  %v10996_v26 = vld [vmem:[#allocation2 + $0x152] sm:$0xff] }
  0xd1   : > { %14672 = vst [vmem:[#allocation48_spill] sm:$0xff] %v10996_v26 }
  0xd2   : > { %v10921_v34 = vpop.f32.mrf.mxu3  ;;  %v953_v35 = vpop.f32.mrf.mxu0 }
  0xd3   : > { %v1162_v48 = vpop.f32.mrf.mxu1  ;;  %v1408_v51 = vpop.f32.mrf.mxu2 }
  0xd4   : > { %v1163_v54 = vadd.f32 %v1162_v48, %v950_v16  ;;  %v10947_v16 = vld [vmem:[#allocation2 + $0xd9] sm:$0xff] }
  0xd5   : > { %8991 = vmatmul.msk.f32.gmra.mxu0 %vm655_vm1, %v10923_v39  ;;  %14661 = vst [vmem:[#allocation37_spill] sm:$0xff] %v10947_v16  ;;  %v10953_v48 = vld [vmem:[#allocation2 + $0x13a] sm:$0xff] }
  0xd6   : > { %9023 = vmatmul.msk.f32.gmra.mxu1 %vm655_vm1, %v10925_v41  ;;  %v10936_v1 = vadd.f32 %v1408_v51, %v1163_v54  ;;  %14662 = vst [vmem:[#allocation38_spill] sm:$0xff] %v10953_v48  ;;  %v10959_v51 = vld [vmem:[#allocation2 + $0xda] sm:$0xff] }
  0xd7   : > { %9065 = vmatmul.msk.f32.gmra.mxu3 %vm655_vm1, %v10928_v59  ;;  %14663 = vst [vmem:[#allocation39_spill] sm:$0xff] %v10959_v51  ;;  %v10973_v59 = vld [vmem:[#allocation2 + $0xd8] sm:$0xff] }
  0xd8   : > { %14660 = vst [vmem:[#allocation36_spill] sm:$0xff] %v10936_v1  ;;  %9057 = vmatmul.msk.f32.gmra.mxu2 %vm655_vm1, %v10934_v61  ;;  %v10976_v1 = vld [vmem:[#allocation2 + $0x142] sm:$0xff] }
  0xd9   : > { %14666 = vst [vmem:[#allocation42_spill] sm:$0xff] %v10973_v59 }
  0xda   : > { %v10945_v10 = vpop.f32.mrf.mxu3  ;;  %v956_v14 = vpop.f32.mrf.mxu0  ;;  %14667 = vst [vmem:[#allocation43_spill] sm:$0xff] %v10976_v1 }
  0xdb   : > { %v1165_v27 = vpop.f32.mrf.mxu1  ;;  %v1411_v30 = vpop.f32.mrf.mxu2 }
  0xdc   : > { %v1166_v42 = vadd.f32 %v1165_v27, %v953_v35  ;;  %v10971_v27 = vld [vmem:[#allocation2 + $0xe1] sm:$0xff] }
  0xdd   : > { %8992 = vmatmul.msk.f32.gmra.mxu0 %vm655_vm1, %v10947_v16  ;;  %14665 = vst [vmem:[#allocation41_spill] sm:$0xff] %v10971_v27 }
  0xde   : > { %9024 = vmatmul.msk.f32.gmra.mxu1 %vm655_vm1, %v10949_v21  ;;  %v10961_v54 = vadd.f32 %v1411_v30, %v1166_v42  ;;  %v741_v30 = vld [vmem:[#allocation2 + $0x117] sm:$0x1] }
  0xdf   : > { %9066 = vmatmul.msk.f32.gmra.mxu3 %vm655_vm1, %v10953_v48  ;;  %759 = vst.msk [vmem:[#allocation2 + $0x119] sm:$0x1] %vm711_vm2, %v741_v30 }
  0xe0   : > { %14664 = vst [vmem:[#allocation40_spill] sm:$0xff] %v10961_v54  ;;  %9058 = vmatmul.msk.f32.gmra.mxu2 %vm655_vm1, %v10959_v51  ;;  %v10994_v51 = vld [vmem:[#allocation2 + $0xe0] sm:$0xff] }
  0xe1   : > { %14671 = vst [vmem:[#allocation47_spill] sm:$0xff] %v10994_v51 }
  0xe2   : > { %v10969_v35 = vpop.f32.mrf.mxu3  ;;  %v959_v23 = vpop.f32.mrf.mxu0 }
  0xe3   : > { %v1168_v42 = vpop.f32.mrf.mxu1  ;;  %v1414_v54 = vpop.f32.mrf.mxu2 }
  0xe4   : > { %v1169_v48 = vadd.f32 %v1168_v42, %v956_v14  ;;  %v10992_v42 = vld [vmem:[#allocation2 + $0xf1] sm:$0xff] }
  0xe5   : > { %8993 = vmatmul.msk.f32.gmra.mxu0 %vm655_vm1, %v10971_v27  ;;  %14670 = vst [vmem:[#allocation46_spill] sm:$0xff] %v10992_v42 }
  0xe6   : > { %9025 = vmatmul.msk.f32.gmra.mxu1 %vm655_vm1, %v10973_v59  ;;  %v10984_v8 = vadd.f32 %v1414_v54, %v1169_v48  ;;  %v11002_v48 = vld [vmem:[#allocation2 + $0xf2] sm:$0xff] }
  0xe7   : > { %9067 = vmatmul.msk.f32.gmra.mxu3 %vm655_vm1, %v10976_v1  ;;  %14673 = vst [vmem:[#allocation49_spill] sm:$0xff] %v11002_v48  ;;  %v2682_v1 = vld [vmem:[#allocation5 + $0x1c] sm:$0x7] }
  0xe8   : > { %14669 = vst [vmem:[#allocation45_spill] sm:$0xff] %v10984_v8  ;;  %9059 = vmatmul.msk.f32.gmra.mxu2 %vm655_vm1, %v10982_v3  ;;  %9204 = vmatpush.msk.msra.mxu3 %vm929_vm0, %v2682_v1  ;;  %v11013_v8 = vld [vmem:[#allocation2 + $0xf9] sm:$0xff]  ;;  %v11015_v3 = vld [vmem:[#allocation2 + $0xf0] sm:$0xff] }
  0xe9   : > { %14675 = vst [vmem:[#allocation51_spill] sm:$0xff] %v11013_v8  ;;  %v11024_v1 = vld [vmem:[#allocation2 + $0xfa] sm:$0xff] }
  0xea   : > { %v10990_v30 = vpop.f32.mrf.mxu3  ;;  %v962_v14 = vpop.f32.mrf.mxu0  ;;  %14676 = vst [vmem:[#allocation52_spill] sm:$0xff] %v11015_v3 }
  0xeb   : > { %v1171_v27 = vpop.f32.mrf.mxu1  ;;  %v1417_v61 = vpop.f32.mrf.mxu2  ;;  %14678 = vst [vmem:[#allocation54_spill] sm:$0xff] %v11024_v1 }
  0xec   : > { %v1172_v16 = vadd.f32 %v1171_v27, %v959_v23 }
  0xed   : > { %8994 = vmatmul.msk.f32.gmra.mxu0 %vm655_vm1, %v10992_v42 }
  0xee   : > { %9026 = vmatmul.msk.f32.gmra.mxu1 %vm655_vm1, %v10994_v51  ;;  %v11004_v54 = vadd.f32 %v1417_v61, %v1172_v16  ;;  %v2404_v61 = vld [vmem:[#allocation5 + $0x18] sm:$0x7] }
  0xef   : > { %9068 = vmatmul.msk.f32.gmra.mxu3 %vm655_vm1, %v10996_v26  ;;  %9171 = vmatpush.msk.msrb.mxu2 %vm929_vm0, %v2404_v61  ;;  %v11035_v61 = vld [vmem:[#allocation2 + $0x109] sm:$0xff] }
  0xf0   : > { %14674 = vst [vmem:[#allocation50_spill] sm:$0xff] %v11004_v54  ;;  %9060 = vmatmul.msk.f32.gmra.mxu2 %vm655_vm1, %v11002_v48  ;;  %v11017_v54 = vld [vmem:[#allocation2 + $0x15a] sm:$0xff]  ;;  %v2960_v48 = vld [vmem:[#allocation5 + $0x20] sm:$0x7] }
  0xf1   : > { %14677 = vst [vmem:[#allocation53_spill] sm:$0xff] %v11017_v54  ;;  %9237 = vmatpush.msk.msra.mxu0 %vm929_vm0, %v2960_v48 }
  0xf2   : > { %v11011_v23 = vpop.f32.mrf.mxu3  ;;  %v965_v27 = vpop.f32.mrf.mxu0  ;;  %14680 = vst [vmem:[#allocation56_spill] sm:$0xff] %v11035_v61 }
  0xf3   : > { %v1174_v42 = vpop.f32.mrf.mxu1  ;;  %v1420_v51 = vpop.f32.mrf.mxu2 }
  0xf4   : > { %v1175_v16 = vadd.f32 %v1174_v42, %v962_v14 }
  0xf5   : > { %8995 = vmatmul.msk.f32.gmra.mxu0 %vm655_vm1, %v11013_v8  ;;  %v11037_v8 = vld [vmem:[#allocation2 + $0xf8] sm:$0xff] }
  0xf6   : > { %9027 = vmatmul.msk.f32.gmra.mxu1 %vm655_vm1, %v11015_v3  ;;  %v11026_v26 = vadd.f32 %v1420_v51, %v1175_v16  ;;  %14681 = vst [vmem:[#allocation57_spill] sm:$0xff] %v11037_v8  ;;  %v11039_v16 = vld [vmem:[#allocation2 + $0x16a] sm:$0xff] }
  0xf7   : > { %9069 = vmatmul.msk.f32.gmra.mxu3 %vm655_vm1, %v11017_v54  ;;  %14682 = vst [vmem:[#allocation58_spill] sm:$0xff] %v11039_v16  ;;  %v11045_v54 = vld [vmem:[#allocation2 + $0x10a] sm:$0xff] }
  0xf8   : > { %14679 = vst [vmem:[#allocation55_spill] sm:$0xff] %v11026_v26  ;;  %9061 = vmatmul.msk.f32.gmra.mxu2 %vm655_vm1, %v11024_v1  ;;  %v11057_v1 = vld [vmem:[#allocation2 + $0x108] sm:$0xff] }
  0xf9   : > { %14683 = vst [vmem:[#allocation59_spill] sm:$0xff] %v11045_v54 }
  0xfa   : > { %v11033_v14 = vpop.f32.mrf.mxu3  ;;  %v968_v42 = vpop.f32.mrf.mxu0 }
  0xfb   : > { %v1177_v3 = vpop.f32.mrf.mxu1  ;;  %v1423_v39 = vpop.f32.mrf.mxu2 }
  0xfc   : > { %v1178_v51 = vadd.f32 %v1177_v3, %v965_v27  ;;  %v11055_v27 = vld [vmem:[#allocation2 + $0x111] sm:$0xff] }
  0xfd   : > { %8996 = vmatmul.msk.f32.gmra.mxu0 %vm655_vm1, %v11035_v61  ;;  %14685 = vst [vmem:[#allocation61_spill] sm:$0xff] %v11055_v27 }
  0xfe   : > { %9028 = vmatmul.msk.f32.gmra.mxu1 %vm655_vm1, %v11037_v8  ;;  %v11047_v48 = vadd.f32 %v1423_v39, %v1178_v51  ;;  %v11065_v39 = vld [vmem:[#allocation2 + $0x112] sm:$0xff] }
  0xff   : > { %9070 = vmatmul.msk.f32.gmra.mxu3 %vm655_vm1, %v11039_v16  ;;  %14687 = vst [vmem:[#allocation63_spill] sm:$0xff] %v11065_v39 }
 0x100   : > { %14684 = vst [vmem:[#allocation60_spill] sm:$0xff] %v11047_v48  ;;  %9062 = vmatmul.msk.f32.gmra.mxu2 %vm655_vm1, %v11045_v54 }
 0x102   : > { %v11053_v26 = vpop.f32.mrf.mxu3  ;;  %v971_v3 = vpop.f32.mrf.mxu0 }
 0x103   : > { %v1180_v61 = vpop.f32.mrf.mxu1  ;;  %v1426_v59 = vpop.f32.mrf.mxu2 }
 0x104   : > { %v1181_v8 = vadd.f32 %v1180_v61, %v968_v42  ;;  %v11075_v61 = vld [vmem:[#allocation2 + $0x110] sm:$0xff] }
 0x105   : > { %8997 = vmatmul.msk.f32.gmra.mxu0 %vm655_vm1, %v11055_v27 }
 0x106   : > { %9029 = vmatmul.msk.f32.gmra.mxu1 %vm655_vm1, %v11057_v1  ;;  %v11067_v51 = vadd.f32 %v1426_v59, %v1181_v8 }
 0x107   : > { %9071 = vmatmul.msk.f32.gmra.mxu3 %vm655_vm1, %v11059_v13 }
 0x108   : > { %14688 = vst [vmem:[#allocation64_spill] sm:$0xff] %v11067_v51  ;;  %9063 = vmatmul.msk.f32.gmra.mxu2 %vm655_vm1, %v11065_v39 }
 0x10a   : > { %v11073_v16 = vpop.f32.mrf.mxu3  ;;  %v974_v42 = vpop.f32.mrf.mxu0 }
 0x10b   : > { %v1183_v48 = vpop.f32.mrf.mxu1  ;;  %v1429_v54 = vpop.f32.mrf.mxu2 }
 0x10c   : > { %v1184_v27 = vadd.f32 %v1183_v48, %v971_v3 }
 0x10d   : > { %9106 = vmatmul.msk.f32.vlgmr.msrb.gmra.mxu0 %vm655_vm1, %v10673_v29 }
 0x10e   : > { %9030 = vmatmul.msk.f32.gmra.mxu1 %vm655_vm1, %v11075_v61  ;;  %v11081_v59 = vadd.f32 %v1429_v54, %v1184_v27 }
 0x10f   : > { %9073 = vmatmul.msk.f32.vlgmr.msrb.gmra.mxu3 %vm655_vm1, %v10691_v37 }
 0x110   : > { %9172 = vmatmul.msk.f32.vlgmr.msrb.gmra.mxu2 %vm655_vm1, %v10724_v50 }
 0x112   : > { %v1234_v8 = vpop.f32.mrf.mxu3  ;;  %v977_v13 = vpop.f32.mrf.mxu0 }
 0x113   : > { %v11088_v51 = vadd.f32 %v1234_v8, %v10921_v34  ;;  %v1186_v48 = vpop.f32.mrf.mxu1  ;;  %v1432_v3 = vpop.f32.mrf.mxu2 }
 0x114   : > { %v1187_v39 = vadd.f32 %v1186_v48, %v974_v42 }
 0x115   : > { %9107 = vmatmul.msk.f32.gmra.mxu0 %vm655_vm1, %v10689_v36 }
 0x116   : > { %9139 = vmatmul.msk.f32.vlgmr.msrb.gmra.mxu1 %vm655_vm1, %v10680_v33  ;;  %v11094_v29 = vadd.f32 %v1432_v3, %v1187_v39 }
 0x117   : > { %9074 = vmatmul.msk.f32.gmra.mxu3 %vm655_vm1, %v10708_v44 }
 0x118   : > { %9173 = vmatmul.msk.f32.gmra.mxu2 %vm655_vm1, %v10741_v57 }
 0x11a   : > { %v1237_v37 = vpop.f32.mrf.mxu3  ;;  %v980_v34 = vpop.f32.mrf.mxu0 }
 0x11b   : > { %v11101_v54 = vadd.f32 %v1237_v37, %v10945_v10  ;;  %v1189_v27 = vpop.f32.mrf.mxu1  ;;  %v1435_v42 = vpop.f32.mrf.mxu2 }
 0x11c   : > { %v1190_v8 = vadd.f32 %v1189_v27, %v977_v13 }
 0x11d   : > { %9108 = vmatmul.msk.f32.gmra.mxu0 %vm655_vm1, %v10706_v43 }
 0x11e   : > { %9140 = vmatmul.msk.f32.gmra.mxu1 %vm655_vm1, %v10698_v40  ;;  %v11107_v33 = vadd.f32 %v1435_v42, %v1190_v8 }
 0x11f   : > { %9075 = vmatmul.msk.f32.gmra.mxu3 %vm655_vm1, %v10724_v50 }
 0x120   : > { %9174 = vmatmul.msk.f32.gmra.mxu2 %vm655_vm1, %v10757_v63 }
 0x122   : > { %v1240_v36 = vpop.f32.mrf.mxu3  ;;  %v983_v44 = vpop.f32.mrf.mxu0 }
 0x123   : > { %v11114_v10 = vadd.f32 %v1240_v36, %v10969_v35  ;;  %v1192_v13 = vpop.f32.mrf.mxu1  ;;  %v1438_v39 = vpop.f32.mrf.mxu2 }
 0x124   : > { %v1193_v48 = vadd.f32 %v1192_v13, %v980_v34 }
 0x125   : > { %9109 = vmatmul.msk.f32.gmra.mxu0 %vm655_vm1, %v10722_v49 }
 0x126   : > { %9141 = vmatmul.msk.f32.gmra.mxu1 %vm655_vm1, %v10716_v47  ;;  %v11120_v40 = vadd.f32 %v1438_v39, %v1193_v48 }
 0x127   : > { %9076 = vmatmul.msk.f32.gmra.mxu3 %vm655_vm1, %v10741_v57 }
 0x128   : > { %9175 = vmatmul.msk.f32.gmra.mxu2 %vm655_vm1, %v10774_v6 }
 0x12a   : > { %v1243_v43 = vpop.f32.mrf.mxu3  ;;  %v986_v50 = vpop.f32.mrf.mxu0 }
 0x12b   : > { %v11127_v35 = vadd.f32 %v1243_v43, %v10990_v30  ;;  %v1195_v3 = vpop.f32.mrf.mxu1  ;;  %v1441_v37 = vpop.f32.mrf.mxu2 }
 0x12c   : > { %v1196_v34 = vadd.f32 %v1195_v3, %v983_v44 }
 0x12d   : > { %9110 = vmatmul.msk.f32.gmra.mxu0 %vm655_vm1, %v10739_v56 }
 0x12e   : > { %9142 = vmatmul.msk.f32.gmra.mxu1 %vm655_vm1, %v10731_v53  ;;  %v11133_v47 = vadd.f32 %v1441_v37, %v1196_v34 }
 0x12f   : > { %9077 = vmatmul.msk.f32.gmra.mxu3 %vm655_vm1, %v10757_v63 }
 0x130   : > { %9176 = vmatmul.msk.f32.gmra.mxu2 %vm655_vm1, %v10790_v12 }
 0x132   : > { %v1246_v49 = vpop.f32.mrf.mxu3  ;;  %v989_v57 = vpop.f32.mrf.mxu0 }
 0x133   : > { %v11140_v30 = vadd.f32 %v1246_v49, %v11011_v23  ;;  %v1198_v27 = vpop.f32.mrf.mxu1  ;;  %v1444_v42 = vpop.f32.mrf.mxu2 }
 0x134   : > { %v1199_v8 = vadd.f32 %v1198_v27, %v986_v50 }
 0x135   : > { %9111 = vmatmul.msk.f32.gmra.mxu0 %vm655_vm1, %v10755_v62 }
 0x136   : > { %9143 = vmatmul.msk.f32.gmra.mxu1 %vm655_vm1, %v10749_v60  ;;  %v11146_v53 = vadd.f32 %v1444_v42, %v1199_v8 }
 0x137   : > { %9078 = vmatmul.msk.f32.gmra.mxu3 %vm655_vm1, %v10774_v6 }
 0x138   : > { %9177 = vmatmul.msk.f32.gmra.mxu2 %vm655_vm1, %v10807_v19 }
 0x13a   : > { %v1249_v56 = vpop.f32.mrf.mxu3  ;;  %v992_v63 = vpop.f32.mrf.mxu0 }
 0x13b   : > { %v11153_v23 = vadd.f32 %v1249_v56, %v11033_v14  ;;  %v1201_v36 = vpop.f32.mrf.mxu1  ;;  %v1447_v44 = vpop.f32.mrf.mxu2 }
 0x13c   : > { %v1202_v13 = vadd.f32 %v1201_v36, %v989_v57 }
 0x13d   : > { %9112 = vmatmul.msk.f32.gmra.mxu0 %vm655_vm1, %v10772_v5 }
 0x13e   : > { %9144 = vmatmul.msk.f32.gmra.mxu1 %vm655_vm1, %v10764_v2  ;;  %v11159_v60 = vadd.f32 %v1447_v44, %v1202_v13 }
 0x13f   : > { %9079 = vmatmul.msk.f32.gmra.mxu3 %vm655_vm1, %v10790_v12 }
 0x140   : > { %9178 = vmatmul.msk.f32.gmra.mxu2 %vm655_vm1, %v10823_v25 }
 0x142   : > { %v1252_v62 = vpop.f32.mrf.mxu3  ;;  %v995_v6 = vpop.f32.mrf.mxu0 }
 0x143   : > { %v11166_v14 = vadd.f32 %v1252_v62, %v11053_v26  ;;  %v1204_v39 = vpop.f32.mrf.mxu1  ;;  %v1450_v48 = vpop.f32.mrf.mxu2 }
 0x144   : > { %v1205_v43 = vadd.f32 %v1204_v39, %v992_v63 }
 0x145   : > { %9113 = vmatmul.msk.f32.gmra.mxu0 %vm655_vm1, %v10788_v11 }
 0x146   : > { %9145 = vmatmul.msk.f32.gmra.mxu1 %vm655_vm1, %v10782_v9  ;;  %v11172_v2 = vadd.f32 %v1450_v48, %v1205_v43 }
 0x147   : > { %9080 = vmatmul.msk.f32.gmra.mxu3 %vm655_vm1, %v10807_v19 }
 0x148   : > { %9179 = vmatmul.msk.f32.gmra.mxu2 %vm655_vm1, %v10839_v32 }
 0x14a   : > { %v1255_v5 = vpop.f32.mrf.mxu3  ;;  %v998_v12 = vpop.f32.mrf.mxu0 }
 0x14b   : > { %v11179_v26 = vadd.f32 %v1255_v5, %v11073_v16  ;;  %v1207_v50 = vpop.f32.mrf.mxu1  ;;  %v1453_v3 = vpop.f32.mrf.mxu2 }
 0x14c   : > { %v1208_v37 = vadd.f32 %v1207_v50, %v995_v6 }
 0x14d   : > { %9114 = vmatmul.msk.f32.gmra.mxu0 %vm655_vm1, %v10805_v18 }
 0x14e   : > { %9146 = vmatmul.msk.f32.gmra.mxu1 %vm655_vm1, %v10797_v15  ;;  %v11185_v9 = vadd.f32 %v1453_v3, %v1208_v37 }
 0x14f   : > { %9081 = vmatmul.msk.f32.gmra.mxu3 %vm655_vm1, %v10823_v25 }
 0x150   : > { %9180 = vmatmul.msk.f32.gmra.mxu2 %vm655_vm1, %v10857_v46 }
 0x152   : > { %v1480_v11 = vpop.f32.mrf.mxu3  ;;  %v1001_v19 = vpop.f32.mrf.mxu0 }
 0x153   : > { %v11192_v16 = vadd.f32 %v1480_v11, %v11088_v51  ;;  %v1210_v34 = vpop.f32.mrf.mxu1  ;;  %v1456_v49 = vpop.f32.mrf.mxu2 }
 0x154   : > { %v1211_v57 = vadd.f32 %v1210_v34, %v998_v12  ;;  %v14692_v34 = vld [vmem:[#allocation32_spill] sm:$0xff] }
 0x155   : > { %9115 = vmatmul.msk.f32.gmra.mxu0 %vm655_vm1, %v10821_v24 }
 0x156   : > { %9147 = vmatmul.msk.f32.gmra.mxu1 %vm655_vm1, %v10815_v22  ;;  %v11198_v15 = vadd.f32 %v1456_v49, %v1211_v57 }
 0x157   : > { %9082 = vmatmul.msk.f32.gmra.mxu3 %vm655_vm1, %v10839_v32 }
 0x158   : > { %9181 = vmatmul.msk.f32.gmra.mxu2 %vm655_vm1, %v10873_v58 }
 0x15a   : > { %v1483_v18 = vpop.f32.mrf.mxu3  ;;  %v1004_v25 = vpop.f32.mrf.mxu0 }
 0x15b   : > { %v11205_v51 = vadd.f32 %v1483_v18, %v11101_v54  ;;  %v1213_v27 = vpop.f32.mrf.mxu1  ;;  %v1459_v42 = vpop.f32.mrf.mxu2 }
 0x15c   : > { %v1214_v8 = vadd.f32 %v1213_v27, %v1001_v19 }
 0x15d   : > { %9116 = vmatmul.msk.f32.gmra.mxu0 %vm655_vm1, %v10837_v31 }
 0x15e   : > { %9148 = vmatmul.msk.f32.gmra.mxu1 %vm655_vm1, %v10830_v28  ;;  %v11211_v22 = vadd.f32 %v1459_v42, %v1214_v8  ;;  %v14694_v8 = vld [vmem:[#allocation37_spill] sm:$0xff] }
 0x15f   : > { %9083 = vmatmul.msk.f32.gmra.mxu3 %vm655_vm1, %v10857_v46 }
 0x160   : > { %9182 = vmatmul.msk.f32.gmra.mxu2 %vm655_vm1, %v10890_v7 }
 0x162   : > { %v1486_v24 = vpop.f32.mrf.mxu3  ;;  %v1007_v32 = vpop.f32.mrf.mxu0 }
 0x163   : > { %v11218_v54 = vadd.f32 %v1486_v24, %v11114_v10  ;;  %v1216_v56 = vpop.f32.mrf.mxu1  ;;  %v1462_v63 = vpop.f32.mrf.mxu2  ;;  %v14695_v24 = vld [vmem:[#allocation35_spill] sm:$0xff] }
 0x164   : > { %v1217_v36 = vadd.f32 %v1216_v56, %v1004_v25 }
 0x165   : > { %9117 = vmatmul.msk.f32.gmra.mxu0 %vm655_vm1, %v10855_v45 }
 0x166   : > { %9149 = vmatmul.msk.f32.gmra.mxu1 %vm655_vm1, %v10847_v38  ;;  %v11224_v28 = vadd.f32 %v1462_v63, %v1217_v36  ;;  %v14697_v63 = vld [vmem:[#allocation36_spill] sm:$0xff] }
 0x167   : > { %9084 = vmatmul.msk.f32.gmra.mxu3 %vm655_vm1, %v10873_v58 }
 0x168   : > { %9183 = vmatmul.msk.f32.gmra.mxu2 %vm655_vm1, %v10906_v20 }
 0x16a   : > { %v1489_v31 = vpop.f32.mrf.mxu3  ;;  %v1010_v46 = vpop.f32.mrf.mxu0 }
 0x16b   : > { %v11231_v10 = vadd.f32 %v1489_v31, %v11127_v35  ;;  %v1219_v44 = vpop.f32.mrf.mxu1  ;;  %v1465_v13 = vpop.f32.mrf.mxu2 }
 0x16c   : > { %v1220_v62 = vadd.f32 %v1219_v44, %v1007_v32 }
 0x16d   : > { %9118 = vmatmul.msk.f32.gmra.mxu0 %vm655_vm1, %v10871_v55 }
 0x16e   : > { %9150 = vmatmul.msk.f32.gmra.mxu1 %vm655_vm1, %v10864_v52  ;;  %v11237_v38 = vadd.f32 %v1465_v13, %v1220_v62  ;;  %v14698_v13 = vld [vmem:[#allocation41_spill] sm:$0xff]  ;;  %v14699_v62 = vld [vmem:[#allocation39_spill] sm:$0xff] }
 0x16f   : > { %9085 = vmatmul.msk.f32.gmra.mxu3 %vm655_vm1, %v10890_v7 }
 0x170   : > { %9184 = vmatmul.msk.f32.gmra.mxu2 %vm655_vm1, %v10925_v41 }
 0x172   : > { %v1492_v45 = vpop.f32.mrf.mxu3  ;;  %v1013_v58 = vpop.f32.mrf.mxu0 }
 0x173   : > { %v11244_v35 = vadd.f32 %v1492_v45, %v11140_v30  ;;  %v1222_v6 = vpop.f32.mrf.mxu1  ;;  %v1468_v39 = vpop.f32.mrf.mxu2 }
 0x174   : > { %v1223_v48 = vadd.f32 %v1222_v6, %v1010_v46  ;;  %v14700_v6 = vld [vmem:[#allocation57_spill] sm:$0xff] }
 0x175   : > { %9119 = vmatmul.msk.f32.gmra.mxu0 %vm655_vm1, %v10888_v4 }
 0x176   : > { %9151 = vmatmul.msk.f32.gmra.mxu1 %vm655_vm1, %v10881_v0  ;;  %v11250_v52 = vadd.f32 %v1468_v39, %v1223_v48  ;;  %v14689_v0 = vld [vmem:[#allocation31_spill] sm:$0xff] }
 0x177   : > { %9086 = vmatmul.msk.f32.gmra.mxu3 %vm655_vm1, %v10906_v20  ;;  %v14690_v20 = vld [vmem:[#allocation42_spill] sm:$0xff] }
 0x178   : > { %9185 = vmatmul.msk.f32.gmra.mxu2 %vm655_vm1, %v10949_v21 }
 0x17a   : > { %v1495_v55 = vpop.f32.mrf.mxu3  ;;  %v1016_v7 = vpop.f32.mrf.mxu0 }
 0x17b   : > { %v11257_v30 = vadd.f32 %v1495_v55, %v11153_v23  ;;  %v1225_v43 = vpop.f32.mrf.mxu1  ;;  %v1471_v5 = vpop.f32.mrf.mxu2 }
 0x17c   : > { %v1226_v12 = vadd.f32 %v1225_v43, %v1013_v58  ;;  %v3523_v58 = vld [vmem:[#allocation12 + $0x8] sm:$0x3f] }
 0x17d   : > { %9120 = vmatmul.msk.f32.gmra.mxu0 %vm655_vm1, %v10904_v17  ;;  %v14691_v17 = vld [vmem:[#allocation33_spill] sm:$0xff]  ;;  %9270 = vmatpush.msk.msra.mxu1 %vm3620_vm3, %v3523_v58 }
 0x17e   : > { %9152 = vmatmul.msk.f32.gmra.mxu1 %vm655_vm1, %v14689_v0  ;;  %v11263_v4 = vadd.f32 %v1471_v5, %v1226_v12 }
 0x17f   : > { %9087 = vmatmul.msk.f32.gmra.mxu3 %vm655_vm1, %v10925_v41  ;;  %v14693_v41 = vld [vmem:[#allocation47_spill] sm:$0xff] }
 0x180   : > { %9186 = vmatmul.msk.f32.gmra.mxu2 %vm655_vm1, %v14690_v20 }
 0x182   : > { %v1498_v50 = vpop.f32.mrf.mxu3  ;;  %v1019_v23 = vpop.f32.mrf.mxu0 }
 0x183   : > { %v11270_v3 = vadd.f32 %v1498_v50, %v11166_v14  ;;  %v1228_v37 = vpop.f32.mrf.mxu1  ;;  %v1474_v11 = vpop.f32.mrf.mxu2  ;;  %v14703_v50 = vld [vmem:[#allocation44_spill] sm:$0xff] }
 0x184   : > { %v1229_v19 = vadd.f32 %v1228_v37, %v1016_v7  ;;  %v14701_v7 = vld [vmem:[#allocation40_spill] sm:$0xff] }
 0x185   : > { %9121 = vmatmul.msk.f32.gmra.mxu0 %vm655_vm1, %v14691_v17  ;;  %v14704_v17 = vld [vmem:[#allocation45_spill] sm:$0xff] }
 0x186   : > { %9153 = vmatmul.msk.f32.gmra.mxu1 %vm655_vm1, %v14692_v34  ;;  %v11276_v49 = vadd.f32 %v1474_v11, %v1229_v19 }
 0x187   : > { %9088 = vmatmul.msk.f32.gmra.mxu3 %vm655_vm1, %v10949_v21  ;;  %v14696_v21 = vld [vmem:[#allocation52_spill] sm:$0xff] }
 0x188   : > { %9187 = vmatmul.msk.f32.gmra.mxu2 %vm655_vm1, %v14693_v41 }
 0x18a   : > { %v1501_v57 = vpop.f32.mrf.mxu3  ;;  %v1964_v14 = vpop.f32.mrf.mxu0 }
 0x18b   : > { %v11283_v18 = vadd.f32 %v1501_v57, %v11179_v26  ;;  %v1231_v25 = vpop.f32.mrf.mxu1  ;;  %v1477_v27 = vpop.f32.mrf.mxu2 }
 0x18c   : > { %v1232_v42 = vadd.f32 %v1231_v25, %v1019_v23  ;;  %v14705_v25 = vld [vmem:[#allocation51_spill] sm:$0xff] }
 0x18d   : > { %9122 = vmatmul.msk.f32.gmra.mxu0 %vm655_vm1, %v14694_v8 }
 0x18e   : > { %9154 = vmatmul.msk.f32.gmra.mxu1 %vm655_vm1, %v14695_v24  ;;  %v11289_v32 = vadd.f32 %v1477_v27, %v1232_v42  ;;  %v14706_v27 = vld [vmem:[#allocation49_spill] sm:$0xff] }
 0x18f   : > { %9089 = vmatmul.msk.f32.gmra.mxu3 %vm655_vm1, %v14690_v20  ;;  %v14702_v20 = vld [vmem:[#allocation46_spill] sm:$0xff] }
 0x190   : > { %9188 = vmatmul.msk.f32.gmra.mxu2 %vm655_vm1, %v14696_v21 }
 0x192   : > { %v1686_v56 = vpop.f32.mrf.mxu3  ;;  %v1967_v26 = vpop.f32.mrf.mxu0 }
 0x193   : > { %v1782_v36 = vadd.f32 %v1686_v56, %v14697_v63  ;;  %v2242_v31 = vpop.f32.mrf.mxu1  ;;  %v2521_v46 = vpop.f32.mrf.mxu2  ;;  %v14707_v56 = vld [vmem:[#allocation50_spill] sm:$0xff] }
 0x195   : > { %v2060_v44 = vadd.f32 %v1964_v14, %v1782_v36  ;;  %9123 = vmatmul.msk.f32.gmra.mxu0 %vm655_vm1, %v14698_v13  ;;  %v2391_v13 = vld [vmem:[#allocation2 + $0x120] sm:$0xff] }
 0x196   : > { %9155 = vmatmul.msk.f32.gmra.mxu1 %vm655_vm1, %v14699_v62 }
 0x197   : > { %v2338_v45 = vadd.f32 %v2242_v31, %v2060_v44  ;;  %9090 = vmatmul.msk.f32.gmra.mxu3 %vm655_vm1, %v14693_v41  ;;  %v14709_v44 = vld [vmem:[#allocation54_spill] sm:$0xff] }
 0x198   : > { %9189 = vmatmul.msk.f32.gmra.mxu2 %vm655_vm1, %v14700_v6 }
 0x199   : > { %v11305_v39 = vadd.f32 %v2521_v46, %v2338_v45  ;;  %v14708_v46 = vld [vmem:[#allocation56_spill] sm:$0xff] }
 0x19a   : > { %v1689_v48 = vpop.f32.mrf.mxu3  ;;  %v1970_v55 = vpop.f32.mrf.mxu0 }
 0x19b   : > { %v1783_v43 = vadd.f32 %v1689_v48, %v14701_v7  ;;  %v2245_v5 = vpop.f32.mrf.mxu1  ;;  %v2524_v12 = vpop.f32.mrf.mxu2  ;;  %v14710_v48 = vld [vmem:[#allocation55_spill] sm:$0xff] }
 0x19d   : > { %v2061_v0 = vadd.f32 %v1967_v26, %v1783_v43  ;;  %9124 = vmatmul.msk.f32.gmra.mxu0 %vm655_vm1, %v14702_v20  ;;  %v2392_v20 = vld [vmem:[#allocation2 + $0x128] sm:$0xff] }
 0x19e   : > { %9156 = vmatmul.msk.f32.gmra.mxu1 %vm655_vm1, %v14703_v50 }
 0x19f   : > { %v2339_v23 = vadd.f32 %v2245_v5, %v2061_v0  ;;  %9091 = vmatmul.msk.f32.gmra.mxu3 %vm655_vm1, %v14696_v21  ;;  %v14712_v0 = vld [vmem:[#allocation59_spill] sm:$0xff] }
 0x1a0   : > { %9190 = vmatmul.msk.f32.gmra.mxu2 %vm655_vm1, %v11057_v1 }
 0x1a1   : > { %v11316_v37 = vadd.f32 %v2524_v12, %v2339_v23  ;;  %v14711_v12 = vld [vmem:[#allocation61_spill] sm:$0xff] }
 0x1a2   : > { %v1692_v11 = vpop.f32.mrf.mxu3  ;;  %v1973_v19 = vpop.f32.mrf.mxu0 }
 0x1a3   : > { %v1784_v34 = vadd.f32 %v1692_v11, %v14704_v17  ;;  %v2248_v41 = vpop.f32.mrf.mxu1  ;;  %v2527_v57 = vpop.f32.mrf.mxu2  ;;  %v14713_v17 = vld [vmem:[#allocation60_spill] sm:$0xff] }
 0x1a5   : > { %v2062_v14 = vadd.f32 %v1970_v55, %v1784_v34  ;;  %9125 = vmatmul.msk.f32.gmra.mxu0 %vm655_vm1, %v14705_v25  ;;  %v14714_v25 = vld [vmem:[#allocation63_spill] sm:$0xff] }
 0x1a6   : > { %9157 = vmatmul.msk.f32.gmra.mxu1 %vm655_vm1, %v14706_v27 }
 0x1a7   : > { %v2340_v42 = vadd.f32 %v2248_v41, %v2062_v14  ;;  %9092 = vmatmul.msk.f32.gmra.mxu3 %vm655_vm1, %v14700_v6 }
 0x1a8   : > { %9191 = vmatmul.msk.f32.gmra.mxu2 %vm655_vm1, %v11075_v61 }
 0x1a9   : > { %v11327_v8 = vadd.f32 %v2527_v57, %v2340_v42 }
 0x1aa   : > { %v1695_v24 = vpop.f32.mrf.mxu3  ;;  %v1976_v21 = vpop.f32.mrf.mxu0 }
 0x1ab   : > { %v1785_v26 = vadd.f32 %v1695_v24, %v14707_v56  ;;  %v2251_v63 = vpop.f32.mrf.mxu1  ;;  %v2530_v36 = vpop.f32.mrf.mxu2  ;;  %v11360_v56 = vld [vmem:[#allocation2 + $0x129] sm:$0xff] }
 0x1ad   : > { %v2063_v31 = vadd.f32 %v1973_v19, %v1785_v26  ;;  %9126 = vmatmul.msk.f32.gmra.mxu0 %vm655_vm1, %v14708_v46  ;;  %v11349_v19 = vld [vmem:[#allocation2 + $0x121] sm:$0xff] }
 0x1ae   : > { %9158 = vmatmul.msk.f32.gmra.mxu1 %vm655_vm1, %v14709_v44  ;;  %v11362_v26 = vld [vmem:[#allocation2 + $0x122] sm:$0xff]  ;;  %v652_v44 = vld [vmem:[%s10624_s27 + $0xf0] sm:$0xff] }
 0x1af   : > { %v2341_v62 = vadd.f32 %v2251_v63, %v2063_v31  ;;  %9093 = vmatmul.msk.f32.gmra.mxu3 %vm655_vm1, %v11057_v1  ;;  %v14715_v63 = vld [vmem:[#allocation64_spill] sm:$0xff]  ;;  %686 = vst.msk [vmem:[#allocation2 + $0x181] sm:$0xff] %vm655_vm1, %v652_v44 }
 0x1b0   : > { %9192 = vmatmul.msk.f32.gmra.mxu2 %vm655_vm1, %v2391_v13  ;;  %v2397_v44 = vld [vmem:[#allocation2 + $0x168] sm:$0xff] }
 0x1b1   : > { %v11337_v45 = vadd.f32 %v2530_v36, %v2341_v62 }
 0x1b2   : > { %v1698_v58 = vpop.f32.mrf.mxu3  ;;  %v1979_v6 = vpop.f32.mrf.mxu0 }
 0x1b3   : > { %v1786_v55 = vadd.f32 %v1698_v58, %v14710_v48  ;;  %v2254_v7 = vpop.f32.mrf.mxu1  ;;  %v2533_v43 = vpop.f32.mrf.mxu2 }
 0x1b5   : > { %v2064_v5 = vadd.f32 %v1976_v21, %v1786_v55  ;;  %9127 = vmatmul.msk.f32.gmra.mxu0 %vm655_vm1, %v14711_v12 }
 0x1b6   : > { %9159 = vmatmul.msk.f32.gmra.mxu1 %vm655_vm1, %v14712_v0  ;;  %v709_v12 = vld [vmem:[#allocation2 + $0x182] sm:$0x1] }
 0x1b7   : > { %v2342_v50 = vadd.f32 %v2254_v7, %v2064_v5  ;;  %9094 = vmatmul.msk.f32.gmra.mxu3 %vm655_vm1, %v11075_v61  ;;  %v2393_v61 = vld [vmem:[#allocation2 + $0x138] sm:$0xff]  ;;  %728 = vst.msk [vmem:[#allocation2 + $0x180] sm:$0x1] %vm711_vm2, %v709_v12 }
 0x1b8   : > { %9193 = vmatmul.msk.f32.gmra.mxu2 %vm655_vm1, %v2392_v20  ;;  %v11375_v7 = vld [vmem:[#allocation2 + $0x139] sm:$0xff] }
 0x1b9   : > { %v11347_v1 = vadd.f32 %v2533_v43, %v2342_v50  ;;  %v14716_v50 = vld [vmem:[#allocation34_spill] sm:$0xff] }
 0x1ba   : > { %v1701_v23 = vpop.f32.mrf.mxu3  ;;  %v1982_v11 = vpop.f32.mrf.mxu0 }
 0x1bb   : > { %v1787_v34 = vadd.f32 %v1701_v23, %v14713_v17  ;;  %v2257_v41 = vpop.f32.mrf.mxu1  ;;  %v2536_v57 = vpop.f32.mrf.mxu2 }
 0x1bd   : > { %v2065_v14 = vadd.f32 %v1979_v6, %v1787_v34  ;;  %9128 = vmatmul.msk.f32.gmra.mxu0 %vm655_vm1, %v11349_v19 }
 0x1be   : > { %9160 = vmatmul.msk.f32.gmra.mxu1 %vm655_vm1, %v14714_v25 }
 0x1bf   : > { %v2343_v27 = vadd.f32 %v2257_v41, %v2065_v14  ;;  %9095 = vmatmul.msk.f32.gmra.mxu3 %vm655_vm1, %v2391_v13  ;;  %v2394_v13 = vld [vmem:[#allocation2 + $0x140] sm:$0xff]  ;;  %v653_v14 = vld [vmem:[%s10624_s27 + $0xf8] sm:$0xff] }
 0x1c0   : > { %9194 = vmatmul.msk.f32.gmra.mxu2 %vm655_vm1, %v2393_v61  ;;  %v11387_v41 = vld [vmem:[#allocation2 + $0x141] sm:$0xff]  ;;  %687 = vst.msk [vmem:[#allocation2 + $0x189] sm:$0xff] %vm655_vm1, %v653_v14 }
 0x1c1   : > { %v11358_v42 = vadd.f32 %v2536_v57, %v2343_v27  ;;  %v14717_v27 = vld [vmem:[#allocation38_spill] sm:$0xff] }
 0x1c2   : > { %v1704_v24 = vpop.f32.mrf.mxu3  ;;  %v1985_v21 = vpop.f32.mrf.mxu0 }
 0x1c3   : > { %v1788_v36 = vadd.f32 %v1704_v24, %v14715_v63  ;;  %v2260_v31 = vpop.f32.mrf.mxu1  ;;  %v2539_v46 = vpop.f32.mrf.mxu2  ;;  %v11400_v63 = vld [vmem:[#allocation2 + $0x151] sm:$0xff] }
 0x1c5   : > { %v2066_v62 = vadd.f32 %v1982_v11, %v1788_v36  ;;  %9129 = vmatmul.msk.f32.gmra.mxu0 %vm655_vm1, %v11360_v56  ;;  %v710_v36 = vld [vmem:[#allocation2 + $0x19a] sm:$0x1] }
 0x1c6   : > { %9161 = vmatmul.msk.f32.gmra.mxu1 %vm655_vm1, %v11362_v26  ;;  %729 = vst.msk [vmem:[#allocation2 + $0x198] sm:$0x1] %vm711_vm2, %v710_v36 }
 0x1c7   : > { %v2344_v58 = vadd.f32 %v2260_v31, %v2066_v62  ;;  %9096 = vmatmul.msk.f32.gmra.mxu3 %vm655_vm1, %v2392_v20  ;;  %v2395_v20 = vld [vmem:[#allocation2 + $0x150] sm:$0xff] }
 0x1c8   : > { %9195 = vmatmul.msk.f32.gmra.mxu2 %vm655_vm1, %v2394_v13 }
 0x1c9   : > { %v11373_v6 = vadd.f32 %v2539_v46, %v2344_v58  ;;  %v14718_v46 = vld [vmem:[#allocation43_spill] sm:$0xff] }
 0x1ca   : > { %v1707_v48 = vpop.f32.mrf.mxu3  ;;  %v1988_v55 = vpop.f32.mrf.mxu0  ;;  %v11412_v58 = vld [vmem:[#allocation2 + $0x159] sm:$0xff] }
 0x1cb   : > { %v1789_v43 = vadd.f32 %v1707_v48, %v11081_v59  ;;  %v2263_v5 = vpop.f32.mrf.mxu1  ;;  %v2542_v23 = vpop.f32.mrf.mxu2 }
 0x1cd   : > { %v2067_v0 = vadd.f32 %v1985_v21, %v1789_v43  ;;  %9130 = vmatmul.msk.f32.gmra.mxu0 %vm655_vm1, %v11375_v7  ;;  %v2398_v43 = vld [vmem:[#allocation2 + $0x170] sm:$0xff] }
 0x1ce   : > { %9162 = vmatmul.msk.f32.gmra.mxu1 %vm655_vm1, %v14716_v50  ;;  %v11424_v50 = vld [vmem:[#allocation2 + $0x169] sm:$0xff] }
 0x1cf   : > { %v2345_v11 = vadd.f32 %v2263_v5, %v2067_v0  ;;  %9097 = vmatmul.msk.f32.gmra.mxu3 %vm655_vm1, %v2393_v61  ;;  %v2396_v61 = vld [vmem:[#allocation2 + $0x158] sm:$0xff]  ;;  %v746_v5 = vld [vmem:[#allocation2 + $0x18f] sm:$0x1] }
 0x1d0   : > { %9196 = vmatmul.msk.f32.gmra.mxu2 %vm655_vm1, %v2395_v20  ;;  %764 = vst.msk [vmem:[#allocation2 + $0x191] sm:$0x1] %vm711_vm2, %v746_v5  ;;  %v2402_v5 = vld [vmem:[#allocation2 + $0x1a0] sm:$0xff] }
 0x1d1   : > { %v11385_v59 = vadd.f32 %v2542_v23, %v2345_v11  ;;  %v14720_v23 = vld [vmem:[#allocation53_spill] sm:$0xff]  ;;  %v2399_v11 = vld [vmem:[#allocation2 + $0x180] sm:$0xff] }
 0x1d2   : > { %v1710_v17 = vpop.f32.mrf.mxu3  ;;  %v1991_v34 = vpop.f32.mrf.mxu0 }
 0x1d3   : > { %v1790_v57 = vadd.f32 %v1710_v17, %v11094_v29 }
 0x1d5   : > { %v11391_v25 = vadd.f32 %v1988_v55, %v1790_v57  ;;  %9131 = vmatmul.msk.f32.gmra.mxu0 %vm655_vm1, %v11387_v41  ;;  %v14719_v55 = vld [vmem:[#allocation48_spill] sm:$0xff]  ;;  %v11435_v57 = vld [vmem:[#allocation2 + $0x171] sm:$0xff] }
 0x1d6   : > { %9163 = vmatmul.msk.f32.gmra.mxu1 %vm655_vm1, %v14717_v27  ;;  %v14721_v27 = vld [vmem:[#allocation58_spill] sm:$0xff] }
 0x1d7   : > { %9098 = vmatmul.msk.f32.gmra.mxu3 %vm655_vm1, %v2394_v13 }
 0x1d8   : > { %9197 = vmatmul.msk.f32.gmra.mxu2 %vm655_vm1, %v2396_v61 }
 0x1da   : > { %v1713_v24 = vpop.f32.mrf.mxu3  ;;  %v1994_v21 = vpop.f32.mrf.mxu0 }
 0x1db   : > { %v1791_v29 = vadd.f32 %v1713_v24, %v11107_v33 }
 0x1dd   : > { %v11403_v31 = vadd.f32 %v1991_v34, %v1791_v29  ;;  %9132 = vmatmul.msk.f32.gmra.mxu0 %vm655_vm1, %v11400_v63  ;;  %v11446_v29 = vld [vmem:[#allocation2 + $0x181] sm:$0xff] }
 0x1de   : > { %9164 = vmatmul.msk.f32.gmra.mxu1 %vm655_vm1, %v14718_v46  ;;  %v14722_v46 = vld [vmem:[#allocation62_spill] sm:$0xff] }
 0x1df   : > { %9099 = vmatmul.msk.f32.gmra.mxu3 %vm655_vm1, %v2395_v20 }
 0x1e0   : > { %9198 = vmatmul.msk.f32.gmra.mxu2 %vm655_vm1, %v2397_v44 }
 0x1e2   : > { %v1716_v62 = vpop.f32.mrf.mxu3  ;;  %v1997_v13 = vpop.f32.mrf.mxu0 }
 0x1e3   : > { %v1792_v33 = vadd.f32 %v1716_v62, %v11120_v40 }
 0x1e5   : > { %v11415_v48 = vadd.f32 %v1994_v21, %v1792_v33  ;;  %9133 = vmatmul.msk.f32.gmra.mxu0 %vm655_vm1, %v11412_v58  ;;  %v11457_v33 = vld [vmem:[#allocation2 + $0x189] sm:$0xff] }
 0x1e6   : > { %9165 = vmatmul.msk.f32.gmra.mxu1 %vm655_vm1, %v14719_v55  ;;  %v11459_v55 = vld [vmem:[#allocation2 + $0x182] sm:$0xff] }
 0x1e7   : > { %9100 = vmatmul.msk.f32.gmra.mxu3 %vm655_vm1, %v2396_v61  ;;  %v2400_v61 = vld [vmem:[#allocation2 + $0x188] sm:$0xff] }
 0x1e8   : > { %9199 = vmatmul.msk.f32.gmra.mxu2 %vm655_vm1, %v2398_v43 }
 0x1ea   : > { %v1719_v12 = vpop.f32.mrf.mxu3  ;;  %v2000_v0 = vpop.f32.mrf.mxu0 }
 0x1eb   : > { %v1793_v40 = vadd.f32 %v1719_v12, %v11133_v47 }
 0x1ed   : > { %v11427_v20 = vadd.f32 %v1997_v13, %v1793_v40  ;;  %9134 = vmatmul.msk.f32.gmra.mxu0 %vm655_vm1, %v11424_v50  ;;  %v2927_v40 = vld [vmem:[#allocation2 + $0x32] sm:$0xff] }
 0x1ee   : > { %9166 = vmatmul.msk.f32.gmra.mxu1 %vm655_vm1, %v14720_v23  ;;  %v11470_v23 = vld [vmem:[#allocation2 + $0x18a] sm:$0xff] }
 0x1ef   : > { %9101 = vmatmul.msk.f32.gmra.mxu3 %vm655_vm1, %v2397_v44  ;;  %v2401_v44 = vld [vmem:[#allocation2 + $0x198] sm:$0xff] }
 0x1f0   : > { %9200 = vmatmul.msk.f32.gmra.mxu2 %vm655_vm1, %v2399_v11 }
 0x1f2   : > { %v1722_v17 = vpop.f32.mrf.mxu3  ;;  %v2003_v34 = vpop.f32.mrf.mxu0 }
 0x1f3   : > { %v1794_v14 = vadd.f32 %v1722_v17, %v11146_v53 }
 0x1f5   : > { %v11438_v47 = vadd.f32 %v2000_v0, %v1794_v14  ;;  %9135 = vmatmul.msk.f32.gmra.mxu0 %vm655_vm1, %v11435_v57 }
 0x1f6   : > { %9167 = vmatmul.msk.f32.gmra.mxu1 %vm655_vm1, %v14721_v27  ;;  %v2928_v27 = vld [vmem:[#allocation2 + $0x3a] sm:$0xff] }
 0x1f7   : > { %9102 = vmatmul.msk.f32.gmra.mxu3 %vm655_vm1, %v2398_v43 }
 0x1f8   : > { %9201 = vmatmul.msk.f32.gmra.mxu2 %vm655_vm1, %v2400_v61 }
 0x1fa   : > { %v1725_v24 = vpop.f32.mrf.mxu3  ;;  %v2006_v21 = vpop.f32.mrf.mxu0 }
 0x1fb   : > { %v1795_v36 = vadd.f32 %v1725_v24, %v11159_v60  ;;  %v2650_v24 = vld [vmem:[#allocation2 + $0x39] sm:$0xff] }
 0x1fd   : > { %v11449_v53 = vadd.f32 %v2003_v34, %v1795_v36  ;;  %9136 = vmatmul.msk.f32.gmra.mxu0 %vm655_vm1, %v11446_v29 }
 0x1fe   : > { %9168 = vmatmul.msk.f32.gmra.mxu1 %vm655_vm1, %v14722_v46  ;;  %v2929_v46 = vld [vmem:[#allocation2 + $0x4a] sm:$0xff] }
 0x1ff   : > { %9103 = vmatmul.msk.f32.gmra.mxu3 %vm655_vm1, %v2399_v11  ;;  %v2649_v11 = vld [vmem:[#allocation2 + $0x31] sm:$0xff] }
 0x200   : > { %9202 = vmatmul.msk.f32.gmra.mxu2 %vm655_vm1, %v2401_v44 }
 0x202   : > { %v1728_v62 = vpop.f32.mrf.mxu3  ;;  %v2009_v13 = vpop.f32.mrf.mxu0 }
 0x203   : > { %v1796_v60 = vadd.f32 %v1728_v62, %v11172_v2  ;;  %v2651_v62 = vld [vmem:[#allocation2 + $0x49] sm:$0xff] }
 0x205   : > { %v11462_v43 = vadd.f32 %v2006_v21, %v1796_v60  ;;  %9137 = vmatmul.msk.f32.gmra.mxu0 %vm655_vm1, %v11457_v33 }
 0x206   : > { %9169 = vmatmul.msk.f32.gmra.mxu1 %vm655_vm1, %v11459_v55 }
 0x207   : > { %9104 = vmatmul.msk.f32.gmra.mxu3 %vm655_vm1, %v2400_v61 }
 0x208   : > { %9203 = vmatmul.msk.f32.gmra.mxu2 %vm655_vm1, %v2402_v5  ;;  %v2930_v5 = vld [vmem:[#allocation2 + $0x52] sm:$0xff] }
 0x20a   : > { %v1731_v12 = vpop.f32.mrf.mxu3  ;;  %v2012_v0 = vpop.f32.mrf.mxu0 }
 0x20b   : > { %v1797_v2 = vadd.f32 %v1731_v12, %v11185_v9 }
 0x20d   : > { %v11473_v17 = vadd.f32 %v2009_v13, %v1797_v2  ;;  %9238 = vmatmul.msk.f32.vlgmr.msra.gmra.mxu0 %vm655_vm1, %v2927_v40 }
 0x20e   : > { %9170 = vmatmul.msk.f32.gmra.mxu1 %vm655_vm1, %v11470_v23 }
 0x20f   : > { %9205 = vmatmul.msk.f32.vlgmr.msra.gmra.mxu3 %vm655_vm1, %v2649_v11  ;;  %v2931_v11 = vld [vmem:[#allocation2 + $0x62] sm:$0xff] }
 0x212   : > { %v1734_v34 = vpop.f32.mrf.mxu3  ;;  %v2015_v14 = vpop.f32.mrf.mxu0 }
 0x213   : > { %v1798_v61 = vadd.f32 %v1734_v34, %v11198_v15 }
 0x215   : > { %v11480_v21 = vadd.f32 %v2012_v0, %v1798_v61  ;;  %9239 = vmatmul.msk.f32.gmra.mxu0 %vm655_vm1, %v2928_v27  ;;  %v2652_v0 = vld [vmem:[#allocation2 + $0x51] sm:$0xff] }
 0x217   : > { %9206 = vmatmul.msk.f32.gmra.mxu3 %vm655_vm1, %v2650_v24  ;;  %v2932_v24 = vld [vmem:[#allocation2 + $0x6a] sm:$0xff] }
 0x21a   : > { %v1737_v9 = vpop.f32.mrf.mxu3  ;;  %v2018_v36 = vpop.f32.mrf.mxu0 }
 0x21b   : > { %v1799_v44 = vadd.f32 %v1737_v9, %v11211_v22 }
 0x21d   : > { %v11485_v13 = vadd.f32 %v2015_v14, %v1799_v44  ;;  %9240 = vmatmul.msk.f32.gmra.mxu0 %vm655_vm1, %v2929_v46  ;;  %v2653_v14 = vld [vmem:[#allocation2 + $0x61] sm:$0xff] }
 0x21f   : > { %9207 = vmatmul.msk.f32.gmra.mxu3 %vm655_vm1, %v2651_v62 }
 0x222   : > { %v1740_v15 = vpop.f32.mrf.mxu3  ;;  %v2021_v60 = vpop.f32.mrf.mxu0 }
 0x223   : > { %v1800_v12 = vadd.f32 %v1740_v15, %v11224_v28  ;;  %v2933_v15 = vld [vmem:[#allocation2 + $0x7a] sm:$0xff] }
 0x225   : > { %v11490_v40 = vadd.f32 %v2018_v36, %v1800_v12  ;;  %9241 = vmatmul.msk.f32.gmra.mxu0 %vm655_vm1, %v2930_v5  ;;  %v2654_v36 = vld [vmem:[#allocation2 + $0x69] sm:$0xff]  ;;  %v2655_v5 = vld [vmem:[#allocation2 + $0x79] sm:$0xff] }
 0x227   : > { %14723 = vst [vmem:[#allocation31_spill] sm:$0xff] %v11490_v40  ;;  %9208 = vmatmul.msk.f32.gmra.mxu3 %vm655_vm1, %v2652_v0 }
 0x22a   : > { %v1743_v22 = vpop.f32.mrf.mxu3  ;;  %v2024_v2 = vpop.f32.mrf.mxu0 }
 0x22b   : > { %v1801_v34 = vadd.f32 %v1743_v22, %v11237_v38  ;;  %v3489_v38 = vld [vmem:[#allocation12] sm:$0x3f]  ;;  %v2934_v22 = vld [vmem:[#allocation2 + $0x82] sm:$0xff] }
 0x22c   : > { %9303 = vmatpush.msk.msra.mxu2 %vm3620_vm3, %v3489_v38 }
 0x22d   : > { %v11495_v27 = vadd.f32 %v2021_v60, %v1801_v34  ;;  %9242 = vmatmul.msk.f32.gmra.mxu0 %vm655_vm1, %v2931_v11  ;;  %v2656_v11 = vld [vmem:[#allocation2 + $0x81] sm:$0xff] }
 0x22f   : > { %14724 = vst [vmem:[#allocation42_spill] sm:$0xff] %v11495_v27  ;;  %9209 = vmatmul.msk.f32.gmra.mxu3 %vm655_vm1, %v2653_v14  ;;  %v11514_v14 = vpop.f32.mrf.mxu1  ;;  %v4538_v27 = vld [vmem:[#allocation12 + $0x20] sm:$0x3f] }
 0x230   : > { %9402 = vmatpush.msk.msrb.mxu1 %vm3620_vm3, %v4538_v27 }
 0x232   : > { %v1746_v28 = vpop.f32.mrf.mxu3  ;;  %v2027_v61 = vpop.f32.mrf.mxu0 }
 0x233   : > { %v1802_v9 = vadd.f32 %v1746_v28, %v11250_v52 }
 0x235   : > { %v11500_v46 = vadd.f32 %v2024_v2, %v1802_v9  ;;  %9243 = vmatmul.msk.f32.gmra.mxu0 %vm655_vm1, %v2932_v24  ;;  %v2657_v9 = vld [vmem:[#allocation2 + $0x91] sm:$0xff] }
 0x237   : > { %14725 = vst [vmem:[#allocation33_spill] sm:$0xff] %v11500_v46  ;;  %9210 = vmatmul.msk.f32.gmra.mxu3 %vm655_vm1, %v2654_v36 }
 0x23a   : > { %v1749_v44 = vpop.f32.mrf.mxu3  ;;  %v2030_v62 = vpop.f32.mrf.mxu0 }
 0x23b   : > { %v1803_v60 = vadd.f32 %v1749_v44, %v11263_v4 }
 0x23d   : > { %v11506_v12 = vadd.f32 %v2027_v61, %v1803_v60  ;;  %9244 = vmatmul.msk.f32.gmra.mxu0 %vm655_vm1, %v2933_v15  ;;  %v2935_v61 = vld [vmem:[#allocation2 + $0x92] sm:$0xff] }
 0x23e   : > { %v2658_v60 = vld [vmem:[#allocation2 + $0x99] sm:$0xff] }
 0x23f   : > { %14726 = vst [vmem:[#allocation32_spill] sm:$0xff] %v11506_v12  ;;  %9211 = vmatmul.msk.f32.gmra.mxu3 %vm655_vm1, %v2655_v5  ;;  %v11525_v5 = vpop.f32.mrf.mxu2  ;;  %v2945_v12 = vld [vmem:[#allocation2 + $0x10a] sm:$0xff] }
 0x242   : > { %v1752_v52 = vpop.f32.mrf.mxu3  ;;  %v2033_v0 = vpop.f32.mrf.mxu0 }
 0x243   : > { %v1804_v2 = vadd.f32 %v1752_v52, %v11276_v49  ;;  %v11522_v49 = vpop.f32.mrf.mxu1 }
 0x245   : > { %v11511_v34 = vadd.f32 %v2030_v62, %v1804_v2  ;;  %9245 = vmatmul.msk.f32.gmra.mxu0 %vm655_vm1, %v2934_v22  ;;  %v2936_v62 = vld [vmem:[#allocation2 + $0x9a] sm:$0xff]  ;;  %v2937_v22 = vld [vmem:[#allocation2 + $0xaa] sm:$0xff] }
 0x247   : > { %14727 = vst [vmem:[#allocation47_spill] sm:$0xff] %v11511_v34  ;;  %9212 = vmatmul.msk.f32.gmra.mxu3 %vm655_vm1, %v2656_v11 }
 0x24a   : > { %v1755_v4 = vpop.f32.mrf.mxu3  ;;  %v2036_v28 = vpop.f32.mrf.mxu0 }
 0x24b   : > { %v1805_v24 = vadd.f32 %v1755_v4, %v11289_v32  ;;  %v11531_v2 = vpop.f32.mrf.mxu1  ;;  %v2659_v4 = vld [vmem:[#allocation2 + $0xa9] sm:$0xff] }
 0x24d   : > { %v11518_v36 = vadd.f32 %v2033_v0, %v1805_v24  ;;  %9246 = vmatmul.msk.f32.gmra.mxu0 %vm655_vm1, %v2935_v61 }
 0x24f   : > { %14728 = vst [vmem:[#allocation37_spill] sm:$0xff] %v11518_v36  ;;  %9213 = vmatmul.msk.f32.gmra.mxu3 %vm655_vm1, %v2657_v9  ;;  %v2938_v9 = vld [vmem:[#allocation2 + $0xb2] sm:$0xff] }
 0x252   : > { %v1758_v38 = vpop.f32.mrf.mxu3  ;;  %v2039_v44 = vpop.f32.mrf.mxu0 }
 0x253   : > { %v1806_v15 = vadd.f32 %v1758_v38, %v11192_v16  ;;  %v11537_v16 = vpop.f32.mrf.mxu2 }
 0x255   : > { %v11527_v52 = vadd.f32 %v2036_v28, %v1806_v15  ;;  %9247 = vmatmul.msk.f32.gmra.mxu0 %vm655_vm1, %v2936_v62  ;;  %v2660_v62 = vld [vmem:[#allocation2 + $0xb1] sm:$0xff]  ;;  %v11541_v15 = vpop.f32.mrf.mxu1 }
 0x257   : > { %14729 = vst [vmem:[#allocation35_spill] sm:$0xff] %v11527_v52  ;;  %9214 = vmatmul.msk.f32.gmra.mxu3 %vm655_vm1, %v2658_v60 }
 0x25a   : > { %v1761_v32 = vpop.f32.mrf.mxu3  ;;  %v2042_v0 = vpop.f32.mrf.mxu0 }
 0x25b   : > { %v1807_v11 = vadd.f32 %v1761_v32, %v11205_v51  ;;  %v11547_v51 = vpop.f32.mrf.mxu2 }
 0x25d   : > { %v11534_v61 = vadd.f32 %v2039_v44, %v1807_v11  ;;  %9248 = vmatmul.msk.f32.gmra.mxu0 %vm655_vm1, %v2937_v22  ;;  %v2939_v22 = vld [vmem:[#allocation2 + $0xc2] sm:$0xff] }
 0x25f   : > { %14730 = vst [vmem:[#allocation52_spill] sm:$0xff] %v11534_v61  ;;  %9215 = vmatmul.msk.f32.gmra.mxu3 %vm655_vm1, %v2659_v4  ;;  %v2661_v4 = vld [vmem:[#allocation2 + $0xc1] sm:$0xff] }
 0x262   : > { %v1764_v28 = vpop.f32.mrf.mxu3  ;;  %v2045_v24 = vpop.f32.mrf.mxu0 }
 0x263   : > { %v1808_v38 = vadd.f32 %v1764_v28, %v11218_v54  ;;  %v11553_v54 = vpop.f32.mrf.mxu1 }
 0x265   : > { %v11543_v60 = vadd.f32 %v2042_v0, %v1808_v38  ;;  %9249 = vmatmul.msk.f32.gmra.mxu0 %vm655_vm1, %v2938_v9  ;;  %v2940_v9 = vld [vmem:[#allocation2 + $0xca] sm:$0xff]  ;;  %v11556_v38 = vpop.f32.mrf.mxu2 }
 0x267   : > { %14731 = vst [vmem:[#allocation36_spill] sm:$0xff] %v11543_v60  ;;  %9216 = vmatmul.msk.f32.gmra.mxu3 %vm655_vm1, %v2660_v62  ;;  %v2662_v60 = vld [vmem:[#allocation2 + $0xc9] sm:$0xff] }
 0x26a   : > { %v1767_v44 = vpop.f32.mrf.mxu3  ;;  %v2048_v32 = vpop.f32.mrf.mxu0 }
 0x26b   : > { %v1809_v11 = vadd.f32 %v1767_v44, %v11231_v10  ;;  %v11563_v10 = vpop.f32.mrf.mxu1 }
 0x26d   : > { %v11550_v61 = vadd.f32 %v2045_v24, %v1809_v11  ;;  %9250 = vmatmul.msk.f32.gmra.mxu0 %vm655_vm1, %v2939_v22  ;;  %v2941_v22 = vld [vmem:[#allocation2 + $0xda] sm:$0xff] }
 0x26f   : > { %14732 = vst [vmem:[#allocation41_spill] sm:$0xff] %v11550_v61  ;;  %9217 = vmatmul.msk.f32.gmra.mxu3 %vm655_vm1, %v2661_v4  ;;  %v2663_v4 = vld [vmem:[#allocation2 + $0xd9] sm:$0xff]  ;;  %v11566_v61 = vpop.f32.mrf.mxu2 }
 0x272   : > { %v1770_v0 = vpop.f32.mrf.mxu3  ;;  %v2051_v28 = vpop.f32.mrf.mxu0 }
 0x273   : > { %v1810_v62 = vadd.f32 %v1770_v0, %v11244_v35  ;;  %v2942_v0 = vld [vmem:[#allocation2 + $0xe2] sm:$0xff] }
 0x275   : > { %v11559_v52 = vadd.f32 %v2048_v32, %v1810_v62  ;;  %9251 = vmatmul.msk.f32.gmra.mxu0 %vm655_vm1, %v2940_v9  ;;  %v2664_v62 = vld [vmem:[#allocation2 + $0xe1] sm:$0xff] }
 0x277   : > { %14733 = vst [vmem:[#allocation39_spill] sm:$0xff] %v11559_v52  ;;  %9218 = vmatmul.msk.f32.gmra.mxu3 %vm655_vm1, %v2662_v60  ;;  %v11572_v60 = vpop.f32.mrf.mxu1 }
 0x27a   : > { %v1773_v24 = vpop.f32.mrf.mxu3  ;;  %v2054_v44 = vpop.f32.mrf.mxu0 }
 0x27b   : > { %v1811_v11 = vadd.f32 %v1773_v24, %v11257_v30  ;;  %v11578_v30 = vpop.f32.mrf.mxu2 }
 0x27d   : > { %v11568_v36 = vadd.f32 %v2051_v28, %v1811_v11  ;;  %9252 = vmatmul.msk.f32.gmra.mxu0 %vm655_vm1, %v2941_v22  ;;  %v2943_v22 = vld [vmem:[#allocation2 + $0xf2] sm:$0xff] }
 0x27f   : > { %14734 = vst [vmem:[#allocation57_spill] sm:$0xff] %v11568_v36  ;;  %9219 = vmatmul.msk.f32.gmra.mxu3 %vm655_vm1, %v2663_v4  ;;  %v2665_v4 = vld [vmem:[#allocation2 + $0xf1] sm:$0xff]  ;;  %v11582_v36 = vpop.f32.mrf.mxu1 }
 0x282   : > { %v1776_v35 = vpop.f32.mrf.mxu3  ;;  %v2057_v32 = vpop.f32.mrf.mxu0 }
 0x283   : > { %v1812_v9 = vadd.f32 %v1776_v35, %v11270_v3  ;;  %v11588_v3 = vpop.f32.mrf.mxu2 }
 0x285   : > { %v11575_v52 = vadd.f32 %v2054_v44, %v1812_v9  ;;  %9253 = vmatmul.msk.f32.gmra.mxu0 %vm655_vm1, %v2942_v0  ;;  %v2944_v0 = vld [vmem:[#allocation2 + $0xfa] sm:$0xff] }
 0x287   : > { %14735 = vst [vmem:[#allocation40_spill] sm:$0xff] %v11575_v52  ;;  %9220 = vmatmul.msk.f32.gmra.mxu3 %vm655_vm1, %v2664_v62  ;;  %v11591_v62 = vld [vmem:[#allocation7] ss:$0 sm:$0xff]  ;;  %v2666_v52 = vld [vmem:[#allocation2 + $0xf9] sm:$0xff] }
 0x28a   : > { %v1779_v28 = vpop.f32.mrf.mxu3  ;;  %v3077_v24 = vpop.f32.mrf.mxu0 }
 0x28b   : > { %v1813_v11 = vadd.f32 %v1779_v28, %v11283_v18  ;;  %v11594_v28 = vpop.f32.mrf.mxu1 }
 0x28d   : > { %v11584_v34 = vadd.f32 %v2057_v32, %v1813_v11  ;;  %9254 = vmatmul.msk.f32.gmra.mxu0 %vm655_vm1, %v2943_v22  ;;  %v11597_v22 = vld [vmem:[#allocation9] ss:$0 sm:$0xff]  ;;  %v3982_v11 = vld [vmem:[#allocation12 + $0x10] sm:$0x3f] }
 0x28e   : > { %9336 = vmatpush.msk.msrb.mxu3 %vm3620_vm3, %v3982_v11  ;;  %v4260_v11 = vld [vmem:[#allocation12 + $0x18] sm:$0x3f] }
 0x28f   : > { %14736 = vst [vmem:[#allocation46_spill] sm:$0xff] %v11584_v34  ;;  %9221 = vmatmul.msk.f32.gmra.mxu3 %vm655_vm1, %v2665_v4  ;;  %v11600_v34 = vld [vmem:[#allocation10] ss:$0 sm:$0xff]  ;;  %9369 = vmatpush.msk.msrb.mxu0 %vm3620_vm3, %v4260_v11 }
 0x292   : > { %v2799_v44 = vpop.f32.mrf.mxu3  ;;  %v3080_v35 = vpop.f32.mrf.mxu0 }
 0x293   : > { %v2895_v9 = vadd.f32 %v2799_v44, %v11305_v39 }
 0x295   : > { %v3173_v18 = vadd.f32 %v3077_v24, %v2895_v9  ;;  %9255 = vmatmul.msk.f32.gmra.mxu0 %vm655_vm1, %v2944_v0  ;;  %v11603_v24 = vpop.f32.mrf.mxu2 }
 0x297   : > { %v3209_v32 = vadd.f32 %v11591_v62, %v3173_v18  ;;  %9222 = vmatmul.msk.f32.gmra.mxu3 %vm655_vm1, %v2666_v52  ;;  %v2667_v18 = vld [vmem:[#allocation2 + $0x109] sm:$0xff] }
 0x299   : > { %v3241_v4 = vmax.f32 %v3209_v32, 0.0 }
 0x29a   : > { %v2802_v39 = vpop.f32.mrf.mxu3  ;;  %v3083_v44 = vpop.f32.mrf.mxu0 }
 0x29b   : > { %v3277_v0 = vmul.f32 %v11597_v22, %v3241_v4  ;;  %v2896_v9 = vadd.f32 %v2802_v39, %v11316_v37  ;;  %v11614_v37 = vpop.f32.mrf.mxu1 }
 0x29d   : > { %v3313_v46 = vadd.f32 %v11600_v34, %v3277_v0  ;;  %v3174_v52 = vadd.f32 %v3080_v35, %v2896_v9  ;;  %9256 = vmatmul.msk.f32.gmra.mxu0 %vm655_vm1, %v2945_v12  ;;  %v2946_v35 = vld [vmem:[#allocation2 + $0x112] sm:$0xff] }
 0x29e   : > { %v2668_v9 = vld [vmem:[#allocation2 + $0x111] sm:$0xff] }
 0x29f   : > { %3347 = vst.msk [vmem:[#allocation3 + $0x19] sm:$0xff] %vm3346_vm4, %v3313_v46  ;;  %v3210_v32 = vadd.f32 %v11591_v62, %v3174_v52  ;;  %9223 = vmatmul.msk.f32.gmra.mxu3 %vm655_vm1, %v2667_v18  ;;  %v11618_v52 = vpop.f32.mrf.mxu2 }
 0x2a1   : > { %v3242_v4 = vmax.f32 %v3210_v32, 0.0 }
 0x2a2   : > { %v2805_v39 = vpop.f32.mrf.mxu3  ;;  %v3086_v0 = vpop.f32.mrf.mxu0 }
 0x2a3   : > { %v3278_v12 = vmul.f32 %v11597_v22, %v3242_v4  ;;  %v2897_v46 = vadd.f32 %v2805_v39, %v11327_v8  ;;  %v11626_v39 = vpop.f32.mrf.mxu1 }
 0x2a5   : > { %v3314_v18 = vadd.f32 %v11600_v34, %v3278_v12  ;;  %v3175_v40 = vadd.f32 %v3083_v44, %v2897_v46  ;;  %9257 = vmatmul.msk.f32.gmra.mxu0 %vm655_vm1, %v2946_v35 }
 0x2a6   : > { %v3385_v27 = vld [vmem:[#allocation3 + $0x1a] sm:$0x1] }
 0x2a7   : > { %3348 = vst.msk [vmem:[#allocation3 + $0x21] sm:$0xff] %vm3346_vm4, %v3314_v18  ;;  %v3211_v32 = vadd.f32 %v11591_v62, %v3175_v40  ;;  %9224 = vmatmul.msk.f32.gmra.mxu3 %vm655_vm1, %v2668_v9  ;;  %v11633_v40 = vpop.f32.mrf.mxu2 }
 0x2a8   : > { %3404 = vst.msk [vmem:[#allocation3 + $0x18] sm:$0x1] %vm3402_vm5, %v3385_v27 }
 0x2a9   : > { %v3243_v11 = vmax.f32 %v3211_v32, 0.0  ;;  %v2948_v32 = vld [vmem:[#allocation2 + $0x12a] sm:$0xff] }
 0x2aa   : > { %v2808_v8 = vpop.f32.mrf.mxu3  ;;  %v3089_v4 = vpop.f32.mrf.mxu0 }
 0x2ab   : > { %v3279_v12 = vmul.f32 %v11597_v22, %v3243_v11  ;;  %v2898_v44 = vadd.f32 %v2808_v8, %v11337_v45  ;;  %v11643_v8 = vpop.f32.mrf.mxu1 }
 0x2ad   : > { %v3315_v35 = vadd.f32 %v11600_v34, %v3279_v12  ;;  %v3176_v46 = vadd.f32 %v3086_v0, %v2898_v44  ;;  %9258 = vmatmul.msk.f32.gmra.mxu0 %vm655_vm1, %v11362_v26 }
 0x2ae   : > { %v3422_v18 = vld [vmem:[#allocation3 + $0x27] sm:$0x1] }
 0x2af   : > { %3349 = vst.msk [vmem:[#allocation3 + $0x31] sm:$0xff] %vm3346_vm4, %v3315_v35  ;;  %v3212_v9 = vadd.f32 %v11591_v62, %v3176_v46  ;;  %9225 = vmatmul.msk.f32.gmra.mxu3 %vm655_vm1, %v11349_v19 }
 0x2b0   : > { %3379 = vst.msk [vmem:[#allocation3 + $0x1] sm:$0xff] %vm3346_vm4, %v3315_v35 }
 0x2b1   : > { %v3244_v27 = vmax.f32 %v3212_v9, 0.0  ;;  %3440 = vst.msk [vmem:[#allocation3 + $0x29] sm:$0x1] %vm3402_vm5, %v3422_v18 }
 0x2b2   : > { %v2811_v45 = vpop.f32.mrf.mxu3  ;;  %v3092_v0 = vpop.f32.mrf.mxu0 }
 0x2b3   : > { %v3280_v26 = vmul.f32 %v11597_v22, %v3244_v27  ;;  %v2899_v11 = vadd.f32 %v2811_v45, %v11347_v1  ;;  %v11653_v1 = vpop.f32.mrf.mxu2  ;;  %v2949_v45 = vld [vmem:[#allocation2 + $0x13a] sm:$0xff] }
 0x2b5   : > { %v3316_v12 = vadd.f32 %v11600_v34, %v3280_v26  ;;  %v3177_v44 = vadd.f32 %v3089_v4, %v2899_v11  ;;  %9259 = vmatmul.msk.f32.gmra.mxu0 %vm655_vm1, %v2948_v32 }
 0x2b6   : > { %v3386_v9 = vld [vmem:[#allocation3 + $0x32] sm:$0x1] }
 0x2b7   : > { %3350 = vst.msk [vmem:[#allocation3 + $0x39] sm:$0xff] %vm3346_vm4, %v3316_v12  ;;  %v3213_v19 = vadd.f32 %v11591_v62, %v3177_v44  ;;  %9226 = vmatmul.msk.f32.gmra.mxu3 %vm655_vm1, %v11360_v56  ;;  %v3490_v35 = vld [vmem:[#allocation3 + $0x1] sm:$0xff] }
 0x2b8   : > { %v3384_v46 = vld [vmem:[#allocation3 + $0x2] sm:$0x1]  ;;  %3380 = vst.msk [vmem:[#allocation3 + $0x9] sm:$0xff] %vm3346_vm4, %v3316_v12  ;;  %9271 = vmatmul.msk.f32.vlgmr.msra.gmra.mxu1 %vm3346_vm4, %v3490_v35  ;;  %v11661_v12 = vpop.f32.mrf.mxu1 }
 0x2b9   : > { %v3245_v18 = vmax.f32 %v3213_v19, 0.0  ;;  %3403 = vst.msk [vmem:[#allocation3] sm:$0x1] %vm3402_vm5, %v3384_v46 }
 0x2ba   : > { %v2814_v4 = vpop.f32.mrf.mxu3  ;;  %v3095_v27 = vpop.f32.mrf.mxu0  ;;  %3405 = vst.msk [vmem:[#allocation3 + $0x30] sm:$0x1] %vm3402_vm5, %v3386_v9 }
 0x2bb   : > { %v3281_v32 = vmul.f32 %v11597_v22, %v3245_v18  ;;  %v2900_v56 = vadd.f32 %v2814_v4, %v11358_v42  ;;  %v2950_v4 = vld [vmem:[#allocation2 + $0x142] sm:$0xff] }
 0x2bd   : > { %v3317_v26 = vadd.f32 %v11600_v34, %v3281_v32  ;;  %v3178_v11 = vadd.f32 %v3092_v0, %v2900_v56  ;;  %9260 = vmatmul.msk.f32.gmra.mxu0 %vm655_vm1, %v2949_v45  ;;  %v11671_v45 = vpop.f32.mrf.mxu2 }
 0x2be   : > { %v3423_v0 = vld [vmem:[#allocation3 + $0x3f] sm:$0x1] }
 0x2bf   : > { %3351 = vst.msk [vmem:[#allocation3 + $0x49] sm:$0xff] %vm3346_vm4, %v3317_v26  ;;  %v3214_v44 = vadd.f32 %v11591_v62, %v3178_v11  ;;  %9227 = vmatmul.msk.f32.gmra.mxu3 %vm655_vm1, %v11375_v7  ;;  %v3491_v19 = vld [vmem:[#allocation3 + $0x9] sm:$0xff] }
 0x2c0   : > { %9272 = vmatmul.msk.f32.gmra.mxu1 %vm3346_vm4, %v3491_v19  ;;  %v3457_v35 = vld [vmem:[#allocation3] sm:$0xff]  ;;  %v3421_v46 = vld [vmem:[#allocation3 + $0xf] sm:$0x1]  ;;  %3441 = vst.msk [vmem:[#allocation3 + $0x41] sm:$0x1] %vm3402_vm5, %v3423_v0 }
 0x2c1   : > { %v3246_v42 = vmax.f32 %v3214_v44, 0.0  ;;  %9304 = vmatmul.msk.f32.vlgmr.msra.gmra.mxu2 %vm3346_vm4, %v3457_v35  ;;  %3439 = vst.msk [vmem:[#allocation3 + $0x11] sm:$0x1] %vm3402_vm5, %v3421_v46  ;;  %v3492_v19 = vld [vmem:[#allocation3 + $0x19] sm:$0xff]  ;;  %v3458_v35 = vld [vmem:[#allocation3 + $0x8] sm:$0xff] }
 0x2c2   : > { %v2817_v9 = vpop.f32.mrf.mxu3  ;;  %v3098_v18 = vpop.f32.mrf.mxu0  ;;  %v2951_v0 = vld [vmem:[#allocation2 + $0x152] sm:$0xff] }
 0x2c3   : > { %v3282_v7 = vmul.f32 %v11597_v22, %v3246_v42  ;;  %v2901_v32 = vadd.f32 %v2817_v9, %v11373_v6  ;;  %v11683_v6 = vpop.f32.mrf.mxu1 }
 0x2c5   : > { %v3318_v56 = vadd.f32 %v11600_v34, %v3282_v7  ;;  %v3179_v26 = vadd.f32 %v3095_v27, %v2901_v32  ;;  %9261 = vmatmul.msk.f32.gmra.mxu0 %vm655_vm1, %v2950_v4  ;;  %v11690_v7 = vpop.f32.mrf.mxu2 }
 0x2c6   : > { %v3387_v11 = vld [vmem:[#allocation3 + $0x4a] sm:$0x1] }
 0x2c7   : > { %3352 = vst.msk [vmem:[#allocation3 + $0x51] sm:$0xff] %vm3346_vm4, %v3318_v56  ;;  %v3215_v44 = vadd.f32 %v11591_v62, %v3179_v26  ;;  %9228 = vmatmul.msk.f32.gmra.mxu3 %vm655_vm1, %v11387_v41  ;;  %v2346_v41 = vadd.f32 %v11514_v14, %v11391_v25 }
 0x2c8   : > { %9273 = vmatmul.msk.f32.gmra.mxu1 %vm3346_vm4, %v3492_v19  ;;  %3406 = vst.msk [vmem:[#allocation3 + $0x48] sm:$0x1] %vm3402_vm5, %v3387_v11  ;;  %v3493_v11 = vld [vmem:[#allocation3 + $0x21] sm:$0xff] }
 0x2c9   : > { %v3247_v46 = vmax.f32 %v3215_v44, 0.0  ;;  %9305 = vmatmul.msk.f32.gmra.mxu2 %vm3346_vm4, %v3458_v35  ;;  %v2625_v25 = vadd.f32 %v11525_v5, %v2346_v41  ;;  %v2952_v35 = vld [vmem:[#allocation2 + $0x15a] sm:$0xff] }
 0x2ca   : > { %v2820_v27 = vpop.f32.mrf.mxu3  ;;  %v3101_v42 = vpop.f32.mrf.mxu0 }
 0x2cb   : > { %v3283_v9 = vmul.f32 %v11597_v22, %v3247_v46  ;;  %v2902_v4 = vadd.f32 %v2820_v27, %v11385_v59  ;;  %v11699_v59 = vld [vmem:[#allocation3 + $0x18] sm:$0xff]  ;;  %v11705_v46 = vpop.f32.mrf.mxu1 }
 0x2cd   : > { %v3319_v32 = vadd.f32 %v11600_v34, %v3283_v9  ;;  %v3180_v56 = vadd.f32 %v3098_v18, %v2902_v4  ;;  %9262 = vmatmul.msk.f32.gmra.mxu0 %vm655_vm1, %v2951_v0  ;;  %v2347_v0 = vadd.f32 %v11522_v49, %v11403_v31  ;;  %v11712_v41 = vpop.f32.mrf.mxu2 }
 0x2ce   : > { %v3424_v44 = vld [vmem:[#allocation3 + $0x57] sm:$0x1] }
 0x2cf   : > { %3353 = vst.msk [vmem:[#allocation3 + $0x61] sm:$0xff] %vm3346_vm4, %v3319_v32  ;;  %v3216_v26 = vadd.f32 %v11591_v62, %v3180_v56  ;;  %9229 = vmatmul.msk.f32.gmra.mxu3 %vm655_vm1, %v11400_v63  ;;  %v3494_v56 = vld [vmem:[#allocation3 + $0x31] sm:$0xff]  ;;  %v2626_v31 = vadd.f32 %v11537_v16, %v2347_v0 }
 0x2d0   : > { %9274 = vmatmul.msk.f32.gmra.mxu1 %vm3346_vm4, %v3493_v11  ;;  %3442 = vst.msk [vmem:[#allocation3 + $0x59] sm:$0x1] %vm3402_vm5, %v3424_v44  ;;  %v2953_v44 = vld [vmem:[#allocation2 + $0x16a] sm:$0xff] }
 0x2d1   : > { %v3248_v14 = vmax.f32 %v3216_v26, 0.0  ;;  %9306 = vmatmul.msk.f32.gmra.mxu2 %vm3346_vm4, %v11699_v59  ;;  %v11719_v26 = vld [vmem:[#allocation3 + $0x20] sm:$0xff] }
 0x2d2   : > { %v2823_v18 = vpop.f32.mrf.mxu3  ;;  %v3104_v19 = vpop.f32.mrf.mxu0 }
 0x2d3   : > { %v3284_v63 = vmul.f32 %v11597_v22, %v3248_v14  ;;  %v2903_v27 = vadd.f32 %v2823_v18, %v2625_v25  ;;  %v11728_v18 = vpop.f32.mrf.mxu1 }
 0x2d5   : > { %v3320_v9 = vadd.f32 %v11600_v34, %v3284_v63  ;;  %v3181_v4 = vadd.f32 %v3101_v42, %v2903_v27  ;;  %9263 = vmatmul.msk.f32.gmra.mxu0 %vm655_vm1, %v2952_v35  ;;  %v3495_v27 = vld [vmem:[#allocation3 + $0x39] sm:$0xff] }
 0x2d6   : > { %v3388_v5 = vld [vmem:[#allocation3 + $0x62] sm:$0x1] }
 0x2d7   : > { %3354 = vst.msk [vmem:[#allocation3 + $0x69] sm:$0xff] %vm3346_vm4, %v3320_v9  ;;  %v3217_v32 = vadd.f32 %v11591_v62, %v3181_v4  ;;  %9230 = vmatmul.msk.f32.gmra.mxu3 %vm655_vm1, %v11412_v58  ;;  %v2348_v58 = vadd.f32 %v11531_v2, %v11415_v48  ;;  %v11737_v9 = vld [vmem:[#allocation3 + $0x30] sm:$0xff]  ;;  %v11741_v2 = vpop.f32.mrf.mxu2 }
 0x2d8   : > { %9275 = vmatmul.msk.f32.gmra.mxu1 %vm3346_vm4, %v3494_v56  ;;  %3407 = vst.msk [vmem:[#allocation3 + $0x60] sm:$0x1] %vm3402_vm5, %v3388_v5  ;;  %v747_v4 = vld [vmem:[#allocation2 + $0x1a7] sm:$0x1] }
 0x2d9   : > { %v3249_v49 = vmax.f32 %v3217_v32, 0.0  ;;  %9307 = vmatmul.msk.f32.gmra.mxu2 %vm3346_vm4, %v11719_v26  ;;  %v2627_v48 = vadd.f32 %v11547_v51, %v2348_v58  ;;  %765 = vst.msk [vmem:[#allocation2 + $0x1a9] sm:$0x1] %vm711_vm2, %v747_v4  ;;  %v3496_v58 = vld [vmem:[#allocation3 + $0x49] sm:$0xff]  ;;  %v3497_v4 = vld [vmem:[#allocation3 + $0x51] sm:$0xff] }
 0x2da   : > { %v2826_v42 = vpop.f32.mrf.mxu3  ;;  %v3107_v11 = vpop.f32.mrf.mxu0 }
 0x2db   : > { %v3285_v25 = vmul.f32 %v11597_v22, %v3249_v49  ;;  %v2904_v14 = vadd.f32 %v2826_v42, %v2626_v31  ;;  %v2349_v49 = vadd.f32 %v11541_v15, %v11427_v20 }
 0x2dd   : > { %v3321_v35 = vadd.f32 %v11600_v34, %v3285_v25  ;;  %v3182_v63 = vadd.f32 %v3104_v19, %v2904_v14  ;;  %9264 = vmatmul.msk.f32.gmra.mxu0 %vm655_vm1, %v2953_v44  ;;  %v11751_v25 = vpop.f32.mrf.mxu1  ;;  %v2628_v20 = vadd.f32 %v11556_v38, %v2349_v49  ;;  %v2351_v49 = vadd.f32 %v11563_v10, %v11449_v53  ;;  %v11798_v53 = vld [vmem:[#allocation3 + $0x50] sm:$0xff] }
 0x2de   : > { %v3425_v0 = vld [vmem:[#allocation3 + $0x6f] sm:$0x1] }
 0x2df   : > { %3355 = vst.msk [vmem:[#allocation3 + $0x79] sm:$0xff] %vm3346_vm4, %v3321_v35  ;;  %v3218_v16 = vadd.f32 %v11591_v62, %v3182_v63  ;;  %9231 = vmatmul.msk.f32.gmra.mxu3 %vm655_vm1, %v11424_v50  ;;  %v2954_v50 = vld [vmem:[#allocation2 + $0x172] sm:$0xff]  ;;  %v11758_v35 = vld [vmem:[#allocation3 + $0x38] sm:$0xff]  ;;  %v2630_v10 = vadd.f32 %v11578_v30, %v2351_v49 }
 0x2e0   : > { %9276 = vmatmul.msk.f32.gmra.mxu1 %vm3346_vm4, %v3495_v27  ;;  %3443 = vst.msk [vmem:[#allocation3 + $0x71] sm:$0x1] %vm3402_vm5, %v3425_v0  ;;  %v2350_v0 = vadd.f32 %v11553_v54, %v11438_v47  ;;  %v2680_v49 = vld [vmem:[#allocation2 + $0x1a1] sm:$0xff] }
 0x2e1   : > { %v3250_v19 = vmax.f32 %v3218_v16, 0.0  ;;  %9308 = vmatmul.msk.f32.gmra.mxu2 %vm3346_vm4, %v11737_v9  ;;  %v11764_v16 = vpop.f32.mrf.mxu2 }
 0x2e2   : > { %v2829_v5 = vpop.f32.mrf.mxu3  ;;  %v3110_v32 = vpop.f32.mrf.mxu0  ;;  %v2629_v47 = vadd.f32 %v11566_v61, %v2350_v0  ;;  %v2352_v0 = vadd.f32 %v11572_v60, %v11462_v43 }
 0x2e3   : > { %v3286_v56 = vmul.f32 %v11597_v22, %v3250_v19  ;;  %v2905_v31 = vadd.f32 %v2829_v5, %v2627_v48 }
 0x2e4   : > { %v2631_v43 = vadd.f32 %v11588_v3, %v2352_v0 }
 0x2e5   : > { %v3322_v51 = vadd.f32 %v11600_v34, %v3286_v56  ;;  %v3183_v42 = vadd.f32 %v3107_v11, %v2905_v31  ;;  %9265 = vmatmul.msk.f32.gmra.mxu0 %vm655_vm1, %v2954_v50  ;;  %v11777_v50 = vld [vmem:[#allocation3 + $0x48] sm:$0xff]  ;;  %v11781_v54 = vpop.f32.mrf.mxu1 }
 0x2e6   : > { %v3389_v44 = vld [vmem:[#allocation3 + $0x7a] sm:$0x1] }
 0x2e7   : > { %3356 = vst.msk [vmem:[#allocation3 + $0x81] sm:$0xff] %vm3346_vm4, %v3322_v51  ;;  %v3219_v14 = vadd.f32 %v11591_v62, %v3183_v42  ;;  %9232 = vmatmul.msk.f32.gmra.mxu3 %vm655_vm1, %v11435_v57 }
 0x2e8   : > { %9277 = vmatmul.msk.f32.gmra.mxu1 %vm3346_vm4, %v3496_v58  ;;  %3408 = vst.msk [vmem:[#allocation3 + $0x78] sm:$0x1] %vm3402_vm5, %v3389_v44  ;;  %v3498_v58 = vld [vmem:[#allocation3 + $0x61] sm:$0xff] }
 0x2e9   : > { %v3251_v15 = vmax.f32 %v3219_v14, 0.0  ;;  %9309 = vmatmul.msk.f32.gmra.mxu2 %vm3346_vm4, %v11758_v35  ;;  %v11788_v51 = vpop.f32.mrf.mxu2 }
 0x2ea   : > { %v2832_v11 = vpop.f32.mrf.mxu3  ;;  %v3113_v63 = vpop.f32.mrf.mxu0 }
 0x2eb   : > { %v3287_v27 = vmul.f32 %v11597_v22, %v3251_v15  ;;  %v2906_v57 = vadd.f32 %v2832_v11, %v2628_v20  ;;  %v2957_v11 = vld [vmem:[#allocation2 + $0x19a] sm:$0xff] }
 0x2ed   : > { %v3323_v48 = vadd.f32 %v11600_v34, %v3287_v27  ;;  %v3184_v19 = vadd.f32 %v3110_v32, %v2906_v57  ;;  %9266 = vmatmul.msk.f32.gmra.mxu0 %vm655_vm1, %v11459_v55  ;;  %v2679_v57 = vld [vmem:[#allocation2 + $0x199] sm:$0xff] }
 0x2ee   : > { %v3426_v5 = vld [vmem:[#allocation3 + $0x87] sm:$0x1] }
 0x2ef   : > { %3357 = vst.msk [vmem:[#allocation3 + $0x91] sm:$0xff] %vm3346_vm4, %v3323_v48  ;;  %v3220_v38 = vadd.f32 %v11591_v62, %v3184_v19  ;;  %9233 = vmatmul.msk.f32.gmra.mxu3 %vm655_vm1, %v11446_v29 }
 0x2f0   : > { %9278 = vmatmul.msk.f32.gmra.mxu1 %vm3346_vm4, %v3497_v4  ;;  %3444 = vst.msk [vmem:[#allocation3 + $0x89] sm:$0x1] %vm3402_vm5, %v3426_v5  ;;  %v3499_v4 = vld [vmem:[#allocation3 + $0x69] sm:$0xff] }
 0x2f1   : > { %v3252_v55 = vmax.f32 %v3220_v38, 0.0  ;;  %9310 = vmatmul.msk.f32.gmra.mxu2 %vm3346_vm4, %v11777_v50  ;;  %v11811_v30 = vpop.f32.mrf.mxu2 }
 0x2f2   : > { %v2835_v32 = vpop.f32.mrf.mxu3  ;;  %v3116_v56 = vpop.f32.mrf.mxu0 }
 0x2f3   : > { %v3288_v29 = vmul.f32 %v11597_v22, %v3252_v55  ;;  %v2907_v31 = vadd.f32 %v2835_v32, %v2629_v47  ;;  %v11817_v47 = vld [vmem:[#allocation3 + $0x60] sm:$0xff] }
 0x2f5   : > { %v3324_v42 = vadd.f32 %v11600_v34, %v3288_v29  ;;  %v3185_v44 = vadd.f32 %v3113_v63, %v2907_v31  ;;  %9267 = vmatmul.msk.f32.gmra.mxu0 %vm655_vm1, %v11470_v23  ;;  %v11804_v63 = vpop.f32.mrf.mxu1 }
 0x2f6   : > { %v3390_v61 = vld [vmem:[#allocation3 + $0x92] sm:$0x1] }
 0x2f7   : > { %3358 = vst.msk [vmem:[#allocation3 + $0x99] sm:$0xff] %vm3346_vm4, %v3324_v42  ;;  %v3221_v14 = vadd.f32 %v11591_v62, %v3185_v44  ;;  %9234 = vmatmul.msk.f32.gmra.mxu3 %vm655_vm1, %v11457_v33  ;;  %v2353_v42 = vadd.f32 %v11582_v36, %v11473_v17 }
 0x2f8   : > { %9279 = vmatmul.msk.f32.gmra.mxu1 %vm3346_vm4, %v3498_v58  ;;  %3409 = vst.msk [vmem:[#allocation3 + $0x90] sm:$0x1] %vm3402_vm5, %v3390_v61 }
 0x2f9   : > { %v3253_v20 = vmax.f32 %v3221_v14, 0.0  ;;  %9311 = vmatmul.msk.f32.gmra.mxu2 %vm3346_vm4, %v11798_v53  ;;  %v2632_v17 = vadd.f32 %v11603_v24, %v2353_v42  ;;  %v11838_v36 = vpop.f32.mrf.mxu2  ;;  %v3949_v24 = vld [vmem:[#allocation3 + $0x2] sm:$0xff] }
 0x2fa   : > { %v2838_v23 = vpop.f32.mrf.mxu3  ;;  %v3119_v15 = vpop.f32.mrf.mxu0 }
 0x2fb   : > { %v3289_v33 = vmul.f32 %v11597_v22, %v3253_v20  ;;  %v2908_v27 = vadd.f32 %v2838_v23, %v2630_v10  ;;  %v3500_v10 = vld [vmem:[#allocation3 + $0x79] sm:$0xff]  ;;  %v11834_v20 = vld [vmem:[#allocation3 + $0x68] sm:$0xff] }
 0x2fd   : > { %v3325_v48 = vadd.f32 %v11600_v34, %v3289_v33  ;;  %v3186_v19 = vadd.f32 %v3116_v56, %v2908_v27  ;;  %9268 = vmatmul.msk.f32.gmra.mxu0 %vm655_vm1, %v2957_v11  ;;  %v2958_v56 = vld [vmem:[#allocation2 + $0x1a2] sm:$0xff]  ;;  %v11826_v44 = vpop.f32.mrf.mxu1 }
 0x2fe   : > { %v3427_v5 = vld [vmem:[#allocation3 + $0x9f] sm:$0x1] }
 0x2ff   : > { %3359 = vst.msk [vmem:[#allocation3 + $0xa9] sm:$0xff] %vm3346_vm4, %v3325_v48  ;;  %v3222_v38 = vadd.f32 %v11591_v62, %v3186_v19  ;;  %9235 = vmatmul.msk.f32.gmra.mxu3 %vm655_vm1, %v2679_v57  ;;  %v2354_v57 = vadd.f32 %v11594_v28, %v11480_v21  ;;  %v11854_v21 = vld [vmem:[#allocation3 + $0x78] sm:$0xff] }
 0x300   : > { %9280 = vmatmul.msk.f32.gmra.mxu1 %vm3346_vm4, %v3499_v4  ;;  %3445 = vst.msk [vmem:[#allocation3 + $0xa1] sm:$0x1] %vm3402_vm5, %v3427_v5  ;;  %v3501_v4 = vld [vmem:[#allocation3 + $0x81] sm:$0xff] }
 0x301   : > { %v3254_v60 = vmax.f32 %v3222_v38, 0.0  ;;  %9312 = vmatmul.msk.f32.gmra.mxu2 %vm3346_vm4, %v11817_v47  ;;  %v2633_v28 = vadd.f32 %v11618_v52, %v2354_v57  ;;  %v3950_v52 = vld [vmem:[#allocation3 + $0xa] sm:$0xff] }
 0x302   : > { %v2841_v55 = vpop.f32.mrf.mxu3  ;;  %v3122_v32 = vpop.f32.mrf.mxu0 }
 0x303   : > { %v3290_v29 = vmul.f32 %v11597_v22, %v3254_v60  ;;  %v2909_v31 = vadd.f32 %v2841_v55, %v2631_v43  ;;  %v11860_v55 = vpop.f32.mrf.mxu2 }
 0x305   : > { %v3326_v61 = vadd.f32 %v11600_v34, %v3290_v29  ;;  %v3187_v14 = vadd.f32 %v3119_v15, %v2909_v31  ;;  %9269 = vmatmul.msk.f32.gmra.mxu0 %vm655_vm1, %v2958_v56  ;;  %v11848_v19 = vpop.f32.mrf.mxu1  ;;  %v2355_v29 = vadd.f32 %v11614_v37, %v11485_v13 }
 0x306   : > { %v3391_v3 = vld [vmem:[#allocation3 + $0xaa] sm:$0x1] }
 0x307   : > { %3360 = vst.msk [vmem:[#allocation3 + $0xb1] sm:$0xff] %vm3346_vm4, %v3326_v61  ;;  %v3223_v58 = vadd.f32 %v11591_v62, %v3187_v14  ;;  %9236 = vmatmul.msk.f32.gmra.mxu3 %vm655_vm1, %v2680_v49  ;;  %v3502_v14 = vld [vmem:[#allocation3 + $0x91] sm:$0xff]  ;;  %v2634_v13 = vadd.f32 %v11633_v40, %v2355_v29  ;;  %v11888_v40 = vld [vmem:[#allocation3 + $0x1a] sm:$0xff] }
 0x308   : > { %9281 = vmatmul.msk.f32.gmra.mxu1 %vm3346_vm4, %v3500_v10  ;;  %3410 = vst.msk [vmem:[#allocation3 + $0xa8] sm:$0x1] %vm3402_vm5, %v3391_v3  ;;  %v11872_v3 = vld [vmem:[#allocation3 + $0x80] sm:$0xff] }
 0x309   : > { %v3255_v23 = vmax.f32 %v3223_v58, 0.0  ;;  %9313 = vmatmul.msk.f32.gmra.mxu2 %vm3346_vm4, %v11834_v20 }
 0x30a   : > { %v2844_v15 = vpop.f32.mrf.mxu3  ;;  %v3125_v11 = vpop.f32.mrf.mxu0 }
 0x30b   : > { %v3291_v33 = vmul.f32 %v11597_v22, %v3255_v23  ;;  %v2910_v27 = vadd.f32 %v2844_v15, %v2632_v17  ;;  %v14737_v15 = vld [vmem:[#allocation31_spill] sm:$0xff] }
 0x30d   : > { %v3327_v0 = vadd.f32 %v11600_v34, %v3291_v33  ;;  %v3188_v48 = vadd.f32 %v3122_v32, %v2910_v27  ;;  %9370 = vmatmul.msk.f32.vlgmr.msrb.gmra.mxu0 %vm3346_vm4, %v11699_v59  ;;  %v11876_v37 = vpop.f32.mrf.mxu1  ;;  %v11883_v33 = vpop.f32.mrf.mxu2 }
 0x30e   : > { %v3428_v5 = vld [vmem:[#allocation3 + $0xb7] sm:$0x1] }
 0x30f   : > { %3361 = vst.msk [vmem:[#allocation3 + $0xc1] sm:$0xff] %vm3346_vm4, %v3327_v0  ;;  %v3224_v38 = vadd.f32 %v11591_v62, %v3188_v48  ;;  %9337 = vmatmul.msk.f32.vlgmr.msrb.gmra.mxu3 %vm3346_vm4, %v3949_v24  ;;  %v3503_v48 = vld [vmem:[#allocation3 + $0x99] sm:$0xff] }
 0x310   : > { %9282 = vmatmul.msk.f32.gmra.mxu1 %vm3346_vm4, %v3501_v4  ;;  %3446 = vst.msk [vmem:[#allocation3 + $0xb9] sm:$0x1] %vm3402_vm5, %v3428_v5 }
 0x311   : > { %v3256_v59 = vmax.f32 %v3224_v38, 0.0  ;;  %9314 = vmatmul.msk.f32.gmra.mxu2 %vm3346_vm4, %v11854_v21 }
 0x312   : > { %v2847_v43 = vpop.f32.mrf.mxu3  ;;  %v3128_v60 = vpop.f32.mrf.mxu0 }
 0x313   : > { %v3292_v32 = vmul.f32 %v11597_v22, %v3256_v59  ;;  %v2911_v56 = vadd.f32 %v2847_v43, %v2633_v28 }
 0x315   : > { %v3328_v31 = vadd.f32 %v11600_v34, %v3292_v32  ;;  %v3189_v49 = vadd.f32 %v3125_v11, %v2911_v56  ;;  %9371 = vmatmul.msk.f32.gmra.mxu0 %vm3346_vm4, %v11719_v26  ;;  %v2356_v11 = vadd.f32 %v11626_v39, %v14737_v15  ;;  %v11895_v39 = vld [vmem:[#allocation3 + $0x90] sm:$0xff]  ;;  %v11901_v28 = vpop.f32.mrf.mxu1 }
 0x316   : > { %v3392_v42 = vld [vmem:[#allocation3 + $0xc2] sm:$0x1] }
 0x317   : > { %3362 = vst.msk [vmem:[#allocation3 + $0xc9] sm:$0xff] %vm3346_vm4, %v3328_v31  ;;  %v3225_v61 = vadd.f32 %v11591_v62, %v3189_v49  ;;  %9338 = vmatmul.msk.f32.gmra.mxu3 %vm3346_vm4, %v3950_v52  ;;  %v2635_v38 = vadd.f32 %v11653_v1, %v2356_v11  ;;  %v11909_v1 = vld [vmem:[#allocation3 + $0x22] sm:$0xff]  ;;  %v11911_v49 = vpop.f32.mrf.mxu2 }
 0x318   : > { %9283 = vmatmul.msk.f32.gmra.mxu1 %vm3346_vm4, %v3502_v14  ;;  %3411 = vst.msk [vmem:[#allocation3 + $0xc0] sm:$0x1] %vm3402_vm5, %v3392_v42  ;;  %v3504_v42 = vld [vmem:[#allocation3 + $0xa9] sm:$0xff] }
 0x319   : > { %v3257_v26 = vmax.f32 %v3225_v61, 0.0  ;;  %9315 = vmatmul.msk.f32.gmra.mxu2 %vm3346_vm4, %v11872_v3 }
 0x31a   : > { %v2850_v58 = vpop.f32.mrf.mxu3  ;;  %v3131_v10 = vpop.f32.mrf.mxu0 }
 0x31b   : > { %v3293_v17 = vmul.f32 %v11597_v22, %v3257_v26  ;;  %v2912_v23 = vadd.f32 %v2850_v58, %v2634_v13 }
 0x31d   : > { %v3329_v27 = vadd.f32 %v11600_v34, %v3293_v17  ;;  %v3190_v57 = vadd.f32 %v3128_v60, %v2912_v23  ;;  %9372 = vmatmul.msk.f32.gmra.mxu0 %vm3346_vm4, %v11737_v9  ;;  %v14738_v60 = vld [vmem:[#allocation42_spill] sm:$0xff]  ;;  %v11927_v23 = vpop.f32.mrf.mxu1 }
 0x31e   : > { %v3429_v24 = vld [vmem:[#allocation3 + $0xcf] sm:$0x1]  ;;  %v2357_v32 = vadd.f32 %v11643_v8, %v14738_v60  ;;  %v11918_v8 = vld [vmem:[#allocation3 + $0x98] sm:$0xff] }
 0x31f   : > { %3363 = vst.msk [vmem:[#allocation3 + $0xd9] sm:$0xff] %vm3346_vm4, %v3329_v27  ;;  %v3226_v0 = vadd.f32 %v11591_v62, %v3190_v57  ;;  %9339 = vmatmul.msk.f32.gmra.mxu3 %vm3346_vm4, %v11888_v40  ;;  %v3505_v57 = vld [vmem:[#allocation3 + $0xb1] sm:$0xff] }
 0x320   : > { %9284 = vmatmul.msk.f32.gmra.mxu1 %vm3346_vm4, %v3503_v48  ;;  %3447 = vst.msk [vmem:[#allocation3 + $0xd1] sm:$0x1] %vm3402_vm5, %v3429_v24 }
 0x321   : > { %v3258_v9 = vmax.f32 %v3226_v0, 0.0  ;;  %9316 = vmatmul.msk.f32.gmra.mxu2 %vm3346_vm4, %v11895_v39 }
 0x322   : > { %v2853_v4 = vpop.f32.mrf.mxu3  ;;  %v3134_v5 = vpop.f32.mrf.mxu0 }
 0x323   : > { %v3294_v59 = vmul.f32 %v11597_v22, %v3258_v9  ;;  %v2913_v43 = vadd.f32 %v2853_v4, %v2635_v38 }
 0x325   : > { %v3330_v56 = vadd.f32 %v11600_v34, %v3294_v59  ;;  %v3191_v29 = vadd.f32 %v3131_v10, %v2913_v43  ;;  %9373 = vmatmul.msk.f32.gmra.mxu0 %vm3346_vm4, %v11758_v35  ;;  %v2636_v35 = vadd.f32 %v11671_v45, %v2357_v32  ;;  %v14739_v10 = vld [vmem:[#allocation33_spill] sm:$0xff]  ;;  %v11932_v45 = vld [vmem:[#allocation3 + $0x32] sm:$0xff] }
 0x326   : > { %v3393_v31 = vld [vmem:[#allocation3 + $0xda] sm:$0x1]  ;;  %v2358_v17 = vadd.f32 %v11661_v12, %v14739_v10  ;;  %v11939_v12 = vld [vmem:[#allocation3 + $0xa8] sm:$0xff] }
 0x327   : > { %3364 = vst.msk [vmem:[#allocation3 + $0xe1] sm:$0xff] %vm3346_vm4, %v3330_v56  ;;  %v3227_v52 = vadd.f32 %v11591_v62, %v3191_v29  ;;  %9340 = vmatmul.msk.f32.gmra.mxu3 %vm3346_vm4, %v11909_v1  ;;  %v14740_v59 = vld [vmem:[#allocation32_spill] sm:$0xff] }
 0x328   : > { %9285 = vmatmul.msk.f32.gmra.mxu1 %vm3346_vm4, %v3504_v42  ;;  %3412 = vst.msk [vmem:[#allocation3 + $0xd8] sm:$0x1] %vm3402_vm5, %v3393_v31  ;;  %v2637_v48 = vadd.f32 %v11690_v7, %v2358_v17  ;;  %v2359_v43 = vadd.f32 %v11683_v6, %v14740_v59  ;;  %v11953_v7 = vld [vmem:[#allocation3 + $0x3a] sm:$0xff]  ;;  %v11960_v6 = vld [vmem:[#allocation3 + $0xb0] sm:$0xff] }
 0x329   : > { %v3259_v61 = vmax.f32 %v3227_v52, 0.0  ;;  %9317 = vmatmul.msk.f32.gmra.mxu2 %vm3346_vm4, %v11918_v8  ;;  %v3506_v52 = vld [vmem:[#allocation3 + $0xc1] sm:$0xff] }
 0x32a   : > { %v2856_v14 = vpop.f32.mrf.mxu3  ;;  %v3137_v13 = vpop.f32.mrf.mxu0  ;;  %v2638_v42 = vadd.f32 %v11712_v41, %v2359_v43  ;;  %v11974_v41 = vld [vmem:[#allocation3 + $0x4a] sm:$0xff]  ;;  %v14742_v43 = vld [vmem:[#allocation37_spill] sm:$0xff] }
 0x32b   : > { %v3295_v26 = vmul.f32 %v11597_v22, %v3259_v61  ;;  %v2914_v58 = vadd.f32 %v2856_v14, %v2636_v35 }
 0x32d   : > { %v3331_v15 = vadd.f32 %v11600_v34, %v3295_v26  ;;  %v3192_v11 = vadd.f32 %v3134_v5, %v2914_v58  ;;  %9374 = vmatmul.msk.f32.gmra.mxu0 %vm3346_vm4, %v11777_v50  ;;  %v11943_v50 = vpop.f32.mrf.mxu2  ;;  %v14741_v58 = vld [vmem:[#allocation47_spill] sm:$0xff] }
 0x32e   : > { %v3430_v0 = vld [vmem:[#allocation3 + $0xe7] sm:$0x1]  ;;  %v2360_v10 = vadd.f32 %v11705_v46, %v14741_v58 }
 0x32f   : > { %3365 = vst.msk [vmem:[#allocation3 + $0xf1] sm:$0xff] %vm3346_vm4, %v3331_v15  ;;  %v3228_v27 = vadd.f32 %v11591_v62, %v3192_v11  ;;  %9341 = vmatmul.msk.f32.gmra.mxu3 %vm3346_vm4, %v11932_v45  ;;  %v11981_v46 = vld [vmem:[#allocation3 + $0xc0] sm:$0xff] }
 0x330   : > { %9286 = vmatmul.msk.f32.gmra.mxu1 %vm3346_vm4, %v3505_v57  ;;  %3448 = vst.msk [vmem:[#allocation3 + $0xe9] sm:$0x1] %vm3402_vm5, %v3430_v0  ;;  %v3507_v57 = vld [vmem:[#allocation3 + $0xc9] sm:$0xff]  ;;  %v4816_v0 = vld [vmem:[#allocation12 + $0x28] sm:$0x3f] }
 0x331   : > { %v3260_v24 = vmax.f32 %v3228_v27, 0.0  ;;  %9318 = vmatmul.msk.f32.gmra.mxu2 %vm3346_vm4, %v11939_v12 }
 0x332   : > { %v2859_v38 = vpop.f32.mrf.mxu3  ;;  %v3140_v9 = vpop.f32.mrf.mxu0  ;;  %9435 = vmatpush.msk.msrb.mxu2 %vm3620_vm3, %v4816_v0 }
 0x333   : > { %v3296_v4 = vmul.f32 %v11597_v22, %v3260_v24  ;;  %v2915_v5 = vadd.f32 %v2859_v38, %v2637_v48 }
 0x335   : > { %v3332_v60 = vadd.f32 %v11600_v34, %v3296_v4  ;;  %v3193_v32 = vadd.f32 %v3137_v13, %v2915_v5  ;;  %v3641_v56 = vpop.f32.mrf.mxu1  ;;  %9375 = vmatmul.msk.f32.gmra.mxu0 %vm3346_vm4, %v11798_v53  ;;  %v11967_v26 = vpop.f32.mrf.mxu2 }
 0x336   : > { %v3394_v29 = vld [vmem:[#allocation3 + $0xf2] sm:$0x1] }
 0x337   : > { %3366 = vst.msk [vmem:[#allocation3 + $0xf9] sm:$0xff] %vm3346_vm4, %v3332_v60  ;;  %v3229_v31 = vadd.f32 %v11591_v62, %v3193_v32  ;;  %9342 = vmatmul.msk.f32.gmra.mxu3 %vm3346_vm4, %v11953_v7  ;;  %v2361_v60 = vadd.f32 %v11728_v18, %v14742_v43  ;;  %v12003_v18 = vld [vmem:[#allocation3 + $0xc8] sm:$0xff]  ;;  %v14744_v43 = vld [vmem:[#allocation52_spill] sm:$0xff] }
 0x338   : > { %9287 = vmatmul.msk.f32.gmra.mxu1 %vm3346_vm4, %v3506_v52  ;;  %3413 = vst.msk [vmem:[#allocation3 + $0xf0] sm:$0x1] %vm3402_vm5, %v3394_v29 }
 0x339   : > { %v3261_v53 = vmax.f32 %v3229_v31, 0.0  ;;  %9319 = vmatmul.msk.f32.gmra.mxu2 %vm3346_vm4, %v11960_v6 }
 0x33a   : > { %v2862_v35 = vpop.f32.mrf.mxu3  ;;  %v3143_v61 = vpop.f32.mrf.mxu0 }
 0x33b   : > { %v3297_v14 = vmul.f32 %v11597_v22, %v3261_v53  ;;  %v2916_v13 = vadd.f32 %v2862_v35, %v2638_v42  ;;  %v3508_v35 = vld [vmem:[#allocation3 + $0xd9] sm:$0xff] }
 0x33d   : > { %v3333_v17 = vadd.f32 %v11600_v34, %v3297_v14  ;;  %v3194_v15 = vadd.f32 %v3140_v9, %v2916_v13  ;;  %v3644_v11 = vpop.f32.mrf.mxu1  ;;  %9376 = vmatmul.msk.f32.gmra.mxu0 %vm3346_vm4, %v11817_v47  ;;  %v2639_v47 = vadd.f32 %v11741_v2, %v2360_v10  ;;  %v11996_v2 = vld [vmem:[#allocation3 + $0x52] sm:$0xff] }
 0x33e   : > { %v3431_v48 = vld [vmem:[#allocation3 + $0xff] sm:$0x1] }
 0x33f   : > { %3367 = vst.msk [vmem:[#allocation3 + $0x109] sm:$0xff] %vm3346_vm4, %v3333_v17  ;;  %v3230_v27 = vadd.f32 %v11591_v62, %v3194_v15  ;;  %9343 = vmatmul.msk.f32.gmra.mxu3 %vm3346_vm4, %v11974_v41  ;;  %v14743_v17 = vld [vmem:[#allocation35_spill] sm:$0xff] }
 0x340   : > { %9288 = vmatmul.msk.f32.gmra.mxu1 %vm3346_vm4, %v3507_v57  ;;  %3449 = vst.msk [vmem:[#allocation3 + $0x101] sm:$0x1] %vm3402_vm5, %v3431_v48  ;;  %v2362_v15 = vadd.f32 %v11751_v25, %v14743_v17  ;;  %v14745_v17 = vld [vmem:[#allocation36_spill] sm:$0xff] }
 0x341   : > { %v3262_v24 = vmax.f32 %v3230_v27, 0.0  ;;  %9320 = vmatmul.msk.f32.gmra.mxu2 %vm3346_vm4, %v11981_v46 }
 0x342   : > { %v2865_v38 = vpop.f32.mrf.mxu3  ;;  %v3146_v9 = vpop.f32.mrf.mxu0 }
 0x343   : > { %v3298_v4 = vmul.f32 %v11597_v22, %v3262_v24  ;;  %v2917_v5 = vadd.f32 %v2865_v38, %v2639_v47  ;;  %v3509_v24 = vld [vmem:[#allocation3 + $0xe1] sm:$0xff]  ;;  %v12024_v38 = vld [vmem:[#allocation3 + $0xd8] sm:$0xff] }
 0x344   : > { %v3853_v59 = vpop.f32.mrf.mxu2 }
 0x345   : > { %v3334_v32 = vadd.f32 %v11600_v34, %v3298_v4  ;;  %v3195_v29 = vadd.f32 %v3143_v61, %v2917_v5  ;;  %v11992_v31 = vadd.f32 %v3853_v59, %v3641_v56  ;;  %v3647_v52 = vpop.f32.mrf.mxu1  ;;  %9377 = vmatmul.msk.f32.gmra.mxu0 %vm3346_vm4, %v11834_v20  ;;  %v2640_v56 = vadd.f32 %v11764_v16, %v2361_v60  ;;  %v12017_v16 = vld [vmem:[#allocation3 + $0x62] sm:$0xff] }
 0x346   : > { %v3395_v42 = vld [vmem:[#allocation3 + $0x10a] sm:$0x1]  ;;  %v2363_v60 = vadd.f32 %v11781_v54, %v14744_v43 }
 0x347   : > { %3368 = vst.msk [vmem:[#allocation3 + $0x111] sm:$0xff] %vm3346_vm4, %v3334_v32  ;;  %v3231_v53 = vadd.f32 %v11591_v62, %v3195_v29  ;;  %9344 = vmatmul.msk.f32.gmra.mxu3 %vm3346_vm4, %v11996_v2 }
 0x348   : > { %9289 = vmatmul.msk.f32.gmra.mxu1 %vm3346_vm4, %v3508_v35  ;;  %3414 = vst.msk [vmem:[#allocation3 + $0x108] sm:$0x1] %vm3402_vm5, %v3395_v42  ;;  %v2642_v54 = vadd.f32 %v11811_v30, %v2363_v60  ;;  %v14746_v60 = vld [vmem:[#allocation41_spill] sm:$0xff] }
 0x349   : > { %v3263_v20 = vmax.f32 %v3231_v53, 0.0  ;;  %9321 = vmatmul.msk.f32.gmra.mxu2 %vm3346_vm4, %v12003_v18 }
 0x34a   : > { %v2868_v61 = vpop.f32.mrf.mxu3  ;;  %v3149_v14 = vpop.f32.mrf.mxu0 }
 0x34b   : > { %v3299_v13 = vmul.f32 %v11597_v22, %v3263_v20  ;;  %v2918_v58 = vadd.f32 %v2868_v61, %v2640_v56  ;;  %v3510_v20 = vld [vmem:[#allocation3 + $0xf1] sm:$0xff] }
 0x34c   : > { %v3856_v10 = vpop.f32.mrf.mxu2 }
 0x34d   : > { %v3335_v27 = vadd.f32 %v11600_v34, %v3299_v13  ;;  %v3196_v57 = vadd.f32 %v3146_v9, %v2918_v58  ;;  %v12013_v0 = vadd.f32 %v3856_v10, %v3644_v11  ;;  %v3650_v48 = vpop.f32.mrf.mxu1  ;;  %9378 = vmatmul.msk.f32.gmra.mxu0 %vm3346_vm4, %v11854_v21  ;;  %v2641_v11 = vadd.f32 %v11788_v51, %v2362_v15  ;;  %v12038_v51 = vld [vmem:[#allocation3 + $0x6a] sm:$0xff] }
 0x34e   : > { %v3432_v25 = vld [vmem:[#allocation3 + $0x117] sm:$0x1]  ;;  %v2364_v15 = vadd.f32 %v11804_v63, %v14745_v17 }
 0x34f   : > { %3369 = vst.msk [vmem:[#allocation3 + $0x121] sm:$0xff] %vm3346_vm4, %v3335_v27  ;;  %v3232_v47 = vadd.f32 %v11591_v62, %v3196_v57  ;;  %9345 = vmatmul.msk.f32.gmra.mxu3 %vm3346_vm4, %v12017_v16  ;;  %v12058_v27 = vld [vmem:[#allocation10] ss:$0 sm:$0xff] }
 0x350   : > { %9290 = vmatmul.msk.f32.gmra.mxu1 %vm3346_vm4, %v3509_v24  ;;  %3450 = vst.msk [vmem:[#allocation3 + $0x119] sm:$0x1] %vm3402_vm5, %v3432_v25  ;;  %v12065_v25 = vld [vmem:[#allocation3 + $0x7a] sm:$0xff] }
 0x351   : > { %v3264_v21 = vmax.f32 %v3232_v47, 0.0  ;;  %9322 = vmatmul.msk.f32.gmra.mxu2 %vm3346_vm4, %v12024_v38 }
 0x352   : > { %v2871_v9 = vpop.f32.mrf.mxu3  ;;  %v3152_v4 = vpop.f32.mrf.mxu0 }
 0x353   : > { %v3300_v62 = vmul.f32 %v11597_v22, %v3264_v21  ;;  %v2919_v5 = vadd.f32 %v2871_v9, %v2641_v11  ;;  %v12041_v22 = vld [vmem:[#allocation7] ss:$0 sm:$0xff]  ;;  %v12069_v21 = vld [vmem:[#allocation3 + $0xf9] sm:$0xff] }
 0x354   : > { %v3859_v59 = vpop.f32.mrf.mxu2 }
 0x355   : > { %v3336_v32 = vadd.f32 %v11600_v34, %v3300_v62  ;;  %v3197_v29 = vadd.f32 %v3149_v14, %v2919_v5  ;;  %v12034_v42 = vadd.f32 %v3859_v59, %v3647_v52  ;;  %v3653_v53 = vpop.f32.mrf.mxu1  ;;  %9379 = vmatmul.msk.f32.gmra.mxu0 %vm3346_vm4, %v11872_v3  ;;  %v12047_v34 = vld [vmem:[#allocation3 + $0xe0] sm:$0xff] }
 0x356   : > { %v3396_v35 = vld [vmem:[#allocation3 + $0x122] sm:$0x1]  ;;  %v12053_v14 = vld [vmem:[#allocation9] ss:$0 sm:$0xff] }
 0x357   : > { %3370 = vst.msk [vmem:[#allocation3 + $0x129] sm:$0xff] %vm3346_vm4, %v3336_v32  ;;  %v3233_v56 = vadd.f32 %v12041_v22, %v3197_v29  ;;  %9346 = vmatmul.msk.f32.gmra.mxu3 %vm3346_vm4, %v12038_v51  ;;  %v2365_v32 = vadd.f32 %v11826_v44, %v14746_v60  ;;  %v12099_v44 = vld [vmem:[#allocation3 + $0xf8] sm:$0xff] }
 0x358   : > { %9291 = vmatmul.msk.f32.gmra.mxu1 %vm3346_vm4, %v3510_v20  ;;  %3415 = vst.msk [vmem:[#allocation3 + $0x120] sm:$0x1] %vm3402_vm5, %v3396_v35 }
 0x359   : > { %v3265_v3 = vmax.f32 %v3233_v56, 0.0  ;;  %9323 = vmatmul.msk.f32.gmra.mxu2 %vm3346_vm4, %v12047_v34 }
 0x35a   : > { %v2874_v52 = vpop.f32.mrf.mxu3  ;;  %v3155_v61 = vpop.f32.mrf.mxu0 }
 0x35b   : > { %v3301_v13 = vmul.f32 %v12053_v14, %v3265_v3  ;;  %v2920_v58 = vadd.f32 %v2874_v52, %v2642_v54  ;;  %v12093_v52 = vld [vmem:[#allocation3 + $0x109] sm:$0xff] }
 0x35c   : > { %v3862_v10 = vpop.f32.mrf.mxu2 }
 0x35d   : > { %v3337_v57 = vadd.f32 %v12058_v27, %v3301_v13  ;;  %v3198_v30 = vadd.f32 %v3152_v4, %v2920_v58  ;;  %v12061_v47 = vadd.f32 %v3862_v10, %v3650_v48  ;;  %v3656_v24 = vpop.f32.mrf.mxu1  ;;  %9380 = vmatmul.msk.f32.gmra.mxu0 %vm3346_vm4, %v11895_v39  ;;  %v12075_v48 = vld [vmem:[#allocation3 + $0xf0] sm:$0xff]  ;;  %v2643_v39 = vadd.f32 %v11838_v36, %v2364_v15  ;;  %v12089_v36 = vld [vmem:[#allocation3 + $0x82] sm:$0xff] }
 0x35e   : > { %v3433_v63 = vld [vmem:[#allocation3 + $0x12f] sm:$0x1] }
 0x35f   : > { %3371 = vst.msk [vmem:[#allocation3 + $0x139] sm:$0xff] %vm3346_vm4, %v3337_v57  ;;  %v3234_v11 = vadd.f32 %v12041_v22, %v3198_v30  ;;  %9347 = vmatmul.msk.f32.gmra.mxu3 %vm3346_vm4, %v12065_v25  ;;  %v14747_v15 = vld [vmem:[#allocation39_spill] sm:$0xff] }
 0x360   : > { %9292 = vmatmul.msk.f32.gmra.mxu1 %vm3346_vm4, %v12069_v21  ;;  %3451 = vst.msk [vmem:[#allocation3 + $0x131] sm:$0x1] %vm3402_vm5, %v3433_v63  ;;  %v2366_v57 = vadd.f32 %v11848_v19, %v14747_v15 }
 0x361   : > { %v3266_v9 = vmax.f32 %v3234_v11, 0.0  ;;  %9324 = vmatmul.msk.f32.gmra.mxu2 %vm3346_vm4, %v12075_v48 }
 0x362   : > { %v2877_v4 = vpop.f32.mrf.mxu3  ;;  %v3158_v62 = vpop.f32.mrf.mxu0 }
 0x363   : > { %v3302_v5 = vmul.f32 %v12053_v14, %v3266_v9  ;;  %v2921_v59 = vadd.f32 %v2877_v4, %v2643_v39  ;;  %v12117_v4 = vld [vmem:[#allocation3 + $0x111] sm:$0xff] }
 0x364   : > { %v3865_v43 = vpop.f32.mrf.mxu2 }
 0x365   : > { %v3338_v29 = vadd.f32 %v12058_v27, %v3302_v5  ;;  %v3199_v35 = vadd.f32 %v3155_v61, %v2921_v59  ;;  %v12085_v56 = vadd.f32 %v3865_v43, %v3653_v53  ;;  %v3659_v20 = vpop.f32.mrf.mxu1  ;;  %9381 = vmatmul.msk.f32.gmra.mxu0 %vm3346_vm4, %v11918_v8  ;;  %v2644_v8 = vadd.f32 %v11860_v55, %v2365_v32  ;;  %v12113_v55 = vld [vmem:[#allocation3 + $0x92] sm:$0xff] }
 0x366   : > { %v3397_v54 = vld [vmem:[#allocation3 + $0x13a] sm:$0x1] }
 0x367   : > { %3372 = vst.msk [vmem:[#allocation3 + $0x141] sm:$0xff] %vm3346_vm4, %v3338_v29  ;;  %v3235_v3 = vadd.f32 %v12041_v22, %v3199_v35  ;;  %9348 = vmatmul.msk.f32.gmra.mxu3 %vm3346_vm4, %v12089_v36  ;;  %v14748_v29 = vld [vmem:[#allocation57_spill] sm:$0xff] }
 0x368   : > { %9293 = vmatmul.msk.f32.gmra.mxu1 %vm3346_vm4, %v12093_v52  ;;  %3416 = vst.msk [vmem:[#allocation3 + $0x138] sm:$0x1] %vm3402_vm5, %v3397_v54  ;;  %v2367_v35 = vadd.f32 %v11876_v37, %v14748_v29  ;;  %v12147_v37 = vld [vmem:[#allocation3 + $0x110] sm:$0xff] }
 0x369   : > { %v3267_v53 = vmax.f32 %v3235_v3, 0.0  ;;  %9325 = vmatmul.msk.f32.gmra.mxu2 %vm3346_vm4, %v12099_v44 }
 0x36a   : > { %v2880_v61 = vpop.f32.mrf.mxu3  ;;  %v3161_v13 = vpop.f32.mrf.mxu0 }
 0x36b   : > { %v3303_v58 = vmul.f32 %v12053_v14, %v3267_v53  ;;  %v2922_v10 = vadd.f32 %v2880_v61, %v2644_v8 }
 0x36c   : > { %v3868_v17 = vpop.f32.mrf.mxu2 }
 0x36d   : > { %v3339_v30 = vadd.f32 %v12058_v27, %v3303_v58  ;;  %v3200_v11 = vadd.f32 %v3158_v62, %v2922_v10  ;;  %v12109_v63 = vadd.f32 %v3868_v17, %v3656_v24  ;;  %v3662_v39 = vpop.f32.mrf.mxu1  ;;  %9382 = vmatmul.msk.f32.gmra.mxu0 %vm3346_vm4, %v11939_v12  ;;  %v12123_v24 = vld [vmem:[#allocation3 + $0x108] sm:$0xff]  ;;  %v2645_v12 = vadd.f32 %v11883_v33, %v2366_v57  ;;  %v12137_v33 = vld [vmem:[#allocation3 + $0x9a] sm:$0xff] }
 0x36e   : > { %v3434_v19 = vld [vmem:[#allocation3 + $0x147] sm:$0x1] }
 0x36f   : > { %3373 = vst.msk [vmem:[#allocation3 + $0x151] sm:$0xff] %vm3346_vm4, %v3339_v30  ;;  %v3236_v9 = vadd.f32 %v12041_v22, %v3200_v11  ;;  %9349 = vmatmul.msk.f32.gmra.mxu3 %vm3346_vm4, %v12113_v55  ;;  %v12141_v10 = vld [vmem:[#allocation3 + $0x121] sm:$0xff]  ;;  %v14749_v11 = vld [vmem:[#allocation40_spill] sm:$0xff] }
 0x370   : > { %9294 = vmatmul.msk.f32.gmra.mxu1 %vm3346_vm4, %v12117_v4  ;;  %3452 = vst.msk [vmem:[#allocation3 + $0x149] sm:$0x1] %vm3402_vm5, %v3434_v19 }
 0x371   : > { %v3268_v62 = vmax.f32 %v3236_v9, 0.0  ;;  %9326 = vmatmul.msk.f32.gmra.mxu2 %vm3346_vm4, %v12123_v24  ;;  %v2368_v9 = vadd.f32 %v11901_v28, %v14749_v11  ;;  %v12190_v11 = vld [vmem:[#allocation3 + $0x139] sm:$0xff] }
 0x372   : > { %v2883_v5 = vpop.f32.mrf.mxu3  ;;  %v3164_v59 = vpop.f32.mrf.mxu0 }
 0x373   : > { %v3304_v43 = vmul.f32 %v12053_v14, %v3268_v62  ;;  %v2923_v60 = vadd.f32 %v2883_v5, %v2645_v12 }
 0x374   : > { %v3871_v32 = vpop.f32.mrf.mxu2 }
 0x375   : > { %v3340_v54 = vadd.f32 %v12058_v27, %v3304_v43  ;;  %v3201_v3 = vadd.f32 %v3161_v13, %v2923_v60  ;;  %v12133_v8 = vadd.f32 %v3871_v32, %v3659_v20  ;;  %v3665_v53 = vpop.f32.mrf.mxu1  ;;  %9383 = vmatmul.msk.f32.gmra.mxu0 %vm3346_vm4, %v11960_v6  ;;  %v2646_v6 = vadd.f32 %v11911_v49, %v2367_v35  ;;  %v12161_v49 = vld [vmem:[#allocation3 + $0xaa] sm:$0xff] }
 0x376   : > { %v3398_v61 = vld [vmem:[#allocation3 + $0x152] sm:$0x1]  ;;  %v12165_v60 = vld [vmem:[#allocation3 + $0x129] sm:$0xff] }
 0x377   : > { %3374 = vst.msk [vmem:[#allocation3 + $0x159] sm:$0xff] %vm3346_vm4, %v3340_v54  ;;  %v3237_v58 = vadd.f32 %v12041_v22, %v3201_v3  ;;  %9350 = vmatmul.msk.f32.gmra.mxu3 %vm3346_vm4, %v12137_v33 }
 0x378   : > { %9295 = vmatmul.msk.f32.gmra.mxu1 %vm3346_vm4, %v12141_v10  ;;  %3417 = vst.msk [vmem:[#allocation3 + $0x150] sm:$0x1] %vm3402_vm5, %v3398_v61  ;;  %v14750_v61 = vld [vmem:[#allocation46_spill] sm:$0xff] }
 0x379   : > { %v3269_v20 = vmax.f32 %v3237_v58, 0.0  ;;  %9327 = vmatmul.msk.f32.gmra.mxu2 %vm3346_vm4, %v12147_v37  ;;  %v2369_v58 = vadd.f32 %v11927_v23, %v14750_v61  ;;  %v12215_v61 = vld [vmem:[#allocation3 + $0x141] sm:$0xff] }
 0x37a   : > { %v2886_v13 = vpop.f32.mrf.mxu3  ;;  %v3167_v17 = vpop.f32.mrf.mxu0  ;;  %14751 = vst [vmem:[#allocation44_spill] sm:$0xff] %v12215_v61 }
 0x37b   : > { %v3305_v15 = vmul.f32 %v12053_v14, %v3269_v20  ;;  %v2924_v57 = vadd.f32 %v2886_v13, %v2646_v6 }
 0x37c   : > { %v3874_v30 = vpop.f32.mrf.mxu2 }
 0x37d   : > { %v3341_v19 = vadd.f32 %v12058_v27, %v3305_v15  ;;  %v3202_v12 = vadd.f32 %v3164_v59, %v2924_v57  ;;  %v12157_v62 = vadd.f32 %v3874_v30, %v3662_v39  ;;  %v3668_v5 = vpop.f32.mrf.mxu1  ;;  %9384 = vmatmul.msk.f32.gmra.mxu0 %vm3346_vm4, %v11981_v46  ;;  %v12172_v39 = vld [vmem:[#allocation3 + $0x120] sm:$0xff]  ;;  %v2647_v46 = vadd.f32 %v11943_v50, %v2368_v9  ;;  %v12186_v15 = vld [vmem:[#allocation3 + $0xb2] sm:$0xff] }
 0x37e   : > { %v3435_v28 = vld [vmem:[#allocation3 + $0x15f] sm:$0x1] }
 0x37f   : > { %3375 = vst.msk [vmem:[#allocation3 + $0x169] sm:$0xff] %vm3346_vm4, %v3341_v19  ;;  %v3238_v43 = vadd.f32 %v12041_v22, %v3202_v12  ;;  %9351 = vmatmul.msk.f32.gmra.mxu3 %vm3346_vm4, %v12161_v49 }
 0x380   : > { %3382 = vst.msk [vmem:[#allocation3 + $0x199] sm:$0xff] %vm3346_vm4, %v3341_v19  ;;  %9296 = vmatmul.msk.f32.gmra.mxu1 %vm3346_vm4, %v12165_v60 }
 0x381   : > { %v3270_v59 = vmax.f32 %v3238_v43, 0.0  ;;  %9328 = vmatmul.msk.f32.gmra.mxu2 %vm3346_vm4, %v12172_v39  ;;  %3453 = vst.msk [vmem:[#allocation3 + $0x161] sm:$0x1] %vm3402_vm5, %v3435_v28 }
 0x382   : > { %v2889_v32 = vpop.f32.mrf.mxu3  ;;  %v3170_v29 = vpop.f32.mrf.mxu0 }
 0x383   : > { %v3306_v35 = vmul.f32 %v12053_v14, %v3270_v59  ;;  %v2925_v54 = vadd.f32 %v2889_v32, %v2647_v46 }
 0x384   : > { %v3877_v3 = vpop.f32.mrf.mxu2 }
 0x385   : > { %v3342_v6 = vadd.f32 %v12058_v27, %v3306_v35  ;;  %v3203_v20 = vadd.f32 %v3167_v17, %v2925_v54  ;;  %v12182_v13 = vadd.f32 %v3877_v3, %v3665_v53  ;;  %v3671_v50 = vpop.f32.mrf.mxu1  ;;  %9385 = vmatmul.msk.f32.gmra.mxu0 %vm3346_vm4, %v12003_v18  ;;  %v12197_v53 = vld [vmem:[#allocation3 + $0x128] sm:$0xff]  ;;  %v2648_v18 = vadd.f32 %v11967_v26, %v2369_v58  ;;  %v5095_v35 = vld [vmem:[#allocation12 + $0x30] sm:$0x3f] }
 0x386   : > { %v3399_v57 = vld [vmem:[#allocation3 + $0x16a] sm:$0x1]  ;;  %v12210_v54 = vld [vmem:[#allocation3 + $0xc2] sm:$0xff]  ;;  %9468 = vmatpush.msk.msra.mxu3 %vm3620_vm3, %v5095_v35 }
 0x387   : > { %3376 = vst.msk [vmem:[#allocation3 + $0x171] sm:$0xff] %vm3346_vm4, %v3342_v6  ;;  %v3239_v30 = vadd.f32 %v12041_v22, %v3203_v20  ;;  %9352 = vmatmul.msk.f32.gmra.mxu3 %vm3346_vm4, %v12186_v15  ;;  %v3401_v23 = vld [vmem:[#allocation3 + $0x19a] sm:$0x1] }
 0x388   : > { %3383 = vst.msk [vmem:[#allocation3 + $0x1a1] sm:$0xff] %vm3346_vm4, %v3342_v6  ;;  %9297 = vmatmul.msk.f32.gmra.mxu1 %vm3346_vm4, %v12190_v11 }
 0x389   : > { %v3271_v17 = vmax.f32 %v3239_v30, 0.0  ;;  %9329 = vmatmul.msk.f32.gmra.mxu2 %vm3346_vm4, %v12197_v53  ;;  %3418 = vst.msk [vmem:[#allocation3 + $0x168] sm:$0x1] %vm3402_vm5, %v3399_v57 }
 0x38a   : > { %v2892_v9 = vpop.f32.mrf.mxu3  ;;  %v4377_v19 = vpop.f32.mrf.mxu0  ;;  %3420 = vst.msk [vmem:[#allocation3 + $0x198] sm:$0x1] %vm3402_vm5, %v3401_v23 }
 0x38b   : > { %v3307_v12 = vmul.f32 %v12053_v14, %v3271_v17  ;;  %v2926_v43 = vadd.f32 %v2892_v9, %v2648_v18  ;;  %v5373_v9 = vld [vmem:[#allocation12 + $0x38] sm:$0x3f] }
 0x38c   : > { %v3880_v28 = vpop.f32.mrf.mxu2  ;;  %9501 = vmatpush.msk.msra.mxu0 %vm3620_vm3, %v5373_v9  ;;  %v12281_v9 = vld [vmem:[#allocation3 + $0x169] sm:$0xff] }
 0x38d   : > { %v3343_v46 = vadd.f32 %v12058_v27, %v3307_v12  ;;  %v3204_v59 = vadd.f32 %v3170_v29, %v2926_v43  ;;  %v12206_v32 = vadd.f32 %v3880_v28, %v3668_v5  ;;  %v3674_v26 = vpop.f32.mrf.mxu1  ;;  %9386 = vmatmul.msk.f32.gmra.mxu0 %vm3346_vm4, %v12024_v38  ;;  %v12221_v29 = vld [vmem:[#allocation3 + $0x138] sm:$0xff]  ;;  %v12236_v43 = vld [vmem:[#allocation3 + $0xca] sm:$0xff]  ;;  %14754 = vst [vmem:[#allocation49_spill] sm:$0xff] %v12281_v9 }
 0x38e   : > { %v3436_v5 = vld [vmem:[#allocation3 + $0x177] sm:$0x1] }
 0x38f   : > { %3377 = vst.msk [vmem:[#allocation3 + $0x181] sm:$0xff] %vm3346_vm4, %v3343_v46  ;;  %v3240_v3 = vadd.f32 %v12041_v22, %v3204_v59  ;;  %9353 = vmatmul.msk.f32.gmra.mxu3 %vm3346_vm4, %v12210_v54  ;;  %v3438_v22 = vld [vmem:[#allocation3 + $0x1a7] sm:$0x1] }
 0x390   : > { %9298 = vmatmul.msk.f32.gmra.mxu1 %vm3346_vm4, %v12215_v61  ;;  %3454 = vst.msk [vmem:[#allocation3 + $0x179] sm:$0x1] %vm3402_vm5, %v3436_v5  ;;  %v12259_v5 = vld [vmem:[#allocation3 + $0xda] sm:$0xff]  ;;  %v12385_v61 = vld [vmem:[#allocation3 + $0x49] sm:$0xff] }
 0x391   : > { %v3272_v38 = vmax.f32 %v3240_v3, 0.0  ;;  %9330 = vmatmul.msk.f32.gmra.mxu2 %vm3346_vm4, %v12221_v29  ;;  %3456 = vst.msk [vmem:[#allocation3 + $0x1a9] sm:$0x1] %vm3402_vm5, %v3438_v22 }
 0x392   : > { %v4099_v58 = vpop.f32.mrf.mxu3  ;;  %v4380_v6 = vpop.f32.mrf.mxu0 }
 0x393   : > { %v3308_v20 = vmul.f32 %v12053_v14, %v3272_v38  ;;  %v4195_v57 = vadd.f32 %v4099_v58, %v11992_v31  ;;  %v12240_v31 = vld [vmem:[#allocation3 + $0x151] sm:$0xff]  ;;  %v12261_v38 = vld [vmem:[#allocation3 + $0x159] sm:$0xff] }
 0x394   : > { %v3883_v30 = vpop.f32.mrf.mxu2  ;;  %14752 = vst [vmem:[#allocation45_spill] sm:$0xff] %v12240_v31 }
 0x395   : > { %v3344_v23 = vadd.f32 %v12058_v27, %v3308_v20  ;;  %v12230_v18 = vadd.f32 %v3883_v30, %v3671_v50  ;;  %v3677_v17 = vpop.f32.mrf.mxu1  ;;  %9387 = vmatmul.msk.f32.gmra.mxu0 %vm3346_vm4, %v12047_v34  ;;  %v12234_v12 = vadd.f32 %v4377_v19, %v4195_v57  ;;  %v12246_v27 = vld [vmem:[#allocation3 + $0x140] sm:$0xff]  ;;  %v5651_v34 = vld [vmem:[#allocation12 + $0x40] sm:$0x3f]  ;;  %14753 = vst [vmem:[#allocation51_spill] sm:$0xff] %v12261_v38 }
 0x396   : > { %v3400_v14 = vld [vmem:[#allocation3 + $0x182] sm:$0x1]  ;;  %9534 = vmatpush.msk.msra.mxu1 %vm3620_vm3, %v5651_v34 }
 0x397   : > { %3378 = vst.msk [vmem:[#allocation3 + $0x189] sm:$0xff] %vm3346_vm4, %v3344_v23  ;;  %9354 = vmatmul.msk.f32.gmra.mxu3 %vm3346_vm4, %v12236_v43  ;;  %v12279_v23 = vld [vmem:[#allocation3 + $0xe2] sm:$0xff] }
 0x398   : > { %9299 = vmatmul.msk.f32.gmra.mxu1 %vm3346_vm4, %v12240_v31  ;;  %3419 = vst.msk [vmem:[#allocation3 + $0x180] sm:$0x1] %vm3402_vm5, %v3400_v14  ;;  %v12368_v31 = vld [vmem:[#allocation3 + $0x39] sm:$0xff] }
 0x399   : > { %9331 = vmatmul.msk.f32.gmra.mxu2 %vm3346_vm4, %v12246_v27 }
 0x39a   : > { %v4102_v50 = vpop.f32.mrf.mxu3  ;;  %v4383_v19 = vpop.f32.mrf.mxu0 }
 0x39b   : > { %v4196_v28 = vadd.f32 %v4102_v50, %v12013_v0  ;;  %v12267_v0 = vld [vmem:[#allocation3 + $0x150] sm:$0xff] }
 0x39c   : > { %v3886_v46 = vpop.f32.mrf.mxu2 }
 0x39d   : > { %v12253_v59 = vadd.f32 %v3886_v46, %v3674_v26  ;;  %v3680_v35 = vpop.f32.mrf.mxu1  ;;  %9388 = vmatmul.msk.f32.gmra.mxu0 %vm3346_vm4, %v12075_v48  ;;  %v12257_v3 = vadd.f32 %v4380_v6, %v4196_v28  ;;  %v12298_v46 = vld [vmem:[#allocation3 + $0xf2] sm:$0xff] }
 0x39e   : > { %v3437_v58 = vld [vmem:[#allocation3 + $0x18f] sm:$0x1] }
 0x39f   : > { %9355 = vmatmul.msk.f32.gmra.mxu3 %vm3346_vm4, %v12259_v5  ;;  %3455 = vst.msk [vmem:[#allocation3 + $0x191] sm:$0x1] %vm3402_vm5, %v3437_v58  ;;  %v12300_v58 = vld [vmem:[#allocation3 + $0x171] sm:$0xff] }
 0x3a0   : > { %9300 = vmatmul.msk.f32.gmra.mxu1 %vm3346_vm4, %v12261_v38  ;;  %14755 = vst [vmem:[#allocation50_spill] sm:$0xff] %v12300_v58 }
 0x3a1   : > { %9332 = vmatmul.msk.f32.gmra.mxu2 %vm3346_vm4, %v12267_v0 }
 0x3a2   : > { %v4105_v48 = vpop.f32.mrf.mxu3  ;;  %v4386_v26 = vpop.f32.mrf.mxu0 }
 0x3a3   : > { %v4197_v6 = vadd.f32 %v4105_v48, %v12034_v42  ;;  %v12287_v42 = vld [vmem:[#allocation3 + $0x158] sm:$0xff] }
 0x3a4   : > { %v3889_v22 = vpop.f32.mrf.mxu2 }
 0x3a5   : > { %v12273_v20 = vadd.f32 %v3889_v22, %v3677_v17  ;;  %v3683_v57 = vpop.f32.mrf.mxu1  ;;  %9389 = vmatmul.msk.f32.gmra.mxu0 %vm3346_vm4, %v12099_v44  ;;  %v12277_v30 = vadd.f32 %v4383_v19, %v4197_v6 }
 0x3a7   : > { %9356 = vmatmul.msk.f32.gmra.mxu3 %vm3346_vm4, %v12279_v23 }
 0x3a8   : > { %9301 = vmatmul.msk.f32.gmra.mxu1 %vm3346_vm4, %v12281_v9  ;;  %v12333_v9 = vld [vmem:[#allocation3 + $0x10a] sm:$0xff] }
 0x3a9   : > { %9333 = vmatmul.msk.f32.gmra.mxu2 %vm3346_vm4, %v12287_v42 }
 0x3aa   : > { %v4108_v17 = vpop.f32.mrf.mxu3  ;;  %v4389_v14 = vpop.f32.mrf.mxu0 }
 0x3ab   : > { %v4198_v44 = vadd.f32 %v4108_v17, %v12061_v47  ;;  %v12306_v47 = vld [vmem:[#allocation3 + $0x168] sm:$0xff] }
 0x3ac   : > { %v3892_v34 = vpop.f32.mrf.mxu2 }
 0x3ad   : > { %v12292_v50 = vadd.f32 %v3892_v34, %v3680_v35  ;;  %v3686_v19 = vpop.f32.mrf.mxu1  ;;  %9390 = vmatmul.msk.f32.gmra.mxu0 %vm3346_vm4, %v12123_v24  ;;  %v12296_v28 = vadd.f32 %v4386_v26, %v4198_v44  ;;  %v12317_v44 = vld [vmem:[#allocation3 + $0xfa] sm:$0xff] }
 0x3ae   : > { %v4505_v34 = vld [vmem:[#allocation3 + $0x19] sm:$0xff] }
 0x3af   : > { %9357 = vmatmul.msk.f32.gmra.mxu3 %vm3346_vm4, %v12298_v46 }
 0x3b0   : > { %9302 = vmatmul.msk.f32.gmra.mxu1 %vm3346_vm4, %v12300_v58  ;;  %v12321_v58 = vld [vmem:[#allocation3 + $0x170] sm:$0xff] }
 0x3b1   : > { %9334 = vmatmul.msk.f32.gmra.mxu2 %vm3346_vm4, %v12306_v47 }
 0x3b2   : > { %v4111_v35 = vpop.f32.mrf.mxu3  ;;  %v4392_v48 = vpop.f32.mrf.mxu0 }
 0x3b3   : > { %v4199_v24 = vadd.f32 %v4111_v35, %v12085_v56 }
 0x3b4   : > { %v3895_v26 = vpop.f32.mrf.mxu2 }
 0x3b5   : > { %v12311_v6 = vadd.f32 %v3895_v26, %v3683_v57  ;;  %v3689_v22 = vpop.f32.mrf.mxu1  ;;  %9391 = vmatmul.msk.f32.gmra.mxu0 %vm3346_vm4, %v12147_v37  ;;  %v12315_v17 = vadd.f32 %v4389_v14, %v4199_v24 }
 0x3b7   : > { %9358 = vmatmul.msk.f32.gmra.mxu3 %vm3346_vm4, %v12317_v44 }
 0x3b8   : > { %9403 = vmatmul.msk.f32.vlgmr.msrb.gmra.mxu1 %vm3346_vm4, %v4505_v34  ;;  %v4506_v34 = vld [vmem:[#allocation3 + $0x21] sm:$0xff] }
 0x3b9   : > { %9335 = vmatmul.msk.f32.gmra.mxu2 %vm3346_vm4, %v12321_v58 }
 0x3ba   : > { %v4114_v56 = vpop.f32.mrf.mxu3  ;;  %v4395_v57 = vpop.f32.mrf.mxu0 }
 0x3bb   : > { %v4200_v35 = vadd.f32 %v4114_v56, %v12109_v63 }
 0x3bc   : > { %v3898_v37 = vpop.f32.mrf.mxu2 }
 0x3bd   : > { %v12327_v14 = vadd.f32 %v3898_v37, %v3686_v19  ;;  %v3692_v24 = vpop.f32.mrf.mxu1  ;;  %9392 = vmatmul.msk.f32.gmra.mxu0 %vm3346_vm4, %v12172_v39  ;;  %v12331_v26 = vadd.f32 %v4392_v48, %v4200_v35  ;;  %v12347_v35 = vld [vmem:[#allocation3 + $0x112] sm:$0xff] }
 0x3bf   : > { %9359 = vmatmul.msk.f32.gmra.mxu3 %vm3346_vm4, %v12333_v9 }
 0x3c0   : > { %9404 = vmatmul.msk.f32.gmra.mxu1 %vm3346_vm4, %v4506_v34  ;;  %v12351_v34 = vld [vmem:[#allocation3 + $0x31] sm:$0xff] }
 0x3c1   : > { %9436 = vmatmul.msk.f32.vlgmr.msrb.gmra.mxu2 %vm3346_vm4, %v11888_v40 }
 0x3c2   : > { %v4117_v63 = vpop.f32.mrf.mxu3  ;;  %v4398_v19 = vpop.f32.mrf.mxu0 }
 0x3c3   : > { %v4201_v56 = vadd.f32 %v4117_v63, %v12133_v8 }
 0x3c4   : > { %v3901_v37 = vpop.f32.mrf.mxu2 }
 0x3c5   : > { %v12341_v38 = vadd.f32 %v3901_v37, %v3689_v22  ;;  %v3695_v39 = vpop.f32.mrf.mxu1  ;;  %9393 = vmatmul.msk.f32.gmra.mxu0 %vm3346_vm4, %v12197_v53  ;;  %v12345_v48 = vadd.f32 %v4395_v57, %v4201_v56  ;;  %v12364_v37 = vld [vmem:[#allocation3 + $0x122] sm:$0xff] }
 0x3c7   : > { %9360 = vmatmul.msk.f32.gmra.mxu3 %vm3346_vm4, %v12347_v35 }
 0x3c8   : > { %9405 = vmatmul.msk.f32.gmra.mxu1 %vm3346_vm4, %v12351_v34 }
 0x3c9   : > { %9437 = vmatmul.msk.f32.gmra.mxu2 %vm3346_vm4, %v11909_v1 }
 0x3ca   : > { %v4120_v40 = vpop.f32.mrf.mxu3  ;;  %v4401_v8 = vpop.f32.mrf.mxu0 }
 0x3cb   : > { %v4202_v22 = vadd.f32 %v4120_v40, %v12157_v62 }
 0x3cc   : > { %v3904_v53 = vpop.f32.mrf.mxu2 }
 0x3cd   : > { %v12358_v57 = vadd.f32 %v3904_v53, %v3692_v24  ;;  %v3698_v63 = vpop.f32.mrf.mxu1  ;;  %9394 = vmatmul.msk.f32.gmra.mxu0 %vm3346_vm4, %v12221_v29  ;;  %v12362_v56 = vadd.f32 %v4398_v19, %v4202_v22  ;;  %v12381_v53 = vld [vmem:[#allocation3 + $0x12a] sm:$0xff] }
 0x3cf   : > { %9361 = vmatmul.msk.f32.gmra.mxu3 %vm3346_vm4, %v12364_v37 }
 0x3d0   : > { %9406 = vmatmul.msk.f32.gmra.mxu1 %vm3346_vm4, %v12368_v31 }
 0x3d1   : > { %9438 = vmatmul.msk.f32.gmra.mxu2 %vm3346_vm4, %v11932_v45 }
 0x3d2   : > { %v4123_v1 = vpop.f32.mrf.mxu3  ;;  %v4404_v62 = vpop.f32.mrf.mxu0 }
 0x3d3   : > { %v4203_v24 = vadd.f32 %v4123_v1, %v12182_v13 }
 0x3d4   : > { %v3907_v29 = vpop.f32.mrf.mxu2 }
 0x3d5   : > { %v12375_v19 = vadd.f32 %v3907_v29, %v3695_v39  ;;  %v3701_v40 = vpop.f32.mrf.mxu1  ;;  %9395 = vmatmul.msk.f32.gmra.mxu0 %vm3346_vm4, %v12246_v27  ;;  %v12379_v22 = vadd.f32 %v4401_v8, %v4203_v24  ;;  %v12398_v29 = vld [vmem:[#allocation3 + $0x13a] sm:$0xff] }
 0x3d7   : > { %14756 = vst [vmem:[#allocation56_spill] sm:$0xff] %v12379_v22  ;;  %9362 = vmatmul.msk.f32.gmra.mxu3 %vm3346_vm4, %v12381_v53  ;;  %v12402_v22 = vld [vmem:[#allocation3 + $0x51] sm:$0xff] }
 0x3d8   : > { %9407 = vmatmul.msk.f32.gmra.mxu1 %vm3346_vm4, %v12385_v61 }
 0x3d9   : > { %9439 = vmatmul.msk.f32.gmra.mxu2 %vm3346_vm4, %v11953_v7 }
 0x3da   : > { %v4126_v45 = vpop.f32.mrf.mxu3  ;;  %v4407_v13 = vpop.f32.mrf.mxu0 }
 0x3db   : > { %v4204_v39 = vadd.f32 %v4126_v45, %v12206_v32 }
 0x3dc   : > { %v3910_v27 = vpop.f32.mrf.mxu2 }
 0x3dd   : > { %v12392_v8 = vadd.f32 %v3910_v27, %v3698_v63  ;;  %v3704_v1 = vpop.f32.mrf.mxu1  ;;  %9396 = vmatmul.msk.f32.gmra.mxu0 %vm3346_vm4, %v12267_v0  ;;  %v12396_v24 = vadd.f32 %v4404_v62, %v4204_v39  ;;  %v12415_v27 = vld [vmem:[#allocation3 + $0x142] sm:$0xff] }
 0x3df   : > { %14757 = vst [vmem:[#allocation54_spill] sm:$0xff] %v12396_v24  ;;  %9363 = vmatmul.msk.f32.gmra.mxu3 %vm3346_vm4, %v12398_v29  ;;  %v12419_v24 = vld [vmem:[#allocation3 + $0x61] sm:$0xff] }
 0x3e0   : > { %9408 = vmatmul.msk.f32.gmra.mxu1 %vm3346_vm4, %v12402_v22 }
 0x3e1   : > { %9440 = vmatmul.msk.f32.gmra.mxu2 %vm3346_vm4, %v11974_v41 }
 0x3e2   : > { %v4129_v7 = vpop.f32.mrf.mxu3  ;;  %v4410_v32 = vpop.f32.mrf.mxu0 }
 0x3e3   : > { %v4205_v63 = vadd.f32 %v4129_v7, %v12230_v18 }
 0x3e4   : > { %v3913_v0 = vpop.f32.mrf.mxu2 }
 0x3e5   : > { %v12409_v62 = vadd.f32 %v3913_v0, %v3701_v40  ;;  %v3707_v45 = vpop.f32.mrf.mxu1  ;;  %9397 = vmatmul.msk.f32.gmra.mxu0 %vm3346_vm4, %v12287_v42  ;;  %v12413_v39 = vadd.f32 %v4407_v13, %v4205_v63  ;;  %v12432_v0 = vld [vmem:[#allocation3 + $0x152] sm:$0xff] }
 0x3e7   : > { %14758 = vst [vmem:[#allocation55_spill] sm:$0xff] %v12413_v39  ;;  %9364 = vmatmul.msk.f32.gmra.mxu3 %vm3346_vm4, %v12415_v27  ;;  %v12436_v39 = vld [vmem:[#allocation3 + $0x69] sm:$0xff] }
 0x3e8   : > { %9409 = vmatmul.msk.f32.gmra.mxu1 %vm3346_vm4, %v12419_v24 }
 0x3e9   : > { %9441 = vmatmul.msk.f32.gmra.mxu2 %vm3346_vm4, %v11996_v2 }
 0x3ea   : > { %v4132_v41 = vpop.f32.mrf.mxu3  ;;  %v4413_v18 = vpop.f32.mrf.mxu0 }
 0x3eb   : > { %v4206_v40 = vadd.f32 %v4132_v41, %v12253_v59 }
 0x3ec   : > { %v3916_v42 = vpop.f32.mrf.mxu2 }
 0x3ed   : > { %v12426_v13 = vadd.f32 %v3916_v42, %v3704_v1  ;;  %v3710_v7 = vpop.f32.mrf.mxu1  ;;  %9398 = vmatmul.msk.f32.gmra.mxu0 %vm3346_vm4, %v12306_v47  ;;  %v12430_v63 = vadd.f32 %v4410_v32, %v4206_v40  ;;  %v12449_v42 = vld [vmem:[#allocation3 + $0x15a] sm:$0xff] }
 0x3ef   : > { %14759 = vst [vmem:[#allocation61_spill] sm:$0xff] %v12430_v63  ;;  %9365 = vmatmul.msk.f32.gmra.mxu3 %vm3346_vm4, %v12432_v0  ;;  %v12453_v63 = vld [vmem:[#allocation3 + $0x79] sm:$0xff] }
 0x3f0   : > { %9410 = vmatmul.msk.f32.gmra.mxu1 %vm3346_vm4, %v12436_v39 }
 0x3f1   : > { %9442 = vmatmul.msk.f32.gmra.mxu2 %vm3346_vm4, %v12017_v16 }
 0x3f2   : > { %v4135_v2 = vpop.f32.mrf.mxu3  ;;  %v4416_v59 = vpop.f32.mrf.mxu0 }
 0x3f3   : > { %v4207_v1 = vadd.f32 %v4135_v2, %v12273_v20 }
 0x3f4   : > { %v3919_v47 = vpop.f32.mrf.mxu2 }
 0x3f5   : > { %v12443_v32 = vadd.f32 %v3919_v47, %v3707_v45  ;;  %v3713_v41 = vpop.f32.mrf.mxu1  ;;  %9399 = vmatmul.msk.f32.gmra.mxu0 %vm3346_vm4, %v12321_v58  ;;  %v12447_v40 = vadd.f32 %v4413_v18, %v4207_v1  ;;  %v12460_v18 = vld [vmem:[#allocation3 + $0x180] sm:$0xff] }
 0x3f6   : > { %14761 = vst [vmem:[#allocation60_spill] sm:$0xff] %v12460_v18 }
 0x3f7   : > { %14760 = vst [vmem:[#allocation59_spill] sm:$0xff] %v12447_v40  ;;  %9366 = vmatmul.msk.f32.gmra.mxu3 %vm3346_vm4, %v12449_v42  ;;  %v12468_v40 = vld [vmem:[#allocation3 + $0x16a] sm:$0xff] }
 0x3f8   : > { %9411 = vmatmul.msk.f32.gmra.mxu1 %vm3346_vm4, %v12453_v63  ;;  %14763 = vst [vmem:[#allocation64_spill] sm:$0xff] %v12468_v40 }
 0x3f9   : > { %9443 = vmatmul.msk.f32.gmra.mxu2 %vm3346_vm4, %v12038_v51  ;;  %v12472_v51 = vld [vmem:[#allocation3 + $0x81] sm:$0xff] }
 0x3fa   : > { %v4138_v16 = vpop.f32.mrf.mxu3  ;;  %v4419_v20 = vpop.f32.mrf.mxu0 }
 0x3fb   : > { %v4208_v45 = vadd.f32 %v4138_v16, %v12292_v50 }
 0x3fc   : > { %v3922_v58 = vpop.f32.mrf.mxu2 }
 0x3fd   : > { %v12462_v2 = vadd.f32 %v3922_v58, %v3710_v7  ;;  %v3716_v1 = vpop.f32.mrf.mxu1  ;;  %9400 = vmatmul.msk.f32.gmra.mxu0 %vm3346_vm4, %v12460_v18  ;;  %v12466_v47 = vadd.f32 %v4416_v59, %v4208_v45  ;;  %v12479_v59 = vld [vmem:[#allocation3 + $0x188] sm:$0xff] }
 0x3fe   : > { %14764 = vst [vmem:[#allocation34_spill] sm:$0xff] %v12479_v59 }
 0x3ff   : > { %14762 = vst [vmem:[#allocation63_spill] sm:$0xff] %v12466_v47  ;;  %9367 = vmatmul.msk.f32.gmra.mxu3 %vm3346_vm4, %v12468_v40  ;;  %v12487_v40 = vld [vmem:[#allocation3 + $0x172] sm:$0xff] }
 0x400   : > { %9412 = vmatmul.msk.f32.gmra.mxu1 %vm3346_vm4, %v12472_v51  ;;  %14766 = vst [vmem:[#allocation43_spill] sm:$0xff] %v12487_v40 }
 0x401   : > { %9444 = vmatmul.msk.f32.gmra.mxu2 %vm3346_vm4, %v12065_v25  ;;  %v12491_v25 = vld [vmem:[#allocation3 + $0x91] sm:$0xff] }
 0x402   : > { %v4141_v50 = vpop.f32.mrf.mxu3  ;;  %v4422_v7 = vpop.f32.mrf.mxu0 }
 0x403   : > { %v4209_v16 = vadd.f32 %v4141_v50, %v12311_v6 }
 0x404   : > { %v3925_v58 = vpop.f32.mrf.mxu2 }
 0x405   : > { %v12481_v45 = vadd.f32 %v3925_v58, %v3713_v41  ;;  %v3719_v47 = vpop.f32.mrf.mxu1  ;;  %9401 = vmatmul.msk.f32.gmra.mxu0 %vm3346_vm4, %v12479_v59  ;;  %v12485_v18 = vadd.f32 %v4419_v20, %v4209_v16  ;;  %v5062_v59 = vld [vmem:[#allocation3 + $0x30] sm:$0xff] }
 0x407   : > { %14765 = vst [vmem:[#allocation38_spill] sm:$0xff] %v12485_v18  ;;  %9368 = vmatmul.msk.f32.gmra.mxu3 %vm3346_vm4, %v12487_v40  ;;  %v12504_v40 = vld [vmem:[#allocation3 + $0x99] sm:$0xff] }
 0x408   : > { %9413 = vmatmul.msk.f32.gmra.mxu1 %vm3346_vm4, %v12491_v25 }
 0x409   : > { %9445 = vmatmul.msk.f32.gmra.mxu2 %vm3346_vm4, %v12089_v36 }
 0x40a   : > { %v4144_v6 = vpop.f32.mrf.mxu3  ;;  %v4425_v41 = vpop.f32.mrf.mxu0 }
 0x40b   : > { %v4210_v50 = vadd.f32 %v4144_v6, %v12327_v14 }
 0x40c   : > { %v3928_v58 = vpop.f32.mrf.mxu2 }
 0x40d   : > { %v12498_v20 = vadd.f32 %v3928_v58, %v3716_v1  ;;  %v3722_v16 = vpop.f32.mrf.mxu1  ;;  %9502 = vmatmul.msk.f32.vlgmr.msra.gmra.mxu0 %vm3346_vm4, %v12351_v34  ;;  %v12502_v18 = vadd.f32 %v4422_v7, %v4210_v50  ;;  %v12518_v50 = vld [vmem:[#allocation3 + $0xa9] sm:$0xff] }
 0x40f   : > { %9469 = vmatmul.msk.f32.vlgmr.msra.gmra.mxu3 %vm3346_vm4, %v5062_v59  ;;  %v5063_v59 = vld [vmem:[#allocation3 + $0x38] sm:$0xff] }
 0x410   : > { %9414 = vmatmul.msk.f32.gmra.mxu1 %vm3346_vm4, %v12504_v40 }
 0x411   : > { %9446 = vmatmul.msk.f32.gmra.mxu2 %vm3346_vm4, %v12113_v55 }
 0x412   : > { %v4147_v36 = vpop.f32.mrf.mxu3  ;;  %v4428_v14 = vpop.f32.mrf.mxu0 }
 0x413   : > { %v4211_v1 = vadd.f32 %v4147_v36, %v12341_v38 }
 0x414   : > { %v3931_v6 = vpop.f32.mrf.mxu2 }
 0x415   : > { %v12512_v58 = vadd.f32 %v3931_v6, %v3719_v47  ;;  %v3725_v34 = vpop.f32.mrf.mxu1  ;;  %9503 = vmatmul.msk.f32.gmra.mxu0 %vm3346_vm4, %v12368_v31  ;;  %v12516_v7 = vadd.f32 %v4425_v41, %v4211_v1  ;;  %v5064_v1 = vld [vmem:[#allocation3 + $0x48] sm:$0xff] }
 0x417   : > { %9470 = vmatmul.msk.f32.gmra.mxu3 %vm3346_vm4, %v5063_v59  ;;  %v12532_v59 = vld [vmem:[#allocation3 + $0xb1] sm:$0xff] }
 0x418   : > { %9415 = vmatmul.msk.f32.gmra.mxu1 %vm3346_vm4, %v12518_v50 }
 0x419   : > { %9447 = vmatmul.msk.f32.gmra.mxu2 %vm3346_vm4, %v12137_v33 }
 0x41a   : > { %v4150_v55 = vpop.f32.mrf.mxu3  ;;  %v4431_v38 = vpop.f32.mrf.mxu0 }
 0x41b   : > { %v4212_v47 = vadd.f32 %v4150_v55, %v12358_v57 }
 0x41c   : > { %v3934_v36 = vpop.f32.mrf.mxu2 }
 0x41d   : > { %v12526_v6 = vadd.f32 %v3934_v36, %v3722_v16  ;;  %v3728_v31 = vpop.f32.mrf.mxu1  ;;  %9504 = vmatmul.msk.f32.gmra.mxu0 %vm3346_vm4, %v12385_v61  ;;  %v12530_v41 = vadd.f32 %v4428_v14, %v4212_v47  ;;  %v5065_v47 = vld [vmem:[#allocation3 + $0x50] sm:$0xff] }
 0x41f   : > { %9471 = vmatmul.msk.f32.gmra.mxu3 %vm3346_vm4, %v5064_v1  ;;  %v12546_v1 = vld [vmem:[#allocation3 + $0xc1] sm:$0xff] }
 0x420   : > { %9416 = vmatmul.msk.f32.gmra.mxu1 %vm3346_vm4, %v12532_v59 }
 0x421   : > { %9448 = vmatmul.msk.f32.gmra.mxu2 %vm3346_vm4, %v12161_v49 }
 0x422   : > { %v4153_v33 = vpop.f32.mrf.mxu3  ;;  %v4434_v57 = vpop.f32.mrf.mxu0 }
 0x423   : > { %v4213_v16 = vadd.f32 %v4153_v33, %v12375_v19 }
 0x424   : > { %v3937_v55 = vpop.f32.mrf.mxu2 }
 0x425   : > { %v12540_v36 = vadd.f32 %v3937_v55, %v3725_v34  ;;  %v3731_v61 = vpop.f32.mrf.mxu1  ;;  %9505 = vmatmul.msk.f32.gmra.mxu0 %vm3346_vm4, %v12402_v22  ;;  %v12544_v14 = vadd.f32 %v4431_v38, %v4213_v16  ;;  %v5066_v16 = vld [vmem:[#allocation3 + $0x60] sm:$0xff] }
 0x427   : > { %9472 = vmatmul.msk.f32.gmra.mxu3 %vm3346_vm4, %v5065_v47  ;;  %v12560_v47 = vld [vmem:[#allocation3 + $0xc9] sm:$0xff] }
 0x428   : > { %9417 = vmatmul.msk.f32.gmra.mxu1 %vm3346_vm4, %v12546_v1 }
 0x429   : > { %9449 = vmatmul.msk.f32.gmra.mxu2 %vm3346_vm4, %v12186_v15 }
 0x42a   : > { %v4156_v49 = vpop.f32.mrf.mxu3  ;;  %v4437_v19 = vpop.f32.mrf.mxu0 }
 0x42b   : > { %v4214_v34 = vadd.f32 %v4156_v49, %v12392_v8 }
 0x42c   : > { %v3940_v33 = vpop.f32.mrf.mxu2 }
 0x42d   : > { %v12554_v55 = vadd.f32 %v3940_v33, %v3728_v31  ;;  %v3734_v22 = vpop.f32.mrf.mxu1  ;;  %9506 = vmatmul.msk.f32.gmra.mxu0 %vm3346_vm4, %v12419_v24  ;;  %v12558_v38 = vadd.f32 %v4434_v57, %v4214_v34  ;;  %v5067_v34 = vld [vmem:[#allocation3 + $0x68] sm:$0xff] }
 0x42f   : > { %14767 = vst [vmem:[#allocation48_spill] sm:$0xff] %v12558_v38  ;;  %9473 = vmatmul.msk.f32.gmra.mxu3 %vm3346_vm4, %v5066_v16  ;;  %v12574_v16 = vld [vmem:[#allocation3 + $0xd9] sm:$0xff] }
 0x430   : > { %9418 = vmatmul.msk.f32.gmra.mxu1 %vm3346_vm4, %v12560_v47 }
 0x431   : > { %9450 = vmatmul.msk.f32.gmra.mxu2 %vm3346_vm4, %v12210_v54  ;;  %v6216_v54 = vld [vmem:[#allocation18 + $0x18] sm:$0xf] }
 0x432   : > { %v4159_v15 = vpop.f32.mrf.mxu3  ;;  %v4440_v8 = vpop.f32.mrf.mxu0  ;;  %9567 = vmatpush.msk.msra.mxu2 %vm6313_vm6, %v6216_v54 }
 0x433   : > { %v4215_v31 = vadd.f32 %v4159_v15, %v12409_v62 }
 0x434   : > { %v3943_v49 = vpop.f32.mrf.mxu2 }
 0x435   : > { %v12568_v33 = vadd.f32 %v3943_v49, %v3731_v61  ;;  %v4655_v24 = vpop.f32.mrf.mxu1  ;;  %9507 = vmatmul.msk.f32.gmra.mxu0 %vm3346_vm4, %v12436_v39  ;;  %v12572_v57 = vadd.f32 %v4437_v19, %v4215_v31 }
 0x437   : > { %14768 = vst [vmem:[#allocation53_spill] sm:$0xff] %v12572_v57  ;;  %9474 = vmatmul.msk.f32.gmra.mxu3 %vm3346_vm4, %v5067_v34  ;;  %v5068_v34 = vld [vmem:[#allocation3 + $0x78] sm:$0xff]  ;;  %v12589_v57 = vld [vmem:[#allocation3 + $0xe1] sm:$0xff] }
 0x438   : > { %9419 = vmatmul.msk.f32.gmra.mxu1 %vm3346_vm4, %v12574_v16 }
 0x439   : > { %9451 = vmatmul.msk.f32.gmra.mxu2 %vm3346_vm4, %v12236_v43 }
 0x43a   : > { %v4162_v62 = vpop.f32.mrf.mxu3  ;;  %v4443_v61 = vpop.f32.mrf.mxu0 }
 0x43b   : > { %v4216_v39 = vadd.f32 %v4162_v62, %v12426_v13 }
 0x43c   : > { %v3946_v19 = vpop.f32.mrf.mxu2 }
 0x43d   : > { %v12583_v15 = vadd.f32 %v3946_v19, %v3734_v22  ;;  %v4658_v31 = vpop.f32.mrf.mxu1  ;;  %9508 = vmatmul.msk.f32.gmra.mxu0 %vm3346_vm4, %v12453_v63  ;;  %v12587_v49 = vadd.f32 %v4440_v8, %v4216_v39  ;;  %v4751_v22 = vadd.f32 %v4655_v24, %v12234_v12  ;;  %v5069_v19 = vld [vmem:[#allocation3 + $0x80] sm:$0xff] }
 0x43f   : > { %14769 = vst [vmem:[#allocation58_spill] sm:$0xff] %v12587_v49  ;;  %9475 = vmatmul.msk.f32.gmra.mxu3 %vm3346_vm4, %v5068_v34  ;;  %v12604_v34 = vld [vmem:[#allocation3 + $0xf1] sm:$0xff]  ;;  %v5635_v49 = vld [vmem:[#allocation3 + $0xfa] sm:$0xff] }
 0x440   : > { %9420 = vmatmul.msk.f32.gmra.mxu1 %vm3346_vm4, %v12589_v57 }
 0x441   : > { %9452 = vmatmul.msk.f32.gmra.mxu2 %vm3346_vm4, %v12259_v5 }
 0x442   : > { %v4165_v43 = vpop.f32.mrf.mxu3  ;;  %v4446_v13 = vpop.f32.mrf.mxu0 }
 0x443   : > { %v4217_v54 = vadd.f32 %v4165_v43, %v12443_v32  ;;  %v4752_v32 = vadd.f32 %v4658_v31, %v12257_v3 }
 0x444   : > { %v4933_v63 = vpop.f32.mrf.mxu2 }
 0x445   : > { %v12598_v8 = vadd.f32 %v4933_v63, %v4751_v22  ;;  %v4661_v62 = vpop.f32.mrf.mxu1  ;;  %9509 = vmatmul.msk.f32.gmra.mxu0 %vm3346_vm4, %v12472_v51  ;;  %v12602_v39 = vadd.f32 %v4443_v61, %v4217_v54  ;;  %v5070_v54 = vld [vmem:[#allocation3 + $0x90] sm:$0xff] }
 0x447   : > { %14770 = vst [vmem:[#allocation62_spill] sm:$0xff] %v12602_v39  ;;  %9476 = vmatmul.msk.f32.gmra.mxu3 %vm3346_vm4, %v5069_v19 }
 0x448   : > { %9421 = vmatmul.msk.f32.gmra.mxu1 %vm3346_vm4, %v12604_v34 }
 0x449   : > { %9453 = vmatmul.msk.f32.gmra.mxu2 %vm3346_vm4, %v12279_v23 }
 0x44a   : > { %v4168_v12 = vpop.f32.mrf.mxu3  ;;  %v4449_v5 = vpop.f32.mrf.mxu0 }
 0x44b   : > { %v4218_v24 = vadd.f32 %v4168_v12, %v12462_v2  ;;  %v4753_v2 = vadd.f32 %v4661_v62, %v12277_v30  ;;  %v5071_v12 = vld [vmem:[#allocation3 + $0x98] sm:$0xff] }
 0x44c   : > { %v4936_v51 = vpop.f32.mrf.mxu2 }
 0x44d   : > { %v12613_v61 = vadd.f32 %v4936_v51, %v4752_v32  ;;  %v4664_v43 = vpop.f32.mrf.mxu1  ;;  %9510 = vmatmul.msk.f32.gmra.mxu0 %vm3346_vm4, %v12491_v25  ;;  %v12617_v22 = vadd.f32 %v4446_v13, %v4218_v24  ;;  %v5072_v24 = vld [vmem:[#allocation3 + $0xa8] sm:$0xff] }
 0x44f   : > { %14771 = vst [vmem:[#allocation31_spill] sm:$0xff] %v12617_v22  ;;  %9477 = vmatmul.msk.f32.gmra.mxu3 %vm3346_vm4, %v5070_v54  ;;  %v12923_v22 = vld [vmem:[#allocation16] ss:$0 sm:$0xff] }
 0x450   : > { %9422 = vmatmul.msk.f32.gmra.mxu1 %vm3346_vm4, %v12069_v21 }
 0x451   : > { %9454 = vmatmul.msk.f32.gmra.mxu2 %vm3346_vm4, %v12298_v46  ;;  %v4754_v46 = vadd.f32 %v4664_v43, %v12296_v28 }
 0x452   : > { %v4171_v3 = vpop.f32.mrf.mxu3  ;;  %v4452_v23 = vpop.f32.mrf.mxu0 }
 0x453   : > { %v4219_v31 = vadd.f32 %v4171_v3, %v12481_v45  ;;  %v5073_v3 = vld [vmem:[#allocation3 + $0xb0] sm:$0xff] }
 0x454   : > { %v4939_v63 = vpop.f32.mrf.mxu2 }
 0x455   : > { %v12626_v19 = vadd.f32 %v4939_v63, %v4753_v2  ;;  %v4667_v25 = vpop.f32.mrf.mxu1  ;;  %9511 = vmatmul.msk.f32.gmra.mxu0 %vm3346_vm4, %v12504_v40  ;;  %v12630_v13 = vadd.f32 %v4449_v5, %v4219_v31  ;;  %v5074_v63 = vld [vmem:[#allocation3 + $0xc0] sm:$0xff] }
 0x457   : > { %14772 = vst [vmem:[#allocation42_spill] sm:$0xff] %v12630_v13  ;;  %9478 = vmatmul.msk.f32.gmra.mxu3 %vm3346_vm4, %v5071_v12 }
 0x458   : > { %9423 = vmatmul.msk.f32.gmra.mxu1 %vm3346_vm4, %v12093_v52 }
 0x459   : > { %9455 = vmatmul.msk.f32.gmra.mxu2 %vm3346_vm4, %v12317_v44  ;;  %v4755_v44 = vadd.f32 %v4667_v25, %v12315_v17 }
 0x45a   : > { %v4174_v21 = vpop.f32.mrf.mxu3  ;;  %v4455_v30 = vpop.f32.mrf.mxu0 }
 0x45b   : > { %v4220_v45 = vadd.f32 %v4174_v21, %v12498_v20 }
 0x45c   : > { %v4942_v62 = vpop.f32.mrf.mxu2 }
 0x45d   : > { %v12639_v32 = vadd.f32 %v4942_v62, %v4754_v46  ;;  %v4670_v40 = vpop.f32.mrf.mxu1  ;;  %9512 = vmatmul.msk.f32.gmra.mxu0 %vm3346_vm4, %v12518_v50  ;;  %v12643_v5 = vadd.f32 %v4452_v23, %v4220_v45 }
 0x45e   : > { %v4756_v17 = vadd.f32 %v4670_v40, %v12331_v26 }
 0x45f   : > { %14773 = vst [vmem:[#allocation33_spill] sm:$0xff] %v12643_v5  ;;  %9479 = vmatmul.msk.f32.gmra.mxu3 %vm3346_vm4, %v5072_v24 }
 0x460   : > { %9424 = vmatmul.msk.f32.gmra.mxu1 %vm3346_vm4, %v12117_v4 }
 0x461   : > { %9456 = vmatmul.msk.f32.gmra.mxu2 %vm3346_vm4, %v12333_v9 }
 0x462   : > { %v4177_v52 = vpop.f32.mrf.mxu3  ;;  %v4458_v28 = vpop.f32.mrf.mxu0 }
 0x463   : > { %v4221_v20 = vadd.f32 %v4177_v52, %v12512_v58  ;;  %v5077_v52 = vld [vmem:[#allocation3 + $0xe0] sm:$0xff] }
 0x464   : > { %v4945_v51 = vpop.f32.mrf.mxu2 }
 0x465   : > { %v12652_v43 = vadd.f32 %v4945_v51, %v4755_v44  ;;  %v4673_v50 = vpop.f32.mrf.mxu1  ;;  %9513 = vmatmul.msk.f32.gmra.mxu0 %vm3346_vm4, %v12532_v59  ;;  %v12656_v54 = vadd.f32 %v4455_v30, %v4221_v20  ;;  %v5078_v51 = vld [vmem:[#allocation3 + $0xf0] sm:$0xff] }
 0x467   : > { %14774 = vst [vmem:[#allocation32_spill] sm:$0xff] %v12656_v54  ;;  %9480 = vmatmul.msk.f32.gmra.mxu3 %vm3346_vm4, %v5073_v3 }
 0x468   : > { %9425 = vmatmul.msk.f32.gmra.mxu1 %vm3346_vm4, %v12141_v10 }
 0x469   : > { %9457 = vmatmul.msk.f32.gmra.mxu2 %vm3346_vm4, %v12347_v35  ;;  %v4757_v35 = vadd.f32 %v4673_v50, %v12345_v48  ;;  %v14782_v50 = vld [vmem:[#allocation51_spill] sm:$0xff] }
 0x46a   : > { %v4180_v4 = vpop.f32.mrf.mxu3  ;;  %v4461_v9 = vpop.f32.mrf.mxu0 }
 0x46b   : > { %v4222_v58 = vadd.f32 %v4180_v4, %v12526_v6  ;;  %v5357_v4 = vld [vmem:[#allocation3 + $0xf9] sm:$0xff] }
 0x46c   : > { %v4948_v23 = vpop.f32.mrf.mxu2 }
 0x46d   : > { %v12665_v2 = vadd.f32 %v4948_v23, %v4756_v17  ;;  %v4676_v59 = vpop.f32.mrf.mxu1  ;;  %9514 = vmatmul.msk.f32.gmra.mxu0 %vm3346_vm4, %v12546_v1  ;;  %v12669_v31 = vadd.f32 %v4458_v28, %v4222_v58  ;;  %v14780_v28 = vld [vmem:[#allocation45_spill] sm:$0xff] }
 0x46e   : > { %v5079_v17 = vld [vmem:[#allocation3 + $0xf8] sm:$0xff] }
 0x46f   : > { %14775 = vst [vmem:[#allocation47_spill] sm:$0xff] %v12669_v31  ;;  %9481 = vmatmul.msk.f32.gmra.mxu3 %vm3346_vm4, %v5074_v63  ;;  %v14783_v58 = vld [vmem:[#allocation49_spill] sm:$0xff] }
 0x470   : > { %9426 = vmatmul.msk.f32.gmra.mxu1 %vm3346_vm4, %v12165_v60  ;;  %v5075_v60 = vld [vmem:[#allocation3 + $0xc8] sm:$0xff] }
 0x471   : > { %9458 = vmatmul.msk.f32.gmra.mxu2 %vm3346_vm4, %v12364_v37 }
 0x472   : > { %v4183_v10 = vpop.f32.mrf.mxu3  ;;  %v4464_v26 = vpop.f32.mrf.mxu0 }
 0x473   : > { %v4223_v6 = vadd.f32 %v4183_v10, %v12540_v36  ;;  %v4758_v36 = vadd.f32 %v4676_v59, %v12362_v56  ;;  %v5358_v59 = vld [vmem:[#allocation3 + $0x109] sm:$0xff] }
 0x474   : > { %v4951_v25 = vpop.f32.mrf.mxu2 }
 0x475   : > { %v12678_v12 = vadd.f32 %v4951_v25, %v4757_v35  ;;  %v12680_v1 = vpop.f32.mrf.mxu1  ;;  %9515 = vmatmul.msk.f32.gmra.mxu0 %vm3346_vm4, %v12560_v47  ;;  %v12684_v21 = vadd.f32 %v4461_v9, %v4223_v6  ;;  %v14784_v35 = vld [vmem:[#allocation50_spill] sm:$0xff]  ;;  %v14785_v6 = vld [vmem:[#allocation64_spill] sm:$0xff] }
 0x477   : > { %14776 = vst [vmem:[#allocation37_spill] sm:$0xff] %v12684_v21  ;;  %9482 = vmatmul.msk.f32.gmra.mxu3 %vm3346_vm4, %v5075_v60  ;;  %v5359_v60 = vld [vmem:[#allocation3 + $0x111] sm:$0xff] }
 0x478   : > { %9427 = vmatmul.msk.f32.gmra.mxu1 %vm3346_vm4, %v12190_v11  ;;  %v5076_v11 = vld [vmem:[#allocation3 + $0xd8] sm:$0xff] }
 0x479   : > { %9459 = vmatmul.msk.f32.gmra.mxu2 %vm3346_vm4, %v12381_v53  ;;  %v14778_v53 = vld [vmem:[#allocation44_spill] sm:$0xff] }
 0x47a   : > { %v4186_v48 = vpop.f32.mrf.mxu3  ;;  %v4467_v37 = vpop.f32.mrf.mxu0 }
 0x47b   : > { %v4224_v30 = vadd.f32 %v4186_v48, %v12554_v55 }
 0x47c   : > { %v4954_v46 = vpop.f32.mrf.mxu2 }
 0x47d   : > { %v12693_v45 = vadd.f32 %v4954_v46, %v4758_v36  ;;  %v12695_v47 = vpop.f32.mrf.mxu1  ;;  %9516 = vmatmul.msk.f32.gmra.mxu0 %vm3346_vm4, %v12574_v16  ;;  %v12699_v62 = vadd.f32 %v4464_v26, %v4224_v30  ;;  %v5080_v26 = vld [vmem:[#allocation3 + $0x108] sm:$0xff]  ;;  %v5081_v36 = vld [vmem:[#allocation3 + $0x110] sm:$0xff] }
 0x47e   : > { %v12758_v30 = vld [vmem:[#allocation3 + $0x181] sm:$0xff]  ;;  %v14786_v46 = vld [vmem:[#allocation43_spill] sm:$0xff] }
 0x47f   : > { %14777 = vst [vmem:[#allocation35_spill] sm:$0xff] %v12699_v62  ;;  %9483 = vmatmul.msk.f32.gmra.mxu3 %vm3346_vm4, %v5076_v11 }
 0x480   : > { %9428 = vmatmul.msk.f32.gmra.mxu1 %vm3346_vm4, %v14778_v53  ;;  %v5360_v53 = vld [vmem:[#allocation3 + $0x121] sm:$0xff] }
 0x481   : > { %9460 = vmatmul.msk.f32.gmra.mxu2 %vm3346_vm4, %v12398_v29 }
 0x482   : > { %v4189_v56 = vpop.f32.mrf.mxu3  ;;  %v4470_v55 = vpop.f32.mrf.mxu0 }
 0x483   : > { %v4225_v40 = vadd.f32 %v4189_v56, %v12568_v33 }
 0x485   : > { %v12707_v24 = vpop.f32.mrf.mxu1  ;;  %9517 = vmatmul.msk.f32.gmra.mxu0 %vm3346_vm4, %v12589_v57  ;;  %v12711_v16 = vadd.f32 %v4467_v37, %v4225_v40 }
 0x487   : > { %14779 = vst [vmem:[#allocation52_spill] sm:$0xff] %v12711_v16  ;;  %9484 = vmatmul.msk.f32.gmra.mxu3 %vm3346_vm4, %v5077_v52  ;;  %v5082_v52 = vld [vmem:[#allocation3 + $0x120] sm:$0xff]  ;;  %v5631_v16 = vld [vmem:[#allocation3 + $0xca] sm:$0xff] }
 0x488   : > { %9429 = vmatmul.msk.f32.gmra.mxu1 %vm3346_vm4, %v14780_v28  ;;  %v12771_v28 = vld [vmem:[#allocation3 + $0x189] sm:$0xff] }
 0x489   : > { %9461 = vmatmul.msk.f32.gmra.mxu2 %vm3346_vm4, %v12415_v27 }
 0x48a   : > { %v4192_v29 = vpop.f32.mrf.mxu3  ;;  %v5490_v44 = vpop.f32.mrf.mxu0 }
 0x48b   : > { %v4226_v33 = vadd.f32 %v4192_v29, %v12583_v15  ;;  %v12776_v29 = vld [vmem:[#allocation3 + $0x182] sm:$0xff] }
 0x48d   : > { %v12719_v20 = vpop.f32.mrf.mxu1  ;;  %9518 = vmatmul.msk.f32.gmra.mxu0 %vm3346_vm4, %v12604_v34  ;;  %v12723_v57 = vadd.f32 %v4470_v55, %v4226_v33  ;;  %v5361_v33 = vld [vmem:[#allocation3 + $0x129] sm:$0xff] }
 0x48f   : > { %14781 = vst [vmem:[#allocation36_spill] sm:$0xff] %v12723_v57  ;;  %9485 = vmatmul.msk.f32.gmra.mxu3 %vm3346_vm4, %v5078_v51 }
 0x490   : > { %9430 = vmatmul.msk.f32.gmra.mxu1 %vm3346_vm4, %v14782_v50 }
 0x491   : > { %9462 = vmatmul.msk.f32.gmra.mxu2 %vm3346_vm4, %v12432_v0 }
 0x492   : > { %v5212_v27 = vpop.f32.mrf.mxu3  ;;  %v5493_v3 = vpop.f32.mrf.mxu0 }
 0x493   : > { %v5308_v15 = vadd.f32 %v5212_v27, %v12598_v8  ;;  %v5083_v27 = vld [vmem:[#allocation3 + $0x128] sm:$0xff] }
 0x495   : > { %v12731_v9 = vpop.f32.mrf.mxu1  ;;  %9519 = vmatmul.msk.f32.gmra.mxu0 %vm3346_vm4, %v5357_v4  ;;  %v12734_v34 = vadd.f32 %v5490_v44, %v5308_v15  ;;  %v12787_v4 = vld [vmem:[#allocation3 + $0x18a] sm:$0xff] }
 0x497   : > { %9486 = vmatmul.msk.f32.gmra.mxu3 %vm3346_vm4, %v5079_v17  ;;  %v6215_v17 = vld [vmem:[#allocation18 + $0x10] sm:$0xff] }
 0x498   : > { %9431 = vmatmul.msk.f32.gmra.mxu1 %vm3346_vm4, %v14783_v58  ;;  %6332 = vmatpush.msra.mxu2 %v6215_v17  ;;  %v5088_v17 = vld [vmem:[#allocation3 + $0x168] sm:$0xff] }
 0x499   : > { %9463 = vmatmul.msk.f32.gmra.mxu2 %vm3346_vm4, %v12449_v42 }
 0x49a   : > { %v5215_v0 = vpop.f32.mrf.mxu3  ;;  %v5496_v23 = vpop.f32.mrf.mxu0 }
 0x49b   : > { %v5309_v8 = vadd.f32 %v5215_v0, %v12613_v61  ;;  %v5362_v0 = vld [vmem:[#allocation3 + $0x139] sm:$0xff] }
 0x49d   : > { %v12742_v63 = vpop.f32.mrf.mxu1  ;;  %9520 = vmatmul.msk.f32.gmra.mxu0 %vm3346_vm4, %v5358_v59  ;;  %v12745_v10 = vadd.f32 %v5493_v3, %v5309_v8  ;;  %v5618_v3 = vld [vmem:[#allocation3 + $0x32] sm:$0xff] }
 0x49e   : > { %v5084_v59 = vld [vmem:[#allocation3 + $0x138] sm:$0xff] }
 0x49f   : > { %9487 = vmatmul.msk.f32.gmra.mxu3 %vm3346_vm4, %v5080_v26  ;;  %v5619_v26 = vld [vmem:[#allocation3 + $0x3a] sm:$0xff] }
 0x4a0   : > { %9432 = vmatmul.msk.f32.gmra.mxu1 %vm3346_vm4, %v14784_v35 }
 0x4a1   : > { %9464 = vmatmul.msk.f32.gmra.mxu2 %vm3346_vm4, %v14785_v6 }
 0x4a2   : > { %v5218_v42 = vpop.f32.mrf.mxu3  ;;  %v5499_v61 = vpop.f32.mrf.mxu0 }
 0x4a3   : > { %v5310_v25 = vadd.f32 %v5218_v42, %v12626_v19 }
 0x4a5   : > { %v12753_v48 = vpop.f32.mrf.mxu1  ;;  %9521 = vmatmul.msk.f32.gmra.mxu0 %vm3346_vm4, %v5359_v60  ;;  %v12756_v37 = vadd.f32 %v5496_v23, %v5310_v25  ;;  %v5363_v25 = vld [vmem:[#allocation3 + $0x141] sm:$0xff] }
 0x4a6   : > { %v5085_v60 = vld [vmem:[#allocation3 + $0x140] sm:$0xff] }
 0x4a7   : > { %9488 = vmatmul.msk.f32.gmra.mxu3 %vm3346_vm4, %v5081_v36  ;;  %v5620_v36 = vld [vmem:[#allocation3 + $0x4a] sm:$0xff] }
 0x4a8   : > { %9433 = vmatmul.msk.f32.gmra.mxu1 %vm3346_vm4, %v12758_v30 }
 0x4a9   : > { %9465 = vmatmul.msk.f32.gmra.mxu2 %vm3346_vm4, %v14786_v46 }
 0x4aa   : > { %v5221_v19 = vpop.f32.mrf.mxu3  ;;  %v5502_v40 = vpop.f32.mrf.mxu0 }
 0x4ab   : > { %v5311_v11 = vadd.f32 %v5221_v19, %v12639_v32 }
 0x4ad   : > { %v12766_v56 = vpop.f32.mrf.mxu1  ;;  %9522 = vmatmul.msk.f32.gmra.mxu0 %vm3346_vm4, %v5360_v53  ;;  %v12769_v55 = vadd.f32 %v5499_v61, %v5311_v11  ;;  %v5364_v53 = vld [vmem:[#allocation3 + $0x151] sm:$0xff] }
 0x4af   : > { %9489 = vmatmul.msk.f32.gmra.mxu3 %vm3346_vm4, %v5082_v52  ;;  %v5086_v52 = vld [vmem:[#allocation3 + $0x150] sm:$0xff] }
 0x4b0   : > { %9434 = vmatmul.msk.f32.gmra.mxu1 %vm3346_vm4, %v12771_v28 }
 0x4b1   : > { %9466 = vmatmul.msk.f32.gmra.mxu2 %vm3346_vm4, %v12776_v29 }
 0x4b2   : > { %v5224_v32 = vpop.f32.mrf.mxu3  ;;  %v5505_v15 = vpop.f32.mrf.mxu0 }
 0x4b3   : > { %v5312_v44 = vadd.f32 %v5224_v32, %v12652_v43  ;;  %v5621_v32 = vld [vmem:[#allocation3 + $0x52] sm:$0xff] }
 0x4b5   : > { %v12781_v51 = vpop.f32.mrf.mxu1  ;;  %9523 = vmatmul.msk.f32.gmra.mxu0 %vm3346_vm4, %v5361_v33  ;;  %v12784_v50 = vadd.f32 %v5502_v40, %v5312_v44  ;;  %v5365_v44 = vld [vmem:[#allocation3 + $0x159] sm:$0xff] }
 0x4b7   : > { %9490 = vmatmul.msk.f32.gmra.mxu3 %vm3346_vm4, %v5083_v27  ;;  %v5622_v27 = vld [vmem:[#allocation3 + $0x62] sm:$0xff] }
 0x4b8   : > { %9535 = vmatmul.msk.f32.vlgmr.msra.gmra.mxu1 %vm3346_vm4, %v5618_v3  ;;  %v5366_v3 = vld [vmem:[#allocation3 + $0x169] sm:$0xff] }
 0x4b9   : > { %9467 = vmatmul.msk.f32.gmra.mxu2 %vm3346_vm4, %v12787_v4 }
 0x4ba   : > { %v5227_v43 = vpop.f32.mrf.mxu3  ;;  %v5508_v35 = vpop.f32.mrf.mxu0 }
 0x4bb   : > { %v5313_v58 = vadd.f32 %v5227_v43, %v12665_v2  ;;  %v5623_v43 = vld [vmem:[#allocation3 + $0x6a] sm:$0xff] }
 0x4bd   : > { %v12793_v23 = vpop.f32.mrf.mxu1  ;;  %9524 = vmatmul.msk.f32.gmra.mxu0 %vm3346_vm4, %v5362_v0  ;;  %v12796_v8 = vadd.f32 %v5505_v15, %v5313_v58  ;;  %v5367_v58 = vld [vmem:[#allocation3 + $0x171] sm:$0xff] }
 0x4bf   : > { %9491 = vmatmul.msk.f32.gmra.mxu3 %vm3346_vm4, %v5084_v59  ;;  %v5089_v59 = vld [vmem:[#allocation3 + $0x170] sm:$0xff] }
 0x4c0   : > { %9536 = vmatmul.msk.f32.gmra.mxu1 %vm3346_vm4, %v5619_v26  ;;  %v5624_v26 = vld [vmem:[#allocation3 + $0x7a] sm:$0xff] }
 0x4c2   : > { %v5230_v6 = vpop.f32.mrf.mxu3  ;;  %v5511_v11 = vpop.f32.mrf.mxu0 }
 0x4c3   : > { %v5314_v42 = vadd.f32 %v5230_v6, %v12678_v12  ;;  %v12835_v6 = vpop.f32.mrf.mxu2 }
 0x4c5   : > { %v12801_v61 = vpop.f32.mrf.mxu1  ;;  %9525 = vmatmul.msk.f32.gmra.mxu0 %vm3346_vm4, %v5363_v25  ;;  %v12804_v2 = vadd.f32 %v5508_v35, %v5314_v42  ;;  %v14793_v42 = vld [vmem:[#allocation60_spill] sm:$0xff]  ;;  %v5625_v25 = vld [vmem:[#allocation3 + $0x82] sm:$0xff] }
 0x4c6   : > { %14787 = vst [vmem:[#allocation41_spill] sm:$0xff] %v12801_v61 }
 0x4c7   : > { %9492 = vmatmul.msk.f32.gmra.mxu3 %vm3346_vm4, %v5085_v60 }
 0x4c8   : > { %9537 = vmatmul.msk.f32.gmra.mxu1 %vm3346_vm4, %v5620_v36 }
 0x4ca   : > { %v5233_v46 = vpop.f32.mrf.mxu3  ;;  %v12839_v60 = vpop.f32.mrf.mxu0 }
 0x4cb   : > { %v5315_v19 = vadd.f32 %v5233_v46, %v12693_v45  ;;  %v5087_v45 = vld [vmem:[#allocation3 + $0x158] sm:$0xff] }
 0x4cd   : > { %v12809_v40 = vpop.f32.mrf.mxu1  ;;  %9526 = vmatmul.msk.f32.gmra.mxu0 %vm3346_vm4, %v5364_v53  ;;  %v12812_v12 = vadd.f32 %v5511_v11, %v5315_v19  ;;  %v14795_v19 = vld [vmem:[#allocation34_spill] sm:$0xff]  ;;  %v12850_v11 = vpop.f32.mrf.mxu2 }
 0x4ce   : > { %14788 = vst [vmem:[#allocation39_spill] sm:$0xff] %v12809_v40 }
 0x4cf   : > { %9493 = vmatmul.msk.f32.gmra.mxu3 %vm3346_vm4, %v5086_v52  ;;  %v5370_v52 = vld [vmem:[#allocation3 + $0x199] sm:$0xff] }
 0x4d0   : > { %9538 = vmatmul.msk.f32.gmra.mxu1 %vm3346_vm4, %v5621_v32 }
 0x4d2   : > { %v12846_v46 = vpop.f32.mrf.mxu3  ;;  %v12853_v53 = vpop.f32.mrf.mxu0 }
 0x4d5   : > { %v12816_v33 = vpop.f32.mrf.mxu1  ;;  %9527 = vmatmul.msk.f32.gmra.mxu0 %vm3346_vm4, %v5365_v44  ;;  %v5092_v44 = vld [vmem:[#allocation3 + $0x198] sm:$0xff] }
 0x4d6   : > { %14789 = vst [vmem:[#allocation57_spill] sm:$0xff] %v12816_v33  ;;  %v6955_v33 = vld [vmem:[#allocation18 + $0x38] sm:$0xf] }
 0x4d7   : > { %9494 = vmatmul.msk.f32.gmra.mxu3 %vm3346_vm4, %v5087_v45  ;;  %9666 = vmatpush.msk.msrb.mxu1 %vm6313_vm6, %v6955_v33 }
 0x4d8   : > { %9539 = vmatmul.msk.f32.gmra.mxu1 %vm3346_vm4, %v5622_v27  ;;  %v12862_v27 = vpop.f32.mrf.mxu2 }
 0x4da   : > { %v12860_v45 = vpop.f32.mrf.mxu3 }
 0x4dd   : > { %v12821_v15 = vpop.f32.mrf.mxu1  ;;  %9528 = vmatmul.msk.f32.gmra.mxu0 %vm3346_vm4, %v5366_v3  ;;  %v12864_v3 = vpop.f32.mrf.mxu0 }
 0x4de   : > { %14790 = vst [vmem:[#allocation40_spill] sm:$0xff] %v12821_v15 }
 0x4df   : > { %9495 = vmatmul.msk.f32.gmra.mxu3 %vm3346_vm4, %v5088_v17  ;;  %v5371_v17 = vld [vmem:[#allocation3 + $0x1a1] sm:$0xff] }
 0x4e0   : > { %9540 = vmatmul.msk.f32.gmra.mxu1 %vm3346_vm4, %v5623_v43 }
 0x4e5   : > { %v12826_v0 = vpop.f32.mrf.mxu1  ;;  %9529 = vmatmul.msk.f32.gmra.mxu0 %vm3346_vm4, %v5367_v58  ;;  %v5093_v58 = vld [vmem:[#allocation3 + $0x1a0] sm:$0xff] }
 0x4e6   : > { %14791 = vst [vmem:[#allocation46_spill] sm:$0xff] %v12826_v0 }
 0x4e7   : > { %9496 = vmatmul.msk.f32.gmra.mxu3 %vm3346_vm4, %v5089_v59  ;;  %v5628_v59 = vld [vmem:[#allocation3 + $0xaa] sm:$0xff] }
 0x4e8   : > { %9541 = vmatmul.msk.f32.gmra.mxu1 %vm3346_vm4, %v5624_v26  ;;  %v12871_v26 = vpop.f32.mrf.mxu3 }
 0x4ed   : > { %v12831_v35 = vpop.f32.mrf.mxu1  ;;  %9530 = vmatmul.msk.f32.gmra.mxu0 %vm3346_vm4, %v12758_v30  ;;  %v5626_v30 = vld [vmem:[#allocation3 + $0x92] sm:$0xff] }
 0x4ee   : > { %14792 = vst [vmem:[#allocation44_spill] sm:$0xff] %v12831_v35  ;;  %v12920_v35 = vld [vmem:[#allocation15] ss:$0 sm:$0xff] }
 0x4ef   : > { %9497 = vmatmul.msk.f32.gmra.mxu3 %vm3346_vm4, %v14793_v42  ;;  %v12873_v42 = vpop.f32.mrf.mxu2 }
 0x4f0   : > { %9542 = vmatmul.msk.f32.gmra.mxu1 %vm3346_vm4, %v5625_v25 }
 0x4f5   : > { %v12842_v36 = vpop.f32.mrf.mxu1  ;;  %9531 = vmatmul.msk.f32.gmra.mxu0 %vm3346_vm4, %v12771_v28  ;;  %v5627_v28 = vld [vmem:[#allocation3 + $0x9a] sm:$0xff] }
 0x4f6   : > { %14794 = vst [vmem:[#allocation45_spill] sm:$0xff] %v12842_v36  ;;  %v5634_v36 = vld [vmem:[#allocation3 + $0xf2] sm:$0xff] }
 0x4f7   : > { %9498 = vmatmul.msk.f32.gmra.mxu3 %vm3346_vm4, %v14795_v19  ;;  %v12877_v19 = vpop.f32.mrf.mxu0 }
 0x4f8   : > { %9543 = vmatmul.msk.f32.gmra.mxu1 %vm3346_vm4, %v5626_v30  ;;  %v5629_v30 = vld [vmem:[#allocation3 + $0xb2] sm:$0xff] }
 0x4fd   : > { %v12855_v32 = vpop.f32.mrf.mxu1  ;;  %9532 = vmatmul.msk.f32.gmra.mxu0 %vm3346_vm4, %v5370_v52  ;;  %v12880_v52 = vpop.f32.mrf.mxu3 }
 0x4fe   : > { %14796 = vst [vmem:[#allocation51_spill] sm:$0xff] %v12855_v32  ;;  %v12914_v32 = vld [vmem:[#allocation13] ss:$0 sm:$0xff] }
 0x4ff   : > { %9499 = vmatmul.msk.f32.gmra.mxu3 %vm3346_vm4, %v5092_v44 }
 0x500   : > { %9544 = vmatmul.msk.f32.gmra.mxu1 %vm3346_vm4, %v5627_v28  ;;  %v12884_v28 = vpop.f32.mrf.mxu2 }
 0x505   : > { %v12866_v43 = vpop.f32.mrf.mxu1  ;;  %9533 = vmatmul.msk.f32.gmra.mxu0 %vm3346_vm4, %v5371_v17  ;;  %v5630_v17 = vld [vmem:[#allocation3 + $0xc2] sm:$0xff]  ;;  %v12891_v57 = vpop.f32.mrf.mxu3 }
 0x506   : > { %14797 = vst [vmem:[#allocation49_spill] sm:$0xff] %v12866_v43  ;;  %v5633_v43 = vld [vmem:[#allocation3 + $0xe2] sm:$0xff] }
 0x507   : > { %9500 = vmatmul.msk.f32.gmra.mxu3 %vm3346_vm4, %v5093_v58  ;;  %v12886_v58 = vpop.f32.mrf.mxu0 }
 0x508   : > { %9545 = vmatmul.msk.f32.gmra.mxu1 %vm3346_vm4, %v5628_v59  ;;  %v12893_v62 = vpop.f32.mrf.mxu2 }
 0x50d   : > { %v12875_v25 = vpop.f32.mrf.mxu1 }
 0x50e   : > { %14798 = vst [vmem:[#allocation50_spill] sm:$0xff] %v12875_v25  ;;  %v12901_v25 = vpop.f32.mrf.mxu3 }
 0x510   : > { %9546 = vmatmul.msk.f32.gmra.mxu1 %vm3346_vm4, %v5629_v30  ;;  %v12896_v30 = vpop.f32.mrf.mxu0  ;;  %v12903_v31 = vpop.f32.mrf.mxu2 }
 0x515   : > { %v12882_v44 = vpop.f32.mrf.mxu1 }
 0x516   : > { %14799 = vst [vmem:[#allocation64_spill] sm:$0xff] %v12882_v44  ;;  %v5632_v44 = vld [vmem:[#allocation3 + $0xda] sm:$0xff]  ;;  %v12910_v54 = vpop.f32.mrf.mxu3 }
 0x518   : > { %9547 = vmatmul.msk.f32.gmra.mxu1 %vm3346_vm4, %v5630_v17  ;;  %v12905_v17 = vpop.f32.mrf.mxu0 }
 0x51d   : > { %v12889_v59 = vpop.f32.mrf.mxu1 }
 0x51e   : > { %14800 = vst [vmem:[#allocation43_spill] sm:$0xff] %v12889_v59  ;;  %v12927_v39 = vpop.f32.mrf.mxu3 }
 0x520   : > { %9548 = vmatmul.msk.f32.gmra.mxu1 %vm3346_vm4, %v5631_v16  ;;  %v12912_v16 = vpop.f32.mrf.mxu2  ;;  %v12916_v5 = vpop.f32.mrf.mxu0 }
 0x525   : > { %v12898_v21 = vpop.f32.mrf.mxu1 }
 0x526   : > { %14801 = vst [vmem:[#allocation60_spill] sm:$0xff] %v12898_v21  ;;  %v12944_v38 = vpop.f32.mrf.mxu3 }
 0x528   : > { %9549 = vmatmul.msk.f32.gmra.mxu1 %vm3346_vm4, %v5632_v44 }
 0x52d   : > { %v12907_v59 = vpop.f32.mrf.mxu1 }
 0x52e   : > { %14802 = vst [vmem:[#allocation34_spill] sm:$0xff] %v12907_v59  ;;  %v6181_v59 = vld [vmem:[#allocation18 + $0x8] sm:$0xf] }
 0x52f   : > { %9600 = vmatpush.msk.msrb.mxu3 %vm6313_vm6, %v6181_v59  ;;  %v7234_v59 = vld [vmem:[#allocation18 + $0x48] sm:$0xf] }
 0x530   : > { %9550 = vmatmul.msk.f32.gmra.mxu1 %vm3346_vm4, %v5633_v43  ;;  %9699 = vmatpush.msk.msrb.mxu2 %vm6313_vm6, %v7234_v59  ;;  %v5636_v59 = vld [vmem:[#allocation3 + $0x10a] sm:$0xff] }
 0x535   : > { %v5768_v21 = vpop.f32.mrf.mxu1 }
 0x536   : > { %v5864_v44 = vadd.f32 %v5768_v21, %v12734_v34  ;;  %v12929_v21 = vpop.f32.mrf.mxu2 }
 0x538   : > { %v5900_v13 = vadd.f32 %v12914_v32, %v5864_v44  ;;  %9551 = vmatmul.msk.f32.gmra.mxu1 %vm3346_vm4, %v5634_v36  ;;  %v12933_v36 = vpop.f32.mrf.mxu0 }
 0x53a   : > { %v5932_v43 = vmax.f32 %v5900_v13, 0.0 }
 0x53c   : > { %v5968_v0 = vmul.f32 %v12920_v35, %v5932_v43  ;;  %v6676_v43 = vld [vmem:[#allocation18 + $0x28] sm:$0xf] }
 0x53d   : > { %v5771_v15 = vpop.f32.mrf.mxu1  ;;  %9633 = vmatpush.msk.msrb.mxu0 %vm6313_vm6, %v6676_v43 }
 0x53e   : > { %v6004_v34 = vadd.f32 %v12923_v22, %v5968_v0  ;;  %v5865_v44 = vadd.f32 %v5771_v15, %v12745_v10  ;;  %v6180_v10 = vld [vmem:[#allocation18] sm:$0xff]  ;;  %v12946_v61 = vpop.f32.mrf.mxu2 }
 0x53f   : > { %v6675_v15 = vld [vmem:[#allocation18 + $0x20] sm:$0xff]  ;;  %6544 = vmatpush.msrb.mxu3 %v6180_v10 }
 0x540   : > { %6038 = vst.msk [vmem:[#allocation4 + $0x19] sm:$0xff] %vm6037_vm7, %v6004_v34  ;;  %v5901_v13 = vadd.f32 %v12914_v32, %v5865_v44  ;;  %9552 = vmatmul.msk.f32.gmra.mxu1 %vm3346_vm4, %v5635_v49  ;;  %6791 = vmatpush.msrb.mxu0 %v6675_v15 }
 0x542   : > { %v5933_v40 = vmax.f32 %v5901_v13, 0.0 }
 0x544   : > { %v5969_v0 = vmul.f32 %v12920_v35, %v5933_v40  ;;  %v12952_v40 = vpop.f32.mrf.mxu0 }
 0x545   : > { %v5774_v34 = vpop.f32.mrf.mxu1  ;;  %14803 = vst [vmem:[#allocation65_spill] sm:$0xff] %v12952_v40 }
 0x546   : > { %v6005_v44 = vadd.f32 %v12923_v22, %v5969_v0  ;;  %v5866_v49 = vadd.f32 %v5774_v34, %v12756_v37  ;;  %v5637_v34 = vld [vmem:[#allocation3 + $0x112] sm:$0xff] }
 0x547   : > { %v6076_v43 = vld [vmem:[#allocation4 + $0x1a] sm:$0x1] }
 0x548   : > { %6039 = vst.msk [vmem:[#allocation4 + $0x21] sm:$0xff] %vm6037_vm7, %v6005_v44  ;;  %v5902_v33 = vadd.f32 %v12914_v32, %v5866_v49  ;;  %9553 = vmatmul.msk.f32.gmra.mxu1 %vm3346_vm4, %v5636_v59  ;;  %v12960_v59 = vpop.f32.mrf.mxu3 }
 0x549   : > { %6095 = vst.msk [vmem:[#allocation4 + $0x18] sm:$0x1] %vm6093_vm8, %v6076_v43  ;;  %v12963_v43 = vpop.f32.mrf.mxu2 }
 0x54a   : > { %v5934_v13 = vmax.f32 %v5902_v33, 0.0  ;;  %14804 = vst [vmem:[#allocation66_spill] sm:$0xff] %v12963_v43 }
 0x54c   : > { %v5970_v37 = vmul.f32 %v12920_v35, %v5934_v13  ;;  %v12966_v13 = vpop.f32.mrf.mxu0 }
 0x54d   : > { %v5777_v10 = vpop.f32.mrf.mxu1  ;;  %14805 = vst [vmem:[#allocation67_spill] sm:$0xff] %v12966_v13  ;;  %v5639_v13 = vld [vmem:[#allocation3 + $0x12a] sm:$0xff] }
 0x54e   : > { %v6006_v15 = vadd.f32 %v12923_v22, %v5970_v37  ;;  %v5867_v0 = vadd.f32 %v5777_v10, %v12769_v55 }
 0x54f   : > { %v6113_v49 = vld [vmem:[#allocation4 + $0x27] sm:$0x1] }
 0x550   : > { %6040 = vst.msk [vmem:[#allocation4 + $0x31] sm:$0xff] %vm6037_vm7, %v6006_v15  ;;  %v5903_v44 = vadd.f32 %v12914_v32, %v5867_v0  ;;  %9554 = vmatmul.msk.f32.gmra.mxu1 %vm3346_vm4, %v5637_v34  ;;  %v5638_v34 = vld [vmem:[#allocation3 + $0x122] sm:$0xff] }
 0x551   : > { %6070 = vst.msk [vmem:[#allocation4 + $0x1] sm:$0xff] %vm6037_vm7, %v6006_v15 }
 0x552   : > { %v5935_v33 = vmax.f32 %v5903_v44, 0.0  ;;  %6131 = vst.msk [vmem:[#allocation4 + $0x29] sm:$0x1] %vm6093_vm8, %v6113_v49 }
 0x554   : > { %v5971_v55 = vmul.f32 %v12920_v35, %v5935_v33  ;;  %v12977_v33 = vpop.f32.mrf.mxu3 }
 0x555   : > { %v5780_v37 = vpop.f32.mrf.mxu1 }
 0x556   : > { %v6007_v10 = vadd.f32 %v12923_v22, %v5971_v55  ;;  %v5868_v0 = vadd.f32 %v5780_v37, %v12784_v50  ;;  %v12980_v50 = vpop.f32.mrf.mxu2 }
 0x557   : > { %v6077_v43 = vld [vmem:[#allocation4 + $0x32] sm:$0x1]  ;;  %14806 = vst [vmem:[#allocation68_spill] sm:$0xff] %v12980_v50 }
 0x558   : > { %6041 = vst.msk [vmem:[#allocation4 + $0x39] sm:$0xff] %vm6037_vm7, %v6007_v10  ;;  %v5904_v40 = vadd.f32 %v12914_v32, %v5868_v0  ;;  %9555 = vmatmul.msk.f32.gmra.mxu1 %vm3346_vm4, %v5638_v34  ;;  %v6182_v15 = vld [vmem:[#allocation4 + $0x1] sm:$0xff]  ;;  %v12983_v0 = vpop.f32.mrf.mxu0 }
 0x559   : > { %v6075_v44 = vld [vmem:[#allocation4 + $0x2] sm:$0x1]  ;;  %6071 = vst.msk [vmem:[#allocation4 + $0x9] sm:$0xff] %vm6037_vm7, %v6007_v10  ;;  %9568 = vmatmul.msk.f32.vlgmr.msra.gmra.mxu2 %vm6037_vm7, %v6182_v15 }
 0x55a   : > { %v5936_v49 = vmax.f32 %v5904_v40, 0.0  ;;  %6094 = vst.msk [vmem:[#allocation4] sm:$0x1] %vm6093_vm8, %v6075_v44 }
 0x55b   : > { %6096 = vst.msk [vmem:[#allocation4 + $0x30] sm:$0x1] %vm6093_vm8, %v6077_v43 }
 0x55c   : > { %v5972_v55 = vmul.f32 %v12920_v35, %v5936_v49  ;;  %14807 = vst [vmem:[#allocation69_spill] sm:$0xff] %v12983_v0 }
 0x55d   : > { %v5783_v37 = vpop.f32.mrf.mxu1 }
 0x55e   : > { %v6008_v34 = vadd.f32 %v12923_v22, %v5972_v55  ;;  %v5869_v10 = vadd.f32 %v5783_v37, %v12796_v8  ;;  %v12996_v55 = vpop.f32.mrf.mxu3  ;;  %v12998_v37 = vpop.f32.mrf.mxu2 }
 0x55f   : > { %v6114_v0 = vld [vmem:[#allocation4 + $0x3f] sm:$0x1]  ;;  %14808 = vst [vmem:[#allocation70_spill] sm:$0xff] %v12998_v37 }
 0x560   : > { %6042 = vst.msk [vmem:[#allocation4 + $0x49] sm:$0xff] %vm6037_vm7, %v6008_v34  ;;  %v5905_v40 = vadd.f32 %v12914_v32, %v5869_v10  ;;  %9556 = vmatmul.msk.f32.gmra.mxu1 %vm3346_vm4, %v5639_v13  ;;  %v6183_v15 = vld [vmem:[#allocation4 + $0x9] sm:$0xff] }
 0x561   : > { %v6642_v43 = vld [vmem:[#allocation4 + $0x2] sm:$0xff]  ;;  %9569 = vmatmul.msk.f32.gmra.mxu2 %vm6037_vm7, %v6183_v15  ;;  %v6112_v49 = vld [vmem:[#allocation4 + $0xf] sm:$0x1]  ;;  %6132 = vst.msk [vmem:[#allocation4 + $0x41] sm:$0x1] %vm6093_vm8, %v6114_v0 }
 0x562   : > { %v6148_v44 = vld [vmem:[#allocation4] sm:$0xff]  ;;  %9634 = vmatmul.msk.f32.vlgmr.msrb.gmra.mxu0 %vm6037_vm7, %v6642_v43  ;;  %v5937_v50 = vmax.f32 %v5905_v40, 0.0  ;;  %6130 = vst.msk [vmem:[#allocation4 + $0x11] sm:$0x1] %vm6093_vm8, %v6112_v49  ;;  %v5640_v15 = vld [vmem:[#allocation3 + $0x13a] sm:$0xff]  ;;  %v13002_v40 = vpop.f32.mrf.mxu0 }
 0x563   : > { %9601 = vmatmul.msk.f32.vlgmr.msrb.gmra.mxu3 %vm6037_vm7, %v6148_v44  ;;  %14809 = vst [vmem:[#allocation71_spill] sm:$0xff] %v13002_v40  ;;  %v6149_v0 = vld [vmem:[#allocation4 + $0x8] sm:$0xff] }
 0x564   : > { %v5973_v8 = vmul.f32 %v12920_v35, %v5937_v50  ;;  %v6184_v50 = vld [vmem:[#allocation4 + $0x19] sm:$0xff] }
 0x565   : > { %v5786_v13 = vpop.f32.mrf.mxu1 }
 0x566   : > { %v6009_v34 = vadd.f32 %v12923_v22, %v5973_v8  ;;  %v5870_v10 = vadd.f32 %v5786_v13, %v12804_v2  ;;  %v14810_v2 = vld [vmem:[#allocation56_spill] sm:$0xff]  ;;  %v13017_v37 = vpop.f32.mrf.mxu3 }
 0x567   : > { %v6078_v43 = vld [vmem:[#allocation4 + $0x4a] sm:$0x1]  ;;  %v4759_v13 = vadd.f32 %v12680_v1, %v14810_v2 }
 0x568   : > { %6043 = vst.msk [vmem:[#allocation4 + $0x51] sm:$0xff] %vm6037_vm7, %v6009_v34  ;;  %v5906_v44 = vadd.f32 %v12914_v32, %v5870_v10  ;;  %9557 = vmatmul.msk.f32.gmra.mxu1 %vm3346_vm4, %v5640_v15 }
 0x569   : > { %9570 = vmatmul.msk.f32.gmra.mxu2 %vm6037_vm7, %v6184_v50  ;;  %v6643_v49 = vld [vmem:[#allocation4 + $0xa] sm:$0xff]  ;;  %6097 = vst.msk [vmem:[#allocation4 + $0x48] sm:$0x1] %vm6093_vm8, %v6078_v43  ;;  %v5037_v15 = vadd.f32 %v12835_v6, %v4759_v13  ;;  %v5641_v43 = vld [vmem:[#allocation3 + $0x142] sm:$0xff] }
 0x56a   : > { %v5938_v8 = vmax.f32 %v5906_v44, 0.0  ;;  %9635 = vmatmul.msk.f32.gmra.mxu0 %vm6037_vm7, %v6643_v49  ;;  %v6185_v49 = vld [vmem:[#allocation4 + $0x21] sm:$0xff]  ;;  %v13026_v6 = vld [vmem:[#allocation4 + $0x18] sm:$0xff]  ;;  %v13029_v2 = vpop.f32.mrf.mxu0 }
 0x56b   : > { %9602 = vmatmul.msk.f32.gmra.mxu3 %vm6037_vm7, %v6149_v0  ;;  %v5316_v44 = vadd.f32 %v12846_v46, %v5037_v15  ;;  %v13020_v0 = vpop.f32.mrf.mxu2  ;;  %14811 = vst [vmem:[#allocation56_spill] sm:$0xff] %v13029_v2 }
 0x56c   : > { %v5974_v34 = vmul.f32 %v12920_v35, %v5938_v8 }
 0x56d   : > { %v5789_v10 = vpop.f32.mrf.mxu1 }
 0x56e   : > { %v6010_v40 = vadd.f32 %v12923_v22, %v5974_v34  ;;  %v5871_v50 = vadd.f32 %v5789_v10, %v12812_v12  ;;  %v6644_v12 = vld [vmem:[#allocation4 + $0x1a] sm:$0xff]  ;;  %v5594_v10 = vadd.f32 %v12839_v60, %v5316_v44 }
 0x56f   : > { %v6115_v8 = vld [vmem:[#allocation4 + $0x57] sm:$0x1]  ;;  %v13047_v60 = vld [vmem:[#allocation4 + $0x20] sm:$0xff] }
 0x570   : > { %6044 = vst.msk [vmem:[#allocation4 + $0x61] sm:$0xff] %vm6037_vm7, %v6010_v40  ;;  %v5907_v1 = vadd.f32 %v12914_v32, %v5871_v50  ;;  %9558 = vmatmul.msk.f32.gmra.mxu1 %vm3346_vm4, %v5641_v43  ;;  %v14812_v40 = vld [vmem:[#allocation54_spill] sm:$0xff] }
 0x571   : > { %9571 = vmatmul.msk.f32.gmra.mxu2 %vm6037_vm7, %v6185_v49  ;;  %6133 = vst.msk [vmem:[#allocation4 + $0x59] sm:$0x1] %vm6093_vm8, %v6115_v8  ;;  %v4760_v13 = vadd.f32 %v12695_v47, %v14812_v40  ;;  %v5642_v8 = vld [vmem:[#allocation3 + $0x152] sm:$0xff]  ;;  %v6186_v47 = vld [vmem:[#allocation4 + $0x31] sm:$0xff] }
 0x572   : > { %v5939_v46 = vmax.f32 %v5907_v1, 0.0  ;;  %9636 = vmatmul.msk.f32.gmra.mxu0 %vm6037_vm7, %v6644_v12 }
 0x573   : > { %9603 = vmatmul.msk.f32.gmra.mxu3 %vm6037_vm7, %v13026_v6  ;;  %v5038_v50 = vadd.f32 %v12850_v11, %v4760_v13  ;;  %v6645_v11 = vld [vmem:[#allocation4 + $0x22] sm:$0xff]  ;;  %v13050_v44 = vpop.f32.mrf.mxu2 }
 0x574   : > { %v5975_v34 = vmul.f32 %v12920_v35, %v5939_v46  ;;  %v13044_v46 = vpop.f32.mrf.mxu3 }
 0x575   : > { %v5792_v15 = vpop.f32.mrf.mxu1  ;;  %v5317_v2 = vadd.f32 %v12860_v45, %v5038_v50  ;;  %v14813_v45 = vld [vmem:[#allocation55_spill] sm:$0xff] }
 0x576   : > { %v6011_v43 = vadd.f32 %v12923_v22, %v5975_v34  ;;  %v5872_v49 = vadd.f32 %v5792_v15, %v5594_v10  ;;  %v4761_v13 = vadd.f32 %v12707_v24, %v14813_v45  ;;  %v13057_v34 = vpop.f32.mrf.mxu0  ;;  %v6187_v24 = vld [vmem:[#allocation4 + $0x39] sm:$0xff] }
 0x577   : > { %v6079_v1 = vld [vmem:[#allocation4 + $0x62] sm:$0x1]  ;;  %v5595_v15 = vadd.f32 %v12853_v53, %v5317_v2  ;;  %v13068_v53 = vld [vmem:[#allocation4 + $0x30] sm:$0xff] }
 0x578   : > { %6045 = vst.msk [vmem:[#allocation4 + $0x69] sm:$0xff] %vm6037_vm7, %v6011_v43  ;;  %v5908_v12 = vadd.f32 %v12914_v32, %v5872_v49  ;;  %9559 = vmatmul.msk.f32.gmra.mxu1 %vm3346_vm4, %v5642_v8  ;;  %v5039_v43 = vadd.f32 %v12862_v27, %v4761_v13  ;;  %v6646_v2 = vld [vmem:[#allocation4 + $0x32] sm:$0xff] }
 0x579   : > { %9572 = vmatmul.msk.f32.gmra.mxu2 %vm6037_vm7, %v6186_v47  ;;  %6098 = vst.msk [vmem:[#allocation4 + $0x60] sm:$0x1] %vm6093_vm8, %v6079_v1  ;;  %v5643_v1 = vld [vmem:[#allocation3 + $0x15a] sm:$0xff] }
 0x57a   : > { %v5940_v40 = vmax.f32 %v5908_v12, 0.0  ;;  %9637 = vmatmul.msk.f32.gmra.mxu0 %vm6037_vm7, %v6645_v11  ;;  %v5318_v12 = vadd.f32 %v12871_v26, %v5039_v43 }
 0x57b   : > { %9604 = vmatmul.msk.f32.gmra.mxu3 %vm6037_vm7, %v13047_v60  ;;  %v13078_v13 = vpop.f32.mrf.mxu2 }
 0x57c   : > { %v5976_v10 = vmul.f32 %v12920_v35, %v5940_v40  ;;  %v13074_v26 = vpop.f32.mrf.mxu3  ;;  %v14814_v40 = vld [vmem:[#allocation61_spill] sm:$0xff] }
 0x57d   : > { %v5795_v50 = vpop.f32.mrf.mxu1  ;;  %v4762_v45 = vadd.f32 %v12719_v20, %v14814_v40 }
 0x57e   : > { %v6012_v49 = vadd.f32 %v12923_v22, %v5976_v10  ;;  %v5873_v8 = vadd.f32 %v5795_v50, %v5595_v15  ;;  %v5596_v15 = vadd.f32 %v12864_v3, %v5318_v12  ;;  %v13091_v3 = vld [vmem:[#allocation4 + $0x38] sm:$0xff] }
 0x57f   : > { %v6116_v11 = vld [vmem:[#allocation4 + $0x6f] sm:$0x1]  ;;  %v5040_v43 = vadd.f32 %v12873_v42, %v4762_v45  ;;  %v6647_v42 = vld [vmem:[#allocation4 + $0x3a] sm:$0xff] }
 0x580   : > { %6046 = vst.msk [vmem:[#allocation4 + $0x79] sm:$0xff] %vm6037_vm7, %v6012_v49  ;;  %v5909_v47 = vadd.f32 %v12914_v32, %v5873_v8  ;;  %9560 = vmatmul.msk.f32.gmra.mxu1 %vm3346_vm4, %v5643_v1  ;;  %v13083_v49 = vpop.f32.mrf.mxu0 }
 0x581   : > { %9573 = vmatmul.msk.f32.gmra.mxu2 %vm6037_vm7, %v6187_v24  ;;  %6134 = vst.msk [vmem:[#allocation4 + $0x71] sm:$0x1] %vm6093_vm8, %v6116_v11  ;;  %v5319_v11 = vadd.f32 %v12880_v52, %v5040_v43  ;;  %v14815_v52 = vld [vmem:[#allocation59_spill] sm:$0xff] }
 0x582   : > { %v5941_v27 = vmax.f32 %v5909_v47, 0.0  ;;  %9638 = vmatmul.msk.f32.gmra.mxu0 %vm6037_vm7, %v6646_v2  ;;  %v5644_v47 = vld [vmem:[#allocation3 + $0x16a] sm:$0xff]  ;;  %v6188_v2 = vld [vmem:[#allocation4 + $0x49] sm:$0xff] }
 0x583   : > { %9605 = vmatmul.msk.f32.gmra.mxu3 %vm6037_vm7, %v13068_v53  ;;  %v5597_v45 = vadd.f32 %v12877_v19, %v5319_v11  ;;  %v13104_v43 = vpop.f32.mrf.mxu2  ;;  %v6189_v19 = vld [vmem:[#allocation4 + $0x51] sm:$0xff] }
 0x584   : > { %v5977_v10 = vmul.f32 %v12920_v35, %v5941_v27  ;;  %v4763_v27 = vadd.f32 %v12731_v9, %v14815_v52 }
 0x585   : > { %v5798_v50 = vpop.f32.mrf.mxu1 }
 0x586   : > { %v6013_v8 = vadd.f32 %v12923_v22, %v5977_v10  ;;  %v5874_v1 = vadd.f32 %v5798_v50, %v5596_v15  ;;  %v13101_v10 = vpop.f32.mrf.mxu3  ;;  %v5041_v50 = vadd.f32 %v12884_v28, %v4763_v27  ;;  %v13114_v28 = vld [vmem:[#allocation4 + $0x48] sm:$0xff] }
 0x587   : > { %v6080_v24 = vld [vmem:[#allocation4 + $0x7a] sm:$0x1] }
 0x588   : > { %6047 = vst.msk [vmem:[#allocation4 + $0x81] sm:$0xff] %vm6037_vm7, %v6013_v8  ;;  %v5910_v20 = vadd.f32 %v12914_v32, %v5874_v1  ;;  %9561 = vmatmul.msk.f32.gmra.mxu1 %vm3346_vm4, %v5644_v47  ;;  %v5645_v47 = vld [vmem:[#allocation3 + $0x172] sm:$0xff] }
 0x589   : > { %9574 = vmatmul.msk.f32.gmra.mxu2 %vm6037_vm7, %v6188_v2  ;;  %6099 = vst.msk [vmem:[#allocation4 + $0x78] sm:$0x1] %vm6093_vm8, %v6080_v24  ;;  %v5320_v24 = vadd.f32 %v12891_v57, %v5041_v50  ;;  %v6648_v2 = vld [vmem:[#allocation4 + $0x4a] sm:$0xff]  ;;  %v14816_v57 = vld [vmem:[#allocation63_spill] sm:$0xff] }
 0x58a   : > { %v5942_v12 = vmax.f32 %v5910_v20, 0.0  ;;  %9639 = vmatmul.msk.f32.gmra.mxu0 %vm6037_vm7, %v6647_v42  ;;  %v13108_v20 = vpop.f32.mrf.mxu0 }
 0x58b   : > { %9606 = vmatmul.msk.f32.gmra.mxu3 %vm6037_vm7, %v13091_v3  ;;  %v5598_v27 = vadd.f32 %v12886_v58, %v5320_v24  ;;  %v6190_v58 = vld [vmem:[#allocation4 + $0x61] sm:$0xff]  ;;  %v6649_v24 = vld [vmem:[#allocation4 + $0x52] sm:$0xff] }
 0x58c   : > { %v5978_v40 = vmul.f32 %v12920_v35, %v5942_v12  ;;  %v4764_v12 = vadd.f32 %v12742_v63, %v14816_v57 }
 0x58d   : > { %v5801_v15 = vpop.f32.mrf.mxu1 }
 0x58e   : > { %v6014_v8 = vadd.f32 %v12923_v22, %v5978_v40  ;;  %v5875_v1 = vadd.f32 %v5801_v15, %v5597_v45  ;;  %v5042_v45 = vadd.f32 %v12893_v62, %v4764_v12  ;;  %v13136_v62 = vld [vmem:[#allocation4 + $0x50] sm:$0xff] }
 0x58f   : > { %v6117_v11 = vld [vmem:[#allocation4 + $0x87] sm:$0x1] }
 0x590   : > { %6048 = vst.msk [vmem:[#allocation4 + $0x91] sm:$0xff] %vm6037_vm7, %v6014_v8  ;;  %v5911_v9 = vadd.f32 %v12914_v32, %v5875_v1  ;;  %9562 = vmatmul.msk.f32.gmra.mxu1 %vm3346_vm4, %v5645_v47  ;;  %v13126_v8 = vpop.f32.mrf.mxu3  ;;  %v5321_v47 = vadd.f32 %v12901_v25, %v5042_v45 }
 0x591   : > { %9575 = vmatmul.msk.f32.gmra.mxu2 %vm6037_vm7, %v6189_v19  ;;  %6135 = vst.msk [vmem:[#allocation4 + $0x89] sm:$0x1] %vm6093_vm8, %v6117_v11  ;;  %v6954_v11 = vld [vmem:[#allocation18 + $0x30] sm:$0xff] }
 0x592   : > { %v5943_v42 = vmax.f32 %v5911_v9, 0.0  ;;  %9640 = vmatmul.msk.f32.gmra.mxu0 %vm6037_vm7, %v6648_v2  ;;  %v13129_v9 = vpop.f32.mrf.mxu2  ;;  %v13139_v19 = vpop.f32.mrf.mxu0  ;;  %7070 = vmatpush.msrb.mxu1 %v6954_v11  ;;  %v14817_v2 = vld [vmem:[#allocation38_spill] sm:$0xff]  ;;  %v5599_v57 = vadd.f32 %v12896_v30, %v5321_v47  ;;  %v13158_v30 = vld [vmem:[#allocation4 + $0x60] sm:$0xff] }
 0x593   : > { %9607 = vmatmul.msk.f32.gmra.mxu3 %vm6037_vm7, %v13114_v28 }
 0x594   : > { %v5979_v52 = vmul.f32 %v12920_v35, %v5943_v42 }
 0x595   : > { %v5804_v40 = vpop.f32.mrf.mxu1 }
 0x596   : > { %v6015_v15 = vadd.f32 %v12923_v22, %v5979_v52  ;;  %v5876_v50 = vadd.f32 %v5804_v40, %v5598_v27 }
 0x597   : > { %v6081_v1 = vld [vmem:[#allocation4 + $0x92] sm:$0x1] }
 0x598   : > { %6049 = vst.msk [vmem:[#allocation4 + $0x99] sm:$0xff] %vm6037_vm7, %v6015_v15  ;;  %v5912_v63 = vadd.f32 %v12914_v32, %v5876_v50  ;;  %9563 = vmatmul.msk.f32.gmra.mxu1 %vm3346_vm4, %v12776_v29  ;;  %v4765_v29 = vadd.f32 %v12753_v48, %v14817_v2  ;;  %v6191_v48 = vld [vmem:[#allocation4 + $0x69] sm:$0xff] }
 0x599   : > { %9576 = vmatmul.msk.f32.gmra.mxu2 %vm6037_vm7, %v6190_v58  ;;  %6100 = vst.msk [vmem:[#allocation4 + $0x90] sm:$0x1] %vm6093_vm8, %v6081_v1  ;;  %v13155_v1 = vpop.f32.mrf.mxu3 }
 0x59a   : > { %v5944_v25 = vmax.f32 %v5912_v63, 0.0  ;;  %9641 = vmatmul.msk.f32.gmra.mxu0 %vm6037_vm7, %v6649_v24  ;;  %v5043_v52 = vadd.f32 %v12903_v31, %v4765_v29  ;;  %v6650_v31 = vld [vmem:[#allocation4 + $0x62] sm:$0xff]  ;;  %v13161_v47 = vpop.f32.mrf.mxu2  ;;  %v13168_v63 = vpop.f32.mrf.mxu0 }
 0x59b   : > { %9608 = vmatmul.msk.f32.gmra.mxu3 %vm6037_vm7, %v13136_v62 }
 0x59c   : > { %v5980_v42 = vmul.f32 %v12920_v35, %v5944_v25  ;;  %v5322_v45 = vadd.f32 %v12910_v54, %v5043_v52  ;;  %v6651_v52 = vld [vmem:[#allocation4 + $0x6a] sm:$0xff] }
 0x59d   : > { %v5807_v12 = vpop.f32.mrf.mxu1 }
 0x59e   : > { %v6016_v27 = vadd.f32 %v12923_v22, %v5980_v42  ;;  %v5877_v40 = vadd.f32 %v5807_v12, %v5599_v57  ;;  %v5600_v24 = vadd.f32 %v12905_v17, %v5322_v45  ;;  %v5648_v42 = vld [vmem:[#allocation3 + $0x19a] sm:$0xff] }
 0x59f   : > { %v6118_v50 = vld [vmem:[#allocation4 + $0x9f] sm:$0x1]  ;;  %v13179_v17 = vld [vmem:[#allocation4 + $0x68] sm:$0xff] }
 0x5a0   : > { %6050 = vst.msk [vmem:[#allocation4 + $0xa9] sm:$0xff] %vm6037_vm7, %v6016_v27  ;;  %v5913_v15 = vadd.f32 %v12914_v32, %v5877_v40  ;;  %9564 = vmatmul.msk.f32.gmra.mxu1 %vm3346_vm4, %v12787_v4  ;;  %v4766_v4 = vadd.f32 %v12766_v56, %v12502_v18  ;;  %v6192_v56 = vld [vmem:[#allocation4 + $0x79] sm:$0xff]  ;;  %v4767_v27 = vadd.f32 %v12781_v51, %v12516_v7  ;;  %v6193_v51 = vld [vmem:[#allocation4 + $0x81] sm:$0xff] }
 0x5a1   : > { %9577 = vmatmul.msk.f32.gmra.mxu2 %vm6037_vm7, %v6191_v48  ;;  %6136 = vst.msk [vmem:[#allocation4 + $0xa1] sm:$0x1] %vm6093_vm8, %v6118_v50 }
 0x5a2   : > { %v5945_v54 = vmax.f32 %v5913_v15, 0.0  ;;  %9642 = vmatmul.msk.f32.gmra.mxu0 %vm6037_vm7, %v6650_v31  ;;  %v5044_v11 = vadd.f32 %v12912_v16, %v4766_v4  ;;  %v13189_v40 = vpop.f32.mrf.mxu2  ;;  %v5045_v50 = vadd.f32 %v12929_v21, %v4767_v27  ;;  %v13194_v31 = vpop.f32.mrf.mxu0  ;;  %v6652_v21 = vld [vmem:[#allocation4 + $0x7a] sm:$0xff] }
 0x5a3   : > { %9609 = vmatmul.msk.f32.gmra.mxu3 %vm6037_vm7, %v13158_v30 }
 0x5a4   : > { %v5981_v58 = vmul.f32 %v12920_v35, %v5945_v54  ;;  %v5323_v12 = vadd.f32 %v12927_v39, %v5044_v11  ;;  %v13185_v39 = vpop.f32.mrf.mxu3 }
 0x5a5   : > { %v5810_v25 = vpop.f32.mrf.mxu1 }
 0x5a6   : > { %v6017_v2 = vadd.f32 %v12923_v22, %v5981_v58  ;;  %v5878_v29 = vadd.f32 %v5810_v25, %v5600_v24  ;;  %v5601_v15 = vadd.f32 %v12916_v5, %v5323_v12  ;;  %v5649_v58 = vld [vmem:[#allocation3 + $0x1a2] sm:$0xff]  ;;  %v5324_v24 = vadd.f32 %v12944_v38, %v5045_v50 }
 0x5a7   : > { %v6082_v57 = vld [vmem:[#allocation4 + $0xaa] sm:$0x1]  ;;  %v13202_v5 = vld [vmem:[#allocation4 + $0x78] sm:$0xff]  ;;  %v4768_v38 = vadd.f32 %v12793_v23, %v12530_v41 }
 0x5a8   : > { %6051 = vst.msk [vmem:[#allocation4 + $0xb1] sm:$0xff] %vm6037_vm7, %v6017_v2  ;;  %v5914_v18 = vadd.f32 %v12914_v32, %v5878_v29  ;;  %9565 = vmatmul.msk.f32.gmra.mxu1 %vm3346_vm4, %v5648_v42  ;;  %v5602_v29 = vadd.f32 %v12933_v36, %v5324_v24  ;;  %v6194_v23 = vld [vmem:[#allocation4 + $0x91] sm:$0xff]  ;;  %v6653_v36 = vld [vmem:[#allocation4 + $0x82] sm:$0xff] }
 0x5a9   : > { %9578 = vmatmul.msk.f32.gmra.mxu2 %vm6037_vm7, %v6192_v56  ;;  %6101 = vst.msk [vmem:[#allocation4 + $0xa8] sm:$0x1] %vm6093_vm8, %v6082_v57  ;;  %v5046_v12 = vadd.f32 %v12946_v61, %v4768_v38  ;;  %v13226_v61 = vld [vmem:[#allocation4 + $0x80] sm:$0xff] }
 0x5aa   : > { %v5946_v16 = vmax.f32 %v5914_v18, 0.0  ;;  %9643 = vmatmul.msk.f32.gmra.mxu0 %vm6037_vm7, %v6651_v52  ;;  %v13215_v18 = vpop.f32.mrf.mxu2  ;;  %v6195_v38 = vld [vmem:[#allocation4 + $0x99] sm:$0xff] }
 0x5ab   : > { %9610 = vmatmul.msk.f32.gmra.mxu3 %vm6037_vm7, %v13179_v17  ;;  %v5325_v27 = vadd.f32 %v12960_v59, %v5046_v12  ;;  %v14818_v59 = vld [vmem:[#allocation41_spill] sm:$0xff] }
 0x5ac   : > { %v5982_v45 = vmul.f32 %v12920_v35, %v5946_v16  ;;  %v13212_v42 = vpop.f32.mrf.mxu3  ;;  %v6654_v12 = vld [vmem:[#allocation4 + $0x92] sm:$0xff] }
 0x5ad   : > { %v5813_v48 = vpop.f32.mrf.mxu1 }
 0x5ae   : > { %v6018_v54 = vadd.f32 %v12923_v22, %v5982_v45  ;;  %v5879_v4 = vadd.f32 %v5813_v48, %v5601_v15  ;;  %v13219_v45 = vpop.f32.mrf.mxu0  ;;  %v4769_v48 = vadd.f32 %v14818_v59, %v12544_v14 }
 0x5af   : > { %v6119_v25 = vld [vmem:[#allocation4 + $0xb7] sm:$0x1] }
 0x5b0   : > { %6052 = vst.msk [vmem:[#allocation4 + $0xc1] sm:$0xff] %vm6037_vm7, %v6018_v54  ;;  %v5915_v7 = vadd.f32 %v12914_v32, %v5879_v4  ;;  %9566 = vmatmul.msk.f32.gmra.mxu1 %vm3346_vm4, %v5649_v58  ;;  %v14819_v54 = vld [vmem:[#allocation65_spill] sm:$0xff]  ;;  %v14820_v58 = vld [vmem:[#allocation66_spill] sm:$0xff] }
 0x5b1   : > { %9579 = vmatmul.msk.f32.gmra.mxu2 %vm6037_vm7, %v6193_v51  ;;  %6137 = vst.msk [vmem:[#allocation4 + $0xb9] sm:$0x1] %vm6093_vm8, %v6119_v25  ;;  %v5047_v24 = vadd.f32 %v14820_v58, %v4769_v48  ;;  %v6196_v58 = vld [vmem:[#allocation4 + $0xa9] sm:$0xff] }
 0x5b2   : > { %v5947_v11 = vmax.f32 %v5915_v7, 0.0  ;;  %9644 = vmatmul.msk.f32.gmra.mxu0 %vm6037_vm7, %v6652_v21 }
 0x5b3   : > { %9611 = vmatmul.msk.f32.gmra.mxu3 %vm6037_vm7, %v13202_v5  ;;  %v5326_v21 = vadd.f32 %v12977_v33, %v5047_v24 }
 0x5b4   : > { %v5983_v2 = vmul.f32 %v12920_v35, %v5947_v11  ;;  %v13238_v25 = vpop.f32.mrf.mxu3  ;;  %v13241_v11 = vpop.f32.mrf.mxu2 }
 0x5b5   : > { %v5816_v57 = vpop.f32.mrf.mxu1 }
 0x5b6   : > { %v6019_v56 = vadd.f32 %v12923_v22, %v5983_v2  ;;  %v5880_v52 = vadd.f32 %v5816_v57, %v5602_v29  ;;  %v7233_v2 = vld [vmem:[#allocation18 + $0x40] sm:$0xff]  ;;  %v13248_v57 = vld [vmem:[#allocation4 + $0x90] sm:$0xff]  ;;  %v13251_v33 = vpop.f32.mrf.mxu0 }
 0x5b7   : > { %v6083_v16 = vld [vmem:[#allocation4 + $0xc2] sm:$0x1]  ;;  %7349 = vmatpush.msrb.mxu2 %v7233_v2 }
 0x5b8   : > { %6053 = vst.msk [vmem:[#allocation4 + $0xc9] sm:$0xff] %vm6037_vm7, %v6019_v56  ;;  %v5916_v41 = vadd.f32 %v12914_v32, %v5880_v52  ;;  %9667 = vmatmul.msk.f32.vlgmr.msrb.gmra.mxu1 %vm6037_vm7, %v13026_v6  ;;  %v5603_v6 = vadd.f32 %v14819_v54, %v5325_v27  ;;  %v14821_v52 = vld [vmem:[#allocation48_spill] sm:$0xff] }
 0x5b9   : > { %9580 = vmatmul.msk.f32.gmra.mxu2 %vm6037_vm7, %v6194_v23  ;;  %6102 = vst.msk [vmem:[#allocation4 + $0xc0] sm:$0x1] %vm6093_vm8, %v6083_v16 }
 0x5ba   : > { %v5948_v15 = vmax.f32 %v5916_v41, 0.0  ;;  %9645 = vmatmul.msk.f32.gmra.mxu0 %vm6037_vm7, %v6653_v36  ;;  %v14823_v41 = vld [vmem:[#allocation67_spill] sm:$0xff] }
 0x5bb   : > { %9612 = vmatmul.msk.f32.gmra.mxu3 %vm6037_vm7, %v13226_v61  ;;  %v5604_v23 = vadd.f32 %v14823_v41, %v5326_v21 }
 0x5bc   : > { %v5984_v50 = vmul.f32 %v12920_v35, %v5948_v15  ;;  %v14824_v15 = vld [vmem:[#allocation68_spill] sm:$0xff]  ;;  %v13267_v24 = vpop.f32.mrf.mxu3  ;;  %v13273_v21 = vpop.f32.mrf.mxu2 }
 0x5bd   : > { %v5819_v4 = vpop.f32.mrf.mxu1 }
 0x5be   : > { %v6020_v7 = vadd.f32 %v12923_v22, %v5984_v50  ;;  %v5881_v51 = vadd.f32 %v5819_v4, %v5603_v6  ;;  %v13280_v2 = vpop.f32.mrf.mxu0 }
 0x5bf   : > { %v6120_v29 = vld [vmem:[#allocation4 + $0xcf] sm:$0x1] }
 0x5c0   : > { %6054 = vst.msk [vmem:[#allocation4 + $0xd9] sm:$0xff] %vm6037_vm7, %v6020_v7  ;;  %v5917_v14 = vadd.f32 %v12914_v32, %v5881_v51  ;;  %9668 = vmatmul.msk.f32.gmra.mxu1 %vm6037_vm7, %v13047_v60  ;;  %v14822_v60 = vld [vmem:[#allocation39_spill] sm:$0xff] }
 0x5c1   : > { %9581 = vmatmul.msk.f32.gmra.mxu2 %vm6037_vm7, %v6195_v38  ;;  %6138 = vst.msk [vmem:[#allocation4 + $0xd1] sm:$0x1] %vm6093_vm8, %v6120_v29  ;;  %v4770_v16 = vadd.f32 %v14822_v60, %v14821_v52  ;;  %v13270_v7 = vld [vmem:[#allocation4 + $0x98] sm:$0xff]  ;;  %v14826_v38 = vld [vmem:[#allocation57_spill] sm:$0xff] }
 0x5c2   : > { %v5949_v56 = vmax.f32 %v5917_v14, 0.0  ;;  %9646 = vmatmul.msk.f32.gmra.mxu0 %vm6037_vm7, %v6654_v12  ;;  %v6655_v51 = vld [vmem:[#allocation4 + $0x9a] sm:$0xff]  ;;  %v14825_v14 = vld [vmem:[#allocation53_spill] sm:$0xff] }
 0x5c3   : > { %9613 = vmatmul.msk.f32.gmra.mxu3 %vm6037_vm7, %v13248_v57  ;;  %v5048_v59 = vadd.f32 %v14824_v15, %v4770_v16  ;;  %v14827_v12 = vld [vmem:[#allocation69_spill] sm:$0xff]  ;;  %v14828_v60 = vld [vmem:[#allocation70_spill] sm:$0xff] }
 0x5c4   : > { %v5985_v27 = vmul.f32 %v12920_v35, %v5949_v56  ;;  %v6197_v15 = vld [vmem:[#allocation4 + $0xb1] sm:$0xff] }
 0x5c5   : > { %v5822_v36 = vpop.f32.mrf.mxu1  ;;  %v5327_v6 = vadd.f32 %v12996_v55, %v5048_v59 }
 0x5c6   : > { %v6021_v48 = vadd.f32 %v12923_v22, %v5985_v27  ;;  %v5882_v50 = vadd.f32 %v5822_v36, %v5604_v23 }
 0x5c7   : > { %v6084_v54 = vld [vmem:[#allocation4 + $0xda] sm:$0x1]  ;;  %v5605_v56 = vadd.f32 %v14827_v12, %v5327_v6 }
 0x5c8   : > { %6055 = vst.msk [vmem:[#allocation4 + $0xe1] sm:$0xff] %vm6037_vm7, %v6021_v48  ;;  %v5918_v4 = vadd.f32 %v12914_v32, %v5882_v50  ;;  %9669 = vmatmul.msk.f32.gmra.mxu1 %vm6037_vm7, %v13068_v53  ;;  %v4771_v53 = vadd.f32 %v14826_v38, %v14825_v14  ;;  %v13292_v48 = vld [vmem:[#allocation4 + $0xa8] sm:$0xff]  ;;  %v14829_v6 = vld [vmem:[#allocation58_spill] sm:$0xff] }
 0x5c9   : > { %9582 = vmatmul.msk.f32.gmra.mxu2 %vm6037_vm7, %v6196_v58  ;;  %6103 = vst.msk [vmem:[#allocation4 + $0xd8] sm:$0x1] %vm6093_vm8, %v6084_v54  ;;  %v6656_v50 = vld [vmem:[#allocation4 + $0xaa] sm:$0xff] }
 0x5ca   : > { %v5950_v55 = vmax.f32 %v5918_v4, 0.0  ;;  %9647 = vmatmul.msk.f32.gmra.mxu0 %vm6037_vm7, %v6655_v51  ;;  %v5049_v16 = vadd.f32 %v14828_v60, %v4771_v53  ;;  %v14830_v4 = vld [vmem:[#allocation40_spill] sm:$0xff] }
 0x5cb   : > { %9614 = vmatmul.msk.f32.gmra.mxu3 %vm6037_vm7, %v13270_v7  ;;  %v4772_v58 = vadd.f32 %v14830_v4, %v14829_v6 }
 0x5cc   : > { %v5986_v29 = vmul.f32 %v12920_v35, %v5950_v55  ;;  %v5328_v23 = vadd.f32 %v13017_v37, %v5049_v16  ;;  %v13298_v37 = vpop.f32.mrf.mxu3  ;;  %v14831_v55 = vld [vmem:[#allocation71_spill] sm:$0xff] }
 0x5cd   : > { %v5825_v52 = vpop.f32.mrf.mxu1  ;;  %v5050_v53 = vadd.f32 %v13020_v0, %v4772_v58  ;;  %v6657_v0 = vld [vmem:[#allocation4 + $0xb2] sm:$0xff] }
 0x5ce   : > { %v6022_v27 = vadd.f32 %v12923_v22, %v5986_v29  ;;  %v5883_v41 = vadd.f32 %v5825_v52, %v5605_v56  ;;  %v5606_v14 = vadd.f32 %v14831_v55, %v5328_v23  ;;  %v13307_v29 = vpop.f32.mrf.mxu0 }
 0x5cf   : > { %v6121_v59 = vld [vmem:[#allocation4 + $0xe7] sm:$0x1]  ;;  %v5329_v60 = vadd.f32 %v13044_v46, %v5050_v53  ;;  %v14832_v46 = vld [vmem:[#allocation62_spill] sm:$0xff] }
 0x5d0   : > { %6056 = vst.msk [vmem:[#allocation4 + $0xf1] sm:$0xff] %vm6037_vm7, %v6022_v27  ;;  %v5919_v36 = vadd.f32 %v12914_v32, %v5883_v41  ;;  %9670 = vmatmul.msk.f32.gmra.mxu1 %vm6037_vm7, %v13091_v3  ;;  %v13302_v3 = vpop.f32.mrf.mxu2  ;;  %v6198_v27 = vld [vmem:[#allocation4 + $0xc1] sm:$0xff]  ;;  %v13316_v41 = vld [vmem:[#allocation4 + $0xb0] sm:$0xff] }
 0x5d1   : > { %9583 = vmatmul.msk.f32.gmra.mxu2 %vm6037_vm7, %v6197_v15  ;;  %6139 = vst.msk [vmem:[#allocation4 + $0xe9] sm:$0x1] %vm6093_vm8, %v6121_v59 }
 0x5d2   : > { %v5951_v54 = vmax.f32 %v5919_v36, 0.0  ;;  %9648 = vmatmul.msk.f32.gmra.mxu0 %vm6037_vm7, %v6656_v50  ;;  %v14833_v36 = vld [vmem:[#allocation46_spill] sm:$0xff] }
 0x5d3   : > { %9615 = vmatmul.msk.f32.gmra.mxu3 %vm6037_vm7, %v13292_v48  ;;  %v4773_v15 = vadd.f32 %v14833_v36, %v14832_v46 }
 0x5d4   : > { %v5987_v51 = vmul.f32 %v12920_v35, %v5951_v54  ;;  %v13326_v6 = vpop.f32.mrf.mxu3 }
 0x5d5   : > { %v5828_v38 = vpop.f32.mrf.mxu1  ;;  %v5051_v58 = vadd.f32 %v13050_v44, %v4773_v15  ;;  %v6658_v44 = vld [vmem:[#allocation4 + $0xc2] sm:$0xff] }
 0x5d6   : > { %v6023_v12 = vadd.f32 %v12923_v22, %v5987_v51  ;;  %v5884_v56 = vadd.f32 %v5828_v38, %v5606_v14 }
 0x5d7   : > { %v6085_v52 = vld [vmem:[#allocation4 + $0xf2] sm:$0x1]  ;;  %v5330_v38 = vadd.f32 %v13074_v26, %v5051_v58  ;;  %v14835_v26 = vld [vmem:[#allocation31_spill] sm:$0xff] }
 0x5d8   : > { %6057 = vst.msk [vmem:[#allocation4 + $0xf9] sm:$0xff] %vm6037_vm7, %v6023_v12  ;;  %v5920_v16 = vadd.f32 %v12914_v32, %v5884_v56  ;;  %9671 = vmatmul.msk.f32.gmra.mxu1 %vm6037_vm7, %v13114_v28  ;;  %v14834_v28 = vld [vmem:[#allocation56_spill] sm:$0xff] }
 0x5d9   : > { %9584 = vmatmul.msk.f32.gmra.mxu2 %vm6037_vm7, %v6198_v27  ;;  %6104 = vst.msk [vmem:[#allocation4 + $0xf0] sm:$0x1] %vm6093_vm8, %v6085_v52  ;;  %v5607_v54 = vadd.f32 %v14834_v28, %v5329_v60  ;;  %v6199_v12 = vld [vmem:[#allocation4 + $0xc9] sm:$0xff]  ;;  %v13336_v52 = vld [vmem:[#allocation4 + $0xc0] sm:$0xff] }
 0x5da   : > { %v5952_v23 = vmax.f32 %v5920_v16, 0.0  ;;  %9649 = vmatmul.msk.f32.gmra.mxu0 %vm6037_vm7, %v6657_v0  ;;  %v14836_v16 = vld [vmem:[#allocation44_spill] sm:$0xff] }
 0x5db   : > { %9616 = vmatmul.msk.f32.gmra.mxu3 %vm6037_vm7, %v13316_v41  ;;  %v4774_v27 = vadd.f32 %v14836_v16, %v14835_v26 }
 0x5dc   : > { %v5988_v59 = vmul.f32 %v12920_v35, %v5952_v23  ;;  %v6334_v50 = vpop.f32.mrf.mxu2  ;;  %v5608_v23 = vadd.f32 %v13057_v34, %v5330_v38 }
 0x5dd   : > { %v5831_v4 = vpop.f32.mrf.mxu1  ;;  %v5052_v15 = vadd.f32 %v13078_v13, %v4774_v27  ;;  %v13356_v13 = vld [vmem:[#allocation4 + $0xc8] sm:$0xff] }
 0x5de   : > { %v6024_v51 = vadd.f32 %v12923_v22, %v5988_v59  ;;  %v5885_v55 = vadd.f32 %v5831_v4, %v5607_v54 }
 0x5df   : > { %v6793_v14 = vpop.f32.mrf.mxu0  ;;  %v6122_v56 = vld [vmem:[#allocation4 + $0xff] sm:$0x1] }
 0x5e0   : > { %6058 = vst.msk [vmem:[#allocation4 + $0x109] sm:$0xff] %vm6037_vm7, %v6024_v51  ;;  %v5921_v53 = vadd.f32 %v12914_v32, %v5885_v55  ;;  %9672 = vmatmul.msk.f32.gmra.mxu1 %vm6037_vm7, %v13136_v62  ;;  %v5331_v51 = vadd.f32 %v13101_v10, %v5052_v15  ;;  %v14837_v10 = vld [vmem:[#allocation42_spill] sm:$0xff] }
 0x5e1   : > { %9585 = vmatmul.msk.f32.gmra.mxu2 %vm6037_vm7, %v6199_v12  ;;  %6140 = vst.msk [vmem:[#allocation4 + $0x101] sm:$0x1] %vm6093_vm8, %v6122_v56  ;;  %v14838_v12 = vld [vmem:[#allocation45_spill] sm:$0xff] }
 0x5e2   : > { %v5953_v60 = vmax.f32 %v5921_v53, 0.0  ;;  %9650 = vmatmul.msk.f32.gmra.mxu0 %vm6037_vm7, %v6658_v44  ;;  %v6200_v53 = vld [vmem:[#allocation4 + $0xd9] sm:$0xff]  ;;  %v4775_v56 = vadd.f32 %v14838_v12, %v14837_v10  ;;  %v5609_v44 = vadd.f32 %v13083_v49, %v5331_v51 }
 0x5e3   : > { %9617 = vmatmul.msk.f32.gmra.mxu3 %vm6037_vm7, %v13336_v52 }
 0x5e4   : > { %v5989_v0 = vmul.f32 %v12920_v35, %v5953_v60  ;;  %v6337_v62 = vpop.f32.mrf.mxu2  ;;  %v5053_v16 = vadd.f32 %v13104_v43, %v4775_v56  ;;  %v13376_v43 = vld [vmem:[#allocation4 + $0xd8] sm:$0xff] }
 0x5e5   : > { %v5834_v36 = vpop.f32.mrf.mxu1 }
 0x5e6   : > { %v6546_v46 = vpop.f32.mrf.mxu3  ;;  %v6025_v59 = vadd.f32 %v12923_v22, %v5989_v0  ;;  %v5886_v54 = vadd.f32 %v5834_v36, %v5608_v23  ;;  %v5332_v36 = vadd.f32 %v13126_v8, %v5053_v16  ;;  %v14840_v8 = vld [vmem:[#allocation51_spill] sm:$0xff] }
 0x5e7   : > { %v6547_v28 = vadd.f32 %v6546_v46, %v6334_v50  ;;  %v6796_v4 = vpop.f32.mrf.mxu0  ;;  %v6086_v58 = vld [vmem:[#allocation4 + $0x10a] sm:$0x1]  ;;  %v6661_v16 = vld [vmem:[#allocation4 + $0xe2] sm:$0xff] }
 0x5e8   : > { %6059 = vst.msk [vmem:[#allocation4 + $0x111] sm:$0xff] %vm6037_vm7, %v6025_v59  ;;  %v5922_v55 = vadd.f32 %v12914_v32, %v5886_v54  ;;  %9673 = vmatmul.msk.f32.gmra.mxu1 %vm6037_vm7, %v13158_v30  ;;  %v6659_v50 = vld [vmem:[#allocation4 + $0xca] sm:$0xff]  ;;  %v6201_v59 = vld [vmem:[#allocation4 + $0xe1] sm:$0xff] }
 0x5e9   : > { %v13353_v34 = vadd.f32 %v6793_v14, %v6547_v28  ;;  %9586 = vmatmul.msk.f32.gmra.mxu2 %vm6037_vm7, %v6200_v53  ;;  %6105 = vst.msk [vmem:[#allocation4 + $0x108] sm:$0x1] %vm6093_vm8, %v6086_v58  ;;  %v5610_v58 = vadd.f32 %v13108_v20, %v5332_v36 }
 0x5ea   : > { %v5954_v38 = vmax.f32 %v5922_v55, 0.0  ;;  %9651 = vmatmul.msk.f32.gmra.mxu0 %vm6037_vm7, %v6659_v50  ;;  %v13389_v50 = vld [vmem:[#allocation16] ss:$0 sm:$0xff] }
 0x5eb   : > { %9618 = vmatmul.msk.f32.gmra.mxu3 %vm6037_vm7, %v13356_v13 }
 0x5ec   : > { %v5990_v30 = vmul.f32 %v12920_v35, %v5954_v38  ;;  %v6340_v14 = vpop.f32.mrf.mxu2 }
 0x5ed   : > { %v5837_v26 = vpop.f32.mrf.mxu1 }
 0x5ee   : > { %v6549_v60 = vpop.f32.mrf.mxu3  ;;  %v6026_v27 = vadd.f32 %v12923_v22, %v5990_v30  ;;  %v5887_v23 = vadd.f32 %v5837_v26, %v5609_v44  ;;  %v6660_v22 = vld [vmem:[#allocation4 + $0xda] sm:$0xff]  ;;  %v6202_v26 = vld [vmem:[#allocation4 + $0xf1] sm:$0xff] }
 0x5ef   : > { %v6550_v0 = vadd.f32 %v6549_v60, %v6337_v62  ;;  %v6799_v46 = vpop.f32.mrf.mxu0  ;;  %v6123_v35 = vld [vmem:[#allocation4 + $0x117] sm:$0x1]  ;;  %v13394_v60 = vld [vmem:[#allocation13] ss:$0 sm:$0xff] }
 0x5f0   : > { %6060 = vst.msk [vmem:[#allocation4 + $0x121] sm:$0xff] %vm6037_vm7, %v6026_v27  ;;  %v5923_v15 = vadd.f32 %v12914_v32, %v5887_v23  ;;  %9674 = vmatmul.msk.f32.gmra.mxu1 %vm6037_vm7, %v13179_v17  ;;  %v14839_v32 = vld [vmem:[#allocation33_spill] sm:$0xff]  ;;  %v13384_v17 = vld [vmem:[#allocation15] ss:$0 sm:$0xff]  ;;  %v14841_v27 = vld [vmem:[#allocation32_spill] sm:$0xff] }
 0x5f1   : > { %v13373_v49 = vadd.f32 %v6796_v4, %v6550_v0  ;;  %9587 = vmatmul.msk.f32.gmra.mxu2 %vm6037_vm7, %v6201_v59  ;;  %6141 = vst.msk [vmem:[#allocation4 + $0x119] sm:$0x1] %vm6093_vm8, %v6123_v35  ;;  %v4776_v28 = vadd.f32 %v14840_v8, %v14839_v32  ;;  %v14842_v0 = vld [vmem:[#allocation49_spill] sm:$0xff] }
 0x5f2   : > { %v5955_v62 = vmax.f32 %v5923_v15, 0.0  ;;  %9652 = vmatmul.msk.f32.gmra.mxu0 %vm6037_vm7, %v6660_v22  ;;  %v4777_v23 = vadd.f32 %v14842_v0, %v14841_v27 }
 0x5f3   : > { %9619 = vmatmul.msk.f32.gmra.mxu3 %vm6037_vm7, %v13376_v43  ;;  %v5054_v53 = vadd.f32 %v13129_v9, %v4776_v28 }
 0x5f4   : > { %v5991_v54 = vmul.f32 %v13384_v17, %v5955_v62  ;;  %v6343_v4 = vpop.f32.mrf.mxu2  ;;  %v5055_v35 = vadd.f32 %v13161_v47, %v4777_v23  ;;  %v13422_v47 = vld [vmem:[#allocation4 + $0xf0] sm:$0xff] }
 0x5f5   : > { %v5840_v55 = vpop.f32.mrf.mxu1  ;;  %v5333_v44 = vadd.f32 %v13155_v1, %v5054_v53  ;;  %v14844_v53 = vld [vmem:[#allocation50_spill] sm:$0xff] }
 0x5f6   : > { %v6552_v51 = vpop.f32.mrf.mxu3  ;;  %v6027_v38 = vadd.f32 %v13389_v50, %v5991_v54  ;;  %v5888_v12 = vadd.f32 %v5840_v55, %v5610_v58  ;;  %v5334_v28 = vadd.f32 %v13185_v39, %v5055_v35  ;;  %v6203_v58 = vld [vmem:[#allocation4 + $0xf9] sm:$0xff] }
 0x5f7   : > { %v6553_v10 = vadd.f32 %v6552_v51, %v6340_v14  ;;  %v6802_v56 = vpop.f32.mrf.mxu0  ;;  %v6087_v30 = vld [vmem:[#allocation4 + $0x122] sm:$0x1]  ;;  %v5611_v36 = vadd.f32 %v13139_v19, %v5333_v44 }
 0x5f8   : > { %6061 = vst.msk [vmem:[#allocation4 + $0x129] sm:$0xff] %vm6037_vm7, %v6027_v38  ;;  %v5924_v20 = vadd.f32 %v13394_v60, %v5888_v12  ;;  %9675 = vmatmul.msk.f32.gmra.mxu1 %vm6037_vm7, %v13202_v5  ;;  %v13402_v14 = vld [vmem:[#allocation4 + $0xe0] sm:$0xff]  ;;  %v5612_v12 = vadd.f32 %v13168_v63, %v5334_v28 }
 0x5f9   : > { %v13399_v9 = vadd.f32 %v6799_v46, %v6553_v10  ;;  %9588 = vmatmul.msk.f32.gmra.mxu2 %vm6037_vm7, %v6202_v26  ;;  %6106 = vst.msk [vmem:[#allocation4 + $0x120] sm:$0x1] %vm6093_vm8, %v6087_v30  ;;  %v14843_v39 = vld [vmem:[#allocation47_spill] sm:$0xff] }
 0x5fa   : > { %v5956_v1 = vmax.f32 %v5924_v20, 0.0  ;;  %9653 = vmatmul.msk.f32.gmra.mxu0 %vm6037_vm7, %v6661_v16  ;;  %v4778_v38 = vadd.f32 %v14844_v53, %v14843_v39  ;;  %v6205_v39 = vld [vmem:[#allocation4 + $0x111] sm:$0xff] }
 0x5fb   : > { %9620 = vmatmul.msk.f32.gmra.mxu3 %vm6037_vm7, %v13402_v14 }
 0x5fc   : > { %v5992_v5 = vmul.f32 %v13384_v17, %v5956_v1  ;;  %v6346_v46 = vpop.f32.mrf.mxu2  ;;  %v5056_v44 = vadd.f32 %v13189_v40, %v4778_v38  ;;  %v13442_v40 = vld [vmem:[#allocation4 + $0xf8] sm:$0xff]  ;;  %v13464_v38 = vld [vmem:[#allocation4 + $0x10a] sm:$0xff] }
 0x5fd   : > { %v5843_v59 = vpop.f32.mrf.mxu1 }
 0x5fe   : > { %v6555_v15 = vpop.f32.mrf.mxu3  ;;  %v6028_v22 = vadd.f32 %v13389_v50, %v5992_v5  ;;  %v5889_v32 = vadd.f32 %v5843_v59, %v5611_v36  ;;  %v5335_v0 = vadd.f32 %v13212_v42, %v5056_v44  ;;  %v6204_v5 = vld [vmem:[#allocation4 + $0x109] sm:$0xff] }
 0x5ff   : > { %v6556_v62 = vadd.f32 %v6555_v15, %v6343_v4  ;;  %v6805_v8 = vpop.f32.mrf.mxu0  ;;  %v6124_v19 = vld [vmem:[#allocation4 + $0x12f] sm:$0x1]  ;;  %v6662_v4 = vld [vmem:[#allocation4 + $0xf2] sm:$0xff]  ;;  %v14846_v15 = vld [vmem:[#allocation64_spill] sm:$0xff] }
 0x600   : > { %6062 = vst.msk [vmem:[#allocation4 + $0x139] sm:$0xff] %vm6037_vm7, %v6028_v22  ;;  %v5925_v54 = vadd.f32 %v13394_v60, %v5889_v32  ;;  %9676 = vmatmul.msk.f32.gmra.mxu1 %vm6037_vm7, %v13226_v61  ;;  %v14845_v42 = vld [vmem:[#allocation37_spill] sm:$0xff]  ;;  %v5613_v22 = vadd.f32 %v13194_v31, %v5335_v0 }
 0x601   : > { %v13419_v51 = vadd.f32 %v6802_v56, %v6556_v62  ;;  %9589 = vmatmul.msk.f32.gmra.mxu2 %vm6037_vm7, %v6203_v58  ;;  %6142 = vst.msk [vmem:[#allocation4 + $0x131] sm:$0x1] %vm6093_vm8, %v6124_v19  ;;  %v4779_v59 = vadd.f32 %v14846_v15, %v14845_v42  ;;  %v13490_v42 = vld [vmem:[#allocation4 + $0x112] sm:$0xff]  ;;  %v14849_v15 = vld [vmem:[#allocation52_spill] sm:$0xff] }
 0x602   : > { %v5957_v55 = vmax.f32 %v5925_v54, 0.0  ;;  %9654 = vmatmul.msk.f32.gmra.mxu0 %vm6037_vm7, %v6662_v4 }
 0x603   : > { %9621 = vmatmul.msk.f32.gmra.mxu3 %vm6037_vm7, %v13422_v47 }
 0x604   : > { %v5993_v61 = vmul.f32 %v13384_v17, %v5957_v55  ;;  %v6349_v10 = vpop.f32.mrf.mxu2 }
 0x605   : > { %v5846_v30 = vpop.f32.mrf.mxu1 }
 0x606   : > { %v6558_v56 = vpop.f32.mrf.mxu3  ;;  %v6029_v20 = vadd.f32 %v13389_v50, %v5993_v61  ;;  %v5890_v16 = vadd.f32 %v5846_v30, %v5612_v12  ;;  %v14847_v61 = vld [vmem:[#allocation35_spill] sm:$0xff] }
 0x607   : > { %v6559_v26 = vadd.f32 %v6558_v56, %v6346_v46  ;;  %v6808_v1 = vpop.f32.mrf.mxu0  ;;  %v6088_v27 = vld [vmem:[#allocation4 + $0x13a] sm:$0x1] }
 0x608   : > { %6063 = vst.msk [vmem:[#allocation4 + $0x141] sm:$0xff] %vm6037_vm7, %v6029_v20  ;;  %v5926_v23 = vadd.f32 %v13394_v60, %v5890_v16  ;;  %9677 = vmatmul.msk.f32.gmra.mxu1 %vm6037_vm7, %v13248_v57  ;;  %v6663_v46 = vld [vmem:[#allocation4 + $0xfa] sm:$0xff] }
 0x609   : > { %v13439_v63 = vadd.f32 %v6805_v8, %v6559_v26  ;;  %9590 = vmatmul.msk.f32.gmra.mxu2 %vm6037_vm7, %v6204_v5  ;;  %6107 = vst.msk [vmem:[#allocation4 + $0x138] sm:$0x1] %vm6093_vm8, %v6088_v27  ;;  %v5057_v8 = vadd.f32 %v13215_v18, %v4779_v59  ;;  %v13462_v18 = vld [vmem:[#allocation4 + $0x108] sm:$0xff] }
 0x60a   : > { %v5958_v36 = vmax.f32 %v5926_v23, 0.0  ;;  %9655 = vmatmul.msk.f32.gmra.mxu0 %vm6037_vm7, %v6663_v46 }
 0x60b   : > { %9622 = vmatmul.msk.f32.gmra.mxu3 %vm6037_vm7, %v13442_v40  ;;  %v5336_v4 = vadd.f32 %v13238_v25, %v5057_v8 }
 0x60c   : > { %v5994_v57 = vmul.f32 %v13384_v17, %v5958_v36  ;;  %v6352_v35 = vpop.f32.mrf.mxu2  ;;  %v13480_v36 = vld [vmem:[#allocation4 + $0x121] sm:$0xff] }
 0x60d   : > { %v5849_v32 = vpop.f32.mrf.mxu1  ;;  %v5614_v30 = vadd.f32 %v13219_v45, %v5336_v4 }
 0x60e   : > { %v6561_v62 = vpop.f32.mrf.mxu3  ;;  %v6030_v28 = vadd.f32 %v13389_v50, %v5994_v57  ;;  %v5891_v58 = vadd.f32 %v5849_v32, %v5613_v22 }
 0x60f   : > { %v6562_v54 = vadd.f32 %v6561_v62, %v6349_v10  ;;  %v6811_v19 = vpop.f32.mrf.mxu0  ;;  %v6125_v31 = vld [vmem:[#allocation4 + $0x147] sm:$0x1] }
 0x610   : > { %6064 = vst.msk [vmem:[#allocation4 + $0x151] sm:$0xff] %vm6037_vm7, %v6030_v28  ;;  %v5927_v55 = vadd.f32 %v13394_v60, %v5891_v58  ;;  %9678 = vmatmul.msk.f32.gmra.mxu1 %vm6037_vm7, %v13270_v7  ;;  %v14848_v7 = vld [vmem:[#allocation43_spill] sm:$0xff] }
 0x611   : > { %v13459_v53 = vadd.f32 %v6808_v1, %v6562_v54  ;;  %9591 = vmatmul.msk.f32.gmra.mxu2 %vm6037_vm7, %v6205_v39  ;;  %6143 = vst.msk [vmem:[#allocation4 + $0x149] sm:$0x1] %vm6093_vm8, %v6125_v31  ;;  %v4780_v10 = vadd.f32 %v14848_v7, %v14847_v61  ;;  %v13506_v39 = vld [vmem:[#allocation4 + $0x129] sm:$0xff]  ;;  %v14852_v61 = vld [vmem:[#allocation34_spill] sm:$0xff] }
 0x612   : > { %v5959_v25 = vmax.f32 %v5927_v55, 0.0  ;;  %9656 = vmatmul.msk.f32.gmra.mxu0 %vm6037_vm7, %v13464_v38 }
 0x613   : > { %9623 = vmatmul.msk.f32.gmra.mxu3 %vm6037_vm7, %v13462_v18  ;;  %v5058_v26 = vadd.f32 %v13241_v11, %v4780_v10  ;;  %v13488_v11 = vld [vmem:[#allocation4 + $0x110] sm:$0xff] }
 0x614   : > { %v5995_v12 = vmul.f32 %v13384_v17, %v5959_v25  ;;  %v6355_v56 = vpop.f32.mrf.mxu2 }
 0x615   : > { %v5852_v20 = vpop.f32.mrf.mxu1  ;;  %v5337_v5 = vadd.f32 %v13267_v24, %v5058_v26 }
 0x616   : > { %v6564_v44 = vpop.f32.mrf.mxu3  ;;  %v6031_v16 = vadd.f32 %v13389_v50, %v5995_v12  ;;  %v5892_v27 = vadd.f32 %v5852_v20, %v5614_v30 }
 0x617   : > { %v6565_v1 = vadd.f32 %v6564_v44, %v6352_v35  ;;  %v6814_v0 = vpop.f32.mrf.mxu0  ;;  %v6089_v23 = vld [vmem:[#allocation4 + $0x152] sm:$0x1]  ;;  %v5615_v22 = vadd.f32 %v13251_v33, %v5337_v5 }
 0x618   : > { %6065 = vst.msk [vmem:[#allocation4 + $0x159] sm:$0xff] %vm6037_vm7, %v6031_v16  ;;  %v5928_v46 = vadd.f32 %v13394_v60, %v5892_v27  ;;  %9679 = vmatmul.msk.f32.gmra.mxu1 %vm6037_vm7, %v13292_v48  ;;  %v14850_v48 = vld [vmem:[#allocation60_spill] sm:$0xff] }
 0x619   : > { %v13484_v45 = vadd.f32 %v6811_v19, %v6565_v1  ;;  %9592 = vmatmul.msk.f32.gmra.mxu2 %vm6037_vm7, %v13480_v36  ;;  %6108 = vst.msk [vmem:[#allocation4 + $0x150] sm:$0x1] %vm6093_vm8, %v6089_v23  ;;  %v4781_v59 = vadd.f32 %v14850_v48, %v14849_v15 }
 0x61a   : > { %v5960_v24 = vmax.f32 %v5928_v46, 0.0  ;;  %9657 = vmatmul.msk.f32.gmra.mxu0 %vm6037_vm7, %v13490_v42  ;;  %v13533_v46 = vld [vmem:[#allocation4 + $0x139] sm:$0xff] }
 0x61b   : > { %9624 = vmatmul.msk.f32.gmra.mxu3 %vm6037_vm7, %v13488_v11  ;;  %v5059_v8 = vadd.f32 %v13273_v21, %v4781_v59  ;;  %v13515_v21 = vld [vmem:[#allocation4 + $0x120] sm:$0xff] }
 0x61c   : > { %v5996_v57 = vmul.f32 %v13384_v17, %v5960_v24  ;;  %v6358_v35 = vpop.f32.mrf.mxu2  ;;  %v13542_v24 = vld [vmem:[#allocation4 + $0x128] sm:$0xff] }
 0x61d   : > { %v5855_v32 = vpop.f32.mrf.mxu1  ;;  %v5338_v4 = vadd.f32 %v13298_v37, %v5059_v8  ;;  %v13517_v37 = vld [vmem:[#allocation4 + $0x122] sm:$0xff] }
 0x61e   : > { %v6567_v62 = vpop.f32.mrf.mxu3  ;;  %v6032_v28 = vadd.f32 %v13389_v50, %v5996_v57  ;;  %v5893_v58 = vadd.f32 %v5855_v32, %v5615_v22 }
 0x61f   : > { %v6568_v54 = vadd.f32 %v6567_v62, %v6355_v56  ;;  %v6817_v19 = vpop.f32.mrf.mxu0  ;;  %v6126_v33 = vld [vmem:[#allocation4 + $0x15f] sm:$0x1]  ;;  %v5616_v56 = vadd.f32 %v13280_v2, %v5338_v4 }
 0x620   : > { %6066 = vst.msk [vmem:[#allocation4 + $0x169] sm:$0xff] %vm6037_vm7, %v6032_v28  ;;  %v5929_v55 = vadd.f32 %v13394_v60, %v5893_v58  ;;  %9680 = vmatmul.msk.f32.gmra.mxu1 %vm6037_vm7, %v13316_v41  ;;  %v14851_v41 = vld [vmem:[#allocation36_spill] sm:$0xff]  ;;  %v13567_v4 = vld [vmem:[#allocation4 + $0x13a] sm:$0xff] }
 0x621   : > { %v13510_v31 = vadd.f32 %v6814_v0, %v6568_v54  ;;  %6073 = vst.msk [vmem:[#allocation4 + $0x199] sm:$0xff] %vm6037_vm7, %v6032_v28  ;;  %9593 = vmatmul.msk.f32.gmra.mxu2 %vm6037_vm7, %v13506_v39  ;;  %v4782_v7 = vadd.f32 %v14852_v61, %v14851_v41  ;;  %v13557_v54 = vld [vmem:[#allocation4 + $0x141] sm:$0xff] }
 0x622   : > { %v5961_v25 = vmax.f32 %v5929_v55, 0.0  ;;  %9658 = vmatmul.msk.f32.gmra.mxu0 %vm6037_vm7, %v13517_v37  ;;  %6144 = vst.msk [vmem:[#allocation4 + $0x161] sm:$0x1] %vm6093_vm8, %v6126_v33 }
 0x623   : > { %9625 = vmatmul.msk.f32.gmra.mxu3 %vm6037_vm7, %v13515_v21  ;;  %v5060_v20 = vadd.f32 %v13302_v3, %v4782_v7 }
 0x624   : > { %v5997_v10 = vmul.f32 %v13384_v17, %v5961_v25  ;;  %v6361_v12 = vpop.f32.mrf.mxu2 }
 0x625   : > { %v5858_v44 = vpop.f32.mrf.mxu1  ;;  %v5339_v23 = vadd.f32 %v13326_v6, %v5060_v20  ;;  %v13544_v6 = vld [vmem:[#allocation4 + $0x12a] sm:$0xff]  ;;  %v13591_v20 = vld [vmem:[#allocation4 + $0x142] sm:$0xff] }
 0x626   : > { %v6570_v30 = vpop.f32.mrf.mxu3  ;;  %v6033_v26 = vadd.f32 %v13389_v50, %v5997_v10  ;;  %v5894_v1 = vadd.f32 %v5858_v44, %v5616_v56  ;;  %14854 = vst [vmem:[#allocation55_spill] sm:$0xff] %v13591_v20 }
 0x627   : > { %v6571_v16 = vadd.f32 %v6570_v30, %v6358_v35  ;;  %v6820_v27 = vpop.f32.mrf.mxu0  ;;  %v6090_v0 = vld [vmem:[#allocation4 + $0x16a] sm:$0x1]  ;;  %v5617_v59 = vadd.f32 %v13307_v29, %v5339_v23  ;;  %v13565_v29 = vld [vmem:[#allocation4 + $0x138] sm:$0xff]  ;;  %v8072_v23 = vld [vmem:[#allocation18 + $0x78] sm:$0xf] }
 0x628   : > { %6067 = vst.msk [vmem:[#allocation4 + $0x171] sm:$0xff] %vm6037_vm7, %v6033_v26  ;;  %v5930_v5 = vadd.f32 %v13394_v60, %v5894_v1  ;;  %9681 = vmatmul.msk.f32.gmra.mxu1 %vm6037_vm7, %v13336_v52  ;;  %v6092_v3 = vld [vmem:[#allocation4 + $0x19a] sm:$0x1]  ;;  %v13581_v30 = vld [vmem:[#allocation4 + $0x151] sm:$0xff] }
 0x629   : > { %v13537_v2 = vadd.f32 %v6817_v19, %v6571_v16  ;;  %6074 = vst.msk [vmem:[#allocation4 + $0x1a1] sm:$0xff] %vm6037_vm7, %v6033_v26  ;;  %9594 = vmatmul.msk.f32.gmra.mxu2 %vm6037_vm7, %v13533_v46  ;;  %v7793_v26 = vld [vmem:[#allocation18 + $0x68] sm:$0xf]  ;;  %9798 = vmatpush.msk.msra.mxu1 %vm6313_vm6, %v8072_v23 }
 0x62a   : > { %v5962_v15 = vmax.f32 %v5930_v5, 0.0  ;;  %9659 = vmatmul.msk.f32.gmra.mxu0 %vm6037_vm7, %v13544_v6  ;;  %6109 = vst.msk [vmem:[#allocation4 + $0x168] sm:$0x1] %vm6093_vm8, %v6090_v0 }
 0x62b   : > { %9626 = vmatmul.msk.f32.gmra.mxu3 %vm6037_vm7, %v13542_v24  ;;  %6111 = vst.msk [vmem:[#allocation4 + $0x198] sm:$0x1] %vm6093_vm8, %v6092_v3  ;;  %9765 = vmatpush.msk.msra.mxu0 %vm6313_vm6, %v7793_v26  ;;  %v7512_v3 = vld [vmem:[#allocation18 + $0x50] sm:$0xff] }
 0x62c   : > { %v5998_v52 = vmul.f32 %v13384_v17, %v5962_v15  ;;  %v6364_v48 = vpop.f32.mrf.mxu2  ;;  %v7792_v15 = vld [vmem:[#allocation18 + $0x60] sm:$0xff] }
 0x62d   : > { %v5861_v35 = vpop.f32.mrf.mxu1  ;;  %7908 = vmatpush.msra.mxu0 %v7792_v15 }
 0x62e   : > { %v6573_v57 = vpop.f32.mrf.mxu3  ;;  %v6034_v22 = vadd.f32 %v13389_v50, %v5998_v52  ;;  %v5895_v32 = vadd.f32 %v5861_v35, %v5617_v59  ;;  %v13603_v52 = vld [vmem:[#allocation4 + $0x159] sm:$0xff]  ;;  %v13611_v59 = vld [vmem:[#allocation4 + $0x150] sm:$0xff] }
 0x62f   : > { %v6574_v62 = vadd.f32 %v6573_v57, %v6361_v12  ;;  %v6823_v8 = vpop.f32.mrf.mxu0  ;;  %v6127_v58 = vld [vmem:[#allocation4 + $0x177] sm:$0x1]  ;;  %14855 = vst [vmem:[#allocation61_spill] sm:$0xff] %v13603_v52  ;;  %v13650_v26 = vld [vmem:[#allocation4 + $0x16a] sm:$0xff] }
 0x630   : > { %6068 = vst.msk [vmem:[#allocation4 + $0x181] sm:$0xff] %vm6037_vm7, %v6034_v22  ;;  %v5931_v28 = vadd.f32 %v13394_v60, %v5895_v32  ;;  %9682 = vmatmul.msk.f32.gmra.mxu1 %vm6037_vm7, %v13356_v13  ;;  %v7513_v13 = vld [vmem:[#allocation18 + $0x58] sm:$0xf]  ;;  %v6129_v60 = vld [vmem:[#allocation4 + $0x1a7] sm:$0x1]  ;;  %v13613_v57 = vld [vmem:[#allocation4 + $0x152] sm:$0xff] }
 0x631   : > { %v13561_v19 = vadd.f32 %v6820_v27, %v6574_v62  ;;  %9595 = vmatmul.msk.f32.gmra.mxu2 %vm6037_vm7, %v13557_v54  ;;  %6145 = vst.msk [vmem:[#allocation4 + $0x179] sm:$0x1] %vm6093_vm8, %v6127_v58  ;;  %9732 = vmatpush.msk.msra.mxu3 %vm6313_vm6, %v7513_v13  ;;  %v13622_v58 = vld [vmem:[#allocation4 + $0x169] sm:$0xff]  ;;  %v13630_v13 = vld [vmem:[#allocation4 + $0x158] sm:$0xff] }
 0x632   : > { %v5963_v55 = vmax.f32 %v5931_v28, 0.0  ;;  %9660 = vmatmul.msk.f32.gmra.mxu0 %vm6037_vm7, %v13567_v4  ;;  %6147 = vst.msk [vmem:[#allocation4 + $0x1a9] sm:$0x1] %vm6093_vm8, %v6129_v60  ;;  %v13632_v60 = vld [vmem:[#allocation4 + $0x15a] sm:$0xff] }
 0x633   : > { %9627 = vmatmul.msk.f32.gmra.mxu3 %vm6037_vm7, %v13565_v29  ;;  %14857 = vst [vmem:[#allocation63_spill] sm:$0xff] %v13613_v57 }
 0x634   : > { %v5999_v33 = vmul.f32 %v13384_v17, %v5963_v55  ;;  %v6367_v25 = vpop.f32.mrf.mxu2  ;;  %v13589_v17 = vld [vmem:[#allocation4 + $0x140] sm:$0xff]  ;;  %7628 = vmatpush.msra.mxu3 %v7512_v3  ;;  %14858 = vst [vmem:[#allocation38_spill] sm:$0xff] %v13622_v58 }
 0x635   : > { %v13577_v61 = vpop.f32.mrf.mxu1  ;;  %14860 = vst [vmem:[#allocation65_spill] sm:$0xff] %v13630_v13  ;;  %v7200_v3 = vld [vmem:[#allocation4 + $0x19] sm:$0xff] }
 0x636   : > { %v6576_v41 = vpop.f32.mrf.mxu3  ;;  %v6035_v7 = vadd.f32 %v13389_v50, %v5999_v33  ;;  %v8351_v50 = vld [vmem:[#allocation18 + $0x88] sm:$0xf]  ;;  %14861 = vst [vmem:[#allocation66_spill] sm:$0xff] %v13632_v60 }
 0x637   : > { %v6577_v10 = vadd.f32 %v6576_v41, %v6364_v48  ;;  %v6826_v12 = vpop.f32.mrf.mxu0  ;;  %v6091_v56 = vld [vmem:[#allocation4 + $0x182] sm:$0x1]  ;;  %9831 = vmatpush.msk.msra.mxu2 %vm6313_vm6, %v8351_v50  ;;  %v13648_v50 = vld [vmem:[#allocation4 + $0x168] sm:$0xff]  ;;  %14865 = vst [vmem:[#allocation68_spill] sm:$0xff] %v13650_v26 }
 0x638   : > { %6069 = vst.msk [vmem:[#allocation4 + $0x189] sm:$0xff] %vm6037_vm7, %v6035_v7  ;;  %9683 = vmatmul.msk.f32.gmra.mxu1 %vm6037_vm7, %v13376_v43 }
 0x639   : > { %v13585_v44 = vadd.f32 %v6823_v8, %v6577_v10  ;;  %9596 = vmatmul.msk.f32.gmra.mxu2 %vm6037_vm7, %v13581_v30  ;;  %6110 = vst.msk [vmem:[#allocation4 + $0x180] sm:$0x1] %vm6093_vm8, %v6091_v56 }
 0x63a   : > { %9661 = vmatmul.msk.f32.gmra.mxu0 %vm6037_vm7, %v13591_v20  ;;  %14864 = vst [vmem:[#allocation67_spill] sm:$0xff] %v13648_v50  ;;  %v13829_v20 = vld [vmem:[#allocation4 + $0xa9] sm:$0xff] }
 0x63b   : > { %14853 = vst [vmem:[#allocation54_spill] sm:$0xff] %v13585_v44  ;;  %9628 = vmatmul.msk.f32.gmra.mxu3 %vm6037_vm7, %v13589_v17 }
 0x63c   : > { %v6370_v16 = vpop.f32.mrf.mxu2 }
 0x63d   : > { %v13600_v27 = vpop.f32.mrf.mxu1 }
 0x63e   : > { %v6579_v1 = vpop.f32.mrf.mxu3 }
 0x63f   : > { %v6580_v0 = vadd.f32 %v6579_v1, %v6367_v25  ;;  %v6829_v5 = vpop.f32.mrf.mxu0  ;;  %v6128_v35 = vld [vmem:[#allocation4 + $0x18f] sm:$0x1] }
 0x640   : > { %9684 = vmatmul.msk.f32.gmra.mxu1 %vm6037_vm7, %v13402_v14  ;;  %6146 = vst.msk [vmem:[#allocation4 + $0x191] sm:$0x1] %vm6093_vm8, %v6128_v35  ;;  %v13662_v35 = vld [vmem:[#allocation4 + $0x170] sm:$0xff] }
 0x641   : > { %v13607_v48 = vadd.f32 %v6826_v12, %v6580_v0  ;;  %9597 = vmatmul.msk.f32.gmra.mxu2 %vm6037_vm7, %v13603_v52  ;;  %v13640_v12 = vld [vmem:[#allocation4 + $0x171] sm:$0xff]  ;;  %14867 = vst [vmem:[#allocation57_spill] sm:$0xff] %v13662_v35 }
 0x642   : > { %9662 = vmatmul.msk.f32.gmra.mxu0 %vm6037_vm7, %v13613_v57  ;;  %14862 = vst [vmem:[#allocation48_spill] sm:$0xff] %v13640_v12 }
 0x643   : > { %14856 = vst [vmem:[#allocation59_spill] sm:$0xff] %v13607_v48  ;;  %9629 = vmatmul.msk.f32.gmra.mxu3 %vm6037_vm7, %v13611_v59 }
 0x644   : > { %v6373_v22 = vpop.f32.mrf.mxu2 }
 0x645   : > { %v13620_v32 = vpop.f32.mrf.mxu1 }
 0x646   : > { %v6582_v62 = vpop.f32.mrf.mxu3 }
 0x647   : > { %v6583_v8 = vadd.f32 %v6582_v62, %v6370_v16  ;;  %v6832_v28 = vpop.f32.mrf.mxu0 }
 0x648   : > { %9685 = vmatmul.msk.f32.gmra.mxu1 %vm6037_vm7, %v13422_v47 }
 0x649   : > { %v13626_v55 = vadd.f32 %v6829_v5, %v6583_v8  ;;  %9598 = vmatmul.msk.f32.gmra.mxu2 %vm6037_vm7, %v13622_v58 }
 0x64a   : > { %9663 = vmatmul.msk.f32.gmra.mxu0 %vm6037_vm7, %v13632_v60  ;;  %v7763_v60 = vld [vmem:[#allocation4 + $0x60] sm:$0xff] }
 0x64b   : > { %14859 = vst [vmem:[#allocation41_spill] sm:$0xff] %v13626_v55  ;;  %9630 = vmatmul.msk.f32.gmra.mxu3 %vm6037_vm7, %v13630_v13 }
 0x64c   : > { %v6376_v33 = vpop.f32.mrf.mxu2 }
 0x64d   : > { %v13638_v41 = vpop.f32.mrf.mxu1 }
 0x64e   : > { %v6585_v25 = vpop.f32.mrf.mxu3 }
 0x64f   : > { %v6586_v7 = vadd.f32 %v6585_v25, %v6373_v22  ;;  %v6835_v10 = vpop.f32.mrf.mxu0  ;;  %v13664_v22 = vld [vmem:[#allocation4 + $0x172] sm:$0xff] }
 0x650   : > { %9686 = vmatmul.msk.f32.gmra.mxu1 %vm6037_vm7, %v13442_v40  ;;  %14868 = vst [vmem:[#allocation69_spill] sm:$0xff] %v13664_v22 }
 0x651   : > { %v13644_v56 = vadd.f32 %v6832_v28, %v6586_v7  ;;  %9599 = vmatmul.msk.f32.gmra.mxu2 %vm6037_vm7, %v13640_v12  ;;  %v7201_v7 = vld [vmem:[#allocation4 + $0x21] sm:$0xff]  ;;  %v7762_v12 = vld [vmem:[#allocation4 + $0x50] sm:$0xff] }
 0x652   : > { %9664 = vmatmul.msk.f32.gmra.mxu0 %vm6037_vm7, %v13650_v26 }
 0x653   : > { %14863 = vst [vmem:[#allocation39_spill] sm:$0xff] %v13644_v56  ;;  %9631 = vmatmul.msk.f32.gmra.mxu3 %vm6037_vm7, %v13648_v50 }
 0x654   : > { %v6379_v16 = vpop.f32.mrf.mxu2 }
 0x655   : > { %v13656_v0 = vpop.f32.mrf.mxu1 }
 0x656   : > { %v6588_v1 = vpop.f32.mrf.mxu3 }
 0x657   : > { %v6589_v23 = vadd.f32 %v6588_v1, %v6376_v33  ;;  %v6838_v5 = vpop.f32.mrf.mxu0  ;;  %v7479_v1 = vld [vmem:[#allocation4 + $0x1a] sm:$0xff] }
 0x658   : > { %9687 = vmatmul.msk.f32.gmra.mxu1 %vm6037_vm7, %v13462_v18 }
 0x659   : > { %v13660_v15 = vadd.f32 %v6835_v10, %v6589_v23  ;;  %9700 = vmatmul.msk.f32.vlgmr.msrb.gmra.mxu2 %vm6037_vm7, %v7200_v3  ;;  %v7759_v23 = vld [vmem:[#allocation4 + $0x30] sm:$0xff] }
 0x65a   : > { %9665 = vmatmul.msk.f32.gmra.mxu0 %vm6037_vm7, %v13664_v22 }
 0x65b   : > { %14866 = vst [vmem:[#allocation53_spill] sm:$0xff] %v13660_v15  ;;  %9632 = vmatmul.msk.f32.gmra.mxu3 %vm6037_vm7, %v13662_v35 }
 0x65c   : > { %v6382_v62 = vpop.f32.mrf.mxu2 }
 0x65d   : > { %v13671_v28 = vpop.f32.mrf.mxu1 }
 0x65e   : > { %v6591_v8 = vpop.f32.mrf.mxu3 }
 0x65f   : > { %v6592_v33 = vadd.f32 %v6591_v8, %v6379_v16  ;;  %v6841_v25 = vpop.f32.mrf.mxu0  ;;  %v13684_v8 = vld [vmem:[#allocation4 + $0x31] sm:$0xff] }
 0x660   : > { %9688 = vmatmul.msk.f32.gmra.mxu1 %vm6037_vm7, %v13488_v11 }
 0x661   : > { %v13675_v10 = vadd.f32 %v6838_v5, %v6592_v33  ;;  %9701 = vmatmul.msk.f32.gmra.mxu2 %vm6037_vm7, %v7201_v7  ;;  %v7480_v33 = vld [vmem:[#allocation4 + $0x22] sm:$0xff]  ;;  %v7760_v7 = vld [vmem:[#allocation4 + $0x38] sm:$0xff] }
 0x662   : > { %9766 = vmatmul.msk.f32.vlgmr.msra.gmra.mxu0 %vm6037_vm7, %v7759_v23 }
 0x663   : > { %14869 = vst [vmem:[#allocation70_spill] sm:$0xff] %v13675_v10  ;;  %9733 = vmatmul.msk.f32.vlgmr.msra.gmra.mxu3 %vm6037_vm7, %v7479_v1 }
 0x664   : > { %v6385_v3 = vpop.f32.mrf.mxu2 }
 0x665   : > { %v13680_v56 = vpop.f32.mrf.mxu1 }
 0x666   : > { %v6594_v15 = vpop.f32.mrf.mxu3 }
 0x667   : > { %v6595_v22 = vadd.f32 %v6594_v15, %v6382_v62  ;;  %v6844_v16 = vpop.f32.mrf.mxu0 }
 0x668   : > { %9689 = vmatmul.msk.f32.gmra.mxu1 %vm6037_vm7, %v13515_v21 }
 0x669   : > { %v13686_v5 = vadd.f32 %v6841_v25, %v6595_v22  ;;  %9702 = vmatmul.msk.f32.gmra.mxu2 %vm6037_vm7, %v13684_v8  ;;  %v13696_v22 = vld [vmem:[#allocation4 + $0x39] sm:$0xff] }
 0x66a   : > { %9767 = vmatmul.msk.f32.gmra.mxu0 %vm6037_vm7, %v7760_v7 }
 0x66b   : > { %14870 = vst [vmem:[#allocation58_spill] sm:$0xff] %v13686_v5  ;;  %9734 = vmatmul.msk.f32.gmra.mxu3 %vm6037_vm7, %v7480_v33  ;;  %v13702_v5 = vld [vmem:[#allocation4 + $0x32] sm:$0xff]  ;;  %v7761_v33 = vld [vmem:[#allocation4 + $0x48] sm:$0xff] }
 0x66c   : > { %v6388_v15 = vpop.f32.mrf.mxu2  ;;  %14872 = vst [vmem:[#allocation71_spill] sm:$0xff] %v13702_v5 }
 0x66d   : > { %v13692_v10 = vpop.f32.mrf.mxu1 }
 0x66e   : > { %v6597_v62 = vpop.f32.mrf.mxu3 }
 0x66f   : > { %v6598_v1 = vadd.f32 %v6597_v62, %v6385_v3  ;;  %v6847_v23 = vpop.f32.mrf.mxu0 }
 0x670   : > { %9690 = vmatmul.msk.f32.gmra.mxu1 %vm6037_vm7, %v13542_v24 }
 0x671   : > { %v13698_v25 = vadd.f32 %v6844_v16, %v6598_v1  ;;  %9703 = vmatmul.msk.f32.gmra.mxu2 %vm6037_vm7, %v13696_v22  ;;  %v13709_v16 = vld [vmem:[#allocation4 + $0x49] sm:$0xff] }
 0x672   : > { %9768 = vmatmul.msk.f32.gmra.mxu0 %vm6037_vm7, %v7761_v33 }
 0x673   : > { %14871 = vst [vmem:[#allocation40_spill] sm:$0xff] %v13698_v25  ;;  %9735 = vmatmul.msk.f32.gmra.mxu3 %vm6037_vm7, %v13702_v5  ;;  %v13715_v25 = vld [vmem:[#allocation4 + $0x3a] sm:$0xff] }
 0x674   : > { %v6391_v3 = vpop.f32.mrf.mxu2  ;;  %14874 = vst [vmem:[#allocation46_spill] sm:$0xff] %v13715_v25 }
 0x675   : > { %v13717_v5 = vpop.f32.mrf.mxu1 }
 0x676   : > { %v6600_v7 = vpop.f32.mrf.mxu3 }
 0x677   : > { %v6601_v62 = vadd.f32 %v6600_v7, %v6388_v15  ;;  %v6850_v26 = vpop.f32.mrf.mxu0 }
 0x678   : > { %9691 = vmatmul.msk.f32.gmra.mxu1 %vm6037_vm7, %v13565_v29 }
 0x679   : > { %v13711_v1 = vadd.f32 %v6847_v23, %v6601_v62  ;;  %9704 = vmatmul.msk.f32.gmra.mxu2 %vm6037_vm7, %v13709_v16  ;;  %v13724_v23 = vld [vmem:[#allocation4 + $0x51] sm:$0xff] }
 0x67a   : > { %9769 = vmatmul.msk.f32.gmra.mxu0 %vm6037_vm7, %v7762_v12 }
 0x67b   : > { %14873 = vst [vmem:[#allocation62_spill] sm:$0xff] %v13711_v1  ;;  %9736 = vmatmul.msk.f32.gmra.mxu3 %vm6037_vm7, %v13715_v25  ;;  %v13730_v1 = vld [vmem:[#allocation4 + $0x4a] sm:$0xff] }
 0x67c   : > { %v6394_v15 = vpop.f32.mrf.mxu2  ;;  %14876 = vst [vmem:[#allocation31_spill] sm:$0xff] %v13730_v1 }
 0x67d   : > { %v13735_v12 = vpop.f32.mrf.mxu1 }
 0x67e   : > { %v6603_v33 = vpop.f32.mrf.mxu3 }
 0x67f   : > { %v6604_v7 = vadd.f32 %v6603_v33, %v6391_v3  ;;  %v6853_v55 = vpop.f32.mrf.mxu0 }
 0x680   : > { %9692 = vmatmul.msk.f32.gmra.mxu1 %vm6037_vm7, %v13589_v17 }
 0x681   : > { %v13726_v62 = vadd.f32 %v6850_v26, %v6604_v7  ;;  %9705 = vmatmul.msk.f32.gmra.mxu2 %vm6037_vm7, %v13724_v23  ;;  %v13739_v26 = vld [vmem:[#allocation4 + $0x61] sm:$0xff] }
 0x682   : > { %9770 = vmatmul.msk.f32.gmra.mxu0 %vm6037_vm7, %v7763_v60 }
 0x683   : > { %14875 = vst [vmem:[#allocation56_spill] sm:$0xff] %v13726_v62  ;;  %9737 = vmatmul.msk.f32.gmra.mxu3 %vm6037_vm7, %v13730_v1  ;;  %v13745_v62 = vld [vmem:[#allocation4 + $0x52] sm:$0xff]  ;;  %v7764_v1 = vld [vmem:[#allocation4 + $0x68] sm:$0xff] }
 0x684   : > { %v6397_v3 = vpop.f32.mrf.mxu2  ;;  %14878 = vst [vmem:[#allocation42_spill] sm:$0xff] %v13745_v62 }
 0x686   : > { %v6606_v33 = vpop.f32.mrf.mxu3 }
 0x687   : > { %v6607_v25 = vadd.f32 %v6606_v33, %v6394_v15  ;;  %v6856_v58 = vpop.f32.mrf.mxu0  ;;  %v13750_v33 = vpop.f32.mrf.mxu1 }
 0x688   : > { %9693 = vmatmul.msk.f32.gmra.mxu1 %vm6037_vm7, %v13611_v59  ;;  %14879 = vst [vmem:[#allocation45_spill] sm:$0xff] %v13750_v33  ;;  %v8071_v33 = vld [vmem:[#allocation18 + $0x70] sm:$0xff] }
 0x689   : > { %v13741_v7 = vadd.f32 %v6853_v55, %v6607_v25  ;;  %9706 = vmatmul.msk.f32.gmra.mxu2 %vm6037_vm7, %v13739_v26  ;;  %v13754_v55 = vld [vmem:[#allocation4 + $0x69] sm:$0xff]  ;;  %8187 = vmatpush.msra.mxu1 %v8071_v33  ;;  %v13788_v33 = vld [vmem:[#allocation4 + $0x7a] sm:$0xff] }
 0x68a   : > { %9771 = vmatmul.msk.f32.gmra.mxu0 %vm6037_vm7, %v7764_v1  ;;  %14886 = vst [vmem:[#allocation37_spill] sm:$0xff] %v13788_v33 }
 0x68b   : > { %14877 = vst [vmem:[#allocation44_spill] sm:$0xff] %v13741_v7  ;;  %9738 = vmatmul.msk.f32.gmra.mxu3 %vm6037_vm7, %v13745_v62  ;;  %v13760_v7 = vld [vmem:[#allocation4 + $0x62] sm:$0xff]  ;;  %v7765_v62 = vld [vmem:[#allocation4 + $0x78] sm:$0xff] }
 0x68c   : > { %v6400_v60 = vpop.f32.mrf.mxu2  ;;  %14881 = vst [vmem:[#allocation51_spill] sm:$0xff] %v13760_v7 }
 0x68e   : > { %v6609_v15 = vpop.f32.mrf.mxu3 }
 0x68f   : > { %v6610_v48 = vadd.f32 %v6609_v15, %v6397_v3  ;;  %v6859_v57 = vpop.f32.mrf.mxu0  ;;  %v13765_v44 = vpop.f32.mrf.mxu1 }
 0x690   : > { %9694 = vmatmul.msk.f32.gmra.mxu1 %vm6037_vm7, %v13630_v13  ;;  %14882 = vst [vmem:[#allocation32_spill] sm:$0xff] %v13765_v44  ;;  %v13812_v13 = vld [vmem:[#allocation4 + $0x188] sm:$0xff] }
 0x691   : > { %v13756_v25 = vadd.f32 %v6856_v58, %v6610_v48  ;;  %9707 = vmatmul.msk.f32.gmra.mxu2 %vm6037_vm7, %v13754_v55  ;;  %v13769_v48 = vld [vmem:[#allocation4 + $0x79] sm:$0xff]  ;;  %14892 = vst [vmem:[#allocation36_spill] sm:$0xff] %v13812_v13 }
 0x692   : > { %9772 = vmatmul.msk.f32.gmra.mxu0 %vm6037_vm7, %v7765_v62  ;;  %v7766_v62 = vld [vmem:[#allocation4 + $0x80] sm:$0xff] }
 0x693   : > { %14880 = vst [vmem:[#allocation33_spill] sm:$0xff] %v13756_v25  ;;  %9739 = vmatmul.msk.f32.gmra.mxu3 %vm6037_vm7, %v13760_v7  ;;  %v13775_v25 = vld [vmem:[#allocation4 + $0x6a] sm:$0xff] }
 0x694   : > { %v6403_v1 = vpop.f32.mrf.mxu2  ;;  %14884 = vst [vmem:[#allocation47_spill] sm:$0xff] %v13775_v25 }
 0x696   : > { %v6612_v3 = vpop.f32.mrf.mxu3 }
 0x697   : > { %v6613_v15 = vadd.f32 %v6612_v3, %v6400_v60  ;;  %v6862_v52 = vpop.f32.mrf.mxu0 }
 0x698   : > { %9695 = vmatmul.msk.f32.gmra.mxu1 %vm6037_vm7, %v13648_v50  ;;  %v13795_v50 = vld [vmem:[#allocation4 + $0x180] sm:$0xff] }
 0x699   : > { %v13771_v58 = vadd.f32 %v6859_v57, %v6613_v15  ;;  %9708 = vmatmul.msk.f32.gmra.mxu2 %vm6037_vm7, %v13769_v48  ;;  %v13782_v57 = vld [vmem:[#allocation4 + $0x81] sm:$0xff]  ;;  %14888 = vst [vmem:[#allocation35_spill] sm:$0xff] %v13795_v50 }
 0x69a   : > { %9773 = vmatmul.msk.f32.gmra.mxu0 %vm6037_vm7, %v7766_v62 }
 0x69b   : > { %14883 = vst [vmem:[#allocation49_spill] sm:$0xff] %v13771_v58  ;;  %9740 = vmatmul.msk.f32.gmra.mxu3 %vm6037_vm7, %v13775_v25  ;;  %v7767_v58 = vld [vmem:[#allocation4 + $0x90] sm:$0xff]  ;;  %v13790_v25 = vpop.f32.mrf.mxu1 }
 0x69c   : > { %v6406_v60 = vpop.f32.mrf.mxu2  ;;  %14887 = vst [vmem:[#allocation64_spill] sm:$0xff] %v13790_v25 }
 0x69e   : > { %v6615_v3 = vpop.f32.mrf.mxu3 }
 0x69f   : > { %v6616_v7 = vadd.f32 %v6615_v3, %v6403_v1  ;;  %v6865_v44 = vpop.f32.mrf.mxu0 }
 0x6a0   : > { %9696 = vmatmul.msk.f32.gmra.mxu1 %vm6037_vm7, %v13662_v35 }
 0x6a1   : > { %v13784_v15 = vadd.f32 %v6862_v52, %v6616_v7  ;;  %9709 = vmatmul.msk.f32.gmra.mxu2 %vm6037_vm7, %v13782_v57  ;;  %v13799_v52 = vld [vmem:[#allocation4 + $0x91] sm:$0xff] }
 0x6a2   : > { %9774 = vmatmul.msk.f32.gmra.mxu0 %vm6037_vm7, %v7767_v58 }
 0x6a3   : > { %14885 = vst [vmem:[#allocation50_spill] sm:$0xff] %v13784_v15  ;;  %9741 = vmatmul.msk.f32.gmra.mxu3 %vm6037_vm7, %v13788_v33  ;;  %v13805_v15 = vld [vmem:[#allocation4 + $0x82] sm:$0xff]  ;;  %v7768_v33 = vld [vmem:[#allocation4 + $0x98] sm:$0xff]  ;;  %v13810_v58 = vpop.f32.mrf.mxu1 }
 0x6a4   : > { %v6409_v1 = vpop.f32.mrf.mxu2  ;;  %14890 = vst [vmem:[#allocation52_spill] sm:$0xff] %v13805_v15 }
 0x6a5   : > { %14891 = vst [vmem:[#allocation60_spill] sm:$0xff] %v13810_v58 }
 0x6a6   : > { %v6618_v62 = vpop.f32.mrf.mxu3 }
 0x6a7   : > { %v6619_v3 = vadd.f32 %v6618_v62, %v6406_v60  ;;  %v6868_v35 = vpop.f32.mrf.mxu0 }
 0x6a8   : > { %9697 = vmatmul.msk.f32.gmra.mxu1 %vm6037_vm7, %v13795_v50 }
 0x6a9   : > { %v13801_v7 = vadd.f32 %v6865_v44, %v6619_v3  ;;  %9710 = vmatmul.msk.f32.gmra.mxu2 %vm6037_vm7, %v13799_v52  ;;  %v13816_v44 = vld [vmem:[#allocation4 + $0x99] sm:$0xff] }
 0x6aa   : > { %9775 = vmatmul.msk.f32.gmra.mxu0 %vm6037_vm7, %v7768_v33  ;;  %v7769_v33 = vld [vmem:[#allocation4 + $0xa8] sm:$0xff] }
 0x6ab   : > { %14889 = vst [vmem:[#allocation43_spill] sm:$0xff] %v13801_v7  ;;  %9742 = vmatmul.msk.f32.gmra.mxu3 %vm6037_vm7, %v13805_v15  ;;  %v13822_v7 = vld [vmem:[#allocation4 + $0x92] sm:$0xff]  ;;  %v13827_v15 = vpop.f32.mrf.mxu1 }
 0x6ac   : > { %v6412_v60 = vpop.f32.mrf.mxu2  ;;  %14894 = vst [vmem:[#allocation72_spill] sm:$0xff] %v13822_v7 }
 0x6ad   : > { %14895 = vst [vmem:[#allocation73_spill] sm:$0xff] %v13827_v15 }
 0x6ae   : > { %v6621_v62 = vpop.f32.mrf.mxu3 }
 0x6af   : > { %v6622_v50 = vadd.f32 %v6621_v62, %v6409_v1  ;;  %v6871_v25 = vpop.f32.mrf.mxu0 }
 0x6b0   : > { %9698 = vmatmul.msk.f32.gmra.mxu1 %vm6037_vm7, %v13812_v13 }
 0x6b1   : > { %v13818_v3 = vadd.f32 %v6868_v35, %v6622_v50  ;;  %9711 = vmatmul.msk.f32.gmra.mxu2 %vm6037_vm7, %v13816_v44  ;;  %v13837_v35 = vld [vmem:[#allocation4 + $0x9a] sm:$0xff] }
 0x6b2   : > { %9776 = vmatmul.msk.f32.gmra.mxu0 %vm6037_vm7, %v7769_v33  ;;  %14897 = vst [vmem:[#allocation75_spill] sm:$0xff] %v13837_v35 }
 0x6b3   : > { %14893 = vst [vmem:[#allocation34_spill] sm:$0xff] %v13818_v3  ;;  %9743 = vmatmul.msk.f32.gmra.mxu3 %vm6037_vm7, %v13822_v7  ;;  %v7770_v3 = vld [vmem:[#allocation4 + $0xb0] sm:$0xff] }
 0x6b4   : > { %v6415_v1 = vpop.f32.mrf.mxu2 }
 0x6b6   : > { %v6624_v62 = vpop.f32.mrf.mxu3 }
 0x6b7   : > { %v6625_v13 = vadd.f32 %v6624_v62, %v6412_v60  ;;  %v6874_v58 = vpop.f32.mrf.mxu0  ;;  %v8350_v60 = vld [vmem:[#allocation18 + $0x80] sm:$0xff] }
 0x6b8   : > { %9799 = vmatmul.msk.f32.vlgmr.msra.gmra.mxu1 %vm6037_vm7, %v13684_v8  ;;  %8466 = vmatpush.msra.mxu2 %v8350_v60  ;;  %v13842_v8 = vpop.f32.mrf.mxu1 }
 0x6b9   : > { %v13833_v50 = vadd.f32 %v6871_v25, %v6625_v13  ;;  %9712 = vmatmul.msk.f32.gmra.mxu2 %vm6037_vm7, %v13829_v20  ;;  %14898 = vst [vmem:[#allocation76_spill] sm:$0xff] %v13842_v8  ;;  %v13844_v13 = vld [vmem:[#allocation4 + $0xb1] sm:$0xff]  ;;  %v13857_v8 = vld [vmem:[#allocation4 + $0xc1] sm:$0xff] }
 0x6ba   : > { %9777 = vmatmul.msk.f32.gmra.mxu0 %vm6037_vm7, %v7770_v3  ;;  %v7771_v3 = vld [vmem:[#allocation4 + $0xc0] sm:$0xff] }
 0x6bb   : > { %14896 = vst [vmem:[#allocation74_spill] sm:$0xff] %v13833_v50  ;;  %9744 = vmatmul.msk.f32.gmra.mxu3 %vm6037_vm7, %v13837_v35  ;;  %v13852_v50 = vld [vmem:[#allocation4 + $0xaa] sm:$0xff] }
 0x6bc   : > { %v6418_v33 = vpop.f32.mrf.mxu2  ;;  %14900 = vst [vmem:[#allocation78_spill] sm:$0xff] %v13852_v50 }
 0x6be   : > { %v6627_v62 = vpop.f32.mrf.mxu3 }
 0x6bf   : > { %v6628_v7 = vadd.f32 %v6627_v62, %v6415_v1  ;;  %v6877_v15 = vpop.f32.mrf.mxu0 }
 0x6c0   : > { %9800 = vmatmul.msk.f32.gmra.mxu1 %vm6037_vm7, %v13696_v22 }
 0x6c1   : > { %v13848_v25 = vadd.f32 %v6874_v58, %v6628_v7  ;;  %9713 = vmatmul.msk.f32.gmra.mxu2 %vm6037_vm7, %v13844_v13  ;;  %v13865_v7 = vld [vmem:[#allocation4 + $0xb2] sm:$0xff]  ;;  %v7772_v58 = vld [vmem:[#allocation4 + $0xc8] sm:$0xff] }
 0x6c2   : > { %9778 = vmatmul.msk.f32.gmra.mxu0 %vm6037_vm7, %v7771_v3  ;;  %14902 = vst [vmem:[#allocation80_spill] sm:$0xff] %v13865_v7 }
 0x6c3   : > { %14899 = vst [vmem:[#allocation77_spill] sm:$0xff] %v13848_v25  ;;  %9745 = vmatmul.msk.f32.gmra.mxu3 %vm6037_vm7, %v13852_v50  ;;  %v13867_v25 = vpop.f32.mrf.mxu1 }
 0x6c4   : > { %v6421_v1 = vpop.f32.mrf.mxu2 }
 0x6c6   : > { %v6630_v60 = vpop.f32.mrf.mxu3 }
 0x6c7   : > { %v6631_v62 = vadd.f32 %v6630_v60, %v6418_v33  ;;  %v6880_v35 = vpop.f32.mrf.mxu0 }
 0x6c8   : > { %9801 = vmatmul.msk.f32.gmra.mxu1 %vm6037_vm7, %v13709_v16  ;;  %v13872_v16 = vld [vmem:[#allocation4 + $0xc9] sm:$0xff] }
 0x6c9   : > { %v13861_v22 = vadd.f32 %v6877_v15, %v6631_v62  ;;  %9714 = vmatmul.msk.f32.gmra.mxu2 %vm6037_vm7, %v13857_v8  ;;  %v13880_v62 = vld [vmem:[#allocation4 + $0xc2] sm:$0xff] }
 0x6ca   : > { %9779 = vmatmul.msk.f32.gmra.mxu0 %vm6037_vm7, %v7772_v58  ;;  %14904 = vst [vmem:[#allocation82_spill] sm:$0xff] %v13880_v62 }
 0x6cb   : > { %14901 = vst [vmem:[#allocation79_spill] sm:$0xff] %v13861_v22  ;;  %9746 = vmatmul.msk.f32.gmra.mxu3 %vm6037_vm7, %v13865_v7 }
 0x6cc   : > { %v6424_v33 = vpop.f32.mrf.mxu2 }
 0x6ce   : > { %v6633_v3 = vpop.f32.mrf.mxu3 }
 0x6cf   : > { %v6634_v60 = vadd.f32 %v6633_v3, %v6421_v1  ;;  %v6883_v50 = vpop.f32.mrf.mxu0  ;;  %v13886_v1 = vpop.f32.mrf.mxu1 }
 0x6d0   : > { %9802 = vmatmul.msk.f32.gmra.mxu1 %vm6037_vm7, %v13724_v23  ;;  %v13888_v23 = vld [vmem:[#allocation4 + $0xd9] sm:$0xff] }
 0x6d1   : > { %v13876_v15 = vadd.f32 %v6880_v35, %v6634_v60  ;;  %9715 = vmatmul.msk.f32.gmra.mxu2 %vm6037_vm7, %v13872_v16  ;;  %v13896_v60 = vld [vmem:[#allocation4 + $0xca] sm:$0xff] }
 0x6d2   : > { %9780 = vmatmul.msk.f32.gmra.mxu0 %vm6037_vm7, %v13376_v43  ;;  %v7168_v43 = vadd.f32 %v13577_v61, %v13353_v34  ;;  %v7169_v34 = vadd.f32 %v13600_v27, %v13373_v49  ;;  %v7170_v49 = vadd.f32 %v13620_v32, %v13399_v9  ;;  %v7171_v9 = vadd.f32 %v13638_v41, %v13419_v51 }
 0x6d3   : > { %14903 = vst [vmem:[#allocation81_spill] sm:$0xff] %v13876_v15  ;;  %9747 = vmatmul.msk.f32.gmra.mxu3 %vm6037_vm7, %v13880_v62  ;;  %v7172_v51 = vadd.f32 %v13656_v0, %v13439_v63  ;;  %v7173_v63 = vadd.f32 %v13671_v28, %v13459_v53  ;;  %v7174_v53 = vadd.f32 %v13680_v56, %v13484_v45 }
 0x6d4   : > { %v6427_v58 = vpop.f32.mrf.mxu2  ;;  %v7175_v45 = vadd.f32 %v13692_v10, %v13510_v31  ;;  %v7176_v31 = vadd.f32 %v13717_v5, %v13537_v2  ;;  %v7177_v2 = vadd.f32 %v13735_v12, %v13561_v19 }
 0x6d6   : > { %v6636_v3 = vpop.f32.mrf.mxu3 }
 0x6d7   : > { %v6637_v22 = vadd.f32 %v6636_v3, %v6424_v33  ;;  %v6886_v7 = vpop.f32.mrf.mxu0 }
 0x6d8   : > { %9803 = vmatmul.msk.f32.gmra.mxu1 %vm6037_vm7, %v13739_v26  ;;  %v13904_v26 = vpop.f32.mrf.mxu1 }
 0x6d9   : > { %v13892_v35 = vadd.f32 %v6883_v50, %v6637_v22  ;;  %9716 = vmatmul.msk.f32.gmra.mxu2 %vm6037_vm7, %v13888_v23 }
 0x6da   : > { %9781 = vmatmul.msk.f32.gmra.mxu0 %vm6037_vm7, %v13402_v14  ;;  %v13914_v14 = vld [vmem:[#allocation4 + $0xda] sm:$0xff] }
 0x6db   : > { %14905 = vst [vmem:[#allocation83_spill] sm:$0xff] %v13892_v35  ;;  %9748 = vmatmul.msk.f32.gmra.mxu3 %vm6037_vm7, %v13896_v60  ;;  %v13906_v35 = vld [vmem:[#allocation4 + $0xe1] sm:$0xff] }
 0x6dc   : > { %v7351_v33 = vpop.f32.mrf.mxu2 }
 0x6dd   : > { %v7447_v15 = vadd.f32 %v7351_v33, %v7168_v43 }
 0x6de   : > { %v6639_v3 = vpop.f32.mrf.mxu3 }
 0x6df   : > { %v6640_v50 = vadd.f32 %v6639_v3, %v6427_v58  ;;  %v7910_v22 = vpop.f32.mrf.mxu0  ;;  %v13924_v3 = vld [vmem:[#allocation4 + $0xf1] sm:$0xff] }
 0x6e0   : > { %9804 = vmatmul.msk.f32.gmra.mxu1 %vm6037_vm7, %v13754_v55  ;;  %v13922_v33 = vpop.f32.mrf.mxu1 }
 0x6e1   : > { %v13910_v62 = vadd.f32 %v6886_v7, %v6640_v50  ;;  %9717 = vmatmul.msk.f32.gmra.mxu2 %vm6037_vm7, %v13906_v35 }
 0x6e2   : > { %9782 = vmatmul.msk.f32.gmra.mxu0 %vm6037_vm7, %v13422_v47  ;;  %v13932_v47 = vld [vmem:[#allocation4 + $0xe2] sm:$0xff] }
 0x6e3   : > { %9749 = vmatmul.msk.f32.gmra.mxu3 %vm6037_vm7, %v13914_v14 }
 0x6e4   : > { %v7354_v61 = vpop.f32.mrf.mxu2 }
 0x6e5   : > { %v7448_v58 = vadd.f32 %v7354_v61, %v7169_v34  ;;  %v13940_v61 = vld [vmem:[#allocation4 + $0xf9] sm:$0xff] }
 0x6e6   : > { %v7630_v43 = vpop.f32.mrf.mxu3 }
 0x6e7   : > { %v7726_v55 = vadd.f32 %v7630_v43, %v7447_v15  ;;  %v7913_v7 = vpop.f32.mrf.mxu0 }
 0x6e8   : > { %9805 = vmatmul.msk.f32.gmra.mxu1 %vm6037_vm7, %v13769_v48 }
 0x6e9   : > { %v13928_v50 = vadd.f32 %v7910_v22, %v7726_v55  ;;  %9718 = vmatmul.msk.f32.gmra.mxu2 %vm6037_vm7, %v13924_v3  ;;  %v13948_v55 = vld [vmem:[#allocation4 + $0xf2] sm:$0xff] }
 0x6ea   : > { %9783 = vmatmul.msk.f32.gmra.mxu0 %vm6037_vm7, %v13442_v40  ;;  %v13950_v40 = vpop.f32.mrf.mxu1 }
 0x6eb   : > { %9750 = vmatmul.msk.f32.gmra.mxu3 %vm6037_vm7, %v13932_v47 }
 0x6ec   : > { %v7357_v27 = vpop.f32.mrf.mxu2 }
 0x6ed   : > { %v7449_v15 = vadd.f32 %v7357_v27, %v7170_v49  ;;  %v13958_v27 = vld [vmem:[#allocation4 + $0x109] sm:$0xff] }
 0x6ee   : > { %v7633_v34 = vpop.f32.mrf.mxu3 }
 0x6ef   : > { %v7727_v48 = vadd.f32 %v7633_v34, %v7448_v58  ;;  %v7916_v22 = vpop.f32.mrf.mxu0 }
 0x6f0   : > { %9806 = vmatmul.msk.f32.gmra.mxu1 %vm6037_vm7, %v13782_v57 }
 0x6f1   : > { %v13944_v43 = vadd.f32 %v7913_v7, %v7727_v48  ;;  %9719 = vmatmul.msk.f32.gmra.mxu2 %vm6037_vm7, %v13940_v61  ;;  %v13966_v48 = vld [vmem:[#allocation4 + $0xfa] sm:$0xff] }
 0x6f2   : > { %9784 = vmatmul.msk.f32.gmra.mxu0 %vm6037_vm7, %v13462_v18  ;;  %v13974_v18 = vpop.f32.mrf.mxu1 }
 0x6f3   : > { %9751 = vmatmul.msk.f32.gmra.mxu3 %vm6037_vm7, %v13948_v55 }
 0x6f4   : > { %v7360_v32 = vpop.f32.mrf.mxu2 }
 0x6f5   : > { %v7450_v57 = vadd.f32 %v7360_v32, %v7171_v9  ;;  %v13976_v9 = vld [vmem:[#allocation4 + $0x111] sm:$0xff] }
 0x6f6   : > { %v7636_v58 = vpop.f32.mrf.mxu3 }
 0x6f7   : > { %v7728_v7 = vadd.f32 %v7636_v58, %v7449_v15  ;;  %v7919_v49 = vpop.f32.mrf.mxu0 }
 0x6f8   : > { %9807 = vmatmul.msk.f32.gmra.mxu1 %vm6037_vm7, %v13799_v52 }
 0x6f9   : > { %v13962_v34 = vadd.f32 %v7916_v22, %v7728_v7  ;;  %9720 = vmatmul.msk.f32.gmra.mxu2 %vm6037_vm7, %v13958_v27 }
 0x6fa   : > { %9785 = vmatmul.msk.f32.gmra.mxu0 %vm6037_vm7, %v13488_v11  ;;  %v13990_v7 = vpop.f32.mrf.mxu1 }
 0x6fb   : > { %9752 = vmatmul.msk.f32.gmra.mxu3 %vm6037_vm7, %v13966_v48 }
 0x6fc   : > { %v7363_v41 = vpop.f32.mrf.mxu2 }
 0x6fd   : > { %v7451_v52 = vadd.f32 %v7363_v41, %v7172_v51 }
 0x6fe   : > { %v7639_v15 = vpop.f32.mrf.mxu3 }
 0x6ff   : > { %v7729_v22 = vadd.f32 %v7639_v15, %v7450_v57  ;;  %v7922_v58 = vpop.f32.mrf.mxu0 }
 0x700   : > { %9808 = vmatmul.msk.f32.gmra.mxu1 %vm6037_vm7, %v13816_v44 }
 0x701   : > { %v13980_v32 = vadd.f32 %v7919_v49, %v7729_v22  ;;  %9721 = vmatmul.msk.f32.gmra.mxu2 %vm6037_vm7, %v13976_v9 }
 0x702   : > { %9786 = vmatmul.msk.f32.gmra.mxu0 %vm6037_vm7, %v13515_v21 }
 0x703   : > { %9753 = vmatmul.msk.f32.gmra.mxu3 %vm6037_vm7, %v13464_v38 }
 0x704   : > { %v7366_v11 = vpop.f32.mrf.mxu2 }
 0x705   : > { %v7452_v0 = vadd.f32 %v7366_v11, %v7173_v63  ;;  %v14912_v11 = vld [vmem:[#allocation67_spill] sm:$0xff] }
 0x706   : > { %v7642_v57 = vpop.f32.mrf.mxu3 }
 0x707   : > { %v7730_v44 = vadd.f32 %v7642_v57, %v7451_v52  ;;  %v7925_v38 = vpop.f32.mrf.mxu0  ;;  %v14914_v57 = vld [vmem:[#allocation32_spill] sm:$0xff] }
 0x708   : > { %9809 = vmatmul.msk.f32.gmra.mxu1 %vm6037_vm7, %v13829_v20  ;;  %v14004_v20 = vpop.f32.mrf.mxu1 }
 0x709   : > { %v13994_v49 = vadd.f32 %v7922_v58, %v7730_v44  ;;  %9722 = vmatmul.msk.f32.gmra.mxu2 %vm6037_vm7, %v13480_v36 }
 0x70a   : > { %9787 = vmatmul.msk.f32.gmra.mxu0 %vm6037_vm7, %v13542_v24 }
 0x70b   : > { %9754 = vmatmul.msk.f32.gmra.mxu3 %vm6037_vm7, %v13490_v42 }
 0x70c   : > { %v7369_v21 = vpop.f32.mrf.mxu2 }
 0x70d   : > { %v7453_v28 = vadd.f32 %v7369_v21, %v7174_v53 }
 0x70e   : > { %v7645_v51 = vpop.f32.mrf.mxu3 }
 0x70f   : > { %v7731_v41 = vadd.f32 %v7645_v51, %v7452_v0  ;;  %v7928_v24 = vpop.f32.mrf.mxu0  ;;  %v14913_v0 = vld [vmem:[#allocation59_spill] sm:$0xff]  ;;  %v14917_v51 = vld [vmem:[#allocation57_spill] sm:$0xff] }
 0x710   : > { %9810 = vmatmul.msk.f32.gmra.mxu1 %vm6037_vm7, %v13844_v13  ;;  %v7179_v44 = vadd.f32 %v14914_v57, %v14913_v0  ;;  %v14929_v0 = vld [vmem:[#allocation70_spill] sm:$0xff]  ;;  %v14930_v57 = vld [vmem:[#allocation76_spill] sm:$0xff] }
 0x711   : > { %v14008_v36 = vadd.f32 %v7925_v38, %v7731_v41  ;;  %9723 = vmatmul.msk.f32.gmra.mxu2 %vm6037_vm7, %v13506_v39  ;;  %v14024_v39 = vpop.f32.mrf.mxu1  ;;  %v14918_v41 = vld [vmem:[#allocation41_spill] sm:$0xff] }
 0x712   : > { %9788 = vmatmul.msk.f32.gmra.mxu0 %vm6037_vm7, %v13565_v29 }
 0x713   : > { %9755 = vmatmul.msk.f32.gmra.mxu3 %vm6037_vm7, %v13517_v37 }
 0x714   : > { %v7372_v42 = vpop.f32.mrf.mxu2 }
 0x715   : > { %v7454_v56 = vadd.f32 %v7372_v42, %v7175_v45  ;;  %v14919_v45 = vld [vmem:[#allocation64_spill] sm:$0xff] }
 0x716   : > { %v7648_v52 = vpop.f32.mrf.mxu3  ;;  %v7180_v42 = vadd.f32 %v14919_v45, %v14918_v41  ;;  %v7790_v41 = vld [vmem:[#allocation4 + $0x1a0] sm:$0xff] }
 0x717   : > { %v7732_v15 = vadd.f32 %v7648_v52, %v7453_v28  ;;  %v7931_v22 = vpop.f32.mrf.mxu0  ;;  %v14916_v28 = vld [vmem:[#allocation66_spill] sm:$0xff]  ;;  %v14920_v52 = vld [vmem:[#allocation48_spill] sm:$0xff]  ;;  %v14931_v45 = vld [vmem:[#allocation71_spill] sm:$0xff] }
 0x718   : > { %9811 = vmatmul.msk.f32.gmra.mxu1 %vm6037_vm7, %v13857_v8 }
 0x719   : > { %v14020_v13 = vadd.f32 %v7928_v24, %v7732_v15  ;;  %9724 = vmatmul.msk.f32.gmra.mxu2 %vm6037_vm7, %v13533_v46  ;;  %v14921_v15 = vld [vmem:[#allocation68_spill] sm:$0xff] }
 0x71a   : > { %9789 = vmatmul.msk.f32.gmra.mxu0 %vm6037_vm7, %v13589_v17 }
 0x71b   : > { %9756 = vmatmul.msk.f32.gmra.mxu3 %vm6037_vm7, %v13544_v6  ;;  %v14046_v6 = vpop.f32.mrf.mxu1 }
 0x71c   : > { %v7375_v37 = vpop.f32.mrf.mxu2 }
 0x71d   : > { %v14032_v29 = vadd.f32 %v7375_v37, %v7176_v31  ;;  %v14922_v31 = vld [vmem:[#allocation35_spill] sm:$0xff] }
 0x71e   : > { %v7651_v10 = vpop.f32.mrf.mxu3  ;;  %v14923_v37 = vld [vmem:[#allocation39_spill] sm:$0xff] }
 0x71f   : > { %v7733_v8 = vadd.f32 %v7651_v10, %v7454_v56  ;;  %v14924_v10 = vld [vmem:[#allocation60_spill] sm:$0xff] }
 0x720   : > { %9812 = vmatmul.msk.f32.gmra.mxu1 %vm6037_vm7, %v13872_v16  ;;  %v14909_v16 = vld [vmem:[#allocation45_spill] sm:$0xff] }
 0x721   : > { %v14036_v46 = vadd.f32 %v7931_v22, %v7733_v8  ;;  %9725 = vmatmul.msk.f32.gmra.mxu2 %vm6037_vm7, %v13557_v54  ;;  %v14906_v54 = vld [vmem:[#allocation55_spill] sm:$0xff]  ;;  %v7181_v8 = vadd.f32 %v14924_v10, %v14923_v37  ;;  %v14933_v10 = vld [vmem:[#allocation46_spill] sm:$0xff] }
 0x722   : > { %9790 = vmatmul.msk.f32.gmra.mxu0 %vm6037_vm7, %v13611_v59  ;;  %v14908_v59 = vld [vmem:[#allocation54_spill] sm:$0xff] }
 0x723   : > { %9757 = vmatmul.msk.f32.gmra.mxu3 %vm6037_vm7, %v13567_v4  ;;  %v14907_v4 = vld [vmem:[#allocation65_spill] sm:$0xff]  ;;  %v7178_v19 = vadd.f32 %v14909_v16, %v14908_v59  ;;  %v14062_v63 = vpop.f32.mrf.mxu1 }
 0x724   : > { %v7378_v17 = vpop.f32.mrf.mxu2  ;;  %v14928_v59 = vld [vmem:[#allocation73_spill] sm:$0xff] }
 0x725   : > { %v14048_v5 = vadd.f32 %v7378_v17, %v7177_v2  ;;  %v14104_v17 = vld [vmem:[#allocation4 + $0x181] sm:$0xff] }
 0x728   : > { %9813 = vmatmul.msk.f32.gmra.mxu1 %vm6037_vm7, %v13888_v23  ;;  %v14910_v23 = vld [vmem:[#allocation61_spill] sm:$0xff] }
 0x729   : > { %9726 = vmatmul.msk.f32.gmra.mxu2 %vm6037_vm7, %v13581_v30  ;;  %v14911_v30 = vld [vmem:[#allocation63_spill] sm:$0xff] }
 0x72a   : > { %9791 = vmatmul.msk.f32.gmra.mxu0 %vm6037_vm7, %v14907_v4  ;;  %v14927_v4 = vld [vmem:[#allocation53_spill] sm:$0xff] }
 0x72b   : > { %9758 = vmatmul.msk.f32.gmra.mxu3 %vm6037_vm7, %v14906_v54  ;;  %v14076_v21 = vpop.f32.mrf.mxu1  ;;  %v14926_v54 = vld [vmem:[#allocation36_spill] sm:$0xff]  ;;  %v7182_v16 = vadd.f32 %v14928_v59, %v14927_v4  ;;  %v8060_v4 = vld [vmem:[#allocation4 + $0x139] sm:$0xff] }
 0x72c   : > { %v7381_v12 = vpop.f32.mrf.mxu2 }
 0x72d   : > { %v14060_v58 = vadd.f32 %v7381_v12, %v7178_v19 }
 0x730   : > { %9814 = vmatmul.msk.f32.gmra.mxu1 %vm6037_vm7, %v13906_v35  ;;  %v14915_v35 = vld [vmem:[#allocation38_spill] sm:$0xff] }
 0x731   : > { %9727 = vmatmul.msk.f32.gmra.mxu2 %vm6037_vm7, %v14910_v23 }
 0x732   : > { %9792 = vmatmul.msk.f32.gmra.mxu0 %vm6037_vm7, %v14912_v11  ;;  %v7789_v11 = vld [vmem:[#allocation4 + $0x198] sm:$0xff] }
 0x733   : > { %9759 = vmatmul.msk.f32.gmra.mxu3 %vm6037_vm7, %v14911_v30  ;;  %v14120_v30 = vld [vmem:[#allocation4 + $0x189] sm:$0xff] }
 0x734   : > { %v7384_v53 = vpop.f32.mrf.mxu2 }
 0x735   : > { %v14074_v38 = vadd.f32 %v7384_v53, %v7179_v44  ;;  %v7183_v44 = vadd.f32 %v14930_v57, %v14929_v0  ;;  %v8061_v57 = vld [vmem:[#allocation4 + $0x141] sm:$0xff] }
 0x738   : > { %9815 = vmatmul.msk.f32.gmra.mxu1 %vm6037_vm7, %v13924_v3  ;;  %v14094_v3 = vpop.f32.mrf.mxu1 }
 0x739   : > { %9728 = vmatmul.msk.f32.gmra.mxu2 %vm6037_vm7, %v14915_v35 }
 0x73a   : > { %9793 = vmatmul.msk.f32.gmra.mxu0 %vm6037_vm7, %v14917_v51  ;;  %v14138_v51 = vld [vmem:[#allocation4 + $0x18a] sm:$0xff] }
 0x73b   : > { %9760 = vmatmul.msk.f32.gmra.mxu3 %vm6037_vm7, %v14916_v28 }
 0x73c   : > { %v7387_v24 = vpop.f32.mrf.mxu2 }
 0x73d   : > { %v14088_v56 = vadd.f32 %v7387_v24, %v7180_v42  ;;  %v14932_v42 = vld [vmem:[#allocation58_spill] sm:$0xff] }
 0x73e   : > { %v7184_v24 = vadd.f32 %v13867_v25, %v14932_v42  ;;  %v14935_v25 = vld [vmem:[#allocation31_spill] sm:$0xff]  ;;  %v8062_v42 = vld [vmem:[#allocation4 + $0x151] sm:$0xff] }
 0x740   : > { %9816 = vmatmul.msk.f32.gmra.mxu1 %vm6037_vm7, %v13940_v61  ;;  %v14925_v61 = vld [vmem:[#allocation69_spill] sm:$0xff]  ;;  %v14116_v19 = vpop.f32.mrf.mxu1 }
 0x741   : > { %9729 = vmatmul.msk.f32.gmra.mxu2 %vm6037_vm7, %v14920_v52 }
 0x742   : > { %9794 = vmatmul.msk.f32.gmra.mxu0 %vm6037_vm7, %v14922_v31  ;;  %v8059_v31 = vld [vmem:[#allocation4 + $0x129] sm:$0xff] }
 0x743   : > { %9761 = vmatmul.msk.f32.gmra.mxu3 %vm6037_vm7, %v14921_v15 }
 0x744   : > { %v7390_v22 = vpop.f32.mrf.mxu2 }
 0x745   : > { %v14102_v2 = vadd.f32 %v7390_v22, %v7181_v8  ;;  %v14934_v8 = vld [vmem:[#allocation40_spill] sm:$0xff] }
 0x746   : > { %v7185_v22 = vadd.f32 %v13886_v1, %v14934_v8  ;;  %v14937_v1 = vld [vmem:[#allocation42_spill] sm:$0xff] }
 0x748   : > { %9817 = vmatmul.msk.f32.gmra.mxu1 %vm6037_vm7, %v13958_v27  ;;  %v14126_v27 = vld [vmem:[#allocation4 + $0x182] sm:$0xff]  ;;  %v14135_v28 = vpop.f32.mrf.mxu1 }
 0x749   : > { %9730 = vmatmul.msk.f32.gmra.mxu2 %vm6037_vm7, %v14104_v17 }
 0x74a   : > { %9795 = vmatmul.msk.f32.gmra.mxu0 %vm6037_vm7, %v14926_v54 }
 0x74b   : > { %9762 = vmatmul.msk.f32.gmra.mxu3 %vm6037_vm7, %v14925_v61 }
 0x74c   : > { %v7393_v12 = vpop.f32.mrf.mxu2 }
 0x74d   : > { %v14118_v23 = vadd.f32 %v7393_v12, %v7182_v16  ;;  %v14936_v16 = vld [vmem:[#allocation62_spill] sm:$0xff] }
 0x74e   : > { %v7186_v12 = vadd.f32 %v13904_v26, %v14936_v16  ;;  %v14939_v26 = vld [vmem:[#allocation51_spill] sm:$0xff] }
 0x750   : > { %9818 = vmatmul.msk.f32.gmra.mxu1 %vm6037_vm7, %v13976_v9  ;;  %v8058_v9 = vld [vmem:[#allocation4 + $0x121] sm:$0xff]  ;;  %v14149_v37 = vpop.f32.mrf.mxu1 }
 0x751   : > { %9731 = vmatmul.msk.f32.gmra.mxu2 %vm6037_vm7, %v14120_v30 }
 0x752   : > { %9796 = vmatmul.msk.f32.gmra.mxu0 %vm6037_vm7, %v7789_v11 }
 0x753   : > { %9763 = vmatmul.msk.f32.gmra.mxu3 %vm6037_vm7, %v14126_v27 }
 0x754   : > { %v7396_v53 = vpop.f32.mrf.mxu2 }
 0x755   : > { %v14133_v35 = vadd.f32 %v7396_v53, %v7183_v44  ;;  %v14938_v44 = vld [vmem:[#allocation56_spill] sm:$0xff] }
 0x756   : > { %v7187_v53 = vadd.f32 %v13922_v33, %v14938_v44  ;;  %v8063_v33 = vld [vmem:[#allocation4 + $0x159] sm:$0xff] }
 0x758   : > { %9819 = vmatmul.msk.f32.gmra.mxu1 %vm6037_vm7, %v8058_v9  ;;  %v14161_v59 = vpop.f32.mrf.mxu1 }
 0x759   : > { %9832 = vmatmul.msk.f32.vlgmr.msra.gmra.mxu2 %vm6037_vm7, %v14931_v45 }
 0x75a   : > { %9797 = vmatmul.msk.f32.gmra.mxu0 %vm6037_vm7, %v7790_v41 }
 0x75b   : > { %9764 = vmatmul.msk.f32.gmra.mxu3 %vm6037_vm7, %v14138_v51 }
 0x75c   : > { %v7399_v52 = vpop.f32.mrf.mxu2 }
 0x75d   : > { %v14147_v15 = vadd.f32 %v7399_v52, %v7184_v24  ;;  %v14940_v24 = vld [vmem:[#allocation44_spill] sm:$0xff] }
 0x75e   : > { %v7188_v52 = vadd.f32 %v13950_v40, %v14940_v24  ;;  %v14943_v40 = vld [vmem:[#allocation37_spill] sm:$0xff] }
 0x760   : > { %9820 = vmatmul.msk.f32.gmra.mxu1 %vm6037_vm7, %v8059_v31  ;;  %v14172_v9 = vpop.f32.mrf.mxu1 }
 0x761   : > { %9833 = vmatmul.msk.f32.gmra.mxu2 %vm6037_vm7, %v14933_v10 }
 0x764   : > { %v7402_v61 = vpop.f32.mrf.mxu2 }
 0x765   : > { %v14156_v54 = vadd.f32 %v7402_v61, %v7185_v22  ;;  %v14941_v22 = vld [vmem:[#allocation47_spill] sm:$0xff]  ;;  %v14942_v61 = vld [vmem:[#allocation33_spill] sm:$0xff] }
 0x768   : > { %9821 = vmatmul.msk.f32.gmra.mxu1 %vm6037_vm7, %v8060_v4  ;;  %v14183_v8 = vpop.f32.mrf.mxu1  ;;  %v7189_v4 = vadd.f32 %v13974_v18, %v14942_v61  ;;  %v14945_v18 = vld [vmem:[#allocation52_spill] sm:$0xff] }
 0x769   : > { %9834 = vmatmul.msk.f32.gmra.mxu2 %vm6037_vm7, %v14935_v25 }
 0x76c   : > { %v7405_v11 = vpop.f32.mrf.mxu2 }
 0x76d   : > { %v14165_v0 = vadd.f32 %v7405_v11, %v7186_v12  ;;  %v8064_v12 = vld [vmem:[#allocation4 + $0x169] sm:$0xff] }
 0x770   : > { %9822 = vmatmul.msk.f32.gmra.mxu1 %vm6037_vm7, %v8061_v57  ;;  %v14192_v11 = vpop.f32.mrf.mxu1  ;;  %v14944_v57 = vld [vmem:[#allocation49_spill] sm:$0xff] }
 0x771   : > { %9835 = vmatmul.msk.f32.gmra.mxu2 %vm6037_vm7, %v14937_v1  ;;  %v7190_v1 = vadd.f32 %v13990_v7, %v14944_v57  ;;  %v14947_v7 = vld [vmem:[#allocation72_spill] sm:$0xff] }
 0x774   : > { %v7408_v41 = vpop.f32.mrf.mxu2 }
 0x775   : > { %v14174_v45 = vadd.f32 %v7408_v41, %v7187_v53  ;;  %v8065_v41 = vld [vmem:[#allocation4 + $0x171] sm:$0xff] }
 0x778   : > { %9823 = vmatmul.msk.f32.gmra.mxu1 %vm6037_vm7, %v8062_v42  ;;  %v14204_v42 = vpop.f32.mrf.mxu1 }
 0x779   : > { %9836 = vmatmul.msk.f32.gmra.mxu2 %vm6037_vm7, %v14939_v26  ;;  %v14946_v26 = vld [vmem:[#allocation50_spill] sm:$0xff] }
 0x77a   : > { %v7191_v24 = vadd.f32 %v14004_v20, %v14946_v26  ;;  %v14949_v20 = vld [vmem:[#allocation75_spill] sm:$0xff] }
 0x77c   : > { %v7411_v31 = vpop.f32.mrf.mxu2 }
 0x77d   : > { %v14181_v10 = vadd.f32 %v7411_v31, %v7188_v52 }
 0x780   : > { %9824 = vmatmul.msk.f32.gmra.mxu1 %vm6037_vm7, %v8063_v33  ;;  %v14948_v33 = vld [vmem:[#allocation43_spill] sm:$0xff]  ;;  %v14216_v61 = vpop.f32.mrf.mxu1 }
 0x781   : > { %9837 = vmatmul.msk.f32.gmra.mxu2 %vm6037_vm7, %v14941_v22  ;;  %v7192_v22 = vadd.f32 %v14024_v39, %v14948_v33  ;;  %v8068_v39 = vld [vmem:[#allocation4 + $0x199] sm:$0xff] }
 0x784   : > { %v7414_v25 = vpop.f32.mrf.mxu2 }
 0x785   : > { %v14190_v16 = vadd.f32 %v7414_v25, %v7189_v4 }
 0x788   : > { %9825 = vmatmul.msk.f32.gmra.mxu1 %vm6037_vm7, %v8064_v12  ;;  %v14950_v12 = vld [vmem:[#allocation34_spill] sm:$0xff] }
 0x789   : > { %9838 = vmatmul.msk.f32.gmra.mxu2 %vm6037_vm7, %v14943_v40 }
 0x78c   : > { %v7417_v44 = vpop.f32.mrf.mxu2 }
 0x78d   : > { %v14199_v53 = vadd.f32 %v7417_v44, %v7190_v1  ;;  %v14228_v1 = vpop.f32.mrf.mxu1  ;;  %v14951_v44 = vld [vmem:[#allocation78_spill] sm:$0xff] }
 0x790   : > { %9826 = vmatmul.msk.f32.gmra.mxu1 %vm6037_vm7, %v8065_v41  ;;  %v14952_v41 = vld [vmem:[#allocation74_spill] sm:$0xff] }
 0x791   : > { %9839 = vmatmul.msk.f32.gmra.mxu2 %vm6037_vm7, %v14945_v18 }
 0x794   : > { %v7420_v52 = vpop.f32.mrf.mxu2 }
 0x795   : > { %v14208_v31 = vadd.f32 %v7420_v52, %v7191_v24  ;;  %v8069_v24 = vld [vmem:[#allocation4 + $0x1a1] sm:$0xff]  ;;  %v14237_v52 = vpop.f32.mrf.mxu1 }
 0x798   : > { %9827 = vmatmul.msk.f32.gmra.mxu1 %vm6037_vm7, %v14104_v17  ;;  %v7193_v17 = vadd.f32 %v14046_v6, %v14950_v12  ;;  %v14953_v6 = vld [vmem:[#allocation80_spill] sm:$0xff] }
 0x799   : > { %9840 = vmatmul.msk.f32.gmra.mxu2 %vm6037_vm7, %v14947_v7  ;;  %v14954_v7 = vld [vmem:[#allocation77_spill] sm:$0xff] }
 0x79a   : > { %v7195_v33 = vadd.f32 %v14076_v21, %v14954_v7 }
 0x79c   : > { %v7423_v4 = vpop.f32.mrf.mxu2 }
 0x79d   : > { %v14218_v25 = vadd.f32 %v7423_v4, %v7192_v22 }
 0x7a0   : > { %9828 = vmatmul.msk.f32.gmra.mxu1 %vm6037_vm7, %v14120_v30  ;;  %v7194_v30 = vadd.f32 %v14062_v63, %v14952_v41  ;;  %v14956_v63 = vld [vmem:[#allocation79_spill] sm:$0xff] }
 0x7a1   : > { %9841 = vmatmul.msk.f32.gmra.mxu2 %vm6037_vm7, %v14949_v20  ;;  %v14955_v20 = vld [vmem:[#allocation82_spill] sm:$0xff]  ;;  %v7196_v12 = vadd.f32 %v14094_v3, %v14956_v63 }
 0x7a4   : > { %v7426_v40 = vpop.f32.mrf.mxu2 }
 0x7a5   : > { %v14226_v57 = vadd.f32 %v7426_v40, %v7193_v17 }
 0x7a8   : > { %9829 = vmatmul.msk.f32.gmra.mxu1 %vm6037_vm7, %v8068_v39  ;;  %v14957_v39 = vld [vmem:[#allocation81_spill] sm:$0xff] }
 0x7a9   : > { %9842 = vmatmul.msk.f32.gmra.mxu2 %vm6037_vm7, %v14951_v44  ;;  %v7197_v44 = vadd.f32 %v14116_v19, %v14957_v39  ;;  %v14302_v39 = vpop.f32.mrf.mxu1 }
 0x7ac   : > { %v7429_v18 = vpop.f32.mrf.mxu2 }
 0x7ad   : > { %v14235_v26 = vadd.f32 %v7429_v18, %v7194_v30  ;;  %v14958_v30 = vld [vmem:[#allocation83_spill] sm:$0xff] }
 0x7ae   : > { %v7198_v18 = vadd.f32 %v14135_v28, %v14958_v30  ;;  %v14274_v28 = vld [vmem:[#allocation19] ss:$0 sm:$0xff] }
 0x7b0   : > { %9830 = vmatmul.msk.f32.gmra.mxu1 %vm6037_vm7, %v8069_v24 }
 0x7b1   : > { %9843 = vmatmul.msk.f32.gmra.mxu2 %vm6037_vm7, %v14953_v6 }
 0x7b4   : > { %v7432_v22 = vpop.f32.mrf.mxu2 }
 0x7b5   : > { %v14244_v4 = vadd.f32 %v7432_v22, %v7195_v33 }
 0x7b9   : > { %9844 = vmatmul.msk.f32.gmra.mxu2 %vm6037_vm7, %v14955_v20 }
 0x7bc   : > { %v7435_v17 = vpop.f32.mrf.mxu2 }
 0x7bd   : > { %v14250_v40 = vadd.f32 %v7435_v17, %v7196_v12 }
 0x7c1   : > { %9845 = vmatmul.msk.f32.gmra.mxu2 %vm6037_vm7, %v13896_v60  ;;  %v7199_v60 = vadd.f32 %v14149_v37, %v13910_v62  ;;  %v14279_v62 = vld [vmem:[#allocation22] ss:$0 sm:$0xff] }
 0x7c4   : > { %v7438_v41 = vpop.f32.mrf.mxu2 }
 0x7c5   : > { %v14256_v21 = vadd.f32 %v7438_v41, %v7197_v44  ;;  %v8287_v44 = vadd.f32 %v14183_v8, %v13962_v34  ;;  %v8288_v34 = vadd.f32 %v14192_v11, %v13980_v32  ;;  %v8289_v32 = vadd.f32 %v14204_v42, %v13994_v49 }
 0x7c6   : > { %v8290_v42 = vadd.f32 %v14216_v61, %v14008_v36  ;;  %v8291_v36 = vadd.f32 %v14228_v1, %v14020_v13  ;;  %v8292_v1 = vadd.f32 %v14237_v52, %v14036_v46 }
 0x7c9   : > { %9846 = vmatmul.msk.f32.gmra.mxu2 %vm6037_vm7, %v13914_v14  ;;  %v8285_v14 = vadd.f32 %v14161_v59, %v13928_v50  ;;  %v14286_v50 = vpop.f32.mrf.mxu3 }
 0x7cc   : > { %v7441_v24 = vpop.f32.mrf.mxu2 }
 0x7cd   : > { %v14262_v3 = vadd.f32 %v7441_v24, %v7198_v18 }
 0x7d1   : > { %9847 = vmatmul.msk.f32.gmra.mxu2 %vm6037_vm7, %v13932_v47  ;;  %v14277_v47 = vld [vmem:[#allocation21] ss:$0 sm:$0xff] }
 0x7d4   : > { %v7444_v19 = vpop.f32.mrf.mxu2 }
 0x7d5   : > { %v14268_v6 = vadd.f32 %v7444_v19, %v7199_v60  ;;  %v14308_v60 = vpop.f32.mrf.mxu3 }
 0x7d9   : > { %9848 = vmatmul.msk.f32.gmra.mxu2 %vm6037_vm7, %v13948_v55  ;;  %v8286_v55 = vadd.f32 %v14172_v9, %v13944_v43  ;;  %v14299_v9 = vpop.f32.mrf.mxu0 }
 0x7dc   : > { %v8468_v7 = vpop.f32.mrf.mxu2 }
 0x7dd   : > { %v8564_v33 = vadd.f32 %v8468_v7, %v8285_v14  ;;  %v8336_v14 = vld [vmem:[#allocation4 + $0x112] sm:$0xff] }
 0x7df   : > { %v8600_v22 = vadd.f32 %v14274_v28, %v8564_v33 }
 0x7e1   : > { %v8632_v20 = vmax.f32 %v8600_v22, 0.0  ;;  %9849 = vmatmul.msk.f32.gmra.mxu2 %vm6037_vm7, %v13966_v48  ;;  %v8335_v48 = vld [vmem:[#allocation4 + $0x10a] sm:$0xff]  ;;  %v14314_v33 = vpop.f32.mrf.mxu0  ;;  %v14319_v22 = vpop.f32.mrf.mxu1 }
 0x7e3   : > { %v8668_v37 = vmul.f32 %v14277_v47, %v8632_v20 }
 0x7e4   : > { %v8471_v59 = vpop.f32.mrf.mxu2 }
 0x7e5   : > { %v8704_v63 = vadd.f32 %v14279_v62, %v8668_v37  ;;  %v8565_v12 = vadd.f32 %v8471_v59, %v8286_v55 }
 0x7e7   : > { %8736 = vst.msk [vmem:[%s14293_s18] sm:$0xff] %vm6037_vm7, %v8704_v63  ;;  %v8601_v43 = vadd.f32 %v14274_v28, %v8565_v12  ;;  %v14325_v63 = vpop.f32.mrf.mxu3  ;;  %v8337_v12 = vld [vmem:[#allocation4 + $0x122] sm:$0xff] }
 0x7e9   : > { %v8633_v17 = vmax.f32 %v8601_v43, 0.0  ;;  %9850 = vmatmul.msk.f32.gmra.mxu2 %vm6037_vm7, %v8335_v48 }
 0x7eb   : > { %v8669_v41 = vmul.f32 %v14277_v47, %v8633_v17  ;;  %v14331_v17 = vpop.f32.mrf.mxu0 }
 0x7ec   : > { %v8474_v30 = vpop.f32.mrf.mxu2 }
 0x7ed   : > { %v8705_v18 = vadd.f32 %v14279_v62, %v8669_v41  ;;  %v8566_v24 = vadd.f32 %v8474_v30, %v8287_v44  ;;  %v14334_v30 = vpop.f32.mrf.mxu1 }
 0x7ef   : > { %8737 = vst.msk [vmem:[%s14293_s18 + $0x8] sm:$0xff] %vm6037_vm7, %v8705_v18  ;;  %v8602_v19 = vadd.f32 %v14274_v28, %v8566_v24  ;;  %v8338_v24 = vld [vmem:[#allocation4 + $0x12a] sm:$0xff]  ;;  %v14340_v49 = vpop.f32.mrf.mxu3 }
 0x7f1   : > { %v8634_v7 = vmax.f32 %v8602_v19, 0.0  ;;  %9851 = vmatmul.msk.f32.gmra.mxu2 %vm6037_vm7, %v8336_v14 }
 0x7f3   : > { %v8670_v8 = vmul.f32 %v14277_v47, %v8634_v7 }
 0x7f4   : > { %v8477_v20 = vpop.f32.mrf.mxu2 }
 0x7f5   : > { %v8706_v55 = vadd.f32 %v14279_v62, %v8670_v8  ;;  %v8567_v37 = vadd.f32 %v8477_v20, %v8288_v34  ;;  %v14346_v20 = vpop.f32.mrf.mxu0 }
 0x7f7   : > { %8738 = vst.msk [vmem:[%s14293_s18 + $0x10] sm:$0xff] %vm6037_vm7, %v8706_v55  ;;  %v8603_v59 = vadd.f32 %v14274_v28, %v8567_v37  ;;  %v14351_v37 = vpop.f32.mrf.mxu1 }
 0x7f9   : > { %v8635_v43 = vmax.f32 %v8603_v59, 0.0  ;;  %9852 = vmatmul.msk.f32.gmra.mxu2 %vm6037_vm7, %v8337_v12  ;;  %v8339_v59 = vld [vmem:[#allocation4 + $0x13a] sm:$0xff] }
 0x7fb   : > { %v8671_v11 = vmul.f32 %v14277_v47, %v8635_v43  ;;  %v14357_v43 = vpop.f32.mrf.mxu3 }
 0x7fc   : > { %v8480_v48 = vpop.f32.mrf.mxu2 }
 0x7fd   : > { %v8707_v44 = vadd.f32 %v14279_v62, %v8671_v11  ;;  %v8568_v41 = vadd.f32 %v8480_v48, %v8289_v32 }
 0x7ff   : > { %8739 = vst.msk [vmem:[%s14293_s18 + $0x18] sm:$0xff] %vm6037_vm7, %v8707_v44  ;;  %v8604_v18 = vadd.f32 %v14274_v28, %v8568_v41  ;;  %v8340_v41 = vld [vmem:[#allocation4 + $0x142] sm:$0xff]  ;;  %v14366_v13 = vpop.f32.mrf.mxu1 }
 0x801   : > { %v8636_v19 = vmax.f32 %v8604_v18, 0.0  ;;  %9853 = vmatmul.msk.f32.gmra.mxu2 %vm6037_vm7, %v8338_v24  ;;  %v14363_v18 = vpop.f32.mrf.mxu0 }
 0x803   : > { %v8672_v14 = vmul.f32 %v14277_v47, %v8636_v19 }
 0x804   : > { %v8483_v7 = vpop.f32.mrf.mxu2 }
 0x805   : > { %v8708_v34 = vadd.f32 %v14279_v62, %v8672_v14  ;;  %v8569_v8 = vadd.f32 %v8483_v7, %v8290_v42  ;;  %v7734_v14 = vadd.f32 %v14286_v50, %v14032_v29 }
 0x807   : > { %8740 = vst.msk [vmem:[%s14293_s18 + $0x20] sm:$0xff] %vm6037_vm7, %v8708_v34  ;;  %v8605_v55 = vadd.f32 %v14274_v28, %v8569_v8  ;;  %v14374_v8 = vpop.f32.mrf.mxu3 }
 0x809   : > { %v8637_v12 = vmax.f32 %v8605_v55, 0.0  ;;  %9854 = vmatmul.msk.f32.gmra.mxu2 %vm6037_vm7, %v8339_v59  ;;  %v8341_v59 = vld [vmem:[#allocation4 + $0x152] sm:$0xff]  ;;  %v14381_v52 = vpop.f32.mrf.mxu0 }
 0x80b   : > { %v8673_v61 = vmul.f32 %v14277_v47, %v8637_v12  ;;  %v8014_v12 = vadd.f32 %v14299_v9, %v7734_v14 }
 0x80c   : > { %v8486_v32 = vpop.f32.mrf.mxu2 }
 0x80d   : > { %v8709_v11 = vadd.f32 %v14279_v62, %v8673_v61  ;;  %v8570_v48 = vadd.f32 %v8486_v32, %v8291_v36  ;;  %v8293_v29 = vadd.f32 %v14302_v39, %v8014_v12  ;;  %v14385_v36 = vpop.f32.mrf.mxu1  ;;  %v7735_v32 = vadd.f32 %v14308_v60, %v14048_v5 }
 0x80f   : > { %8741 = vst.msk [vmem:[%s14293_s18 + $0x28] sm:$0xff] %vm6037_vm7, %v8709_v11  ;;  %v8606_v44 = vadd.f32 %v14274_v28, %v8570_v48  ;;  %v8015_v39 = vadd.f32 %v14314_v33, %v7735_v32 }
 0x811   : > { %v8638_v24 = vmax.f32 %v8606_v44, 0.0  ;;  %9855 = vmatmul.msk.f32.gmra.mxu2 %vm6037_vm7, %v8340_v41  ;;  %v14393_v44 = vpop.f32.mrf.mxu3  ;;  %v8342_v41 = vld [vmem:[#allocation4 + $0x15a] sm:$0xff] }
 0x813   : > { %v8674_v19 = vmul.f32 %v14277_v47, %v8638_v24 }
 0x814   : > { %v8489_v42 = vpop.f32.mrf.mxu2 }
 0x815   : > { %v8710_v7 = vadd.f32 %v14279_v62, %v8674_v19  ;;  %v8571_v34 = vadd.f32 %v8489_v42, %v8292_v1  ;;  %v8294_v1 = vadd.f32 %v14319_v22, %v8015_v39  ;;  %v7736_v19 = vadd.f32 %v14325_v63, %v14060_v58  ;;  %v14401_v42 = vpop.f32.mrf.mxu0 }
 0x817   : > { %8742 = vst.msk [vmem:[%s14293_s18 + $0x30] sm:$0xff] %vm6037_vm7, %v8710_v7  ;;  %v8607_v55 = vadd.f32 %v14274_v28, %v8571_v34  ;;  %v14404_v34 = vpop.f32.mrf.mxu1  ;;  %v8016_v22 = vadd.f32 %v14331_v17, %v7736_v19 }
 0x819   : > { %v8639_v46 = vmax.f32 %v8607_v55, 0.0  ;;  %9856 = vmatmul.msk.f32.gmra.mxu2 %vm6037_vm7, %v8341_v59  ;;  %v8343_v55 = vld [vmem:[#allocation4 + $0x16a] sm:$0xff]  ;;  %v7675_v12 = vpop.f32.mrf.mxu3  ;;  %v8295_v58 = vadd.f32 %v14334_v30, %v8016_v22 }
 0x81b   : > { %v8675_v50 = vmul.f32 %v14277_v47, %v8639_v46 }
 0x81c   : > { %v8492_v61 = vpop.f32.mrf.mxu2 }
 0x81d   : > { %v8711_v11 = vadd.f32 %v14279_v62, %v8675_v50  ;;  %v8572_v48 = vadd.f32 %v8492_v61, %v8293_v29  ;;  %v7737_v29 = vadd.f32 %v14340_v49, %v14074_v38  ;;  %v7955_v32 = vpop.f32.mrf.mxu0 }
 0x81f   : > { %8743 = vst.msk [vmem:[%s14293_s18 + $0x38] sm:$0xff] %vm6037_vm7, %v8711_v11  ;;  %v8608_v9 = vadd.f32 %v14274_v28, %v8572_v48  ;;  %v8234_v11 = vpop.f32.mrf.mxu1  ;;  %v8344_v48 = vld [vmem:[#allocation4 + $0x172] sm:$0xff] }
 0x821   : > { %v8640_v24 = vmax.f32 %v8608_v9, 0.0  ;;  %9857 = vmatmul.msk.f32.gmra.mxu2 %vm6037_vm7, %v8342_v41  ;;  %v8017_v9 = vadd.f32 %v14346_v20, %v7737_v29  ;;  %v7678_v49 = vpop.f32.mrf.mxu3  ;;  %v7740_v29 = vadd.f32 %v14393_v44, %v14118_v23  ;;  %v7741_v44 = vadd.f32 %v7675_v12, %v14133_v35 }
 0x822   : > { %v7742_v12 = vadd.f32 %v7678_v49, %v14147_v15 }
 0x823   : > { %v8676_v5 = vmul.f32 %v14277_v47, %v8640_v24  ;;  %v8296_v41 = vadd.f32 %v14351_v37, %v8017_v9  ;;  %v7738_v24 = vadd.f32 %v14357_v43, %v14088_v56 }
 0x824   : > { %v8495_v60 = vpop.f32.mrf.mxu2 }
 0x825   : > { %v8712_v14 = vadd.f32 %v14279_v62, %v8676_v5  ;;  %v8573_v7 = vadd.f32 %v8495_v60, %v8294_v1  ;;  %v7958_v60 = vpop.f32.mrf.mxu0  ;;  %v8018_v19 = vadd.f32 %v14363_v18, %v7738_v24 }
 0x827   : > { %8744 = vst.msk [vmem:[%s14293_s18 + $0x40] sm:$0xff] %vm6037_vm7, %v8712_v14  ;;  %v8609_v33 = vadd.f32 %v14274_v28, %v8573_v7  ;;  %v8237_v37 = vpop.f32.mrf.mxu1  ;;  %v8297_v7 = vadd.f32 %v14366_v13, %v8018_v19 }
 0x829   : > { %v8641_v59 = vmax.f32 %v8609_v33, 0.0  ;;  %9858 = vmatmul.msk.f32.gmra.mxu2 %vm6037_vm7, %v8343_v55  ;;  %v7739_v33 = vadd.f32 %v14374_v8, %v14102_v2 }
 0x82b   : > { %v8677_v63 = vmul.f32 %v14277_v47, %v8641_v59  ;;  %v7681_v59 = vpop.f32.mrf.mxu3 }
 0x82c   : > { %v8498_v46 = vpop.f32.mrf.mxu2 }
 0x82d   : > { %v8713_v50 = vadd.f32 %v14279_v62, %v8677_v63  ;;  %v8574_v61 = vadd.f32 %v8498_v46, %v8295_v58  ;;  %v7961_v13 = vpop.f32.mrf.mxu0 }
 0x82f   : > { %8745 = vst.msk [vmem:[%s14293_s18 + $0x48] sm:$0xff] %vm6037_vm7, %v8713_v50  ;;  %v8610_v17 = vadd.f32 %v14274_v28, %v8574_v61  ;;  %v8240_v8 = vpop.f32.mrf.mxu1 }
 0x831   : > { %v8642_v30 = vmax.f32 %v8610_v17, 0.0  ;;  %9859 = vmatmul.msk.f32.gmra.mxu2 %vm6037_vm7, %v8344_v48  ;;  %v8020_v48 = vadd.f32 %v14401_v42, %v7740_v29 }
 0x833   : > { %v8678_v38 = vmul.f32 %v14277_v47, %v8642_v30  ;;  %v7684_v17 = vpop.f32.mrf.mxu3  ;;  %v8299_v9 = vadd.f32 %v14404_v34, %v8020_v48 }
 0x834   : > { %v8501_v39 = vpop.f32.mrf.mxu2 }
 0x835   : > { %v8714_v1 = vadd.f32 %v14279_v62, %v8678_v38  ;;  %v8575_v5 = vadd.f32 %v8501_v39, %v8296_v41  ;;  %v7964_v41 = vpop.f32.mrf.mxu0 }
 0x837   : > { %8746 = vst.msk [vmem:[%s14293_s18 + $0x50] sm:$0xff] %vm6037_vm7, %v8714_v1  ;;  %v8611_v20 = vadd.f32 %v14274_v28, %v8575_v5  ;;  %v8243_v24 = vpop.f32.mrf.mxu1  ;;  %v8348_v1 = vld [vmem:[#allocation4 + $0x1a2] sm:$0xff]  ;;  %v8021_v5 = vadd.f32 %v7955_v32, %v7741_v44 }
 0x839   : > { %v8643_v14 = vmax.f32 %v8611_v20, 0.0  ;;  %9860 = vmatmul.msk.f32.gmra.mxu2 %vm6037_vm7, %v14126_v27  ;;  %v8019_v27 = vadd.f32 %v14381_v52, %v7739_v33  ;;  %v8300_v19 = vadd.f32 %v8234_v11, %v8021_v5 }
 0x83b   : > { %v8679_v56 = vmul.f32 %v14277_v47, %v8643_v14  ;;  %v8298_v63 = vadd.f32 %v14385_v36, %v8019_v27  ;;  %v7687_v34 = vpop.f32.mrf.mxu3 }
 0x83c   : > { %v8504_v43 = vpop.f32.mrf.mxu2 }
 0x83d   : > { %v8715_v55 = vadd.f32 %v14279_v62, %v8679_v56  ;;  %v8576_v22 = vadd.f32 %v8504_v43, %v8297_v7  ;;  %v7967_v43 = vpop.f32.mrf.mxu0 }
 0x83f   : > { %8747 = vst.msk [vmem:[%s14293_s18 + $0x58] sm:$0xff] %vm6037_vm7, %v8715_v55  ;;  %v8612_v18 = vadd.f32 %v14274_v28, %v8576_v22  ;;  %v8246_v32 = vpop.f32.mrf.mxu1  ;;  %v8022_v55 = vadd.f32 %v7958_v60, %v7742_v12 }
 0x841   : > { %v8644_v58 = vmax.f32 %v8612_v18, 0.0  ;;  %9861 = vmatmul.msk.f32.gmra.mxu2 %vm6037_vm7, %v14138_v51  ;;  %v8347_v51 = vld [vmem:[#allocation4 + $0x19a] sm:$0xff]  ;;  %v8301_v18 = vadd.f32 %v8237_v37, %v8022_v55 }
 0x843   : > { %v8680_v2 = vmul.f32 %v14277_v47, %v8644_v58  ;;  %v7690_v27 = vpop.f32.mrf.mxu3 }
 0x844   : > { %v8507_v46 = vpop.f32.mrf.mxu2 }
 0x845   : > { %v8716_v50 = vadd.f32 %v14279_v62, %v8680_v2  ;;  %v8577_v61 = vadd.f32 %v8507_v46, %v8298_v63  ;;  %v7743_v63 = vadd.f32 %v7681_v59, %v14156_v54  ;;  %v7970_v46 = vpop.f32.mrf.mxu0 }
 0x847   : > { %8748 = vst.msk [vmem:[%s14293_s18 + $0x60] sm:$0xff] %vm6037_vm7, %v8716_v50  ;;  %v8613_v52 = vadd.f32 %v14274_v28, %v8577_v61  ;;  %v8023_v29 = vadd.f32 %v7961_v13, %v7743_v63  ;;  %v8249_v60 = vpop.f32.mrf.mxu1 }
 0x849   : > { %v8645_v36 = vmax.f32 %v8613_v52, 0.0  ;;  %9862 = vmatmul.msk.f32.gmra.mxu2 %vm6037_vm7, %v8347_v51  ;;  %v8302_v61 = vadd.f32 %v8240_v8, %v8023_v29  ;;  %v7744_v51 = vadd.f32 %v7684_v17, %v14165_v0 }
 0x84b   : > { %v8681_v30 = vmul.f32 %v14277_v47, %v8645_v36  ;;  %v7693_v48 = vpop.f32.mrf.mxu3 }
 0x84c   : > { %v8510_v23 = vpop.f32.mrf.mxu2 }
 0x84d   : > { %v8717_v38 = vadd.f32 %v14279_v62, %v8681_v30  ;;  %v8578_v39 = vadd.f32 %v8510_v23, %v8299_v9  ;;  %v8024_v9 = vadd.f32 %v7964_v41, %v7744_v51  ;;  %v7973_v13 = vpop.f32.mrf.mxu0 }
 0x84f   : > { %8749 = vst.msk [vmem:[%s14293_s18 + $0x68] sm:$0xff] %vm6037_vm7, %v8717_v38  ;;  %v8614_v42 = vadd.f32 %v14274_v28, %v8578_v39  ;;  %v8303_v23 = vadd.f32 %v8243_v24, %v8024_v9  ;;  %v8252_v44 = vpop.f32.mrf.mxu1  ;;  %v7745_v39 = vadd.f32 %v7687_v34, %v14174_v45 }
 0x851   : > { %v8646_v20 = vmax.f32 %v8614_v42, 0.0  ;;  %9863 = vmatmul.msk.f32.gmra.mxu2 %vm6037_vm7, %v8348_v1  ;;  %v8025_v5 = vadd.f32 %v7967_v43, %v7745_v39 }
 0x853   : > { %v8682_v14 = vmul.f32 %v14277_v47, %v8646_v20  ;;  %v7696_v1 = vpop.f32.mrf.mxu3  ;;  %v8304_v20 = vadd.f32 %v8246_v32, %v8025_v5 }
 0x854   : > { %v8513_v35 = vpop.f32.mrf.mxu2 }
 0x855   : > { %v8718_v7 = vadd.f32 %v14279_v62, %v8682_v14  ;;  %v8579_v56 = vadd.f32 %v8513_v35, %v8300_v19  ;;  %v7746_v14 = vadd.f32 %v7690_v27, %v14181_v10  ;;  %v7976_v35 = vpop.f32.mrf.mxu0 }
 0x857   : > { %8750 = vst.msk [vmem:[%s14293_s18 + $0x70] sm:$0xff] %vm6037_vm7, %v8718_v7  ;;  %v8615_v33 = vadd.f32 %v14274_v28, %v8579_v56  ;;  %v8255_v12 = vpop.f32.mrf.mxu1  ;;  %v8026_v56 = vadd.f32 %v7970_v46, %v7746_v14 }
 0x859   : > { %v8647_v22 = vmax.f32 %v8615_v33, 0.0  ;;  %v8305_v55 = vadd.f32 %v8249_v60, %v8026_v56  ;;  %v7748_v60 = vadd.f32 %v7696_v1, %v14199_v53 }
 0x85b   : > { %v8683_v11 = vmul.f32 %v14277_v47, %v8647_v22  ;;  %v7699_v43 = vpop.f32.mrf.mxu3  ;;  %v8028_v51 = vadd.f32 %v7976_v35, %v7748_v60 }
 0x85c   : > { %v8516_v58 = vpop.f32.mrf.mxu2 }
 0x85d   : > { %v8719_v15 = vadd.f32 %v14279_v62, %v8683_v11  ;;  %v8580_v49 = vadd.f32 %v8516_v58, %v8301_v18  ;;  %v7747_v18 = vadd.f32 %v7693_v48, %v14190_v16  ;;  %v7979_v27 = vpop.f32.mrf.mxu0  ;;  %v8307_v48 = vadd.f32 %v8255_v12, %v8028_v51 }
 0x85f   : > { %8751 = vst.msk [vmem:[%s14293_s18 + $0x78] sm:$0xff] %vm6037_vm7, %v8719_v15  ;;  %v8616_v2 = vadd.f32 %v14274_v28, %v8580_v49  ;;  %v8258_v63 = vpop.f32.mrf.mxu1  ;;  %v8027_v15 = vadd.f32 %v7973_v13, %v7747_v18 }
 0x861   : > { %v8648_v50 = vmax.f32 %v8616_v2, 0.0  ;;  %v8306_v2 = vadd.f32 %v8252_v44, %v8027_v15 }
 0x863   : > { %v8684_v37 = vmul.f32 %v14277_v47, %v8648_v50  ;;  %v7702_v29 = vpop.f32.mrf.mxu3 }
 0x864   : > { %v8519_v52 = vpop.f32.mrf.mxu2  ;;  %v7750_v5 = vadd.f32 %v7702_v29, %v14218_v25 }
 0x865   : > { %v8720_v54 = vadd.f32 %v14279_v62, %v8684_v37  ;;  %v8581_v59 = vadd.f32 %v8519_v52, %v8302_v61  ;;  %v7982_v52 = vpop.f32.mrf.mxu0 }
 0x867   : > { %8752 = vst.msk [vmem:[%s14293_s18 + $0x80] sm:$0xff] %vm6037_vm7, %v8720_v54  ;;  %v8617_v36 = vadd.f32 %v14274_v28, %v8581_v59  ;;  %v8261_v59 = vpop.f32.mrf.mxu1 }
 0x869   : > { %v8649_v30 = vmax.f32 %v8617_v36, 0.0 }
 0x86b   : > { %v8685_v8 = vmul.f32 %v14277_v47, %v8649_v30  ;;  %v7749_v30 = vadd.f32 %v7699_v43, %v14208_v31 }
 0x86c   : > { %v8522_v38 = vpop.f32.mrf.mxu2 }
 0x86d   : > { %v8721_v0 = vadd.f32 %v14279_v62, %v8685_v8  ;;  %v8582_v17 = vadd.f32 %v8522_v38, %v8303_v23  ;;  %v7705_v23 = vpop.f32.mrf.mxu3  ;;  %v8029_v44 = vadd.f32 %v7979_v27, %v7749_v30  ;;  %v7985_v39 = vpop.f32.mrf.mxu0 }
 0x86e   : > { %v7751_v12 = vadd.f32 %v7705_v23, %v14226_v57 }
 0x86f   : > { %8753 = vst.msk [vmem:[%s14293_s18 + $0x88] sm:$0xff] %vm6037_vm7, %v8721_v0  ;;  %v8618_v42 = vadd.f32 %v14274_v28, %v8582_v17  ;;  %v8308_v0 = vadd.f32 %v8258_v63, %v8029_v44 }
 0x871   : > { %v8650_v41 = vmax.f32 %v8618_v42, 0.0  ;;  %v8264_v42 = vpop.f32.mrf.mxu1 }
 0x873   : > { %v8686_v24 = vmul.f32 %v14277_v47, %v8650_v41 }
 0x874   : > { %v8525_v19 = vpop.f32.mrf.mxu2 }
 0x875   : > { %v8722_v45 = vadd.f32 %v14279_v62, %v8686_v24  ;;  %v8583_v34 = vadd.f32 %v8525_v19, %v8304_v20  ;;  %v7708_v24 = vpop.f32.mrf.mxu3  ;;  %v8030_v19 = vadd.f32 %v7982_v52, %v7750_v5 }
 0x876   : > { %v7752_v27 = vadd.f32 %v7708_v24, %v14235_v26 }
 0x877   : > { %8754 = vst.msk [vmem:[%s14293_s18 + $0x90] sm:$0xff] %vm6037_vm7, %v8722_v45  ;;  %v8619_v7 = vadd.f32 %v14274_v28, %v8583_v34  ;;  %v8309_v35 = vadd.f32 %v8261_v59, %v8030_v19 }
 0x879   : > { %v8651_v33 = vmax.f32 %v8619_v7, 0.0  ;;  %v7988_v7 = vpop.f32.mrf.mxu0 }
 0x87b   : > { %v8687_v32 = vmul.f32 %v14277_v47, %v8651_v33  ;;  %v8267_v33 = vpop.f32.mrf.mxu1 }
 0x87c   : > { %v8528_v22 = vpop.f32.mrf.mxu2 }
 0x87d   : > { %v8723_v10 = vadd.f32 %v14279_v62, %v8687_v32  ;;  %v8584_v11 = vadd.f32 %v8528_v22, %v8305_v55  ;;  %v8031_v55 = vadd.f32 %v7985_v39, %v7751_v12  ;;  %v7711_v22 = vpop.f32.mrf.mxu3 }
 0x87f   : > { %8755 = vst.msk [vmem:[%s14293_s18 + $0x98] sm:$0xff] %vm6037_vm7, %v8723_v10  ;;  %v8620_v58 = vadd.f32 %v14274_v28, %v8584_v11  ;;  %v8310_v18 = vadd.f32 %v8264_v42, %v8031_v55 }
 0x881   : > { %v8652_v49 = vmax.f32 %v8620_v58, 0.0  ;;  %v7991_v63 = vpop.f32.mrf.mxu0 }
 0x883   : > { %v8688_v46 = vmul.f32 %v14277_v47, %v8652_v49  ;;  %v8270_v49 = vpop.f32.mrf.mxu1 }
 0x884   : > { %v8531_v50 = vpop.f32.mrf.mxu2 }
 0x885   : > { %v8724_v16 = vadd.f32 %v14279_v62, %v8688_v46  ;;  %v8585_v61 = vadd.f32 %v8531_v50, %v8306_v2  ;;  %v8032_v2 = vadd.f32 %v7988_v7, %v7752_v27  ;;  %v7714_v60 = vpop.f32.mrf.mxu3 }
 0x887   : > { %8756 = vst.msk [vmem:[%s14293_s18 + $0xa0] sm:$0xff] %vm6037_vm7, %v8724_v16  ;;  %v8621_v37 = vadd.f32 %v14274_v28, %v8585_v61  ;;  %v8311_v29 = vadd.f32 %v8267_v33, %v8032_v2  ;;  %v7753_v61 = vadd.f32 %v7711_v22, %v14244_v4 }
 0x889   : > { %v8653_v54 = vmax.f32 %v8621_v37, 0.0  ;;  %v7994_v51 = vpop.f32.mrf.mxu0 }
 0x88b   : > { %v8689_v36 = vmul.f32 %v14277_v47, %v8653_v54  ;;  %v8033_v54 = vadd.f32 %v7991_v63, %v7753_v61 }
 0x88c   : > { %v8534_v9 = vpop.f32.mrf.mxu2 }
 0x88d   : > { %v8725_v53 = vadd.f32 %v14279_v62, %v8689_v36  ;;  %v8586_v13 = vadd.f32 %v8534_v9, %v8307_v48  ;;  %v8273_v48 = vpop.f32.mrf.mxu1  ;;  %v8312_v36 = vadd.f32 %v8270_v49, %v8033_v54  ;;  %v7717_v23 = vpop.f32.mrf.mxu3 }
 0x88e   : > { %v7755_v5 = vadd.f32 %v7717_v23, %v14256_v21 }
 0x88f   : > { %8757 = vst.msk [vmem:[%s14293_s18 + $0xa8] sm:$0xff] %vm6037_vm7, %v8725_v53  ;;  %v8622_v8 = vadd.f32 %v14274_v28, %v8586_v13  ;;  %v7754_v53 = vadd.f32 %v7714_v60, %v14250_v40 }
 0x891   : > { %v8654_v38 = vmax.f32 %v8622_v8, 0.0  ;;  %v8034_v44 = vadd.f32 %v7994_v51, %v7754_v53  ;;  %v7997_v39 = vpop.f32.mrf.mxu0 }
 0x892   : > { %v8035_v24 = vadd.f32 %v7997_v39, %v7755_v5 }
 0x893   : > { %v8690_v17 = vmul.f32 %v14277_v47, %v8654_v38 }
 0x894   : > { %v8537_v1 = vpop.f32.mrf.mxu2 }
 0x895   : > { %v8726_v31 = vadd.f32 %v14279_v62, %v8690_v17  ;;  %v8587_v41 = vadd.f32 %v8537_v1, %v8308_v0  ;;  %v8313_v0 = vadd.f32 %v8273_v48, %v8034_v44  ;;  %v8276_v42 = vpop.f32.mrf.mxu1 }
 0x897   : > { %8758 = vst.msk [vmem:[%s14293_s18 + $0xb0] sm:$0xff] %vm6037_vm7, %v8726_v31  ;;  %v8623_v20 = vadd.f32 %v14274_v28, %v8587_v41 }
 0x899   : > { %v8655_v14 = vmax.f32 %v8623_v20, 0.0  ;;  %v7720_v20 = vpop.f32.mrf.mxu3  ;;  %v8000_v7 = vpop.f32.mrf.mxu0 }
 0x89b   : > { %v8691_v45 = vmul.f32 %v14277_v47, %v8655_v14  ;;  %v8314_v14 = vadd.f32 %v8276_v42, %v8035_v24 }
 0x89c   : > { %v8540_v34 = vpop.f32.mrf.mxu2 }
 0x89d   : > { %v8727_v25 = vadd.f32 %v14279_v62, %v8691_v45  ;;  %v8588_v56 = vadd.f32 %v8540_v34, %v8309_v35  ;;  %v7756_v34 = vadd.f32 %v7720_v20, %v14262_v3 }
 0x89f   : > { %8759 = vst.msk [vmem:[%s14293_s18 + $0xb8] sm:$0xff] %vm6037_vm7, %v8727_v25  ;;  %v8624_v43 = vadd.f32 %v14274_v28, %v8588_v56  ;;  %v8279_v25 = vpop.f32.mrf.mxu1  ;;  %v8036_v33 = vadd.f32 %v8000_v7, %v7756_v34 }
 0x8a1   : > { %v8656_v32 = vmax.f32 %v8624_v43, 0.0  ;;  %v7723_v55 = vpop.f32.mrf.mxu3 }
 0x8a2   : > { %v7757_v3 = vadd.f32 %v7723_v55, %v14268_v6 }
 0x8a3   : > { %v8692_v10 = vmul.f32 %v14277_v47, %v8656_v32  ;;  %v8315_v32 = vadd.f32 %v8279_v25, %v8036_v33 }
 0x8a4   : > { %v8543_v11 = vpop.f32.mrf.mxu2 }
 0x8a5   : > { %v8728_v57 = vadd.f32 %v14279_v62, %v8692_v10  ;;  %v8589_v58 = vadd.f32 %v8543_v11, %v8310_v18 }
 0x8a7   : > { %8760 = vst.msk [vmem:[%s14293_s18 + $0xc0] sm:$0xff] %vm6037_vm7, %v8728_v57  ;;  %v8625_v15 = vadd.f32 %v14274_v28, %v8589_v58  ;;  %v8003_v57 = vpop.f32.mrf.mxu0  ;;  %v8282_v58 = vpop.f32.mrf.mxu1 }
 0x8a8   : > { %v8037_v63 = vadd.f32 %v8003_v57, %v7757_v3 }
 0x8a9   : > { %v8657_v46 = vmax.f32 %v8625_v15, 0.0 }
 0x8aa   : > { %v8316_v49 = vadd.f32 %v8282_v58, %v8037_v63 }
 0x8ab   : > { %v8693_v50 = vmul.f32 %v14277_v47, %v8657_v46 }
 0x8ac   : > { %v8546_v16 = vpop.f32.mrf.mxu2 }
 0x8ad   : > { %v8729_v26 = vadd.f32 %v14279_v62, %v8693_v50  ;;  %v8590_v37 = vadd.f32 %v8546_v16, %v8311_v29 }
 0x8af   : > { %8761 = vst.msk [vmem:[%s14293_s18 + $0xc8] sm:$0xff] %vm6037_vm7, %v8729_v26  ;;  %v8626_v52 = vadd.f32 %v14274_v28, %v8590_v37 }
 0x8b1   : > { %v8658_v59 = vmax.f32 %v8626_v52, 0.0 }
 0x8b3   : > { %v8694_v9 = vmul.f32 %v14277_v47, %v8658_v59 }
 0x8b4   : > { %v8549_v30 = vpop.f32.mrf.mxu2 }
 0x8b5   : > { %v8730_v4 = vadd.f32 %v14279_v62, %v8694_v9  ;;  %v8591_v13 = vadd.f32 %v8549_v30, %v8312_v36 }
 0x8b7   : > { %8762 = vst.msk [vmem:[%s14293_s18 + $0xd0] sm:$0xff] %vm6037_vm7, %v8730_v4  ;;  %v8627_v8 = vadd.f32 %v14274_v28, %v8591_v13 }
 0x8b9   : > { %v8659_v38 = vmax.f32 %v8627_v8, 0.0 }
 0x8bb   : > { %v8695_v17 = vmul.f32 %v14277_v47, %v8659_v38 }
 0x8bc   : > { %v8552_v1 = vpop.f32.mrf.mxu2 }
 0x8bd   : > { %v8731_v40 = vadd.f32 %v14279_v62, %v8695_v17  ;;  %v8592_v31 = vadd.f32 %v8552_v1, %v8313_v0 }
 0x8bf   : > { %8763 = vst.msk [vmem:[%s14293_s18 + $0xd8] sm:$0xff] %vm6037_vm7, %v8731_v40  ;;  %v8628_v41 = vadd.f32 %v14274_v28, %v8592_v31 }
 0x8c1   : > { %v8660_v19 = vmax.f32 %v8628_v41, 0.0 }
 0x8c3   : > { %v8696_v35 = vmul.f32 %v14277_v47, %v8660_v19 }
 0x8c4   : > { %v8555_v45 = vpop.f32.mrf.mxu2 }
 0x8c5   : > { %v8732_v21 = vadd.f32 %v14279_v62, %v8696_v35  ;;  %v8593_v12 = vadd.f32 %v8555_v45, %v8314_v14 }
 0x8c7   : > { %8764 = vst.msk [vmem:[%s14293_s18 + $0xe0] sm:$0xff] %vm6037_vm7, %v8732_v21  ;;  %v8629_v56 = vadd.f32 %v14274_v28, %v8593_v12 }
 0x8c9   : > { %v8661_v43 = vmax.f32 %v8629_v56, 0.0 }
 0x8cb   : > { %v8697_v22 = vmul.f32 %v14277_v47, %v8661_v43 }
 0x8cc   : > { %v8558_v18 = vpop.f32.mrf.mxu2 }
 0x8cd   : > { %v8733_v10 = vadd.f32 %v14279_v62, %v8697_v22  ;;  %v8594_v11 = vadd.f32 %v8558_v18, %v8315_v32 }
 0x8cf   : > { %8765 = vst.msk [vmem:[%s14293_s18 + $0xe8] sm:$0xff] %vm6037_vm7, %v8733_v10  ;;  %v8630_v27 = vadd.f32 %v14274_v28, %v8594_v11 }
 0x8d1   : > { %v8662_v15 = vmax.f32 %v8630_v27, 0.0 }
 0x8d3   : > { %v8698_v2 = vmul.f32 %v14277_v47, %v8662_v15 }
 0x8d4   : > { %v8561_v46 = vpop.f32.mrf.mxu2 }
 0x8d5   : > { %v8734_v29 = vadd.f32 %v14279_v62, %v8698_v2  ;;  %v8595_v50 = vadd.f32 %v8561_v46, %v8316_v49 }
 0x8d7   : > { %8766 = vst.msk [vmem:[%s14293_s18 + $0xf0] sm:$0xff] %vm6037_vm7, %v8734_v29  ;;  %v8631_v6 = vadd.f32 %v14274_v28, %v8595_v50 }
 0x8d9   : > { %v8663_v60 = vmax.f32 %v8631_v6, 0.0 }
 0x8db   : > { %v8699_v16 = vmul.f32 %v14277_v47, %v8663_v60 }
 0x8dd   : > { %v8735_v61 = vadd.f32 %v14279_v62, %v8699_v16 }
 0x8df   : > { %8767 = vst.msk [vmem:[%s14293_s18 + $0xf8] sm:$0xff] %vm6037_vm7, %v8735_v61 }
 0x8e0 PF: > { %s30_s25 = sadd.s32 1, %s10413_s25  }
 0x8e1   : > { %p27_p7 = scmp.ge.s32.totalorder %s30_s25, 6  }
 0x8e3   :  { %29 = sbr.rel (!%p27_p7) target bundleno = 10 (0xa), region = 184 }
 0x8e8   :  { %8789 = vsyncpa [#allocation6], 1 }
 0x8e9   :  { %8791 = vsyncpa [#allocation6 + $0x1], 1 }
 0x8ea   :  { %8792 = vsyncpa [#allocation8], 1 }
 0x8eb   :  { %8793 = vsyncpa [#allocation11], 1 }
 0x8ec   :  { %8794 = vsyncpa [#allocation14], 1 }
 0x8ed   :  { %8795 = vsyncpa [#allocation17], 1 }
 0x8ee   :  { %8796 = vsyncpa [#allocation20], 1 }
 0x8ef   :  { %8797 = vsyncpa [#allocation23], 1 }

</bundles_post_ra>
